<compile_context>
chip_gen: v7x
topology: tpu7x:2x2x1
jax: 0.10.0
libtpu: 0.0.40
codegen_flags: <defaults>
</compile_context>

<pallas_src>
import numpy as np

import jax
import jax.numpy as jnp
from jax.experimental import pallas as pl
from jax.experimental.pallas import tpu as pltpu

NEG_SLOPE = 0.01  # PyTorch LeakyReLU default


def _leaky(v):
    return jnp.where(v >= 0, v, v * NEG_SLOPE)


# ----------------------------------------------------------------------------
# Fused whole-network kernel (one batch element per grid step)
# ----------------------------------------------------------------------------
def _make_fused_kernel(*, D, H, W, K, CMAX, block_has_shortcut):
    P = K // 2
    Dp, Hp, Wp = D + 2 * P, H + 2 * P, W + 2 * P
    LANES = Wp * CMAX   # lane extent of a padded scratch row
    INNER = W * CMAX    # lane extent of an activation row

    def kernel(x_ref, w3_ref, w1_ref, o_ref, pad_ref):
        # ---- helpers -----------------------------------------------------
        def fill_interior(act3d):
            pad_ref[P:P + D, P:P + H, P * CMAX:P * CMAX + INNER] = act3d

        def fill_replicate_halos():
            # W (lane) halos first, so interior rows carry valid halos.
            left = pad_ref[:, :, P * CMAX:(P + 1) * CMAX]
            right = pad_ref[:, :, (P + W - 1) * CMAX:(P + W) * CMAX]
            for q in range(P):
                pad_ref[:, :, q * CMAX:(q + 1) * CMAX] = left
                pad_ref[:, :, (P + W + q) * CMAX:(P + W + q + 1) * CMAX] = right
            # H (sublane) halos -- source rows already have valid W halos.
            h_lo = pad_ref[:, P:P + 1, :]
            h_hi = pad_ref[:, P + H - 1:P + H, :]
            for q in range(P):
                pad_ref[:, q:q + 1, :] = h_lo
                pad_ref[:, P + H + q:P + H + q + 1, :] = h_hi
            # D halos -- source slabs already have valid H/W halos.
            d_lo = pad_ref[P:P + 1, :, :]
            d_hi = pad_ref[P + D - 1:P + D, :, :]
            for q in range(P):
                pad_ref[q:q + 1, :, :] = d_lo
                pad_ref[P + D + q:P + D + q + 1, :, :] = d_hi

        def conv_kkk(conv_idx):
            """KxKxK conv of the padded scratch; kw/Cin are folded into the
            packed weight, so one matmul per (kd, kh) tap."""
            acc = jnp.zeros((D * H, INNER), jnp.float32)
            for kd in range(K):
                for kh in range(K):
                    patch = pad_ref[kd:kd + D, kh:kh + H, :]       # (D, H, LANES)
                    p2 = patch.reshape(D * H, LANES).astype(jnp.bfloat16)
                    wm = w3_ref[conv_idx * K * K + kd * K + kh]    # (LANES, INNER)
                    acc = acc + jnp.dot(p2, wm,
                                        preferred_element_type=jnp.float32)
            return acc                                             # (D*H, INNER) f32

        def conv1x1(act, idx):
            return jnp.dot(act.astype(jnp.bfloat16), w1_ref[idx],
                           preferred_element_type=jnp.float32)

        # ---- conv1: zero padding + LeakyReLU ------------------------------
        pad_ref[...] = jnp.zeros((Dp, Hp, LANES), jnp.float32)
        fill_interior(x_ref[...])
        act = _leaky(conv_kkk(0))

        # ---- residual blocks (replicate padding in the conv path) ---------
        conv_idx, oneone_idx = 1, 0
        for has_sc in block_has_shortcut:
            fill_interior(act.reshape(D, H, INNER))
            fill_replicate_halos()
            y = _leaky(conv_kkk(conv_idx))
            conv_idx += 1

            fill_interior(y.reshape(D, H, INNER))
            fill_replicate_halos()
            y = conv_kkk(conv_idx)
            conv_idx += 1

            if has_sc:
                sc = conv1x1(act, oneone_idx)
                oneone_idx += 1
            else:
                sc = act
            act = _leaky(y + sc)          # residual add + LeakyReLU epilogue

        # ---- conv2 (1x1x1, no activation) -> single HBM store -------------
        out = conv1x1(act, oneone_idx)
        o_ref[...] = out.astype(o_ref.dtype)

    return kernel


# ----------------------------------------------------------------------------
# Weight packing (plain numpy, done once at wrapper level)
# ----------------------------------------------------------------------------
def _pack_conv_kkk(w, W, cmax):
    """(K,K,K,Cin,Cout) -> (K*K, (W+K-1)*cmax, W*cmax) banded matrices: the kw
    taps + Cin are folded into the contraction dim, Cout into cmax-strided
    output lanes."""
    K, _, _, Cin, Cout = w.shape
    Wp = W + K - 1
    w_np = np.asarray(w, np.float32)
    m = np.zeros((K * K, Wp * cmax, W * cmax), np.float32)
    for kd in range(K):
        for kh in range(K):
            t = kd * K + kh
            for kw in range(K):
                for wo in range(W):
                    r0 = (wo + kw) * cmax
                    c0 = wo * cmax
                    m[t, r0:r0 + Cin, c0:c0 + Cout] = w_np[kd, kh, kw]
    return m


def _pack_conv_1x1(w, W, cmax):
    """(Cin, Cout) 1x1x1 conv -> block-diagonal (W*cmax, W*cmax) matrix acting
    on interleaved (w, c) lanes."""
    Cin, Cout = w.shape
    w_np = np.asarray(w, np.float32)
    m = np.zeros((W * cmax, W * cmax), np.float32)
    for wo in range(W):
        m[wo * cmax:wo * cmax + Cin, wo * cmax:wo * cmax + Cout] = w_np
    return m


def pack_resnet_params(params, *, W, cmax):
    w3_list = [_pack_conv_kkk(params["conv1"], W, cmax)]
    w1_list = []
    has_sc = []
    for blk in params["blocks"]:
        w3_list.append(_pack_conv_kkk(blk["conv_a"], W, cmax))
        w3_list.append(_pack_conv_kkk(blk["conv_b"], W, cmax))
        has_sc.append(blk["shortcut"] is not None)
        if blk["shortcut"] is not None:
            w1_list.append(_pack_conv_1x1(blk["shortcut"][0, 0, 0], W, cmax))
    w1_list.append(_pack_conv_1x1(params["conv2"][0, 0, 0], W, cmax))
    w3 = jnp.asarray(np.concatenate(w3_list, axis=0), jnp.bfloat16)
    w1 = jnp.asarray(np.stack(w1_list, axis=0), jnp.bfloat16)
    return w3, w1, tuple(has_sc)


# ----------------------------------------------------------------------------
# Forward wrapper (NCDHW in / NCDHW out, like the PyTorch module)
# ----------------------------------------------------------------------------
def resnet_forward(params, x_ncdhw):
    N, cin0, D, H, W = x_ncdhw.shape
    assert cin0 == 1, "ResNet.conv1 expects a single input channel"
    K = params["conv1"].shape[0]
    assert K == 3, "packed-weight path implemented for kernel_size=3 (module default)"
    P = K // 2
    Dp, Hp, Wp = D + 2 * P, H + 2 * P, W + 2 * P

    cmax = max(blk["conv_b"].shape[-1] for blk in params["blocks"])
    cmax = max(cmax, params["conv1"].shape[-1], 1)

    w3, w1, has_sc = pack_resnet_params(params, W=W, cmax=cmax)

    # Input NCDHW -> interleaved-channel layout (N, D, H, W*cmax); channel 0
    # carries the data, channels 1..cmax-1 are zero (layout plumbing only).
    x = jnp.transpose(x_ncdhw, (0, 2, 3, 4, 1)).astype(jnp.float32)
    x = jnp.pad(x, ((0, 0), (0, 0), (0, 0), (0, 0), (0, cmax - 1)))
    x = x.reshape(N, D, H, W * cmax)

    kernel = _make_fused_kernel(D=D, H=H, W=W, K=K, CMAX=cmax,
                                block_has_shortcut=has_sc)

    out = pl.pallas_call(
        kernel,
        out_shape=jax.ShapeDtypeStruct((N, D * H, W * cmax), jnp.float32),
        grid=(N,),
        in_specs=[
            pl.BlockSpec((None, D, H, W * cmax), lambda n: (n, 0, 0, 0)),
            pl.BlockSpec(w3.shape, lambda n: (0, 0, 0)),
            pl.BlockSpec(w1.shape, lambda n: (0, 0, 0)),
        ],
        out_specs=pl.BlockSpec((None, D * H, W * cmax), lambda n: (n, 0, 0)),
        scratch_shapes=[pltpu.VMEM((Dp, Hp, Wp * cmax), jnp.float32)],
        compiler_params=pltpu.CompilerParams(
            dimension_semantics=("parallel",)),
    )(x, w3, w1)

    # (N, D*H, W*cmax) -> (N, 1, D, H, W): channel 0 holds the conv2 output.
    out = out.reshape(N, D, H, W, cmax)[..., 0]
    return out[:, None]


# ----------------------------------------------------------------------------
# Parameter construction (deterministic, synthetic, kaiming-like)
# ----------------------------------------------------------------------------
def _conv_weight(key, K, cin, cout):
    fan_in = cin * K ** 3
    std = (2.0 / fan_in) ** 0.5
    return std * jax.random.normal(key, (K, K, K, cin, cout), jnp.float32)


def init_resnet_params(key, channels, kernel_size=3):
    keys = iter(jax.random.split(key, 128))
    params = {"conv1": _conv_weight(next(keys), 3, 1, channels[0])}
    blocks = []
    inch = channels[0]
    for ch in channels:
        for _ in range(2):              # make_layer(channels, num_blocks=2)
            blocks.append({
                "conv_a": _conv_weight(next(keys), kernel_size, inch, ch),
                "conv_b": _conv_weight(next(keys), kernel_size, ch, ch),
                "shortcut": (_conv_weight(next(keys), 1, inch, ch)
                             if inch != ch else None),
            })
            inch = ch
    params["blocks"] = blocks
    params["conv2"] = _conv_weight(next(keys), 1, channels[-1], 1)
    return params


# ----------------------------------------------------------------------------
if __name__ == "__main__":
    key = jax.random.PRNGKey(0)
    k_x, k_p = jax.random.split(key)

    Channels = [4, 8]
    # Input matching Conv3d(1, ...) expectations: (N, C=1, D, H, W)
    x = jax.random.normal(k_x, (2, 1, 8, 8, 8), jnp.float32)

    params = init_resnet_params(k_p, Channels, kernel_size=3)
    out = resnet_forward(params, x)
    out = jax.block_until_ready(out)

    assert out.shape == (2, 1, 8, 8, 8), out.shape
    assert bool(jnp.all(jnp.isfinite(out)))
    print("KERNEL_OK")
</pallas_src>

<mosaic_0001>
module attributes {stable_mosaic.version = 11 : i64} {
  func.func @kernel(%arg0: i32, %arg1: memref<1x8x8x64xf32, #tpu.memory_space<vmem>>, %arg2: memref<81x80x64xbf16, #tpu.memory_space<vmem>>, %arg3: memref<2x64x64xbf16, #tpu.memory_space<vmem>>, %arg4: memref<1x64x64xf32, #tpu.memory_space<vmem>>, %arg5: memref<10x10x80xf32, #tpu.memory_space<vmem>>) attributes {dimension_semantics = [#tpu.dimension_semantics<parallel>], iteration_bounds = array<i64: 2>, scalar_prefetch = 0 : i64, scratch_operands = 1 : i64, tpu.core_type = #tpu.core_type<tc>, window_params = [{transform_indices = @transform_0, window_bounds = array<i64: 1, 8, 8, 64>}, {pipeline_mode = #tpu.pipeline_mode<synchronous>, transform_indices = @transform_1, window_bounds = array<i64: 81, 80, 64>}, {pipeline_mode = #tpu.pipeline_mode<synchronous>, transform_indices = @transform_2, window_bounds = array<i64: 2, 64, 64>}, {transform_indices = @transform_3, window_bounds = array<i64: 1, 64, 64>}]} {
    %cst = arith.constant 0.000000e+00 : f32
    %0 = vector.broadcast %cst : f32 to vector<10x10x80xf32>
    %c0 = arith.constant 0 : index
    %c0_0 = arith.constant 0 : index
    %c0_1 = arith.constant 0 : index
    %1 = vector.load %arg5[%c0, %c0_0, %c0_1] : memref<10x10x80xf32, #tpu.memory_space<vmem>>, vector<10x10x80xf32>
    tpu.vector_store %arg5[%c0, %c0_0, %c0_1], %0 {strides = array<i32>} : memref<10x10x80xf32, #tpu.memory_space<vmem>>, vector<10x10x80xf32>,
    %c0_2 = arith.constant 0 : index
    %c0_3 = arith.constant 0 : index
    %c0_4 = arith.constant 0 : index
    %c0_5 = arith.constant 0 : index
    %2 = vector.load %arg1[%c0_2, %c0_3, %c0_4, %c0_5] : memref<1x8x8x64xf32, #tpu.memory_space<vmem>>, vector<1x8x8x64xf32>
    %3 = vector.shape_cast %2 : vector<1x8x8x64xf32> to vector<8x8x64xf32>
    %c1 = arith.constant 1 : index
    %c1_6 = arith.constant 1 : index
    %c8 = arith.constant 8 : index
    %4 = vector.load %arg5[%c1, %c1_6, %c8] : memref<10x10x80xf32, #tpu.memory_space<vmem>>, vector<8x8x64xf32>
    tpu.vector_store %arg5[%c1, %c1_6, %c8], %3 {strides = array<i32>} : memref<10x10x80xf32, #tpu.memory_space<vmem>>, vector<8x8x64xf32>,
    %cst_7 = arith.constant 0.000000e+00 : f32
    %5 = vector.broadcast %cst_7 : f32 to vector<64x64xf32>
    %c0_8 = arith.constant 0 : index
    %c0_9 = arith.constant 0 : index
    %c0_10 = arith.constant 0 : index
    %6 = vector.load %arg5[%c0_8, %c0_9, %c0_10] : memref<10x10x80xf32, #tpu.memory_space<vmem>>, vector<8x8x80xf32>
    %7 = vector.shape_cast %6 : vector<8x8x80xf32> to vector<64x80xf32>
    %8 = arith.truncf %7 : vector<64x80xf32> to vector<64x80xbf16>
    %c0_11 = arith.constant 0 : index
    %c0_12 = arith.constant 0 : index
    %c0_13 = arith.constant 0 : index
    %9 = vector.load %arg2[%c0_11, %c0_12, %c0_13] : memref<81x80x64xbf16, #tpu.memory_space<vmem>>, vector<1x80x64xbf16>
    %10 = vector.shape_cast %9 : vector<1x80x64xbf16> to vector<80x64xbf16>
    %cst_14 = arith.constant dense<0.000000e+00> : vector<64x64xf32>
    %11 = tpu.matmul %8, %10, %cst_14 {dimension_numbers = #tpu.dot_dimension_numbers<[1], [0], [0], [1], [0, 0, 1, 1], [], []>} : vector<64x80xbf16>, vector<80x64xbf16>, vector<64x64xf32> -> vector<64x64xf32>
    %12 = arith.addf %5, %11 : vector<64x64xf32>
    %c0_15 = arith.constant 0 : index
    %c1_16 = arith.constant 1 : index
    %c0_17 = arith.constant 0 : index
    %13 = vector.load %arg5[%c0_15, %c1_16, %c0_17] : memref<10x10x80xf32, #tpu.memory_space<vmem>>, vector<8x8x80xf32>
    %14 = vector.shape_cast %13 : vector<8x8x80xf32> to vector<64x80xf32>
    %15 = arith.truncf %14 : vector<64x80xf32> to vector<64x80xbf16>
    %c1_18 = arith.constant 1 : index
    %c0_19 = arith.constant 0 : index
    %c0_20 = arith.constant 0 : index
    %16 = vector.load %arg2[%c1_18, %c0_19, %c0_20] : memref<81x80x64xbf16, #tpu.memory_space<vmem>>, vector<1x80x64xbf16>
    %17 = vector.shape_cast %16 : vector<1x80x64xbf16> to vector<80x64xbf16>
    %cst_21 = arith.constant dense<0.000000e+00> : vector<64x64xf32>
    %18 = tpu.matmul %15, %17, %cst_21 {dimension_numbers = #tpu.dot_dimension_numbers<[1], [0], [0], [1], [0, 0, 1, 1], [], []>} : vector<64x80xbf16>, vector<80x64xbf16>, vector<64x64xf32> -> vector<64x64xf32>
    %19 = arith.addf %12, %18 : vector<64x64xf32>
    %c0_22 = arith.constant 0 : index
    %c2 = arith.constant 2 : index
    %c0_23 = arith.constant 0 : index
    %20 = vector.load %arg5[%c0_22, %c2, %c0_23] : memref<10x10x80xf32, #tpu.memory_space<vmem>>, vector<8x8x80xf32>
    %21 = vector.shape_cast %20 : vector<8x8x80xf32> to vector<64x80xf32>
    %22 = arith.truncf %21 : vector<64x80xf32> to vector<64x80xbf16>
    %c2_24 = arith.constant 2 : index
    %c0_25 = arith.constant 0 : index
    %c0_26 = arith.constant 0 : index
    %23 = vector.load %arg2[%c2_24, %c0_25, %c0_26] : memref<81x80x64xbf16, #tpu.memory_space<vmem>>, vector<1x80x64xbf16>
    %24 = vector.shape_cast %23 : vector<1x80x64xbf16> to vector<80x64xbf16>
    %cst_27 = arith.constant dense<0.000000e+00> : vector<64x64xf32>
    %25 = tpu.matmul %22, %24, %cst_27 {dimension_numbers = #tpu.dot_dimension_numbers<[1], [0], [0], [1], [0, 0, 1, 1], [], []>} : vector<64x80xbf16>, vector<80x64xbf16>, vector<64x64xf32> -> vector<64x64xf32>
    %26 = arith.addf %19, %25 : vector<64x64xf32>
    %c1_28 = arith.constant 1 : index
    %c0_29 = arith.constant 0 : index
    %c0_30 = arith.constant 0 : index
    %27 = vector.load %arg5[%c1_28, %c0_29, %c0_30] : memref<10x10x80xf32, #tpu.memory_space<vmem>>, vector<8x8x80xf32>
    %28 = vector.shape_cast %27 : vector<8x8x80xf32> to vector<64x80xf32>
    %29 = arith.truncf %28 : vector<64x80xf32> to vector<64x80xbf16>
    %c3 = arith.constant 3 : index
    %c0_31 = arith.constant 0 : index
    %c0_32 = arith.constant 0 : index
    %30 = vector.load %arg2[%c3, %c0_31, %c0_32] : memref<81x80x64xbf16, #tpu.memory_space<vmem>>, vector<1x80x64xbf16>
    %31 = vector.shape_cast %30 : vector<1x80x64xbf16> to vector<80x64xbf16>
    %cst_33 = arith.constant dense<0.000000e+00> : vector<64x64xf32>
    %32 = tpu.matmul %29, %31, %cst_33 {dimension_numbers = #tpu.dot_dimension_numbers<[1], [0], [0], [1], [0, 0, 1, 1], [], []>} : vector<64x80xbf16>, vector<80x64xbf16>, vector<64x64xf32> -> vector<64x64xf32>
    %33 = arith.addf %26, %32 : vector<64x64xf32>
    %c1_34 = arith.constant 1 : index
    %c1_35 = arith.constant 1 : index
    %c0_36 = arith.constant 0 : index
    %34 = vector.load %arg5[%c1_34, %c1_35, %c0_36] : memref<10x10x80xf32, #tpu.memory_space<vmem>>, vector<8x8x80xf32>
    %35 = vector.shape_cast %34 : vector<8x8x80xf32> to vector<64x80xf32>
    %36 = arith.truncf %35 : vector<64x80xf32> to vector<64x80xbf16>
    %c4 = arith.constant 4 : index
    %c0_37 = arith.constant 0 : index
    %c0_38 = arith.constant 0 : index
    %37 = vector.load %arg2[%c4, %c0_37, %c0_38] : memref<81x80x64xbf16, #tpu.memory_space<vmem>>, vector<1x80x64xbf16>
    %38 = vector.shape_cast %37 : vector<1x80x64xbf16> to vector<80x64xbf16>
    %cst_39 = arith.constant dense<0.000000e+00> : vector<64x64xf32>
    %39 = tpu.matmul %36, %38, %cst_39 {dimension_numbers = #tpu.dot_dimension_numbers<[1], [0], [0], [1], [0, 0, 1, 1], [], []>} : vector<64x80xbf16>, vector<80x64xbf16>, vector<64x64xf32> -> vector<64x64xf32>
    %40 = arith.addf %33, %39 : vector<64x64xf32>
    %c1_40 = arith.constant 1 : index
    %c2_41 = arith.constant 2 : index
    %c0_42 = arith.constant 0 : index
    %41 = vector.load %arg5[%c1_40, %c2_41, %c0_42] : memref<10x10x80xf32, #tpu.memory_space<vmem>>, vector<8x8x80xf32>
    %42 = vector.shape_cast %41 : vector<8x8x80xf32> to vector<64x80xf32>
    %43 = arith.truncf %42 : vector<64x80xf32> to vector<64x80xbf16>
    %c5 = arith.constant 5 : index
    %c0_43 = arith.constant 0 : index
    %c0_44 = arith.constant 0 : index
    %44 = vector.load %arg2[%c5, %c0_43, %c0_44] : memref<81x80x64xbf16, #tpu.memory_space<vmem>>, vector<1x80x64xbf16>
    %45 = vector.shape_cast %44 : vector<1x80x64xbf16> to vector<80x64xbf16>
    %cst_45 = arith.constant dense<0.000000e+00> : vector<64x64xf32>
    %46 = tpu.matmul %43, %45, %cst_45 {dimension_numbers = #tpu.dot_dimension_numbers<[1], [0], [0], [1], [0, 0, 1, 1], [], []>} : vector<64x80xbf16>, vector<80x64xbf16>, vector<64x64xf32> -> vector<64x64xf32>
    %47 = arith.addf %40, %46 : vector<64x64xf32>
    %c2_46 = arith.constant 2 : index
    %c0_47 = arith.constant 0 : index
    %c0_48 = arith.constant 0 : index
    %48 = vector.load %arg5[%c2_46, %c0_47, %c0_48] : memref<10x10x80xf32, #tpu.memory_space<vmem>>, vector<8x8x80xf32>
    %49 = vector.shape_cast %48 : vector<8x8x80xf32> to vector<64x80xf32>
    %50 = arith.truncf %49 : vector<64x80xf32> to vector<64x80xbf16>
    %c6 = arith.constant 6 : index
    %c0_49 = arith.constant 0 : index
    %c0_50 = arith.constant 0 : index
    %51 = vector.load %arg2[%c6, %c0_49, %c0_50] : memref<81x80x64xbf16, #tpu.memory_space<vmem>>, vector<1x80x64xbf16>
    %52 = vector.shape_cast %51 : vector<1x80x64xbf16> to vector<80x64xbf16>
    %cst_51 = arith.constant dense<0.000000e+00> : vector<64x64xf32>
    %53 = tpu.matmul %50, %52, %cst_51 {dimension_numbers = #tpu.dot_dimension_numbers<[1], [0], [0], [1], [0, 0, 1, 1], [], []>} : vector<64x80xbf16>, vector<80x64xbf16>, vector<64x64xf32> -> vector<64x64xf32>
    %54 = arith.addf %47, %53 : vector<64x64xf32>
    %c2_52 = arith.constant 2 : index
    %c1_53 = arith.constant 1 : index
    %c0_54 = arith.constant 0 : index
    %55 = vector.load %arg5[%c2_52, %c1_53, %c0_54] : memref<10x10x80xf32, #tpu.memory_space<vmem>>, vector<8x8x80xf32>
    %56 = vector.shape_cast %55 : vector<8x8x80xf32> to vector<64x80xf32>
    %57 = arith.truncf %56 : vector<64x80xf32> to vector<64x80xbf16>
    %c7 = arith.constant 7 : index
    %c0_55 = arith.constant 0 : index
    %c0_56 = arith.constant 0 : index
    %58 = vector.load %arg2[%c7, %c0_55, %c0_56] : memref<81x80x64xbf16, #tpu.memory_space<vmem>>, vector<1x80x64xbf16>
    %59 = vector.shape_cast %58 : vector<1x80x64xbf16> to vector<80x64xbf16>
    %cst_57 = arith.constant dense<0.000000e+00> : vector<64x64xf32>
    %60 = tpu.matmul %57, %59, %cst_57 {dimension_numbers = #tpu.dot_dimension_numbers<[1], [0], [0], [1], [0, 0, 1, 1], [], []>} : vector<64x80xbf16>, vector<80x64xbf16>, vector<64x64xf32> -> vector<64x64xf32>
    %61 = arith.addf %54, %60 : vector<64x64xf32>
    %c2_58 = arith.constant 2 : index
    %c2_59 = arith.constant 2 : index
    %c0_60 = arith.constant 0 : index
    %62 = vector.load %arg5[%c2_58, %c2_59, %c0_60] : memref<10x10x80xf32, #tpu.memory_space<vmem>>, vector<8x8x80xf32>
    %63 = vector.shape_cast %62 : vector<8x8x80xf32> to vector<64x80xf32>
    %64 = arith.truncf %63 : vector<64x80xf32> to vector<64x80xbf16>
    %c8_61 = arith.constant 8 : index
    %c0_62 = arith.constant 0 : index
    %c0_63 = arith.constant 0 : index
    %65 = vector.load %arg2[%c8_61, %c0_62, %c0_63] : memref<81x80x64xbf16, #tpu.memory_space<vmem>>, vector<1x80x64xbf16>
    %66 = vector.shape_cast %65 : vector<1x80x64xbf16> to vector<80x64xbf16>
    %cst_64 = arith.constant dense<0.000000e+00> : vector<64x64xf32>
    %67 = tpu.matmul %64, %66, %cst_64 {dimension_numbers = #tpu.dot_dimension_numbers<[1], [0], [0], [1], [0, 0, 1, 1], [], []>} : vector<64x80xbf16>, vector<80x64xbf16>, vector<64x64xf32> -> vector<64x64xf32>
    %68 = arith.addf %61, %67 : vector<64x64xf32>
    %cst_65 = arith.constant 0.000000e+00 : f32
    %69 = vector.broadcast %cst_65 : f32 to vector<64x64xf32>
    %70 = arith.cmpf oge, %68, %69 : vector<64x64xf32>
    %cst_66 = arith.constant 0.00999999977 : f32
    %71 = vector.broadcast %cst_66 : f32 to vector<64x64xf32>
    %72 = arith.mulf %68, %71 : vector<64x64xf32>
    %73 = arith.select %70, %68, %72 : vector<64x64xi1>, vector<64x64xf32>
    %74 = vector.shape_cast %73 : vector<64x64xf32> to vector<8x8x64xf32>
    %c1_67 = arith.constant 1 : index
    %c1_68 = arith.constant 1 : index
    %c8_69 = arith.constant 8 : index
    %75 = vector.load %arg5[%c1_67, %c1_68, %c8_69] : memref<10x10x80xf32, #tpu.memory_space<vmem>>, vector<8x8x64xf32>
    tpu.vector_store %arg5[%c1_67, %c1_68, %c8_69], %74 {strides = array<i32>} : memref<10x10x80xf32, #tpu.memory_space<vmem>>, vector<8x8x64xf32>,
    %c0_70 = arith.constant 0 : index
    %c0_71 = arith.constant 0 : index
    %c8_72 = arith.constant 8 : index
    %76 = vector.load %arg5[%c0_70, %c0_71, %c8_72] : memref<10x10x80xf32, #tpu.memory_space<vmem>>, vector<10x10x8xf32>
    %c0_73 = arith.constant 0 : index
    %c0_74 = arith.constant 0 : index
    %c64 = arith.constant 64 : index
    %77 = vector.load %arg5[%c0_73, %c0_74, %c64] : memref<10x10x80xf32, #tpu.memory_space<vmem>>, vector<10x10x8xf32>
    %c0_75 = arith.constant 0 : index
    %c0_76 = arith.constant 0 : index
    %c0_77 = arith.constant 0 : index
    %78 = vector.load %arg5[%c0_75, %c0_76, %c0_77] : memref<10x10x80xf32, #tpu.memory_space<vmem>>, vector<10x10x8xf32>
    tpu.vector_store %arg5[%c0_75, %c0_76, %c0_77], %76 {strides = array<i32>} : memref<10x10x80xf32, #tpu.memory_space<vmem>>, vector<10x10x8xf32>,
    %c0_78 = arith.constant 0 : index
    %c0_79 = arith.constant 0 : index
    %c72 = arith.constant 72 : index
    %79 = vector.load %arg5[%c0_78, %c0_79, %c72] : memref<10x10x80xf32, #tpu.memory_space<vmem>>, vector<10x10x8xf32>
    tpu.vector_store %arg5[%c0_78, %c0_79, %c72], %77 {strides = array<i32>} : memref<10x10x80xf32, #tpu.memory_space<vmem>>, vector<10x10x8xf32>,
    %c0_80 = arith.constant 0 : index
    %c1_81 = arith.constant 1 : index
    %c0_82 = arith.constant 0 : index
    %80 = vector.load %arg5[%c0_80, %c1_81, %c0_82] : memref<10x10x80xf32, #tpu.memory_space<vmem>>, vector<10x1x80xf32>
    %c0_83 = arith.constant 0 : index
    %c8_84 = arith.constant 8 : index
    %c0_85 = arith.constant 0 : index
    %81 = vector.load %arg5[%c0_83, %c8_84, %c0_85] : memref<10x10x80xf32, #tpu.memory_space<vmem>>, vector<10x1x80xf32>
    %c0_86 = arith.constant 0 : index
    %c0_87 = arith.constant 0 : index
    %c0_88 = arith.constant 0 : index
    %82 = vector.load %arg5[%c0_86, %c0_87, %c0_88] : memref<10x10x80xf32, #tpu.memory_space<vmem>>, vector<10x1x80xf32>
    tpu.vector_store %arg5[%c0_86, %c0_87, %c0_88], %80 {strides = array<i32>} : memref<10x10x80xf32, #tpu.memory_space<vmem>>, vector<10x1x80xf32>,
    %c0_89 = arith.constant 0 : index
    %c9 = arith.constant 9 : index
    %c0_90 = arith.constant 0 : index
    %83 = vector.load %arg5[%c0_89, %c9, %c0_90] : memref<10x10x80xf32, #tpu.memory_space<vmem>>, vector<10x1x80xf32>
    tpu.vector_store %arg5[%c0_89, %c9, %c0_90], %81 {strides = array<i32>} : memref<10x10x80xf32, #tpu.memory_space<vmem>>, vector<10x1x80xf32>,
    %c1_91 = arith.constant 1 : index
    %c0_92 = arith.constant 0 : index
    %c0_93 = arith.constant 0 : index
    %84 = vector.load %arg5[%c1_91, %c0_92, %c0_93] : memref<10x10x80xf32, #tpu.memory_space<vmem>>, vector<1x10x80xf32>
    %c8_94 = arith.constant 8 : index
    %c0_95 = arith.constant 0 : index
    %c0_96 = arith.constant 0 : index
    %85 = vector.load %arg5[%c8_94, %c0_95, %c0_96] : memref<10x10x80xf32, #tpu.memory_space<vmem>>, vector<1x10x80xf32>
    %c0_97 = arith.constant 0 : index
    %c0_98 = arith.constant 0 : index
    %c0_99 = arith.constant 0 : index
    %86 = vector.load %arg5[%c0_97, %c0_98, %c0_99] : memref<10x10x80xf32, #tpu.memory_space<vmem>>, vector<1x10x80xf32>
    tpu.vector_store %arg5[%c0_97, %c0_98, %c0_99], %84 {strides = array<i32>} : memref<10x10x80xf32, #tpu.memory_space<vmem>>, vector<1x10x80xf32>,
    %c9_100 = arith.constant 9 : index
    %c0_101 = arith.constant 0 : index
    %c0_102 = arith.constant 0 : index
    %87 = vector.load %arg5[%c9_100, %c0_101, %c0_102] : memref<10x10x80xf32, #tpu.memory_space<vmem>>, vector<1x10x80xf32>
    tpu.vector_store %arg5[%c9_100, %c0_101, %c0_102], %85 {strides = array<i32>} : memref<10x10x80xf32, #tpu.memory_space<vmem>>, vector<1x10x80xf32>,
    %cst_103 = arith.constant 0.000000e+00 : f32
    %88 = vector.broadcast %cst_103 : f32 to vector<64x64xf32>
    %c0_104 = arith.constant 0 : index
    %c0_105 = arith.constant 0 : index
    %c0_106 = arith.constant 0 : index
    %89 = vector.load %arg5[%c0_104, %c0_105, %c0_106] : memref<10x10x80xf32, #tpu.memory_space<vmem>>, vector<8x8x80xf32>
    %90 = vector.shape_cast %89 : vector<8x8x80xf32> to vector<64x80xf32>
    %91 = arith.truncf %90 : vector<64x80xf32> to vector<64x80xbf16>
    %c9_107 = arith.constant 9 : index
    %c0_108 = arith.constant 0 : index
    %c0_109 = arith.constant 0 : index
    %92 = vector.load %arg2[%c9_107, %c0_108, %c0_109] : memref<81x80x64xbf16, #tpu.memory_space<vmem>>, vector<1x80x64xbf16>
    %93 = vector.shape_cast %92 : vector<1x80x64xbf16> to vector<80x64xbf16>
    %cst_110 = arith.constant dense<0.000000e+00> : vector<64x64xf32>
    %94 = tpu.matmul %91, %93, %cst_110 {dimension_numbers = #tpu.dot_dimension_numbers<[1], [0], [0], [1], [0, 0, 1, 1], [], []>} : vector<64x80xbf16>, vector<80x64xbf16>, vector<64x64xf32> -> vector<64x64xf32>
    %95 = arith.addf %88, %94 : vector<64x64xf32>
    %c0_111 = arith.constant 0 : index
    %c1_112 = arith.constant 1 : index
    %c0_113 = arith.constant 0 : index
    %96 = vector.load %arg5[%c0_111, %c1_112, %c0_113] : memref<10x10x80xf32, #tpu.memory_space<vmem>>, vector<8x8x80xf32>
    %97 = vector.shape_cast %96 : vector<8x8x80xf32> to vector<64x80xf32>
    %98 = arith.truncf %97 : vector<64x80xf32> to vector<64x80xbf16>
    %c10 = arith.constant 10 : index
    %c0_114 = arith.constant 0 : index
    %c0_115 = arith.constant 0 : index
    %99 = vector.load %arg2[%c10, %c0_114, %c0_115] : memref<81x80x64xbf16, #tpu.memory_space<vmem>>, vector<1x80x64xbf16>
    %100 = vector.shape_cast %99 : vector<1x80x64xbf16> to vector<80x64xbf16>
    %cst_116 = arith.constant dense<0.000000e+00> : vector<64x64xf32>
    %101 = tpu.matmul %98, %100, %cst_116 {dimension_numbers = #tpu.dot_dimension_numbers<[1], [0], [0], [1], [0, 0, 1, 1], [], []>} : vector<64x80xbf16>, vector<80x64xbf16>, vector<64x64xf32> -> vector<64x64xf32>
    %102 = arith.addf %95, %101 : vector<64x64xf32>
    %c0_117 = arith.constant 0 : index
    %c2_118 = arith.constant 2 : index
    %c0_119 = arith.constant 0 : index
    %103 = vector.load %arg5[%c0_117, %c2_118, %c0_119] : memref<10x10x80xf32, #tpu.memory_space<vmem>>, vector<8x8x80xf32>
    %104 = vector.shape_cast %103 : vector<8x8x80xf32> to vector<64x80xf32>
    %105 = arith.truncf %104 : vector<64x80xf32> to vector<64x80xbf16>
    %c11 = arith.constant 11 : index
    %c0_120 = arith.constant 0 : index
    %c0_121 = arith.constant 0 : index
    %106 = vector.load %arg2[%c11, %c0_120, %c0_121] : memref<81x80x64xbf16, #tpu.memory_space<vmem>>, vector<1x80x64xbf16>
    %107 = vector.shape_cast %106 : vector<1x80x64xbf16> to vector<80x64xbf16>
    %cst_122 = arith.constant dense<0.000000e+00> : vector<64x64xf32>
    %108 = tpu.matmul %105, %107, %cst_122 {dimension_numbers = #tpu.dot_dimension_numbers<[1], [0], [0], [1], [0, 0, 1, 1], [], []>} : vector<64x80xbf16>, vector<80x64xbf16>, vector<64x64xf32> -> vector<64x64xf32>
    %109 = arith.addf %102, %108 : vector<64x64xf32>
    %c1_123 = arith.constant 1 : index
    %c0_124 = arith.constant 0 : index
    %c0_125 = arith.constant 0 : index
    %110 = vector.load %arg5[%c1_123, %c0_124, %c0_125] : memref<10x10x80xf32, #tpu.memory_space<vmem>>, vector<8x8x80xf32>
    %111 = vector.shape_cast %110 : vector<8x8x80xf32> to vector<64x80xf32>
    %112 = arith.truncf %111 : vector<64x80xf32> to vector<64x80xbf16>
    %c12 = arith.constant 12 : index
    %c0_126 = arith.constant 0 : index
    %c0_127 = arith.constant 0 : index
    %113 = vector.load %arg2[%c12, %c0_126, %c0_127] : memref<81x80x64xbf16, #tpu.memory_space<vmem>>, vector<1x80x64xbf16>
    %114 = vector.shape_cast %113 : vector<1x80x64xbf16> to vector<80x64xbf16>
    %cst_128 = arith.constant dense<0.000000e+00> : vector<64x64xf32>
    %115 = tpu.matmul %112, %114, %cst_128 {dimension_numbers = #tpu.dot_dimension_numbers<[1], [0], [0], [1], [0, 0, 1, 1], [], []>} : vector<64x80xbf16>, vector<80x64xbf16>, vector<64x64xf32> -> vector<64x64xf32>
    %116 = arith.addf %109, %115 : vector<64x64xf32>
    %c1_129 = arith.constant 1 : index
    %c1_130 = arith.constant 1 : index
    %c0_131 = arith.constant 0 : index
    %117 = vector.load %arg5[%c1_129, %c1_130, %c0_131] : memref<10x10x80xf32, #tpu.memory_space<vmem>>, vector<8x8x80xf32>
    %118 = vector.shape_cast %117 : vector<8x8x80xf32> to vector<64x80xf32>
    %119 = arith.truncf %118 : vector<64x80xf32> to vector<64x80xbf16>
    %c13 = arith.constant 13 : index
    %c0_132 = arith.constant 0 : index
    %c0_133 = arith.constant 0 : index
    %120 = vector.load %arg2[%c13, %c0_132, %c0_133] : memref<81x80x64xbf16, #tpu.memory_space<vmem>>, vector<1x80x64xbf16>
    %121 = vector.shape_cast %120 : vector<1x80x64xbf16> to vector<80x64xbf16>
    %cst_134 = arith.constant dense<0.000000e+00> : vector<64x64xf32>
    %122 = tpu.matmul %119, %121, %cst_134 {dimension_numbers = #tpu.dot_dimension_numbers<[1], [0], [0], [1], [0, 0, 1, 1], [], []>} : vector<64x80xbf16>, vector<80x64xbf16>, vector<64x64xf32> -> vector<64x64xf32>
    %123 = arith.addf %116, %122 : vector<64x64xf32>
    %c1_135 = arith.constant 1 : index
    %c2_136 = arith.constant 2 : index
    %c0_137 = arith.constant 0 : index
    %124 = vector.load %arg5[%c1_135, %c2_136, %c0_137] : memref<10x10x80xf32, #tpu.memory_space<vmem>>, vector<8x8x80xf32>
    %125 = vector.shape_cast %124 : vector<8x8x80xf32> to vector<64x80xf32>
    %126 = arith.truncf %125 : vector<64x80xf32> to vector<64x80xbf16>
    %c14 = arith.constant 14 : index
    %c0_138 = arith.constant 0 : index
    %c0_139 = arith.constant 0 : index
    %127 = vector.load %arg2[%c14, %c0_138, %c0_139] : memref<81x80x64xbf16, #tpu.memory_space<vmem>>, vector<1x80x64xbf16>
    %128 = vector.shape_cast %127 : vector<1x80x64xbf16> to vector<80x64xbf16>
    %cst_140 = arith.constant dense<0.000000e+00> : vector<64x64xf32>
    %129 = tpu.matmul %126, %128, %cst_140 {dimension_numbers = #tpu.dot_dimension_numbers<[1], [0], [0], [1], [0, 0, 1, 1], [], []>} : vector<64x80xbf16>, vector<80x64xbf16>, vector<64x64xf32> -> vector<64x64xf32>
    %130 = arith.addf %123, %129 : vector<64x64xf32>
    %c2_141 = arith.constant 2 : index
    %c0_142 = arith.constant 0 : index
    %c0_143 = arith.constant 0 : index
    %131 = vector.load %arg5[%c2_141, %c0_142, %c0_143] : memref<10x10x80xf32, #tpu.memory_space<vmem>>, vector<8x8x80xf32>
    %132 = vector.shape_cast %131 : vector<8x8x80xf32> to vector<64x80xf32>
    %133 = arith.truncf %132 : vector<64x80xf32> to vector<64x80xbf16>
    %c15 = arith.constant 15 : index
    %c0_144 = arith.constant 0 : index
    %c0_145 = arith.constant 0 : index
    %134 = vector.load %arg2[%c15, %c0_144, %c0_145] : memref<81x80x64xbf16, #tpu.memory_space<vmem>>, vector<1x80x64xbf16>
    %135 = vector.shape_cast %134 : vector<1x80x64xbf16> to vector<80x64xbf16>
    %cst_146 = arith.constant dense<0.000000e+00> : vector<64x64xf32>
    %136 = tpu.matmul %133, %135, %cst_146 {dimension_numbers = #tpu.dot_dimension_numbers<[1], [0], [0], [1], [0, 0, 1, 1], [], []>} : vector<64x80xbf16>, vector<80x64xbf16>, vector<64x64xf32> -> vector<64x64xf32>
    %137 = arith.addf %130, %136 : vector<64x64xf32>
    %c2_147 = arith.constant 2 : index
    %c1_148 = arith.constant 1 : index
    %c0_149 = arith.constant 0 : index
    %138 = vector.load %arg5[%c2_147, %c1_148, %c0_149] : memref<10x10x80xf32, #tpu.memory_space<vmem>>, vector<8x8x80xf32>
    %139 = vector.shape_cast %138 : vector<8x8x80xf32> to vector<64x80xf32>
    %140 = arith.truncf %139 : vector<64x80xf32> to vector<64x80xbf16>
    %c16 = arith.constant 16 : index
    %c0_150 = arith.constant 0 : index
    %c0_151 = arith.constant 0 : index
    %141 = vector.load %arg2[%c16, %c0_150, %c0_151] : memref<81x80x64xbf16, #tpu.memory_space<vmem>>, vector<1x80x64xbf16>
    %142 = vector.shape_cast %141 : vector<1x80x64xbf16> to vector<80x64xbf16>
    %cst_152 = arith.constant dense<0.000000e+00> : vector<64x64xf32>
    %143 = tpu.matmul %140, %142, %cst_152 {dimension_numbers = #tpu.dot_dimension_numbers<[1], [0], [0], [1], [0, 0, 1, 1], [], []>} : vector<64x80xbf16>, vector<80x64xbf16>, vector<64x64xf32> -> vector<64x64xf32>
    %144 = arith.addf %137, %143 : vector<64x64xf32>
    %c2_153 = arith.constant 2 : index
    %c2_154 = arith.constant 2 : index
    %c0_155 = arith.constant 0 : index
    %145 = vector.load %arg5[%c2_153, %c2_154, %c0_155] : memref<10x10x80xf32, #tpu.memory_space<vmem>>, vector<8x8x80xf32>
    %146 = vector.shape_cast %145 : vector<8x8x80xf32> to vector<64x80xf32>
    %147 = arith.truncf %146 : vector<64x80xf32> to vector<64x80xbf16>
    %c17 = arith.constant 17 : index
    %c0_156 = arith.constant 0 : index
    %c0_157 = arith.constant 0 : index
    %148 = vector.load %arg2[%c17, %c0_156, %c0_157] : memref<81x80x64xbf16, #tpu.memory_space<vmem>>, vector<1x80x64xbf16>
    %149 = vector.shape_cast %148 : vector<1x80x64xbf16> to vector<80x64xbf16>
    %cst_158 = arith.constant dense<0.000000e+00> : vector<64x64xf32>
    %150 = tpu.matmul %147, %149, %cst_158 {dimension_numbers = #tpu.dot_dimension_numbers<[1], [0], [0], [1], [0, 0, 1, 1], [], []>} : vector<64x80xbf16>, vector<80x64xbf16>, vector<64x64xf32> -> vector<64x64xf32>
    %151 = arith.addf %144, %150 : vector<64x64xf32>
    %cst_159 = arith.constant 0.000000e+00 : f32
    %152 = vector.broadcast %cst_159 : f32 to vector<64x64xf32>
    %153 = arith.cmpf oge, %151, %152 : vector<64x64xf32>
    %cst_160 = arith.constant 0.00999999977 : f32
    %154 = vector.broadcast %cst_160 : f32 to vector<64x64xf32>
    %155 = arith.mulf %151, %154 : vector<64x64xf32>
    %156 = arith.select %153, %151, %155 : vector<64x64xi1>, vector<64x64xf32>
    %157 = vector.shape_cast %156 : vector<64x64xf32> to vector<8x8x64xf32>
    %c1_161 = arith.constant 1 : index
    %c1_162 = arith.constant 1 : index
    %c8_163 = arith.constant 8 : index
    %158 = vector.load %arg5[%c1_161, %c1_162, %c8_163] : memref<10x10x80xf32, #tpu.memory_space<vmem>>, vector<8x8x64xf32>
    tpu.vector_store %arg5[%c1_161, %c1_162, %c8_163], %157 {strides = array<i32>} : memref<10x10x80xf32, #tpu.memory_space<vmem>>, vector<8x8x64xf32>,
    %c0_164 = arith.constant 0 : index
    %c0_165 = arith.constant 0 : index
    %c8_166 = arith.constant 8 : index
    %159 = vector.load %arg5[%c0_164, %c0_165, %c8_166] : memref<10x10x80xf32, #tpu.memory_space<vmem>>, vector<10x10x8xf32>
    %c0_167 = arith.constant 0 : index
    %c0_168 = arith.constant 0 : index
    %c64_169 = arith.constant 64 : index
    %160 = vector.load %arg5[%c0_167, %c0_168, %c64_169] : memref<10x10x80xf32, #tpu.memory_space<vmem>>, vector<10x10x8xf32>
    %c0_170 = arith.constant 0 : index
    %c0_171 = arith.constant 0 : index
    %c0_172 = arith.constant 0 : index
    %161 = vector.load %arg5[%c0_170, %c0_171, %c0_172] : memref<10x10x80xf32, #tpu.memory_space<vmem>>, vector<10x10x8xf32>
    tpu.vector_store %arg5[%c0_170, %c0_171, %c0_172], %159 {strides = array<i32>} : memref<10x10x80xf32, #tpu.memory_space<vmem>>, vector<10x10x8xf32>,
    %c0_173 = arith.constant 0 : index
    %c0_174 = arith.constant 0 : index
    %c72_175 = arith.constant 72 : index
    %162 = vector.load %arg5[%c0_173, %c0_174, %c72_175] : memref<10x10x80xf32, #tpu.memory_space<vmem>>, vector<10x10x8xf32>
    tpu.vector_store %arg5[%c0_173, %c0_174, %c72_175], %160 {strides = array<i32>} : memref<10x10x80xf32, #tpu.memory_space<vmem>>, vector<10x10x8xf32>,
    %c0_176 = arith.constant 0 : index
    %c1_177 = arith.constant 1 : index
    %c0_178 = arith.constant 0 : index
    %163 = vector.load %arg5[%c0_176, %c1_177, %c0_178] : memref<10x10x80xf32, #tpu.memory_space<vmem>>, vector<10x1x80xf32>
    %c0_179 = arith.constant 0 : index
    %c8_180 = arith.constant 8 : index
    %c0_181 = arith.constant 0 : index
    %164 = vector.load %arg5[%c0_179, %c8_180, %c0_181] : memref<10x10x80xf32, #tpu.memory_space<vmem>>, vector<10x1x80xf32>
    %c0_182 = arith.constant 0 : index
    %c0_183 = arith.constant 0 : index
    %c0_184 = arith.constant 0 : index
    %165 = vector.load %arg5[%c0_182, %c0_183, %c0_184] : memref<10x10x80xf32, #tpu.memory_space<vmem>>, vector<10x1x80xf32>
    tpu.vector_store %arg5[%c0_182, %c0_183, %c0_184], %163 {strides = array<i32>} : memref<10x10x80xf32, #tpu.memory_space<vmem>>, vector<10x1x80xf32>,
    %c0_185 = arith.constant 0 : index
    %c9_186 = arith.constant 9 : index
    %c0_187 = arith.constant 0 : index
    %166 = vector.load %arg5[%c0_185, %c9_186, %c0_187] : memref<10x10x80xf32, #tpu.memory_space<vmem>>, vector<10x1x80xf32>
    tpu.vector_store %arg5[%c0_185, %c9_186, %c0_187], %164 {strides = array<i32>} : memref<10x10x80xf32, #tpu.memory_space<vmem>>, vector<10x1x80xf32>,
    %c1_188 = arith.constant 1 : index
    %c0_189 = arith.constant 0 : index
    %c0_190 = arith.constant 0 : index
    %167 = vector.load %arg5[%c1_188, %c0_189, %c0_190] : memref<10x10x80xf32, #tpu.memory_space<vmem>>, vector<1x10x80xf32>
    %c8_191 = arith.constant 8 : index
    %c0_192 = arith.constant 0 : index
    %c0_193 = arith.constant 0 : index
    %168 = vector.load %arg5[%c8_191, %c0_192, %c0_193] : memref<10x10x80xf32, #tpu.memory_space<vmem>>, vector<1x10x80xf32>
    %c0_194 = arith.constant 0 : index
    %c0_195 = arith.constant 0 : index
    %c0_196 = arith.constant 0 : index
    %169 = vector.load %arg5[%c0_194, %c0_195, %c0_196] : memref<10x10x80xf32, #tpu.memory_space<vmem>>, vector<1x10x80xf32>
    tpu.vector_store %arg5[%c0_194, %c0_195, %c0_196], %167 {strides = array<i32>} : memref<10x10x80xf32, #tpu.memory_space<vmem>>, vector<1x10x80xf32>,
    %c9_197 = arith.constant 9 : index
    %c0_198 = arith.constant 0 : index
    %c0_199 = arith.constant 0 : index
    %170 = vector.load %arg5[%c9_197, %c0_198, %c0_199] : memref<10x10x80xf32, #tpu.memory_space<vmem>>, vector<1x10x80xf32>
    tpu.vector_store %arg5[%c9_197, %c0_198, %c0_199], %168 {strides = array<i32>} : memref<10x10x80xf32, #tpu.memory_space<vmem>>, vector<1x10x80xf32>,
    %cst_200 = arith.constant 0.000000e+00 : f32
    %171 = vector.broadcast %cst_200 : f32 to vector<64x64xf32>
    %c0_201 = arith.constant 0 : index
    %c0_202 = arith.constant 0 : index
    %c0_203 = arith.constant 0 : index
    %172 = vector.load %arg5[%c0_201, %c0_202, %c0_203] : memref<10x10x80xf32, #tpu.memory_space<vmem>>, vector<8x8x80xf32>
    %173 = vector.shape_cast %172 : vector<8x8x80xf32> to vector<64x80xf32>
    %174 = arith.truncf %173 : vector<64x80xf32> to vector<64x80xbf16>
    %c18 = arith.constant 18 : index
    %c0_204 = arith.constant 0 : index
    %c0_205 = arith.constant 0 : index
    %175 = vector.load %arg2[%c18, %c0_204, %c0_205] : memref<81x80x64xbf16, #tpu.memory_space<vmem>>, vector<1x80x64xbf16>
    %176 = vector.shape_cast %175 : vector<1x80x64xbf16> to vector<80x64xbf16>
    %cst_206 = arith.constant dense<0.000000e+00> : vector<64x64xf32>
    %177 = tpu.matmul %174, %176, %cst_206 {dimension_numbers = #tpu.dot_dimension_numbers<[1], [0], [0], [1], [0, 0, 1, 1], [], []>} : vector<64x80xbf16>, vector<80x64xbf16>, vector<64x64xf32> -> vector<64x64xf32>
    %178 = arith.addf %171, %177 : vector<64x64xf32>
    %c0_207 = arith.constant 0 : index
    %c1_208 = arith.constant 1 : index
    %c0_209 = arith.constant 0 : index
    %179 = vector.load %arg5[%c0_207, %c1_208, %c0_209] : memref<10x10x80xf32, #tpu.memory_space<vmem>>, vector<8x8x80xf32>
    %180 = vector.shape_cast %179 : vector<8x8x80xf32> to vector<64x80xf32>
    %181 = arith.truncf %180 : vector<64x80xf32> to vector<64x80xbf16>
    %c19 = arith.constant 19 : index
    %c0_210 = arith.constant 0 : index
    %c0_211 = arith.constant 0 : index
    %182 = vector.load %arg2[%c19, %c0_210, %c0_211] : memref<81x80x64xbf16, #tpu.memory_space<vmem>>, vector<1x80x64xbf16>
    %183 = vector.shape_cast %182 : vector<1x80x64xbf16> to vector<80x64xbf16>
    %cst_212 = arith.constant dense<0.000000e+00> : vector<64x64xf32>
    %184 = tpu.matmul %181, %183, %cst_212 {dimension_numbers = #tpu.dot_dimension_numbers<[1], [0], [0], [1], [0, 0, 1, 1], [], []>} : vector<64x80xbf16>, vector<80x64xbf16>, vector<64x64xf32> -> vector<64x64xf32>
    %185 = arith.addf %178, %184 : vector<64x64xf32>
    %c0_213 = arith.constant 0 : index
    %c2_214 = arith.constant 2 : index
    %c0_215 = arith.constant 0 : index
    %186 = vector.load %arg5[%c0_213, %c2_214, %c0_215] : memref<10x10x80xf32, #tpu.memory_space<vmem>>, vector<8x8x80xf32>
    %187 = vector.shape_cast %186 : vector<8x8x80xf32> to vector<64x80xf32>
    %188 = arith.truncf %187 : vector<64x80xf32> to vector<64x80xbf16>
    %c20 = arith.constant 20 : index
    %c0_216 = arith.constant 0 : index
    %c0_217 = arith.constant 0 : index
    %189 = vector.load %arg2[%c20, %c0_216, %c0_217] : memref<81x80x64xbf16, #tpu.memory_space<vmem>>, vector<1x80x64xbf16>
    %190 = vector.shape_cast %189 : vector<1x80x64xbf16> to vector<80x64xbf16>
    %cst_218 = arith.constant dense<0.000000e+00> : vector<64x64xf32>
    %191 = tpu.matmul %188, %190, %cst_218 {dimension_numbers = #tpu.dot_dimension_numbers<[1], [0], [0], [1], [0, 0, 1, 1], [], []>} : vector<64x80xbf16>, vector<80x64xbf16>, vector<64x64xf32> -> vector<64x64xf32>
    %192 = arith.addf %185, %191 : vector<64x64xf32>
    %c1_219 = arith.constant 1 : index
    %c0_220 = arith.constant 0 : index
    %c0_221 = arith.constant 0 : index
    %193 = vector.load %arg5[%c1_219, %c0_220, %c0_221] : memref<10x10x80xf32, #tpu.memory_space<vmem>>, vector<8x8x80xf32>
    %194 = vector.shape_cast %193 : vector<8x8x80xf32> to vector<64x80xf32>
    %195 = arith.truncf %194 : vector<64x80xf32> to vector<64x80xbf16>
    %c21 = arith.constant 21 : index
    %c0_222 = arith.constant 0 : index
    %c0_223 = arith.constant 0 : index
    %196 = vector.load %arg2[%c21, %c0_222, %c0_223] : memref<81x80x64xbf16, #tpu.memory_space<vmem>>, vector<1x80x64xbf16>
    %197 = vector.shape_cast %196 : vector<1x80x64xbf16> to vector<80x64xbf16>
    %cst_224 = arith.constant dense<0.000000e+00> : vector<64x64xf32>
    %198 = tpu.matmul %195, %197, %cst_224 {dimension_numbers = #tpu.dot_dimension_numbers<[1], [0], [0], [1], [0, 0, 1, 1], [], []>} : vector<64x80xbf16>, vector<80x64xbf16>, vector<64x64xf32> -> vector<64x64xf32>
    %199 = arith.addf %192, %198 : vector<64x64xf32>
    %c1_225 = arith.constant 1 : index
    %c1_226 = arith.constant 1 : index
    %c0_227 = arith.constant 0 : index
    %200 = vector.load %arg5[%c1_225, %c1_226, %c0_227] : memref<10x10x80xf32, #tpu.memory_space<vmem>>, vector<8x8x80xf32>
    %201 = vector.shape_cast %200 : vector<8x8x80xf32> to vector<64x80xf32>
    %202 = arith.truncf %201 : vector<64x80xf32> to vector<64x80xbf16>
    %c22 = arith.constant 22 : index
    %c0_228 = arith.constant 0 : index
    %c0_229 = arith.constant 0 : index
    %203 = vector.load %arg2[%c22, %c0_228, %c0_229] : memref<81x80x64xbf16, #tpu.memory_space<vmem>>, vector<1x80x64xbf16>
    %204 = vector.shape_cast %203 : vector<1x80x64xbf16> to vector<80x64xbf16>
    %cst_230 = arith.constant dense<0.000000e+00> : vector<64x64xf32>
    %205 = tpu.matmul %202, %204, %cst_230 {dimension_numbers = #tpu.dot_dimension_numbers<[1], [0], [0], [1], [0, 0, 1, 1], [], []>} : vector<64x80xbf16>, vector<80x64xbf16>, vector<64x64xf32> -> vector<64x64xf32>
    %206 = arith.addf %199, %205 : vector<64x64xf32>
    %c1_231 = arith.constant 1 : index
    %c2_232 = arith.constant 2 : index
    %c0_233 = arith.constant 0 : index
    %207 = vector.load %arg5[%c1_231, %c2_232, %c0_233] : memref<10x10x80xf32, #tpu.memory_space<vmem>>, vector<8x8x80xf32>
    %208 = vector.shape_cast %207 : vector<8x8x80xf32> to vector<64x80xf32>
    %209 = arith.truncf %208 : vector<64x80xf32> to vector<64x80xbf16>
    %c23 = arith.constant 23 : index
    %c0_234 = arith.constant 0 : index
    %c0_235 = arith.constant 0 : index
    %210 = vector.load %arg2[%c23, %c0_234, %c0_235] : memref<81x80x64xbf16, #tpu.memory_space<vmem>>, vector<1x80x64xbf16>
    %211 = vector.shape_cast %210 : vector<1x80x64xbf16> to vector<80x64xbf16>
    %cst_236 = arith.constant dense<0.000000e+00> : vector<64x64xf32>
    %212 = tpu.matmul %209, %211, %cst_236 {dimension_numbers = #tpu.dot_dimension_numbers<[1], [0], [0], [1], [0, 0, 1, 1], [], []>} : vector<64x80xbf16>, vector<80x64xbf16>, vector<64x64xf32> -> vector<64x64xf32>
    %213 = arith.addf %206, %212 : vector<64x64xf32>
    %c2_237 = arith.constant 2 : index
    %c0_238 = arith.constant 0 : index
    %c0_239 = arith.constant 0 : index
    %214 = vector.load %arg5[%c2_237, %c0_238, %c0_239] : memref<10x10x80xf32, #tpu.memory_space<vmem>>, vector<8x8x80xf32>
    %215 = vector.shape_cast %214 : vector<8x8x80xf32> to vector<64x80xf32>
    %216 = arith.truncf %215 : vector<64x80xf32> to vector<64x80xbf16>
    %c24 = arith.constant 24 : index
    %c0_240 = arith.constant 0 : index
    %c0_241 = arith.constant 0 : index
    %217 = vector.load %arg2[%c24, %c0_240, %c0_241] : memref<81x80x64xbf16, #tpu.memory_space<vmem>>, vector<1x80x64xbf16>
    %218 = vector.shape_cast %217 : vector<1x80x64xbf16> to vector<80x64xbf16>
    %cst_242 = arith.constant dense<0.000000e+00> : vector<64x64xf32>
    %219 = tpu.matmul %216, %218, %cst_242 {dimension_numbers = #tpu.dot_dimension_numbers<[1], [0], [0], [1], [0, 0, 1, 1], [], []>} : vector<64x80xbf16>, vector<80x64xbf16>, vector<64x64xf32> -> vector<64x64xf32>
    %220 = arith.addf %213, %219 : vector<64x64xf32>
    %c2_243 = arith.constant 2 : index
    %c1_244 = arith.constant 1 : index
    %c0_245 = arith.constant 0 : index
    %221 = vector.load %arg5[%c2_243, %c1_244, %c0_245] : memref<10x10x80xf32, #tpu.memory_space<vmem>>, vector<8x8x80xf32>
    %222 = vector.shape_cast %221 : vector<8x8x80xf32> to vector<64x80xf32>
    %223 = arith.truncf %222 : vector<64x80xf32> to vector<64x80xbf16>
    %c25 = arith.constant 25 : index
    %c0_246 = arith.constant 0 : index
    %c0_247 = arith.constant 0 : index
    %224 = vector.load %arg2[%c25, %c0_246, %c0_247] : memref<81x80x64xbf16, #tpu.memory_space<vmem>>, vector<1x80x64xbf16>
    %225 = vector.shape_cast %224 : vector<1x80x64xbf16> to vector<80x64xbf16>
    %cst_248 = arith.constant dense<0.000000e+00> : vector<64x64xf32>
    %226 = tpu.matmul %223, %225, %cst_248 {dimension_numbers = #tpu.dot_dimension_numbers<[1], [0], [0], [1], [0, 0, 1, 1], [], []>} : vector<64x80xbf16>, vector<80x64xbf16>, vector<64x64xf32> -> vector<64x64xf32>
    %227 = arith.addf %220, %226 : vector<64x64xf32>
    %c2_249 = arith.constant 2 : index
    %c2_250 = arith.constant 2 : index
    %c0_251 = arith.constant 0 : index
    %228 = vector.load %arg5[%c2_249, %c2_250, %c0_251] : memref<10x10x80xf32, #tpu.memory_space<vmem>>, vector<8x8x80xf32>
    %229 = vector.shape_cast %228 : vector<8x8x80xf32> to vector<64x80xf32>
    %230 = arith.truncf %229 : vector<64x80xf32> to vector<64x80xbf16>
    %c26 = arith.constant 26 : index
    %c0_252 = arith.constant 0 : index
    %c0_253 = arith.constant 0 : index
    %231 = vector.load %arg2[%c26, %c0_252, %c0_253] : memref<81x80x64xbf16, #tpu.memory_space<vmem>>, vector<1x80x64xbf16>
    %232 = vector.shape_cast %231 : vector<1x80x64xbf16> to vector<80x64xbf16>
    %cst_254 = arith.constant dense<0.000000e+00> : vector<64x64xf32>
    %233 = tpu.matmul %230, %232, %cst_254 {dimension_numbers = #tpu.dot_dimension_numbers<[1], [0], [0], [1], [0, 0, 1, 1], [], []>} : vector<64x80xbf16>, vector<80x64xbf16>, vector<64x64xf32> -> vector<64x64xf32>
    %234 = arith.addf %227, %233 : vector<64x64xf32>
    %235 = arith.addf %234, %73 : vector<64x64xf32>
    %cst_255 = arith.constant 0.000000e+00 : f32
    %236 = vector.broadcast %cst_255 : f32 to vector<64x64xf32>
    %237 = arith.cmpf oge, %235, %236 : vector<64x64xf32>
    %cst_256 = arith.constant 0.00999999977 : f32
    %238 = vector.broadcast %cst_256 : f32 to vector<64x64xf32>
    %239 = arith.mulf %235, %238 : vector<64x64xf32>
    %240 = arith.select %237, %235, %239 : vector<64x64xi1>, vector<64x64xf32>
    %241 = vector.shape_cast %240 : vector<64x64xf32> to vector<8x8x64xf32>
    %c1_257 = arith.constant 1 : index
    %c1_258 = arith.constant 1 : index
    %c8_259 = arith.constant 8 : index
    %242 = vector.load %arg5[%c1_257, %c1_258, %c8_259] : memref<10x10x80xf32, #tpu.memory_space<vmem>>, vector<8x8x64xf32>
    tpu.vector_store %arg5[%c1_257, %c1_258, %c8_259], %241 {strides = array<i32>} : memref<10x10x80xf32, #tpu.memory_space<vmem>>, vector<8x8x64xf32>,
    %c0_260 = arith.constant 0 : index
    %c0_261 = arith.constant 0 : index
    %c8_262 = arith.constant 8 : index
    %243 = vector.load %arg5[%c0_260, %c0_261, %c8_262] : memref<10x10x80xf32, #tpu.memory_space<vmem>>, vector<10x10x8xf32>
    %c0_263 = arith.constant 0 : index
    %c0_264 = arith.constant 0 : index
    %c64_265 = arith.constant 64 : index
    %244 = vector.load %arg5[%c0_263, %c0_264, %c64_265] : memref<10x10x80xf32, #tpu.memory_space<vmem>>, vector<10x10x8xf32>
    %c0_266 = arith.constant 0 : index
    %c0_267 = arith.constant 0 : index
    %c0_268 = arith.constant 0 : index
    %245 = vector.load %arg5[%c0_266, %c0_267, %c0_268] : memref<10x10x80xf32, #tpu.memory_space<vmem>>, vector<10x10x8xf32>
    tpu.vector_store %arg5[%c0_266, %c0_267, %c0_268], %243 {strides = array<i32>} : memref<10x10x80xf32, #tpu.memory_space<vmem>>, vector<10x10x8xf32>,
    %c0_269 = arith.constant 0 : index
    %c0_270 = arith.constant 0 : index
    %c72_271 = arith.constant 72 : index
    %246 = vector.load %arg5[%c0_269, %c0_270, %c72_271] : memref<10x10x80xf32, #tpu.memory_space<vmem>>, vector<10x10x8xf32>
    tpu.vector_store %arg5[%c0_269, %c0_270, %c72_271], %244 {strides = array<i32>} : memref<10x10x80xf32, #tpu.memory_space<vmem>>, vector<10x10x8xf32>,
    %c0_272 = arith.constant 0 : index
    %c1_273 = arith.constant 1 : index
    %c0_274 = arith.constant 0 : index
    %247 = vector.load %arg5[%c0_272, %c1_273, %c0_274] : memref<10x10x80xf32, #tpu.memory_space<vmem>>, vector<10x1x80xf32>
    %c0_275 = arith.constant 0 : index
    %c8_276 = arith.constant 8 : index
    %c0_277 = arith.constant 0 : index
    %248 = vector.load %arg5[%c0_275, %c8_276, %c0_277] : memref<10x10x80xf32, #tpu.memory_space<vmem>>, vector<10x1x80xf32>
    %c0_278 = arith.constant 0 : index
    %c0_279 = arith.constant 0 : index
    %c0_280 = arith.constant 0 : index
    %249 = vector.load %arg5[%c0_278, %c0_279, %c0_280] : memref<10x10x80xf32, #tpu.memory_space<vmem>>, vector<10x1x80xf32>
    tpu.vector_store %arg5[%c0_278, %c0_279, %c0_280], %247 {strides = array<i32>} : memref<10x10x80xf32, #tpu.memory_space<vmem>>, vector<10x1x80xf32>,
    %c0_281 = arith.constant 0 : index
    %c9_282 = arith.constant 9 : index
    %c0_283 = arith.constant 0 : index
    %250 = vector.load %arg5[%c0_281, %c9_282, %c0_283] : memref<10x10x80xf32, #tpu.memory_space<vmem>>, vector<10x1x80xf32>
    tpu.vector_store %arg5[%c0_281, %c9_282, %c0_283], %248 {strides = array<i32>} : memref<10x10x80xf32, #tpu.memory_space<vmem>>, vector<10x1x80xf32>,
    %c1_284 = arith.constant 1 : index
    %c0_285 = arith.constant 0 : index
    %c0_286 = arith.constant 0 : index
    %251 = vector.load %arg5[%c1_284, %c0_285, %c0_286] : memref<10x10x80xf32, #tpu.memory_space<vmem>>, vector<1x10x80xf32>
    %c8_287 = arith.constant 8 : index
    %c0_288 = arith.constant 0 : index
    %c0_289 = arith.constant 0 : index
    %252 = vector.load %arg5[%c8_287, %c0_288, %c0_289] : memref<10x10x80xf32, #tpu.memory_space<vmem>>, vector<1x10x80xf32>
    %c0_290 = arith.constant 0 : index
    %c0_291 = arith.constant 0 : index
    %c0_292 = arith.constant 0 : index
    %253 = vector.load %arg5[%c0_290, %c0_291, %c0_292] : memref<10x10x80xf32, #tpu.memory_space<vmem>>, vector<1x10x80xf32>
    tpu.vector_store %arg5[%c0_290, %c0_291, %c0_292], %251 {strides = array<i32>} : memref<10x10x80xf32, #tpu.memory_space<vmem>>, vector<1x10x80xf32>,
    %c9_293 = arith.constant 9 : index
    %c0_294 = arith.constant 0 : index
    %c0_295 = arith.constant 0 : index
    %254 = vector.load %arg5[%c9_293, %c0_294, %c0_295] : memref<10x10x80xf32, #tpu.memory_space<vmem>>, vector<1x10x80xf32>
    tpu.vector_store %arg5[%c9_293, %c0_294, %c0_295], %252 {strides = array<i32>} : memref<10x10x80xf32, #tpu.memory_space<vmem>>, vector<1x10x80xf32>,
    %cst_296 = arith.constant 0.000000e+00 : f32
    %255 = vector.broadcast %cst_296 : f32 to vector<64x64xf32>
    %c0_297 = arith.constant 0 : index
    %c0_298 = arith.constant 0 : index
    %c0_299 = arith.constant 0 : index
    %256 = vector.load %arg5[%c0_297, %c0_298, %c0_299] : memref<10x10x80xf32, #tpu.memory_space<vmem>>, vector<8x8x80xf32>
    %257 = vector.shape_cast %256 : vector<8x8x80xf32> to vector<64x80xf32>
    %258 = arith.truncf %257 : vector<64x80xf32> to vector<64x80xbf16>
    %c27 = arith.constant 27 : index
    %c0_300 = arith.constant 0 : index
    %c0_301 = arith.constant 0 : index
    %259 = vector.load %arg2[%c27, %c0_300, %c0_301] : memref<81x80x64xbf16, #tpu.memory_space<vmem>>, vector<1x80x64xbf16>
    %260 = vector.shape_cast %259 : vector<1x80x64xbf16> to vector<80x64xbf16>
    %cst_302 = arith.constant dense<0.000000e+00> : vector<64x64xf32>
    %261 = tpu.matmul %258, %260, %cst_302 {dimension_numbers = #tpu.dot_dimension_numbers<[1], [0], [0], [1], [0, 0, 1, 1], [], []>} : vector<64x80xbf16>, vector<80x64xbf16>, vector<64x64xf32> -> vector<64x64xf32>
    %262 = arith.addf %255, %261 : vector<64x64xf32>
    %c0_303 = arith.constant 0 : index
    %c1_304 = arith.constant 1 : index
    %c0_305 = arith.constant 0 : index
    %263 = vector.load %arg5[%c0_303, %c1_304, %c0_305] : memref<10x10x80xf32, #tpu.memory_space<vmem>>, vector<8x8x80xf32>
    %264 = vector.shape_cast %263 : vector<8x8x80xf32> to vector<64x80xf32>
    %265 = arith.truncf %264 : vector<64x80xf32> to vector<64x80xbf16>
    %c28 = arith.constant 28 : index
    %c0_306 = arith.constant 0 : index
    %c0_307 = arith.constant 0 : index
    %266 = vector.load %arg2[%c28, %c0_306, %c0_307] : memref<81x80x64xbf16, #tpu.memory_space<vmem>>, vector<1x80x64xbf16>
    %267 = vector.shape_cast %266 : vector<1x80x64xbf16> to vector<80x64xbf16>
    %cst_308 = arith.constant dense<0.000000e+00> : vector<64x64xf32>
    %268 = tpu.matmul %265, %267, %cst_308 {dimension_numbers = #tpu.dot_dimension_numbers<[1], [0], [0], [1], [0, 0, 1, 1], [], []>} : vector<64x80xbf16>, vector<80x64xbf16>, vector<64x64xf32> -> vector<64x64xf32>
    %269 = arith.addf %262, %268 : vector<64x64xf32>
    %c0_309 = arith.constant 0 : index
    %c2_310 = arith.constant 2 : index
    %c0_311 = arith.constant 0 : index
    %270 = vector.load %arg5[%c0_309, %c2_310, %c0_311] : memref<10x10x80xf32, #tpu.memory_space<vmem>>, vector<8x8x80xf32>
    %271 = vector.shape_cast %270 : vector<8x8x80xf32> to vector<64x80xf32>
    %272 = arith.truncf %271 : vector<64x80xf32> to vector<64x80xbf16>
    %c29 = arith.constant 29 : index
    %c0_312 = arith.constant 0 : index
    %c0_313 = arith.constant 0 : index
    %273 = vector.load %arg2[%c29, %c0_312, %c0_313] : memref<81x80x64xbf16, #tpu.memory_space<vmem>>, vector<1x80x64xbf16>
    %274 = vector.shape_cast %273 : vector<1x80x64xbf16> to vector<80x64xbf16>
    %cst_314 = arith.constant dense<0.000000e+00> : vector<64x64xf32>
    %275 = tpu.matmul %272, %274, %cst_314 {dimension_numbers = #tpu.dot_dimension_numbers<[1], [0], [0], [1], [0, 0, 1, 1], [], []>} : vector<64x80xbf16>, vector<80x64xbf16>, vector<64x64xf32> -> vector<64x64xf32>
    %276 = arith.addf %269, %275 : vector<64x64xf32>
    %c1_315 = arith.constant 1 : index
    %c0_316 = arith.constant 0 : index
    %c0_317 = arith.constant 0 : index
    %277 = vector.load %arg5[%c1_315, %c0_316, %c0_317] : memref<10x10x80xf32, #tpu.memory_space<vmem>>, vector<8x8x80xf32>
    %278 = vector.shape_cast %277 : vector<8x8x80xf32> to vector<64x80xf32>
    %279 = arith.truncf %278 : vector<64x80xf32> to vector<64x80xbf16>
    %c30 = arith.constant 30 : index
    %c0_318 = arith.constant 0 : index
    %c0_319 = arith.constant 0 : index
    %280 = vector.load %arg2[%c30, %c0_318, %c0_319] : memref<81x80x64xbf16, #tpu.memory_space<vmem>>, vector<1x80x64xbf16>
    %281 = vector.shape_cast %280 : vector<1x80x64xbf16> to vector<80x64xbf16>
    %cst_320 = arith.constant dense<0.000000e+00> : vector<64x64xf32>
    %282 = tpu.matmul %279, %281, %cst_320 {dimension_numbers = #tpu.dot_dimension_numbers<[1], [0], [0], [1], [0, 0, 1, 1], [], []>} : vector<64x80xbf16>, vector<80x64xbf16>, vector<64x64xf32> -> vector<64x64xf32>
    %283 = arith.addf %276, %282 : vector<64x64xf32>
    %c1_321 = arith.constant 1 : index
    %c1_322 = arith.constant 1 : index
    %c0_323 = arith.constant 0 : index
    %284 = vector.load %arg5[%c1_321, %c1_322, %c0_323] : memref<10x10x80xf32, #tpu.memory_space<vmem>>, vector<8x8x80xf32>
    %285 = vector.shape_cast %284 : vector<8x8x80xf32> to vector<64x80xf32>
    %286 = arith.truncf %285 : vector<64x80xf32> to vector<64x80xbf16>
    %c31 = arith.constant 31 : index
    %c0_324 = arith.constant 0 : index
    %c0_325 = arith.constant 0 : index
    %287 = vector.load %arg2[%c31, %c0_324, %c0_325] : memref<81x80x64xbf16, #tpu.memory_space<vmem>>, vector<1x80x64xbf16>
    %288 = vector.shape_cast %287 : vector<1x80x64xbf16> to vector<80x64xbf16>
    %cst_326 = arith.constant dense<0.000000e+00> : vector<64x64xf32>
    %289 = tpu.matmul %286, %288, %cst_326 {dimension_numbers = #tpu.dot_dimension_numbers<[1], [0], [0], [1], [0, 0, 1, 1], [], []>} : vector<64x80xbf16>, vector<80x64xbf16>, vector<64x64xf32> -> vector<64x64xf32>
    %290 = arith.addf %283, %289 : vector<64x64xf32>
    %c1_327 = arith.constant 1 : index
    %c2_328 = arith.constant 2 : index
    %c0_329 = arith.constant 0 : index
    %291 = vector.load %arg5[%c1_327, %c2_328, %c0_329] : memref<10x10x80xf32, #tpu.memory_space<vmem>>, vector<8x8x80xf32>
    %292 = vector.shape_cast %291 : vector<8x8x80xf32> to vector<64x80xf32>
    %293 = arith.truncf %292 : vector<64x80xf32> to vector<64x80xbf16>
    %c32 = arith.constant 32 : index
    %c0_330 = arith.constant 0 : index
    %c0_331 = arith.constant 0 : index
    %294 = vector.load %arg2[%c32, %c0_330, %c0_331] : memref<81x80x64xbf16, #tpu.memory_space<vmem>>, vector<1x80x64xbf16>
    %295 = vector.shape_cast %294 : vector<1x80x64xbf16> to vector<80x64xbf16>
    %cst_332 = arith.constant dense<0.000000e+00> : vector<64x64xf32>
    %296 = tpu.matmul %293, %295, %cst_332 {dimension_numbers = #tpu.dot_dimension_numbers<[1], [0], [0], [1], [0, 0, 1, 1], [], []>} : vector<64x80xbf16>, vector<80x64xbf16>, vector<64x64xf32> -> vector<64x64xf32>
    %297 = arith.addf %290, %296 : vector<64x64xf32>
    %c2_333 = arith.constant 2 : index
    %c0_334 = arith.constant 0 : index
    %c0_335 = arith.constant 0 : index
    %298 = vector.load %arg5[%c2_333, %c0_334, %c0_335] : memref<10x10x80xf32, #tpu.memory_space<vmem>>, vector<8x8x80xf32>
    %299 = vector.shape_cast %298 : vector<8x8x80xf32> to vector<64x80xf32>
    %300 = arith.truncf %299 : vector<64x80xf32> to vector<64x80xbf16>
    %c33 = arith.constant 33 : index
    %c0_336 = arith.constant 0 : index
    %c0_337 = arith.constant 0 : index
    %301 = vector.load %arg2[%c33, %c0_336, %c0_337] : memref<81x80x64xbf16, #tpu.memory_space<vmem>>, vector<1x80x64xbf16>
    %302 = vector.shape_cast %301 : vector<1x80x64xbf16> to vector<80x64xbf16>
    %cst_338 = arith.constant dense<0.000000e+00> : vector<64x64xf32>
    %303 = tpu.matmul %300, %302, %cst_338 {dimension_numbers = #tpu.dot_dimension_numbers<[1], [0], [0], [1], [0, 0, 1, 1], [], []>} : vector<64x80xbf16>, vector<80x64xbf16>, vector<64x64xf32> -> vector<64x64xf32>
    %304 = arith.addf %297, %303 : vector<64x64xf32>
    %c2_339 = arith.constant 2 : index
    %c1_340 = arith.constant 1 : index
    %c0_341 = arith.constant 0 : index
    %305 = vector.load %arg5[%c2_339, %c1_340, %c0_341] : memref<10x10x80xf32, #tpu.memory_space<vmem>>, vector<8x8x80xf32>
    %306 = vector.shape_cast %305 : vector<8x8x80xf32> to vector<64x80xf32>
    %307 = arith.truncf %306 : vector<64x80xf32> to vector<64x80xbf16>
    %c34 = arith.constant 34 : index
    %c0_342 = arith.constant 0 : index
    %c0_343 = arith.constant 0 : index
    %308 = vector.load %arg2[%c34, %c0_342, %c0_343] : memref<81x80x64xbf16, #tpu.memory_space<vmem>>, vector<1x80x64xbf16>
    %309 = vector.shape_cast %308 : vector<1x80x64xbf16> to vector<80x64xbf16>
    %cst_344 = arith.constant dense<0.000000e+00> : vector<64x64xf32>
    %310 = tpu.matmul %307, %309, %cst_344 {dimension_numbers = #tpu.dot_dimension_numbers<[1], [0], [0], [1], [0, 0, 1, 1], [], []>} : vector<64x80xbf16>, vector<80x64xbf16>, vector<64x64xf32> -> vector<64x64xf32>
    %311 = arith.addf %304, %310 : vector<64x64xf32>
    %c2_345 = arith.constant 2 : index
    %c2_346 = arith.constant 2 : index
    %c0_347 = arith.constant 0 : index
    %312 = vector.load %arg5[%c2_345, %c2_346, %c0_347] : memref<10x10x80xf32, #tpu.memory_space<vmem>>, vector<8x8x80xf32>
    %313 = vector.shape_cast %312 : vector<8x8x80xf32> to vector<64x80xf32>
    %314 = arith.truncf %313 : vector<64x80xf32> to vector<64x80xbf16>
    %c35 = arith.constant 35 : index
    %c0_348 = arith.constant 0 : index
    %c0_349 = arith.constant 0 : index
    %315 = vector.load %arg2[%c35, %c0_348, %c0_349] : memref<81x80x64xbf16, #tpu.memory_space<vmem>>, vector<1x80x64xbf16>
    %316 = vector.shape_cast %315 : vector<1x80x64xbf16> to vector<80x64xbf16>
    %cst_350 = arith.constant dense<0.000000e+00> : vector<64x64xf32>
    %317 = tpu.matmul %314, %316, %cst_350 {dimension_numbers = #tpu.dot_dimension_numbers<[1], [0], [0], [1], [0, 0, 1, 1], [], []>} : vector<64x80xbf16>, vector<80x64xbf16>, vector<64x64xf32> -> vector<64x64xf32>
    %318 = arith.addf %311, %317 : vector<64x64xf32>
    %cst_351 = arith.constant 0.000000e+00 : f32
    %319 = vector.broadcast %cst_351 : f32 to vector<64x64xf32>
    %320 = arith.cmpf oge, %318, %319 : vector<64x64xf32>
    %cst_352 = arith.constant 0.00999999977 : f32
    %321 = vector.broadcast %cst_352 : f32 to vector<64x64xf32>
    %322 = arith.mulf %318, %321 : vector<64x64xf32>
    %323 = arith.select %320, %318, %322 : vector<64x64xi1>, vector<64x64xf32>
    %324 = vector.shape_cast %323 : vector<64x64xf32> to vector<8x8x64xf32>
    %c1_353 = arith.constant 1 : index
    %c1_354 = arith.constant 1 : index
    %c8_355 = arith.constant 8 : index
    %325 = vector.load %arg5[%c1_353, %c1_354, %c8_355] : memref<10x10x80xf32, #tpu.memory_space<vmem>>, vector<8x8x64xf32>
    tpu.vector_store %arg5[%c1_353, %c1_354, %c8_355], %324 {strides = array<i32>} : memref<10x10x80xf32, #tpu.memory_space<vmem>>, vector<8x8x64xf32>,
    %c0_356 = arith.constant 0 : index
    %c0_357 = arith.constant 0 : index
    %c8_358 = arith.constant 8 : index
    %326 = vector.load %arg5[%c0_356, %c0_357, %c8_358] : memref<10x10x80xf32, #tpu.memory_space<vmem>>, vector<10x10x8xf32>
    %c0_359 = arith.constant 0 : index
    %c0_360 = arith.constant 0 : index
    %c64_361 = arith.constant 64 : index
    %327 = vector.load %arg5[%c0_359, %c0_360, %c64_361] : memref<10x10x80xf32, #tpu.memory_space<vmem>>, vector<10x10x8xf32>
    %c0_362 = arith.constant 0 : index
    %c0_363 = arith.constant 0 : index
    %c0_364 = arith.constant 0 : index
    %328 = vector.load %arg5[%c0_362, %c0_363, %c0_364] : memref<10x10x80xf32, #tpu.memory_space<vmem>>, vector<10x10x8xf32>
    tpu.vector_store %arg5[%c0_362, %c0_363, %c0_364], %326 {strides = array<i32>} : memref<10x10x80xf32, #tpu.memory_space<vmem>>, vector<10x10x8xf32>,
    %c0_365 = arith.constant 0 : index
    %c0_366 = arith.constant 0 : index
    %c72_367 = arith.constant 72 : index
    %329 = vector.load %arg5[%c0_365, %c0_366, %c72_367] : memref<10x10x80xf32, #tpu.memory_space<vmem>>, vector<10x10x8xf32>
    tpu.vector_store %arg5[%c0_365, %c0_366, %c72_367], %327 {strides = array<i32>} : memref<10x10x80xf32, #tpu.memory_space<vmem>>, vector<10x10x8xf32>,
    %c0_368 = arith.constant 0 : index
    %c1_369 = arith.constant 1 : index
    %c0_370 = arith.constant 0 : index
    %330 = vector.load %arg5[%c0_368, %c1_369, %c0_370] : memref<10x10x80xf32, #tpu.memory_space<vmem>>, vector<10x1x80xf32>
    %c0_371 = arith.constant 0 : index
    %c8_372 = arith.constant 8 : index
    %c0_373 = arith.constant 0 : index
    %331 = vector.load %arg5[%c0_371, %c8_372, %c0_373] : memref<10x10x80xf32, #tpu.memory_space<vmem>>, vector<10x1x80xf32>
    %c0_374 = arith.constant 0 : index
    %c0_375 = arith.constant 0 : index
    %c0_376 = arith.constant 0 : index
    %332 = vector.load %arg5[%c0_374, %c0_375, %c0_376] : memref<10x10x80xf32, #tpu.memory_space<vmem>>, vector<10x1x80xf32>
    tpu.vector_store %arg5[%c0_374, %c0_375, %c0_376], %330 {strides = array<i32>} : memref<10x10x80xf32, #tpu.memory_space<vmem>>, vector<10x1x80xf32>,
    %c0_377 = arith.constant 0 : index
    %c9_378 = arith.constant 9 : index
    %c0_379 = arith.constant 0 : index
    %333 = vector.load %arg5[%c0_377, %c9_378, %c0_379] : memref<10x10x80xf32, #tpu.memory_space<vmem>>, vector<10x1x80xf32>
    tpu.vector_store %arg5[%c0_377, %c9_378, %c0_379], %331 {strides = array<i32>} : memref<10x10x80xf32, #tpu.memory_space<vmem>>, vector<10x1x80xf32>,
    %c1_380 = arith.constant 1 : index
    %c0_381 = arith.constant 0 : index
    %c0_382 = arith.constant 0 : index
    %334 = vector.load %arg5[%c1_380, %c0_381, %c0_382] : memref<10x10x80xf32, #tpu.memory_space<vmem>>, vector<1x10x80xf32>
    %c8_383 = arith.constant 8 : index
    %c0_384 = arith.constant 0 : index
    %c0_385 = arith.constant 0 : index
    %335 = vector.load %arg5[%c8_383, %c0_384, %c0_385] : memref<10x10x80xf32, #tpu.memory_space<vmem>>, vector<1x10x80xf32>
    %c0_386 = arith.constant 0 : index
    %c0_387 = arith.constant 0 : index
    %c0_388 = arith.constant 0 : index
    %336 = vector.load %arg5[%c0_386, %c0_387, %c0_388] : memref<10x10x80xf32, #tpu.memory_space<vmem>>, vector<1x10x80xf32>
    tpu.vector_store %arg5[%c0_386, %c0_387, %c0_388], %334 {strides = array<i32>} : memref<10x10x80xf32, #tpu.memory_space<vmem>>, vector<1x10x80xf32>,
    %c9_389 = arith.constant 9 : index
    %c0_390 = arith.constant 0 : index
    %c0_391 = arith.constant 0 : index
    %337 = vector.load %arg5[%c9_389, %c0_390, %c0_391] : memref<10x10x80xf32, #tpu.memory_space<vmem>>, vector<1x10x80xf32>
    tpu.vector_store %arg5[%c9_389, %c0_390, %c0_391], %335 {strides = array<i32>} : memref<10x10x80xf32, #tpu.memory_space<vmem>>, vector<1x10x80xf32>,
    %cst_392 = arith.constant 0.000000e+00 : f32
    %338 = vector.broadcast %cst_392 : f32 to vector<64x64xf32>
    %c0_393 = arith.constant 0 : index
    %c0_394 = arith.constant 0 : index
    %c0_395 = arith.constant 0 : index
    %339 = vector.load %arg5[%c0_393, %c0_394, %c0_395] : memref<10x10x80xf32, #tpu.memory_space<vmem>>, vector<8x8x80xf32>
    %340 = vector.shape_cast %339 : vector<8x8x80xf32> to vector<64x80xf32>
    %341 = arith.truncf %340 : vector<64x80xf32> to vector<64x80xbf16>
    %c36 = arith.constant 36 : index
    %c0_396 = arith.constant 0 : index
    %c0_397 = arith.constant 0 : index
    %342 = vector.load %arg2[%c36, %c0_396, %c0_397] : memref<81x80x64xbf16, #tpu.memory_space<vmem>>, vector<1x80x64xbf16>
    %343 = vector.shape_cast %342 : vector<1x80x64xbf16> to vector<80x64xbf16>
    %cst_398 = arith.constant dense<0.000000e+00> : vector<64x64xf32>
    %344 = tpu.matmul %341, %343, %cst_398 {dimension_numbers = #tpu.dot_dimension_numbers<[1], [0], [0], [1], [0, 0, 1, 1], [], []>} : vector<64x80xbf16>, vector<80x64xbf16>, vector<64x64xf32> -> vector<64x64xf32>
    %345 = arith.addf %338, %344 : vector<64x64xf32>
    %c0_399 = arith.constant 0 : index
    %c1_400 = arith.constant 1 : index
    %c0_401 = arith.constant 0 : index
    %346 = vector.load %arg5[%c0_399, %c1_400, %c0_401] : memref<10x10x80xf32, #tpu.memory_space<vmem>>, vector<8x8x80xf32>
    %347 = vector.shape_cast %346 : vector<8x8x80xf32> to vector<64x80xf32>
    %348 = arith.truncf %347 : vector<64x80xf32> to vector<64x80xbf16>
    %c37 = arith.constant 37 : index
    %c0_402 = arith.constant 0 : index
    %c0_403 = arith.constant 0 : index
    %349 = vector.load %arg2[%c37, %c0_402, %c0_403] : memref<81x80x64xbf16, #tpu.memory_space<vmem>>, vector<1x80x64xbf16>
    %350 = vector.shape_cast %349 : vector<1x80x64xbf16> to vector<80x64xbf16>
    %cst_404 = arith.constant dense<0.000000e+00> : vector<64x64xf32>
    %351 = tpu.matmul %348, %350, %cst_404 {dimension_numbers = #tpu.dot_dimension_numbers<[1], [0], [0], [1], [0, 0, 1, 1], [], []>} : vector<64x80xbf16>, vector<80x64xbf16>, vector<64x64xf32> -> vector<64x64xf32>
    %352 = arith.addf %345, %351 : vector<64x64xf32>
    %c0_405 = arith.constant 0 : index
    %c2_406 = arith.constant 2 : index
    %c0_407 = arith.constant 0 : index
    %353 = vector.load %arg5[%c0_405, %c2_406, %c0_407] : memref<10x10x80xf32, #tpu.memory_space<vmem>>, vector<8x8x80xf32>
    %354 = vector.shape_cast %353 : vector<8x8x80xf32> to vector<64x80xf32>
    %355 = arith.truncf %354 : vector<64x80xf32> to vector<64x80xbf16>
    %c38 = arith.constant 38 : index
    %c0_408 = arith.constant 0 : index
    %c0_409 = arith.constant 0 : index
    %356 = vector.load %arg2[%c38, %c0_408, %c0_409] : memref<81x80x64xbf16, #tpu.memory_space<vmem>>, vector<1x80x64xbf16>
    %357 = vector.shape_cast %356 : vector<1x80x64xbf16> to vector<80x64xbf16>
    %cst_410 = arith.constant dense<0.000000e+00> : vector<64x64xf32>
    %358 = tpu.matmul %355, %357, %cst_410 {dimension_numbers = #tpu.dot_dimension_numbers<[1], [0], [0], [1], [0, 0, 1, 1], [], []>} : vector<64x80xbf16>, vector<80x64xbf16>, vector<64x64xf32> -> vector<64x64xf32>
    %359 = arith.addf %352, %358 : vector<64x64xf32>
    %c1_411 = arith.constant 1 : index
    %c0_412 = arith.constant 0 : index
    %c0_413 = arith.constant 0 : index
    %360 = vector.load %arg5[%c1_411, %c0_412, %c0_413] : memref<10x10x80xf32, #tpu.memory_space<vmem>>, vector<8x8x80xf32>
    %361 = vector.shape_cast %360 : vector<8x8x80xf32> to vector<64x80xf32>
    %362 = arith.truncf %361 : vector<64x80xf32> to vector<64x80xbf16>
    %c39 = arith.constant 39 : index
    %c0_414 = arith.constant 0 : index
    %c0_415 = arith.constant 0 : index
    %363 = vector.load %arg2[%c39, %c0_414, %c0_415] : memref<81x80x64xbf16, #tpu.memory_space<vmem>>, vector<1x80x64xbf16>
    %364 = vector.shape_cast %363 : vector<1x80x64xbf16> to vector<80x64xbf16>
    %cst_416 = arith.constant dense<0.000000e+00> : vector<64x64xf32>
    %365 = tpu.matmul %362, %364, %cst_416 {dimension_numbers = #tpu.dot_dimension_numbers<[1], [0], [0], [1], [0, 0, 1, 1], [], []>} : vector<64x80xbf16>, vector<80x64xbf16>, vector<64x64xf32> -> vector<64x64xf32>
    %366 = arith.addf %359, %365 : vector<64x64xf32>
    %c1_417 = arith.constant 1 : index
    %c1_418 = arith.constant 1 : index
    %c0_419 = arith.constant 0 : index
    %367 = vector.load %arg5[%c1_417, %c1_418, %c0_419] : memref<10x10x80xf32, #tpu.memory_space<vmem>>, vector<8x8x80xf32>
    %368 = vector.shape_cast %367 : vector<8x8x80xf32> to vector<64x80xf32>
    %369 = arith.truncf %368 : vector<64x80xf32> to vector<64x80xbf16>
    %c40 = arith.constant 40 : index
    %c0_420 = arith.constant 0 : index
    %c0_421 = arith.constant 0 : index
    %370 = vector.load %arg2[%c40, %c0_420, %c0_421] : memref<81x80x64xbf16, #tpu.memory_space<vmem>>, vector<1x80x64xbf16>
    %371 = vector.shape_cast %370 : vector<1x80x64xbf16> to vector<80x64xbf16>
    %cst_422 = arith.constant dense<0.000000e+00> : vector<64x64xf32>
    %372 = tpu.matmul %369, %371, %cst_422 {dimension_numbers = #tpu.dot_dimension_numbers<[1], [0], [0], [1], [0, 0, 1, 1], [], []>} : vector<64x80xbf16>, vector<80x64xbf16>, vector<64x64xf32> -> vector<64x64xf32>
    %373 = arith.addf %366, %372 : vector<64x64xf32>
    %c1_423 = arith.constant 1 : index
    %c2_424 = arith.constant 2 : index
    %c0_425 = arith.constant 0 : index
    %374 = vector.load %arg5[%c1_423, %c2_424, %c0_425] : memref<10x10x80xf32, #tpu.memory_space<vmem>>, vector<8x8x80xf32>
    %375 = vector.shape_cast %374 : vector<8x8x80xf32> to vector<64x80xf32>
    %376 = arith.truncf %375 : vector<64x80xf32> to vector<64x80xbf16>
    %c41 = arith.constant 41 : index
    %c0_426 = arith.constant 0 : index
    %c0_427 = arith.constant 0 : index
    %377 = vector.load %arg2[%c41, %c0_426, %c0_427] : memref<81x80x64xbf16, #tpu.memory_space<vmem>>, vector<1x80x64xbf16>
    %378 = vector.shape_cast %377 : vector<1x80x64xbf16> to vector<80x64xbf16>
    %cst_428 = arith.constant dense<0.000000e+00> : vector<64x64xf32>
    %379 = tpu.matmul %376, %378, %cst_428 {dimension_numbers = #tpu.dot_dimension_numbers<[1], [0], [0], [1], [0, 0, 1, 1], [], []>} : vector<64x80xbf16>, vector<80x64xbf16>, vector<64x64xf32> -> vector<64x64xf32>
    %380 = arith.addf %373, %379 : vector<64x64xf32>
    %c2_429 = arith.constant 2 : index
    %c0_430 = arith.constant 0 : index
    %c0_431 = arith.constant 0 : index
    %381 = vector.load %arg5[%c2_429, %c0_430, %c0_431] : memref<10x10x80xf32, #tpu.memory_space<vmem>>, vector<8x8x80xf32>
    %382 = vector.shape_cast %381 : vector<8x8x80xf32> to vector<64x80xf32>
    %383 = arith.truncf %382 : vector<64x80xf32> to vector<64x80xbf16>
    %c42 = arith.constant 42 : index
    %c0_432 = arith.constant 0 : index
    %c0_433 = arith.constant 0 : index
    %384 = vector.load %arg2[%c42, %c0_432, %c0_433] : memref<81x80x64xbf16, #tpu.memory_space<vmem>>, vector<1x80x64xbf16>
    %385 = vector.shape_cast %384 : vector<1x80x64xbf16> to vector<80x64xbf16>
    %cst_434 = arith.constant dense<0.000000e+00> : vector<64x64xf32>
    %386 = tpu.matmul %383, %385, %cst_434 {dimension_numbers = #tpu.dot_dimension_numbers<[1], [0], [0], [1], [0, 0, 1, 1], [], []>} : vector<64x80xbf16>, vector<80x64xbf16>, vector<64x64xf32> -> vector<64x64xf32>
    %387 = arith.addf %380, %386 : vector<64x64xf32>
    %c2_435 = arith.constant 2 : index
    %c1_436 = arith.constant 1 : index
    %c0_437 = arith.constant 0 : index
    %388 = vector.load %arg5[%c2_435, %c1_436, %c0_437] : memref<10x10x80xf32, #tpu.memory_space<vmem>>, vector<8x8x80xf32>
    %389 = vector.shape_cast %388 : vector<8x8x80xf32> to vector<64x80xf32>
    %390 = arith.truncf %389 : vector<64x80xf32> to vector<64x80xbf16>
    %c43 = arith.constant 43 : index
    %c0_438 = arith.constant 0 : index
    %c0_439 = arith.constant 0 : index
    %391 = vector.load %arg2[%c43, %c0_438, %c0_439] : memref<81x80x64xbf16, #tpu.memory_space<vmem>>, vector<1x80x64xbf16>
    %392 = vector.shape_cast %391 : vector<1x80x64xbf16> to vector<80x64xbf16>
    %cst_440 = arith.constant dense<0.000000e+00> : vector<64x64xf32>
    %393 = tpu.matmul %390, %392, %cst_440 {dimension_numbers = #tpu.dot_dimension_numbers<[1], [0], [0], [1], [0, 0, 1, 1], [], []>} : vector<64x80xbf16>, vector<80x64xbf16>, vector<64x64xf32> -> vector<64x64xf32>
    %394 = arith.addf %387, %393 : vector<64x64xf32>
    %c2_441 = arith.constant 2 : index
    %c2_442 = arith.constant 2 : index
    %c0_443 = arith.constant 0 : index
    %395 = vector.load %arg5[%c2_441, %c2_442, %c0_443] : memref<10x10x80xf32, #tpu.memory_space<vmem>>, vector<8x8x80xf32>
    %396 = vector.shape_cast %395 : vector<8x8x80xf32> to vector<64x80xf32>
    %397 = arith.truncf %396 : vector<64x80xf32> to vector<64x80xbf16>
    %c44 = arith.constant 44 : index
    %c0_444 = arith.constant 0 : index
    %c0_445 = arith.constant 0 : index
    %398 = vector.load %arg2[%c44, %c0_444, %c0_445] : memref<81x80x64xbf16, #tpu.memory_space<vmem>>, vector<1x80x64xbf16>
    %399 = vector.shape_cast %398 : vector<1x80x64xbf16> to vector<80x64xbf16>
    %cst_446 = arith.constant dense<0.000000e+00> : vector<64x64xf32>
    %400 = tpu.matmul %397, %399, %cst_446 {dimension_numbers = #tpu.dot_dimension_numbers<[1], [0], [0], [1], [0, 0, 1, 1], [], []>} : vector<64x80xbf16>, vector<80x64xbf16>, vector<64x64xf32> -> vector<64x64xf32>
    %401 = arith.addf %394, %400 : vector<64x64xf32>
    %402 = arith.addf %401, %240 : vector<64x64xf32>
    %cst_447 = arith.constant 0.000000e+00 : f32
    %403 = vector.broadcast %cst_447 : f32 to vector<64x64xf32>
    %404 = arith.cmpf oge, %402, %403 : vector<64x64xf32>
    %cst_448 = arith.constant 0.00999999977 : f32
    %405 = vector.broadcast %cst_448 : f32 to vector<64x64xf32>
    %406 = arith.mulf %402, %405 : vector<64x64xf32>
    %407 = arith.select %404, %402, %406 : vector<64x64xi1>, vector<64x64xf32>
    %408 = vector.shape_cast %407 : vector<64x64xf32> to vector<8x8x64xf32>
    %c1_449 = arith.constant 1 : index
    %c1_450 = arith.constant 1 : index
    %c8_451 = arith.constant 8 : index
    %409 = vector.load %arg5[%c1_449, %c1_450, %c8_451] : memref<10x10x80xf32, #tpu.memory_space<vmem>>, vector<8x8x64xf32>
    tpu.vector_store %arg5[%c1_449, %c1_450, %c8_451], %408 {strides = array<i32>} : memref<10x10x80xf32, #tpu.memory_space<vmem>>, vector<8x8x64xf32>,
    %c0_452 = arith.constant 0 : index
    %c0_453 = arith.constant 0 : index
    %c8_454 = arith.constant 8 : index
    %410 = vector.load %arg5[%c0_452, %c0_453, %c8_454] : memref<10x10x80xf32, #tpu.memory_space<vmem>>, vector<10x10x8xf32>
    %c0_455 = arith.constant 0 : index
    %c0_456 = arith.constant 0 : index
    %c64_457 = arith.constant 64 : index
    %411 = vector.load %arg5[%c0_455, %c0_456, %c64_457] : memref<10x10x80xf32, #tpu.memory_space<vmem>>, vector<10x10x8xf32>
    %c0_458 = arith.constant 0 : index
    %c0_459 = arith.constant 0 : index
    %c0_460 = arith.constant 0 : index
    %412 = vector.load %arg5[%c0_458, %c0_459, %c0_460] : memref<10x10x80xf32, #tpu.memory_space<vmem>>, vector<10x10x8xf32>
    tpu.vector_store %arg5[%c0_458, %c0_459, %c0_460], %410 {strides = array<i32>} : memref<10x10x80xf32, #tpu.memory_space<vmem>>, vector<10x10x8xf32>,
    %c0_461 = arith.constant 0 : index
    %c0_462 = arith.constant 0 : index
    %c72_463 = arith.constant 72 : index
    %413 = vector.load %arg5[%c0_461, %c0_462, %c72_463] : memref<10x10x80xf32, #tpu.memory_space<vmem>>, vector<10x10x8xf32>
    tpu.vector_store %arg5[%c0_461, %c0_462, %c72_463], %411 {strides = array<i32>} : memref<10x10x80xf32, #tpu.memory_space<vmem>>, vector<10x10x8xf32>,
    %c0_464 = arith.constant 0 : index
    %c1_465 = arith.constant 1 : index
    %c0_466 = arith.constant 0 : index
    %414 = vector.load %arg5[%c0_464, %c1_465, %c0_466] : memref<10x10x80xf32, #tpu.memory_space<vmem>>, vector<10x1x80xf32>
    %c0_467 = arith.constant 0 : index
    %c8_468 = arith.constant 8 : index
    %c0_469 = arith.constant 0 : index
    %415 = vector.load %arg5[%c0_467, %c8_468, %c0_469] : memref<10x10x80xf32, #tpu.memory_space<vmem>>, vector<10x1x80xf32>
    %c0_470 = arith.constant 0 : index
    %c0_471 = arith.constant 0 : index
    %c0_472 = arith.constant 0 : index
    %416 = vector.load %arg5[%c0_470, %c0_471, %c0_472] : memref<10x10x80xf32, #tpu.memory_space<vmem>>, vector<10x1x80xf32>
    tpu.vector_store %arg5[%c0_470, %c0_471, %c0_472], %414 {strides = array<i32>} : memref<10x10x80xf32, #tpu.memory_space<vmem>>, vector<10x1x80xf32>,
    %c0_473 = arith.constant 0 : index
    %c9_474 = arith.constant 9 : index
    %c0_475 = arith.constant 0 : index
    %417 = vector.load %arg5[%c0_473, %c9_474, %c0_475] : memref<10x10x80xf32, #tpu.memory_space<vmem>>, vector<10x1x80xf32>
    tpu.vector_store %arg5[%c0_473, %c9_474, %c0_475], %415 {strides = array<i32>} : memref<10x10x80xf32, #tpu.memory_space<vmem>>, vector<10x1x80xf32>,
    %c1_476 = arith.constant 1 : index
    %c0_477 = arith.constant 0 : index
    %c0_478 = arith.constant 0 : index
    %418 = vector.load %arg5[%c1_476, %c0_477, %c0_478] : memref<10x10x80xf32, #tpu.memory_space<vmem>>, vector<1x10x80xf32>
    %c8_479 = arith.constant 8 : index
    %c0_480 = arith.constant 0 : index
    %c0_481 = arith.constant 0 : index
    %419 = vector.load %arg5[%c8_479, %c0_480, %c0_481] : memref<10x10x80xf32, #tpu.memory_space<vmem>>, vector<1x10x80xf32>
    %c0_482 = arith.constant 0 : index
    %c0_483 = arith.constant 0 : index
    %c0_484 = arith.constant 0 : index
    %420 = vector.load %arg5[%c0_482, %c0_483, %c0_484] : memref<10x10x80xf32, #tpu.memory_space<vmem>>, vector<1x10x80xf32>
    tpu.vector_store %arg5[%c0_482, %c0_483, %c0_484], %418 {strides = array<i32>} : memref<10x10x80xf32, #tpu.memory_space<vmem>>, vector<1x10x80xf32>,
    %c9_485 = arith.constant 9 : index
    %c0_486 = arith.constant 0 : index
    %c0_487 = arith.constant 0 : index
    %421 = vector.load %arg5[%c9_485, %c0_486, %c0_487] : memref<10x10x80xf32, #tpu.memory_space<vmem>>, vector<1x10x80xf32>
    tpu.vector_store %arg5[%c9_485, %c0_486, %c0_487], %419 {strides = array<i32>} : memref<10x10x80xf32, #tpu.memory_space<vmem>>, vector<1x10x80xf32>,
    %cst_488 = arith.constant 0.000000e+00 : f32
    %422 = vector.broadcast %cst_488 : f32 to vector<64x64xf32>
    %c0_489 = arith.constant 0 : index
    %c0_490 = arith.constant 0 : index
    %c0_491 = arith.constant 0 : index
    %423 = vector.load %arg5[%c0_489, %c0_490, %c0_491] : memref<10x10x80xf32, #tpu.memory_space<vmem>>, vector<8x8x80xf32>
    %424 = vector.shape_cast %423 : vector<8x8x80xf32> to vector<64x80xf32>
    %425 = arith.truncf %424 : vector<64x80xf32> to vector<64x80xbf16>
    %c45 = arith.constant 45 : index
    %c0_492 = arith.constant 0 : index
    %c0_493 = arith.constant 0 : index
    %426 = vector.load %arg2[%c45, %c0_492, %c0_493] : memref<81x80x64xbf16, #tpu.memory_space<vmem>>, vector<1x80x64xbf16>
    %427 = vector.shape_cast %426 : vector<1x80x64xbf16> to vector<80x64xbf16>
    %cst_494 = arith.constant dense<0.000000e+00> : vector<64x64xf32>
    %428 = tpu.matmul %425, %427, %cst_494 {dimension_numbers = #tpu.dot_dimension_numbers<[1], [0], [0], [1], [0, 0, 1, 1], [], []>} : vector<64x80xbf16>, vector<80x64xbf16>, vector<64x64xf32> -> vector<64x64xf32>
    %429 = arith.addf %422, %428 : vector<64x64xf32>
    %c0_495 = arith.constant 0 : index
    %c1_496 = arith.constant 1 : index
    %c0_497 = arith.constant 0 : index
    %430 = vector.load %arg5[%c0_495, %c1_496, %c0_497] : memref<10x10x80xf32, #tpu.memory_space<vmem>>, vector<8x8x80xf32>
    %431 = vector.shape_cast %430 : vector<8x8x80xf32> to vector<64x80xf32>
    %432 = arith.truncf %431 : vector<64x80xf32> to vector<64x80xbf16>
    %c46 = arith.constant 46 : index
    %c0_498 = arith.constant 0 : index
    %c0_499 = arith.constant 0 : index
    %433 = vector.load %arg2[%c46, %c0_498, %c0_499] : memref<81x80x64xbf16, #tpu.memory_space<vmem>>, vector<1x80x64xbf16>
    %434 = vector.shape_cast %433 : vector<1x80x64xbf16> to vector<80x64xbf16>
    %cst_500 = arith.constant dense<0.000000e+00> : vector<64x64xf32>
    %435 = tpu.matmul %432, %434, %cst_500 {dimension_numbers = #tpu.dot_dimension_numbers<[1], [0], [0], [1], [0, 0, 1, 1], [], []>} : vector<64x80xbf16>, vector<80x64xbf16>, vector<64x64xf32> -> vector<64x64xf32>
    %436 = arith.addf %429, %435 : vector<64x64xf32>
    %c0_501 = arith.constant 0 : index
    %c2_502 = arith.constant 2 : index
    %c0_503 = arith.constant 0 : index
    %437 = vector.load %arg5[%c0_501, %c2_502, %c0_503] : memref<10x10x80xf32, #tpu.memory_space<vmem>>, vector<8x8x80xf32>
    %438 = vector.shape_cast %437 : vector<8x8x80xf32> to vector<64x80xf32>
    %439 = arith.truncf %438 : vector<64x80xf32> to vector<64x80xbf16>
    %c47 = arith.constant 47 : index
    %c0_504 = arith.constant 0 : index
    %c0_505 = arith.constant 0 : index
    %440 = vector.load %arg2[%c47, %c0_504, %c0_505] : memref<81x80x64xbf16, #tpu.memory_space<vmem>>, vector<1x80x64xbf16>
    %441 = vector.shape_cast %440 : vector<1x80x64xbf16> to vector<80x64xbf16>
    %cst_506 = arith.constant dense<0.000000e+00> : vector<64x64xf32>
    %442 = tpu.matmul %439, %441, %cst_506 {dimension_numbers = #tpu.dot_dimension_numbers<[1], [0], [0], [1], [0, 0, 1, 1], [], []>} : vector<64x80xbf16>, vector<80x64xbf16>, vector<64x64xf32> -> vector<64x64xf32>
    %443 = arith.addf %436, %442 : vector<64x64xf32>
    %c1_507 = arith.constant 1 : index
    %c0_508 = arith.constant 0 : index
    %c0_509 = arith.constant 0 : index
    %444 = vector.load %arg5[%c1_507, %c0_508, %c0_509] : memref<10x10x80xf32, #tpu.memory_space<vmem>>, vector<8x8x80xf32>
    %445 = vector.shape_cast %444 : vector<8x8x80xf32> to vector<64x80xf32>
    %446 = arith.truncf %445 : vector<64x80xf32> to vector<64x80xbf16>
    %c48 = arith.constant 48 : index
    %c0_510 = arith.constant 0 : index
    %c0_511 = arith.constant 0 : index
    %447 = vector.load %arg2[%c48, %c0_510, %c0_511] : memref<81x80x64xbf16, #tpu.memory_space<vmem>>, vector<1x80x64xbf16>
    %448 = vector.shape_cast %447 : vector<1x80x64xbf16> to vector<80x64xbf16>
    %cst_512 = arith.constant dense<0.000000e+00> : vector<64x64xf32>
    %449 = tpu.matmul %446, %448, %cst_512 {dimension_numbers = #tpu.dot_dimension_numbers<[1], [0], [0], [1], [0, 0, 1, 1], [], []>} : vector<64x80xbf16>, vector<80x64xbf16>, vector<64x64xf32> -> vector<64x64xf32>
    %450 = arith.addf %443, %449 : vector<64x64xf32>
    %c1_513 = arith.constant 1 : index
    %c1_514 = arith.constant 1 : index
    %c0_515 = arith.constant 0 : index
    %451 = vector.load %arg5[%c1_513, %c1_514, %c0_515] : memref<10x10x80xf32, #tpu.memory_space<vmem>>, vector<8x8x80xf32>
    %452 = vector.shape_cast %451 : vector<8x8x80xf32> to vector<64x80xf32>
    %453 = arith.truncf %452 : vector<64x80xf32> to vector<64x80xbf16>
    %c49 = arith.constant 49 : index
    %c0_516 = arith.constant 0 : index
    %c0_517 = arith.constant 0 : index
    %454 = vector.load %arg2[%c49, %c0_516, %c0_517] : memref<81x80x64xbf16, #tpu.memory_space<vmem>>, vector<1x80x64xbf16>
    %455 = vector.shape_cast %454 : vector<1x80x64xbf16> to vector<80x64xbf16>
    %cst_518 = arith.constant dense<0.000000e+00> : vector<64x64xf32>
    %456 = tpu.matmul %453, %455, %cst_518 {dimension_numbers = #tpu.dot_dimension_numbers<[1], [0], [0], [1], [0, 0, 1, 1], [], []>} : vector<64x80xbf16>, vector<80x64xbf16>, vector<64x64xf32> -> vector<64x64xf32>
    %457 = arith.addf %450, %456 : vector<64x64xf32>
    %c1_519 = arith.constant 1 : index
    %c2_520 = arith.constant 2 : index
    %c0_521 = arith.constant 0 : index
    %458 = vector.load %arg5[%c1_519, %c2_520, %c0_521] : memref<10x10x80xf32, #tpu.memory_space<vmem>>, vector<8x8x80xf32>
    %459 = vector.shape_cast %458 : vector<8x8x80xf32> to vector<64x80xf32>
    %460 = arith.truncf %459 : vector<64x80xf32> to vector<64x80xbf16>
    %c50 = arith.constant 50 : index
    %c0_522 = arith.constant 0 : index
    %c0_523 = arith.constant 0 : index
    %461 = vector.load %arg2[%c50, %c0_522, %c0_523] : memref<81x80x64xbf16, #tpu.memory_space<vmem>>, vector<1x80x64xbf16>
    %462 = vector.shape_cast %461 : vector<1x80x64xbf16> to vector<80x64xbf16>
    %cst_524 = arith.constant dense<0.000000e+00> : vector<64x64xf32>
    %463 = tpu.matmul %460, %462, %cst_524 {dimension_numbers = #tpu.dot_dimension_numbers<[1], [0], [0], [1], [0, 0, 1, 1], [], []>} : vector<64x80xbf16>, vector<80x64xbf16>, vector<64x64xf32> -> vector<64x64xf32>
    %464 = arith.addf %457, %463 : vector<64x64xf32>
    %c2_525 = arith.constant 2 : index
    %c0_526 = arith.constant 0 : index
    %c0_527 = arith.constant 0 : index
    %465 = vector.load %arg5[%c2_525, %c0_526, %c0_527] : memref<10x10x80xf32, #tpu.memory_space<vmem>>, vector<8x8x80xf32>
    %466 = vector.shape_cast %465 : vector<8x8x80xf32> to vector<64x80xf32>
    %467 = arith.truncf %466 : vector<64x80xf32> to vector<64x80xbf16>
    %c51 = arith.constant 51 : index
    %c0_528 = arith.constant 0 : index
    %c0_529 = arith.constant 0 : index
    %468 = vector.load %arg2[%c51, %c0_528, %c0_529] : memref<81x80x64xbf16, #tpu.memory_space<vmem>>, vector<1x80x64xbf16>
    %469 = vector.shape_cast %468 : vector<1x80x64xbf16> to vector<80x64xbf16>
    %cst_530 = arith.constant dense<0.000000e+00> : vector<64x64xf32>
    %470 = tpu.matmul %467, %469, %cst_530 {dimension_numbers = #tpu.dot_dimension_numbers<[1], [0], [0], [1], [0, 0, 1, 1], [], []>} : vector<64x80xbf16>, vector<80x64xbf16>, vector<64x64xf32> -> vector<64x64xf32>
    %471 = arith.addf %464, %470 : vector<64x64xf32>
    %c2_531 = arith.constant 2 : index
    %c1_532 = arith.constant 1 : index
    %c0_533 = arith.constant 0 : index
    %472 = vector.load %arg5[%c2_531, %c1_532, %c0_533] : memref<10x10x80xf32, #tpu.memory_space<vmem>>, vector<8x8x80xf32>
    %473 = vector.shape_cast %472 : vector<8x8x80xf32> to vector<64x80xf32>
    %474 = arith.truncf %473 : vector<64x80xf32> to vector<64x80xbf16>
    %c52 = arith.constant 52 : index
    %c0_534 = arith.constant 0 : index
    %c0_535 = arith.constant 0 : index
    %475 = vector.load %arg2[%c52, %c0_534, %c0_535] : memref<81x80x64xbf16, #tpu.memory_space<vmem>>, vector<1x80x64xbf16>
    %476 = vector.shape_cast %475 : vector<1x80x64xbf16> to vector<80x64xbf16>
    %cst_536 = arith.constant dense<0.000000e+00> : vector<64x64xf32>
    %477 = tpu.matmul %474, %476, %cst_536 {dimension_numbers = #tpu.dot_dimension_numbers<[1], [0], [0], [1], [0, 0, 1, 1], [], []>} : vector<64x80xbf16>, vector<80x64xbf16>, vector<64x64xf32> -> vector<64x64xf32>
    %478 = arith.addf %471, %477 : vector<64x64xf32>
    %c2_537 = arith.constant 2 : index
    %c2_538 = arith.constant 2 : index
    %c0_539 = arith.constant 0 : index
    %479 = vector.load %arg5[%c2_537, %c2_538, %c0_539] : memref<10x10x80xf32, #tpu.memory_space<vmem>>, vector<8x8x80xf32>
    %480 = vector.shape_cast %479 : vector<8x8x80xf32> to vector<64x80xf32>
    %481 = arith.truncf %480 : vector<64x80xf32> to vector<64x80xbf16>
    %c53 = arith.constant 53 : index
    %c0_540 = arith.constant 0 : index
    %c0_541 = arith.constant 0 : index
    %482 = vector.load %arg2[%c53, %c0_540, %c0_541] : memref<81x80x64xbf16, #tpu.memory_space<vmem>>, vector<1x80x64xbf16>
    %483 = vector.shape_cast %482 : vector<1x80x64xbf16> to vector<80x64xbf16>
    %cst_542 = arith.constant dense<0.000000e+00> : vector<64x64xf32>
    %484 = tpu.matmul %481, %483, %cst_542 {dimension_numbers = #tpu.dot_dimension_numbers<[1], [0], [0], [1], [0, 0, 1, 1], [], []>} : vector<64x80xbf16>, vector<80x64xbf16>, vector<64x64xf32> -> vector<64x64xf32>
    %485 = arith.addf %478, %484 : vector<64x64xf32>
    %cst_543 = arith.constant 0.000000e+00 : f32
    %486 = vector.broadcast %cst_543 : f32 to vector<64x64xf32>
    %487 = arith.cmpf oge, %485, %486 : vector<64x64xf32>
    %cst_544 = arith.constant 0.00999999977 : f32
    %488 = vector.broadcast %cst_544 : f32 to vector<64x64xf32>
    %489 = arith.mulf %485, %488 : vector<64x64xf32>
    %490 = arith.select %487, %485, %489 : vector<64x64xi1>, vector<64x64xf32>
    %491 = vector.shape_cast %490 : vector<64x64xf32> to vector<8x8x64xf32>
    %c1_545 = arith.constant 1 : index
    %c1_546 = arith.constant 1 : index
    %c8_547 = arith.constant 8 : index
    %492 = vector.load %arg5[%c1_545, %c1_546, %c8_547] : memref<10x10x80xf32, #tpu.memory_space<vmem>>, vector<8x8x64xf32>
    tpu.vector_store %arg5[%c1_545, %c1_546, %c8_547], %491 {strides = array<i32>} : memref<10x10x80xf32, #tpu.memory_space<vmem>>, vector<8x8x64xf32>,
    %c0_548 = arith.constant 0 : index
    %c0_549 = arith.constant 0 : index
    %c8_550 = arith.constant 8 : index
    %493 = vector.load %arg5[%c0_548, %c0_549, %c8_550] : memref<10x10x80xf32, #tpu.memory_space<vmem>>, vector<10x10x8xf32>
    %c0_551 = arith.constant 0 : index
    %c0_552 = arith.constant 0 : index
    %c64_553 = arith.constant 64 : index
    %494 = vector.load %arg5[%c0_551, %c0_552, %c64_553] : memref<10x10x80xf32, #tpu.memory_space<vmem>>, vector<10x10x8xf32>
    %c0_554 = arith.constant 0 : index
    %c0_555 = arith.constant 0 : index
    %c0_556 = arith.constant 0 : index
    %495 = vector.load %arg5[%c0_554, %c0_555, %c0_556] : memref<10x10x80xf32, #tpu.memory_space<vmem>>, vector<10x10x8xf32>
    tpu.vector_store %arg5[%c0_554, %c0_555, %c0_556], %493 {strides = array<i32>} : memref<10x10x80xf32, #tpu.memory_space<vmem>>, vector<10x10x8xf32>,
    %c0_557 = arith.constant 0 : index
    %c0_558 = arith.constant 0 : index
    %c72_559 = arith.constant 72 : index
    %496 = vector.load %arg5[%c0_557, %c0_558, %c72_559] : memref<10x10x80xf32, #tpu.memory_space<vmem>>, vector<10x10x8xf32>
    tpu.vector_store %arg5[%c0_557, %c0_558, %c72_559], %494 {strides = array<i32>} : memref<10x10x80xf32, #tpu.memory_space<vmem>>, vector<10x10x8xf32>,
    %c0_560 = arith.constant 0 : index
    %c1_561 = arith.constant 1 : index
    %c0_562 = arith.constant 0 : index
    %497 = vector.load %arg5[%c0_560, %c1_561, %c0_562] : memref<10x10x80xf32, #tpu.memory_space<vmem>>, vector<10x1x80xf32>
    %c0_563 = arith.constant 0 : index
    %c8_564 = arith.constant 8 : index
    %c0_565 = arith.constant 0 : index
    %498 = vector.load %arg5[%c0_563, %c8_564, %c0_565] : memref<10x10x80xf32, #tpu.memory_space<vmem>>, vector<10x1x80xf32>
    %c0_566 = arith.constant 0 : index
    %c0_567 = arith.constant 0 : index
    %c0_568 = arith.constant 0 : index
    %499 = vector.load %arg5[%c0_566, %c0_567, %c0_568] : memref<10x10x80xf32, #tpu.memory_space<vmem>>, vector<10x1x80xf32>
    tpu.vector_store %arg5[%c0_566, %c0_567, %c0_568], %497 {strides = array<i32>} : memref<10x10x80xf32, #tpu.memory_space<vmem>>, vector<10x1x80xf32>,
    %c0_569 = arith.constant 0 : index
    %c9_570 = arith.constant 9 : index
    %c0_571 = arith.constant 0 : index
    %500 = vector.load %arg5[%c0_569, %c9_570, %c0_571] : memref<10x10x80xf32, #tpu.memory_space<vmem>>, vector<10x1x80xf32>
    tpu.vector_store %arg5[%c0_569, %c9_570, %c0_571], %498 {strides = array<i32>} : memref<10x10x80xf32, #tpu.memory_space<vmem>>, vector<10x1x80xf32>,
    %c1_572 = arith.constant 1 : index
    %c0_573 = arith.constant 0 : index
    %c0_574 = arith.constant 0 : index
    %501 = vector.load %arg5[%c1_572, %c0_573, %c0_574] : memref<10x10x80xf32, #tpu.memory_space<vmem>>, vector<1x10x80xf32>
    %c8_575 = arith.constant 8 : index
    %c0_576 = arith.constant 0 : index
    %c0_577 = arith.constant 0 : index
    %502 = vector.load %arg5[%c8_575, %c0_576, %c0_577] : memref<10x10x80xf32, #tpu.memory_space<vmem>>, vector<1x10x80xf32>
    %c0_578 = arith.constant 0 : index
    %c0_579 = arith.constant 0 : index
    %c0_580 = arith.constant 0 : index
    %503 = vector.load %arg5[%c0_578, %c0_579, %c0_580] : memref<10x10x80xf32, #tpu.memory_space<vmem>>, vector<1x10x80xf32>
    tpu.vector_store %arg5[%c0_578, %c0_579, %c0_580], %501 {strides = array<i32>} : memref<10x10x80xf32, #tpu.memory_space<vmem>>, vector<1x10x80xf32>,
    %c9_581 = arith.constant 9 : index
    %c0_582 = arith.constant 0 : index
    %c0_583 = arith.constant 0 : index
    %504 = vector.load %arg5[%c9_581, %c0_582, %c0_583] : memref<10x10x80xf32, #tpu.memory_space<vmem>>, vector<1x10x80xf32>
    tpu.vector_store %arg5[%c9_581, %c0_582, %c0_583], %502 {strides = array<i32>} : memref<10x10x80xf32, #tpu.memory_space<vmem>>, vector<1x10x80xf32>,
    %cst_584 = arith.constant 0.000000e+00 : f32
    %505 = vector.broadcast %cst_584 : f32 to vector<64x64xf32>
    %c0_585 = arith.constant 0 : index
    %c0_586 = arith.constant 0 : index
    %c0_587 = arith.constant 0 : index
    %506 = vector.load %arg5[%c0_585, %c0_586, %c0_587] : memref<10x10x80xf32, #tpu.memory_space<vmem>>, vector<8x8x80xf32>
    %507 = vector.shape_cast %506 : vector<8x8x80xf32> to vector<64x80xf32>
    %508 = arith.truncf %507 : vector<64x80xf32> to vector<64x80xbf16>
    %c54 = arith.constant 54 : index
    %c0_588 = arith.constant 0 : index
    %c0_589 = arith.constant 0 : index
    %509 = vector.load %arg2[%c54, %c0_588, %c0_589] : memref<81x80x64xbf16, #tpu.memory_space<vmem>>, vector<1x80x64xbf16>
    %510 = vector.shape_cast %509 : vector<1x80x64xbf16> to vector<80x64xbf16>
    %cst_590 = arith.constant dense<0.000000e+00> : vector<64x64xf32>
    %511 = tpu.matmul %508, %510, %cst_590 {dimension_numbers = #tpu.dot_dimension_numbers<[1], [0], [0], [1], [0, 0, 1, 1], [], []>} : vector<64x80xbf16>, vector<80x64xbf16>, vector<64x64xf32> -> vector<64x64xf32>
    %512 = arith.addf %505, %511 : vector<64x64xf32>
    %c0_591 = arith.constant 0 : index
    %c1_592 = arith.constant 1 : index
    %c0_593 = arith.constant 0 : index
    %513 = vector.load %arg5[%c0_591, %c1_592, %c0_593] : memref<10x10x80xf32, #tpu.memory_space<vmem>>, vector<8x8x80xf32>
    %514 = vector.shape_cast %513 : vector<8x8x80xf32> to vector<64x80xf32>
    %515 = arith.truncf %514 : vector<64x80xf32> to vector<64x80xbf16>
    %c55 = arith.constant 55 : index
    %c0_594 = arith.constant 0 : index
    %c0_595 = arith.constant 0 : index
    %516 = vector.load %arg2[%c55, %c0_594, %c0_595] : memref<81x80x64xbf16, #tpu.memory_space<vmem>>, vector<1x80x64xbf16>
    %517 = vector.shape_cast %516 : vector<1x80x64xbf16> to vector<80x64xbf16>
    %cst_596 = arith.constant dense<0.000000e+00> : vector<64x64xf32>
    %518 = tpu.matmul %515, %517, %cst_596 {dimension_numbers = #tpu.dot_dimension_numbers<[1], [0], [0], [1], [0, 0, 1, 1], [], []>} : vector<64x80xbf16>, vector<80x64xbf16>, vector<64x64xf32> -> vector<64x64xf32>
    %519 = arith.addf %512, %518 : vector<64x64xf32>
    %c0_597 = arith.constant 0 : index
    %c2_598 = arith.constant 2 : index
    %c0_599 = arith.constant 0 : index
    %520 = vector.load %arg5[%c0_597, %c2_598, %c0_599] : memref<10x10x80xf32, #tpu.memory_space<vmem>>, vector<8x8x80xf32>
    %521 = vector.shape_cast %520 : vector<8x8x80xf32> to vector<64x80xf32>
    %522 = arith.truncf %521 : vector<64x80xf32> to vector<64x80xbf16>
    %c56 = arith.constant 56 : index
    %c0_600 = arith.constant 0 : index
    %c0_601 = arith.constant 0 : index
    %523 = vector.load %arg2[%c56, %c0_600, %c0_601] : memref<81x80x64xbf16, #tpu.memory_space<vmem>>, vector<1x80x64xbf16>
    %524 = vector.shape_cast %523 : vector<1x80x64xbf16> to vector<80x64xbf16>
    %cst_602 = arith.constant dense<0.000000e+00> : vector<64x64xf32>
    %525 = tpu.matmul %522, %524, %cst_602 {dimension_numbers = #tpu.dot_dimension_numbers<[1], [0], [0], [1], [0, 0, 1, 1], [], []>} : vector<64x80xbf16>, vector<80x64xbf16>, vector<64x64xf32> -> vector<64x64xf32>
    %526 = arith.addf %519, %525 : vector<64x64xf32>
    %c1_603 = arith.constant 1 : index
    %c0_604 = arith.constant 0 : index
    %c0_605 = arith.constant 0 : index
    %527 = vector.load %arg5[%c1_603, %c0_604, %c0_605] : memref<10x10x80xf32, #tpu.memory_space<vmem>>, vector<8x8x80xf32>
    %528 = vector.shape_cast %527 : vector<8x8x80xf32> to vector<64x80xf32>
    %529 = arith.truncf %528 : vector<64x80xf32> to vector<64x80xbf16>
    %c57 = arith.constant 57 : index
    %c0_606 = arith.constant 0 : index
    %c0_607 = arith.constant 0 : index
    %530 = vector.load %arg2[%c57, %c0_606, %c0_607] : memref<81x80x64xbf16, #tpu.memory_space<vmem>>, vector<1x80x64xbf16>
    %531 = vector.shape_cast %530 : vector<1x80x64xbf16> to vector<80x64xbf16>
    %cst_608 = arith.constant dense<0.000000e+00> : vector<64x64xf32>
    %532 = tpu.matmul %529, %531, %cst_608 {dimension_numbers = #tpu.dot_dimension_numbers<[1], [0], [0], [1], [0, 0, 1, 1], [], []>} : vector<64x80xbf16>, vector<80x64xbf16>, vector<64x64xf32> -> vector<64x64xf32>
    %533 = arith.addf %526, %532 : vector<64x64xf32>
    %c1_609 = arith.constant 1 : index
    %c1_610 = arith.constant 1 : index
    %c0_611 = arith.constant 0 : index
    %534 = vector.load %arg5[%c1_609, %c1_610, %c0_611] : memref<10x10x80xf32, #tpu.memory_space<vmem>>, vector<8x8x80xf32>
    %535 = vector.shape_cast %534 : vector<8x8x80xf32> to vector<64x80xf32>
    %536 = arith.truncf %535 : vector<64x80xf32> to vector<64x80xbf16>
    %c58 = arith.constant 58 : index
    %c0_612 = arith.constant 0 : index
    %c0_613 = arith.constant 0 : index
    %537 = vector.load %arg2[%c58, %c0_612, %c0_613] : memref<81x80x64xbf16, #tpu.memory_space<vmem>>, vector<1x80x64xbf16>
    %538 = vector.shape_cast %537 : vector<1x80x64xbf16> to vector<80x64xbf16>
    %cst_614 = arith.constant dense<0.000000e+00> : vector<64x64xf32>
    %539 = tpu.matmul %536, %538, %cst_614 {dimension_numbers = #tpu.dot_dimension_numbers<[1], [0], [0], [1], [0, 0, 1, 1], [], []>} : vector<64x80xbf16>, vector<80x64xbf16>, vector<64x64xf32> -> vector<64x64xf32>
    %540 = arith.addf %533, %539 : vector<64x64xf32>
    %c1_615 = arith.constant 1 : index
    %c2_616 = arith.constant 2 : index
    %c0_617 = arith.constant 0 : index
    %541 = vector.load %arg5[%c1_615, %c2_616, %c0_617] : memref<10x10x80xf32, #tpu.memory_space<vmem>>, vector<8x8x80xf32>
    %542 = vector.shape_cast %541 : vector<8x8x80xf32> to vector<64x80xf32>
    %543 = arith.truncf %542 : vector<64x80xf32> to vector<64x80xbf16>
    %c59 = arith.constant 59 : index
    %c0_618 = arith.constant 0 : index
    %c0_619 = arith.constant 0 : index
    %544 = vector.load %arg2[%c59, %c0_618, %c0_619] : memref<81x80x64xbf16, #tpu.memory_space<vmem>>, vector<1x80x64xbf16>
    %545 = vector.shape_cast %544 : vector<1x80x64xbf16> to vector<80x64xbf16>
    %cst_620 = arith.constant dense<0.000000e+00> : vector<64x64xf32>
    %546 = tpu.matmul %543, %545, %cst_620 {dimension_numbers = #tpu.dot_dimension_numbers<[1], [0], [0], [1], [0, 0, 1, 1], [], []>} : vector<64x80xbf16>, vector<80x64xbf16>, vector<64x64xf32> -> vector<64x64xf32>
    %547 = arith.addf %540, %546 : vector<64x64xf32>
    %c2_621 = arith.constant 2 : index
    %c0_622 = arith.constant 0 : index
    %c0_623 = arith.constant 0 : index
    %548 = vector.load %arg5[%c2_621, %c0_622, %c0_623] : memref<10x10x80xf32, #tpu.memory_space<vmem>>, vector<8x8x80xf32>
    %549 = vector.shape_cast %548 : vector<8x8x80xf32> to vector<64x80xf32>
    %550 = arith.truncf %549 : vector<64x80xf32> to vector<64x80xbf16>
    %c60 = arith.constant 60 : index
    %c0_624 = arith.constant 0 : index
    %c0_625 = arith.constant 0 : index
    %551 = vector.load %arg2[%c60, %c0_624, %c0_625] : memref<81x80x64xbf16, #tpu.memory_space<vmem>>, vector<1x80x64xbf16>
    %552 = vector.shape_cast %551 : vector<1x80x64xbf16> to vector<80x64xbf16>
    %cst_626 = arith.constant dense<0.000000e+00> : vector<64x64xf32>
    %553 = tpu.matmul %550, %552, %cst_626 {dimension_numbers = #tpu.dot_dimension_numbers<[1], [0], [0], [1], [0, 0, 1, 1], [], []>} : vector<64x80xbf16>, vector<80x64xbf16>, vector<64x64xf32> -> vector<64x64xf32>
    %554 = arith.addf %547, %553 : vector<64x64xf32>
    %c2_627 = arith.constant 2 : index
    %c1_628 = arith.constant 1 : index
    %c0_629 = arith.constant 0 : index
    %555 = vector.load %arg5[%c2_627, %c1_628, %c0_629] : memref<10x10x80xf32, #tpu.memory_space<vmem>>, vector<8x8x80xf32>
    %556 = vector.shape_cast %555 : vector<8x8x80xf32> to vector<64x80xf32>
    %557 = arith.truncf %556 : vector<64x80xf32> to vector<64x80xbf16>
    %c61 = arith.constant 61 : index
    %c0_630 = arith.constant 0 : index
    %c0_631 = arith.constant 0 : index
    %558 = vector.load %arg2[%c61, %c0_630, %c0_631] : memref<81x80x64xbf16, #tpu.memory_space<vmem>>, vector<1x80x64xbf16>
    %559 = vector.shape_cast %558 : vector<1x80x64xbf16> to vector<80x64xbf16>
    %cst_632 = arith.constant dense<0.000000e+00> : vector<64x64xf32>
    %560 = tpu.matmul %557, %559, %cst_632 {dimension_numbers = #tpu.dot_dimension_numbers<[1], [0], [0], [1], [0, 0, 1, 1], [], []>} : vector<64x80xbf16>, vector<80x64xbf16>, vector<64x64xf32> -> vector<64x64xf32>
    %561 = arith.addf %554, %560 : vector<64x64xf32>
    %c2_633 = arith.constant 2 : index
    %c2_634 = arith.constant 2 : index
    %c0_635 = arith.constant 0 : index
    %562 = vector.load %arg5[%c2_633, %c2_634, %c0_635] : memref<10x10x80xf32, #tpu.memory_space<vmem>>, vector<8x8x80xf32>
    %563 = vector.shape_cast %562 : vector<8x8x80xf32> to vector<64x80xf32>
    %564 = arith.truncf %563 : vector<64x80xf32> to vector<64x80xbf16>
    %c62 = arith.constant 62 : index
    %c0_636 = arith.constant 0 : index
    %c0_637 = arith.constant 0 : index
    %565 = vector.load %arg2[%c62, %c0_636, %c0_637] : memref<81x80x64xbf16, #tpu.memory_space<vmem>>, vector<1x80x64xbf16>
    %566 = vector.shape_cast %565 : vector<1x80x64xbf16> to vector<80x64xbf16>
    %cst_638 = arith.constant dense<0.000000e+00> : vector<64x64xf32>
    %567 = tpu.matmul %564, %566, %cst_638 {dimension_numbers = #tpu.dot_dimension_numbers<[1], [0], [0], [1], [0, 0, 1, 1], [], []>} : vector<64x80xbf16>, vector<80x64xbf16>, vector<64x64xf32> -> vector<64x64xf32>
    %568 = arith.addf %561, %567 : vector<64x64xf32>
    %569 = arith.truncf %407 : vector<64x64xf32> to vector<64x64xbf16>
    %c0_639 = arith.constant 0 : index
    %c0_640 = arith.constant 0 : index
    %c0_641 = arith.constant 0 : index
    %570 = vector.load %arg3[%c0_639, %c0_640, %c0_641] : memref<2x64x64xbf16, #tpu.memory_space<vmem>>, vector<1x64x64xbf16>
    %571 = vector.shape_cast %570 : vector<1x64x64xbf16> to vector<64x64xbf16>
    %cst_642 = arith.constant dense<0.000000e+00> : vector<64x64xf32>
    %572 = tpu.matmul %569, %571, %cst_642 {dimension_numbers = #tpu.dot_dimension_numbers<[1], [0], [0], [1], [0, 0, 1, 1], [], []>} : vector<64x64xbf16>, vector<64x64xbf16>, vector<64x64xf32> -> vector<64x64xf32>
    %573 = arith.addf %568, %572 : vector<64x64xf32>
    %cst_643 = arith.constant 0.000000e+00 : f32
    %574 = vector.broadcast %cst_643 : f32 to vector<64x64xf32>
    %575 = arith.cmpf oge, %573, %574 : vector<64x64xf32>
    %cst_644 = arith.constant 0.00999999977 : f32
    %576 = vector.broadcast %cst_644 : f32 to vector<64x64xf32>
    %577 = arith.mulf %573, %576 : vector<64x64xf32>
    %578 = arith.select %575, %573, %577 : vector<64x64xi1>, vector<64x64xf32>
    %579 = vector.shape_cast %578 : vector<64x64xf32> to vector<8x8x64xf32>
    %c1_645 = arith.constant 1 : index
    %c1_646 = arith.constant 1 : index
    %c8_647 = arith.constant 8 : index
    %580 = vector.load %arg5[%c1_645, %c1_646, %c8_647] : memref<10x10x80xf32, #tpu.memory_space<vmem>>, vector<8x8x64xf32>
    tpu.vector_store %arg5[%c1_645, %c1_646, %c8_647], %579 {strides = array<i32>} : memref<10x10x80xf32, #tpu.memory_space<vmem>>, vector<8x8x64xf32>,
    %c0_648 = arith.constant 0 : index
    %c0_649 = arith.constant 0 : index
    %c8_650 = arith.constant 8 : index
    %581 = vector.load %arg5[%c0_648, %c0_649, %c8_650] : memref<10x10x80xf32, #tpu.memory_space<vmem>>, vector<10x10x8xf32>
    %c0_651 = arith.constant 0 : index
    %c0_652 = arith.constant 0 : index
    %c64_653 = arith.constant 64 : index
    %582 = vector.load %arg5[%c0_651, %c0_652, %c64_653] : memref<10x10x80xf32, #tpu.memory_space<vmem>>, vector<10x10x8xf32>
    %c0_654 = arith.constant 0 : index
    %c0_655 = arith.constant 0 : index
    %c0_656 = arith.constant 0 : index
    %583 = vector.load %arg5[%c0_654, %c0_655, %c0_656] : memref<10x10x80xf32, #tpu.memory_space<vmem>>, vector<10x10x8xf32>
    tpu.vector_store %arg5[%c0_654, %c0_655, %c0_656], %581 {strides = array<i32>} : memref<10x10x80xf32, #tpu.memory_space<vmem>>, vector<10x10x8xf32>,
    %c0_657 = arith.constant 0 : index
    %c0_658 = arith.constant 0 : index
    %c72_659 = arith.constant 72 : index
    %584 = vector.load %arg5[%c0_657, %c0_658, %c72_659] : memref<10x10x80xf32, #tpu.memory_space<vmem>>, vector<10x10x8xf32>
    tpu.vector_store %arg5[%c0_657, %c0_658, %c72_659], %582 {strides = array<i32>} : memref<10x10x80xf32, #tpu.memory_space<vmem>>, vector<10x10x8xf32>,
    %c0_660 = arith.constant 0 : index
    %c1_661 = arith.constant 1 : index
    %c0_662 = arith.constant 0 : index
    %585 = vector.load %arg5[%c0_660, %c1_661, %c0_662] : memref<10x10x80xf32, #tpu.memory_space<vmem>>, vector<10x1x80xf32>
    %c0_663 = arith.constant 0 : index
    %c8_664 = arith.constant 8 : index
    %c0_665 = arith.constant 0 : index
    %586 = vector.load %arg5[%c0_663, %c8_664, %c0_665] : memref<10x10x80xf32, #tpu.memory_space<vmem>>, vector<10x1x80xf32>
    %c0_666 = arith.constant 0 : index
    %c0_667 = arith.constant 0 : index
    %c0_668 = arith.constant 0 : index
    %587 = vector.load %arg5[%c0_666, %c0_667, %c0_668] : memref<10x10x80xf32, #tpu.memory_space<vmem>>, vector<10x1x80xf32>
    tpu.vector_store %arg5[%c0_666, %c0_667, %c0_668], %585 {strides = array<i32>} : memref<10x10x80xf32, #tpu.memory_space<vmem>>, vector<10x1x80xf32>,
    %c0_669 = arith.constant 0 : index
    %c9_670 = arith.constant 9 : index
    %c0_671 = arith.constant 0 : index
    %588 = vector.load %arg5[%c0_669, %c9_670, %c0_671] : memref<10x10x80xf32, #tpu.memory_space<vmem>>, vector<10x1x80xf32>
    tpu.vector_store %arg5[%c0_669, %c9_670, %c0_671], %586 {strides = array<i32>} : memref<10x10x80xf32, #tpu.memory_space<vmem>>, vector<10x1x80xf32>,
    %c1_672 = arith.constant 1 : index
    %c0_673 = arith.constant 0 : index
    %c0_674 = arith.constant 0 : index
    %589 = vector.load %arg5[%c1_672, %c0_673, %c0_674] : memref<10x10x80xf32, #tpu.memory_space<vmem>>, vector<1x10x80xf32>
    %c8_675 = arith.constant 8 : index
    %c0_676 = arith.constant 0 : index
    %c0_677 = arith.constant 0 : index
    %590 = vector.load %arg5[%c8_675, %c0_676, %c0_677] : memref<10x10x80xf32, #tpu.memory_space<vmem>>, vector<1x10x80xf32>
    %c0_678 = arith.constant 0 : index
    %c0_679 = arith.constant 0 : index
    %c0_680 = arith.constant 0 : index
    %591 = vector.load %arg5[%c0_678, %c0_679, %c0_680] : memref<10x10x80xf32, #tpu.memory_space<vmem>>, vector<1x10x80xf32>
    tpu.vector_store %arg5[%c0_678, %c0_679, %c0_680], %589 {strides = array<i32>} : memref<10x10x80xf32, #tpu.memory_space<vmem>>, vector<1x10x80xf32>,
    %c9_681 = arith.constant 9 : index
    %c0_682 = arith.constant 0 : index
    %c0_683 = arith.constant 0 : index
    %592 = vector.load %arg5[%c9_681, %c0_682, %c0_683] : memref<10x10x80xf32, #tpu.memory_space<vmem>>, vector<1x10x80xf32>
    tpu.vector_store %arg5[%c9_681, %c0_682, %c0_683], %590 {strides = array<i32>} : memref<10x10x80xf32, #tpu.memory_space<vmem>>, vector<1x10x80xf32>,
    %cst_684 = arith.constant 0.000000e+00 : f32
    %593 = vector.broadcast %cst_684 : f32 to vector<64x64xf32>
    %c0_685 = arith.constant 0 : index
    %c0_686 = arith.constant 0 : index
    %c0_687 = arith.constant 0 : index
    %594 = vector.load %arg5[%c0_685, %c0_686, %c0_687] : memref<10x10x80xf32, #tpu.memory_space<vmem>>, vector<8x8x80xf32>
    %595 = vector.shape_cast %594 : vector<8x8x80xf32> to vector<64x80xf32>
    %596 = arith.truncf %595 : vector<64x80xf32> to vector<64x80xbf16>
    %c63 = arith.constant 63 : index
    %c0_688 = arith.constant 0 : index
    %c0_689 = arith.constant 0 : index
    %597 = vector.load %arg2[%c63, %c0_688, %c0_689] : memref<81x80x64xbf16, #tpu.memory_space<vmem>>, vector<1x80x64xbf16>
    %598 = vector.shape_cast %597 : vector<1x80x64xbf16> to vector<80x64xbf16>
    %cst_690 = arith.constant dense<0.000000e+00> : vector<64x64xf32>
    %599 = tpu.matmul %596, %598, %cst_690 {dimension_numbers = #tpu.dot_dimension_numbers<[1], [0], [0], [1], [0, 0, 1, 1], [], []>} : vector<64x80xbf16>, vector<80x64xbf16>, vector<64x64xf32> -> vector<64x64xf32>
    %600 = arith.addf %593, %599 : vector<64x64xf32>
    %c0_691 = arith.constant 0 : index
    %c1_692 = arith.constant 1 : index
    %c0_693 = arith.constant 0 : index
    %601 = vector.load %arg5[%c0_691, %c1_692, %c0_693] : memref<10x10x80xf32, #tpu.memory_space<vmem>>, vector<8x8x80xf32>
    %602 = vector.shape_cast %601 : vector<8x8x80xf32> to vector<64x80xf32>
    %603 = arith.truncf %602 : vector<64x80xf32> to vector<64x80xbf16>
    %c64_694 = arith.constant 64 : index
    %c0_695 = arith.constant 0 : index
    %c0_696 = arith.constant 0 : index
    %604 = vector.load %arg2[%c64_694, %c0_695, %c0_696] : memref<81x80x64xbf16, #tpu.memory_space<vmem>>, vector<1x80x64xbf16>
    %605 = vector.shape_cast %604 : vector<1x80x64xbf16> to vector<80x64xbf16>
    %cst_697 = arith.constant dense<0.000000e+00> : vector<64x64xf32>
    %606 = tpu.matmul %603, %605, %cst_697 {dimension_numbers = #tpu.dot_dimension_numbers<[1], [0], [0], [1], [0, 0, 1, 1], [], []>} : vector<64x80xbf16>, vector<80x64xbf16>, vector<64x64xf32> -> vector<64x64xf32>
    %607 = arith.addf %600, %606 : vector<64x64xf32>
    %c0_698 = arith.constant 0 : index
    %c2_699 = arith.constant 2 : index
    %c0_700 = arith.constant 0 : index
    %608 = vector.load %arg5[%c0_698, %c2_699, %c0_700] : memref<10x10x80xf32, #tpu.memory_space<vmem>>, vector<8x8x80xf32>
    %609 = vector.shape_cast %608 : vector<8x8x80xf32> to vector<64x80xf32>
    %610 = arith.truncf %609 : vector<64x80xf32> to vector<64x80xbf16>
    %c65 = arith.constant 65 : index
    %c0_701 = arith.constant 0 : index
    %c0_702 = arith.constant 0 : index
    %611 = vector.load %arg2[%c65, %c0_701, %c0_702] : memref<81x80x64xbf16, #tpu.memory_space<vmem>>, vector<1x80x64xbf16>
    %612 = vector.shape_cast %611 : vector<1x80x64xbf16> to vector<80x64xbf16>
    %cst_703 = arith.constant dense<0.000000e+00> : vector<64x64xf32>
    %613 = tpu.matmul %610, %612, %cst_703 {dimension_numbers = #tpu.dot_dimension_numbers<[1], [0], [0], [1], [0, 0, 1, 1], [], []>} : vector<64x80xbf16>, vector<80x64xbf16>, vector<64x64xf32> -> vector<64x64xf32>
    %614 = arith.addf %607, %613 : vector<64x64xf32>
    %c1_704 = arith.constant 1 : index
    %c0_705 = arith.constant 0 : index
    %c0_706 = arith.constant 0 : index
    %615 = vector.load %arg5[%c1_704, %c0_705, %c0_706] : memref<10x10x80xf32, #tpu.memory_space<vmem>>, vector<8x8x80xf32>
    %616 = vector.shape_cast %615 : vector<8x8x80xf32> to vector<64x80xf32>
    %617 = arith.truncf %616 : vector<64x80xf32> to vector<64x80xbf16>
    %c66 = arith.constant 66 : index
    %c0_707 = arith.constant 0 : index
    %c0_708 = arith.constant 0 : index
    %618 = vector.load %arg2[%c66, %c0_707, %c0_708] : memref<81x80x64xbf16, #tpu.memory_space<vmem>>, vector<1x80x64xbf16>
    %619 = vector.shape_cast %618 : vector<1x80x64xbf16> to vector<80x64xbf16>
    %cst_709 = arith.constant dense<0.000000e+00> : vector<64x64xf32>
    %620 = tpu.matmul %617, %619, %cst_709 {dimension_numbers = #tpu.dot_dimension_numbers<[1], [0], [0], [1], [0, 0, 1, 1], [], []>} : vector<64x80xbf16>, vector<80x64xbf16>, vector<64x64xf32> -> vector<64x64xf32>
    %621 = arith.addf %614, %620 : vector<64x64xf32>
    %c1_710 = arith.constant 1 : index
    %c1_711 = arith.constant 1 : index
    %c0_712 = arith.constant 0 : index
    %622 = vector.load %arg5[%c1_710, %c1_711, %c0_712] : memref<10x10x80xf32, #tpu.memory_space<vmem>>, vector<8x8x80xf32>
    %623 = vector.shape_cast %622 : vector<8x8x80xf32> to vector<64x80xf32>
    %624 = arith.truncf %623 : vector<64x80xf32> to vector<64x80xbf16>
    %c67 = arith.constant 67 : index
    %c0_713 = arith.constant 0 : index
    %c0_714 = arith.constant 0 : index
    %625 = vector.load %arg2[%c67, %c0_713, %c0_714] : memref<81x80x64xbf16, #tpu.memory_space<vmem>>, vector<1x80x64xbf16>
    %626 = vector.shape_cast %625 : vector<1x80x64xbf16> to vector<80x64xbf16>
    %cst_715 = arith.constant dense<0.000000e+00> : vector<64x64xf32>
    %627 = tpu.matmul %624, %626, %cst_715 {dimension_numbers = #tpu.dot_dimension_numbers<[1], [0], [0], [1], [0, 0, 1, 1], [], []>} : vector<64x80xbf16>, vector<80x64xbf16>, vector<64x64xf32> -> vector<64x64xf32>
    %628 = arith.addf %621, %627 : vector<64x64xf32>
    %c1_716 = arith.constant 1 : index
    %c2_717 = arith.constant 2 : index
    %c0_718 = arith.constant 0 : index
    %629 = vector.load %arg5[%c1_716, %c2_717, %c0_718] : memref<10x10x80xf32, #tpu.memory_space<vmem>>, vector<8x8x80xf32>
    %630 = vector.shape_cast %629 : vector<8x8x80xf32> to vector<64x80xf32>
    %631 = arith.truncf %630 : vector<64x80xf32> to vector<64x80xbf16>
    %c68 = arith.constant 68 : index
    %c0_719 = arith.constant 0 : index
    %c0_720 = arith.constant 0 : index
    %632 = vector.load %arg2[%c68, %c0_719, %c0_720] : memref<81x80x64xbf16, #tpu.memory_space<vmem>>, vector<1x80x64xbf16>
    %633 = vector.shape_cast %632 : vector<1x80x64xbf16> to vector<80x64xbf16>
    %cst_721 = arith.constant dense<0.000000e+00> : vector<64x64xf32>
    %634 = tpu.matmul %631, %633, %cst_721 {dimension_numbers = #tpu.dot_dimension_numbers<[1], [0], [0], [1], [0, 0, 1, 1], [], []>} : vector<64x80xbf16>, vector<80x64xbf16>, vector<64x64xf32> -> vector<64x64xf32>
    %635 = arith.addf %628, %634 : vector<64x64xf32>
    %c2_722 = arith.constant 2 : index
    %c0_723 = arith.constant 0 : index
    %c0_724 = arith.constant 0 : index
    %636 = vector.load %arg5[%c2_722, %c0_723, %c0_724] : memref<10x10x80xf32, #tpu.memory_space<vmem>>, vector<8x8x80xf32>
    %637 = vector.shape_cast %636 : vector<8x8x80xf32> to vector<64x80xf32>
    %638 = arith.truncf %637 : vector<64x80xf32> to vector<64x80xbf16>
    %c69 = arith.constant 69 : index
    %c0_725 = arith.constant 0 : index
    %c0_726 = arith.constant 0 : index
    %639 = vector.load %arg2[%c69, %c0_725, %c0_726] : memref<81x80x64xbf16, #tpu.memory_space<vmem>>, vector<1x80x64xbf16>
    %640 = vector.shape_cast %639 : vector<1x80x64xbf16> to vector<80x64xbf16>
    %cst_727 = arith.constant dense<0.000000e+00> : vector<64x64xf32>
    %641 = tpu.matmul %638, %640, %cst_727 {dimension_numbers = #tpu.dot_dimension_numbers<[1], [0], [0], [1], [0, 0, 1, 1], [], []>} : vector<64x80xbf16>, vector<80x64xbf16>, vector<64x64xf32> -> vector<64x64xf32>
    %642 = arith.addf %635, %641 : vector<64x64xf32>
    %c2_728 = arith.constant 2 : index
    %c1_729 = arith.constant 1 : index
    %c0_730 = arith.constant 0 : index
    %643 = vector.load %arg5[%c2_728, %c1_729, %c0_730] : memref<10x10x80xf32, #tpu.memory_space<vmem>>, vector<8x8x80xf32>
    %644 = vector.shape_cast %643 : vector<8x8x80xf32> to vector<64x80xf32>
    %645 = arith.truncf %644 : vector<64x80xf32> to vector<64x80xbf16>
    %c70 = arith.constant 70 : index
    %c0_731 = arith.constant 0 : index
    %c0_732 = arith.constant 0 : index
    %646 = vector.load %arg2[%c70, %c0_731, %c0_732] : memref<81x80x64xbf16, #tpu.memory_space<vmem>>, vector<1x80x64xbf16>
    %647 = vector.shape_cast %646 : vector<1x80x64xbf16> to vector<80x64xbf16>
    %cst_733 = arith.constant dense<0.000000e+00> : vector<64x64xf32>
    %648 = tpu.matmul %645, %647, %cst_733 {dimension_numbers = #tpu.dot_dimension_numbers<[1], [0], [0], [1], [0, 0, 1, 1], [], []>} : vector<64x80xbf16>, vector<80x64xbf16>, vector<64x64xf32> -> vector<64x64xf32>
    %649 = arith.addf %642, %648 : vector<64x64xf32>
    %c2_734 = arith.constant 2 : index
    %c2_735 = arith.constant 2 : index
    %c0_736 = arith.constant 0 : index
    %650 = vector.load %arg5[%c2_734, %c2_735, %c0_736] : memref<10x10x80xf32, #tpu.memory_space<vmem>>, vector<8x8x80xf32>
    %651 = vector.shape_cast %650 : vector<8x8x80xf32> to vector<64x80xf32>
    %652 = arith.truncf %651 : vector<64x80xf32> to vector<64x80xbf16>
    %c71 = arith.constant 71 : index
    %c0_737 = arith.constant 0 : index
    %c0_738 = arith.constant 0 : index
    %653 = vector.load %arg2[%c71, %c0_737, %c0_738] : memref<81x80x64xbf16, #tpu.memory_space<vmem>>, vector<1x80x64xbf16>
    %654 = vector.shape_cast %653 : vector<1x80x64xbf16> to vector<80x64xbf16>
    %cst_739 = arith.constant dense<0.000000e+00> : vector<64x64xf32>
    %655 = tpu.matmul %652, %654, %cst_739 {dimension_numbers = #tpu.dot_dimension_numbers<[1], [0], [0], [1], [0, 0, 1, 1], [], []>} : vector<64x80xbf16>, vector<80x64xbf16>, vector<64x64xf32> -> vector<64x64xf32>
    %656 = arith.addf %649, %655 : vector<64x64xf32>
    %cst_740 = arith.constant 0.000000e+00 : f32
    %657 = vector.broadcast %cst_740 : f32 to vector<64x64xf32>
    %658 = arith.cmpf oge, %656, %657 : vector<64x64xf32>
    %cst_741 = arith.constant 0.00999999977 : f32
    %659 = vector.broadcast %cst_741 : f32 to vector<64x64xf32>
    %660 = arith.mulf %656, %659 : vector<64x64xf32>
    %661 = arith.select %658, %656, %660 : vector<64x64xi1>, vector<64x64xf32>
    %662 = vector.shape_cast %661 : vector<64x64xf32> to vector<8x8x64xf32>
    %c1_742 = arith.constant 1 : index
    %c1_743 = arith.constant 1 : index
    %c8_744 = arith.constant 8 : index
    %663 = vector.load %arg5[%c1_742, %c1_743, %c8_744] : memref<10x10x80xf32, #tpu.memory_space<vmem>>, vector<8x8x64xf32>
    tpu.vector_store %arg5[%c1_742, %c1_743, %c8_744], %662 {strides = array<i32>} : memref<10x10x80xf32, #tpu.memory_space<vmem>>, vector<8x8x64xf32>,
    %c0_745 = arith.constant 0 : index
    %c0_746 = arith.constant 0 : index
    %c8_747 = arith.constant 8 : index
    %664 = vector.load %arg5[%c0_745, %c0_746, %c8_747] : memref<10x10x80xf32, #tpu.memory_space<vmem>>, vector<10x10x8xf32>
    %c0_748 = arith.constant 0 : index
    %c0_749 = arith.constant 0 : index
    %c64_750 = arith.constant 64 : index
    %665 = vector.load %arg5[%c0_748, %c0_749, %c64_750] : memref<10x10x80xf32, #tpu.memory_space<vmem>>, vector<10x10x8xf32>
    %c0_751 = arith.constant 0 : index
    %c0_752 = arith.constant 0 : index
    %c0_753 = arith.constant 0 : index
    %666 = vector.load %arg5[%c0_751, %c0_752, %c0_753] : memref<10x10x80xf32, #tpu.memory_space<vmem>>, vector<10x10x8xf32>
    tpu.vector_store %arg5[%c0_751, %c0_752, %c0_753], %664 {strides = array<i32>} : memref<10x10x80xf32, #tpu.memory_space<vmem>>, vector<10x10x8xf32>,
    %c0_754 = arith.constant 0 : index
    %c0_755 = arith.constant 0 : index
    %c72_756 = arith.constant 72 : index
    %667 = vector.load %arg5[%c0_754, %c0_755, %c72_756] : memref<10x10x80xf32, #tpu.memory_space<vmem>>, vector<10x10x8xf32>
    tpu.vector_store %arg5[%c0_754, %c0_755, %c72_756], %665 {strides = array<i32>} : memref<10x10x80xf32, #tpu.memory_space<vmem>>, vector<10x10x8xf32>,
    %c0_757 = arith.constant 0 : index
    %c1_758 = arith.constant 1 : index
    %c0_759 = arith.constant 0 : index
    %668 = vector.load %arg5[%c0_757, %c1_758, %c0_759] : memref<10x10x80xf32, #tpu.memory_space<vmem>>, vector<10x1x80xf32>
    %c0_760 = arith.constant 0 : index
    %c8_761 = arith.constant 8 : index
    %c0_762 = arith.constant 0 : index
    %669 = vector.load %arg5[%c0_760, %c8_761, %c0_762] : memref<10x10x80xf32, #tpu.memory_space<vmem>>, vector<10x1x80xf32>
    %c0_763 = arith.constant 0 : index
    %c0_764 = arith.constant 0 : index
    %c0_765 = arith.constant 0 : index
    %670 = vector.load %arg5[%c0_763, %c0_764, %c0_765] : memref<10x10x80xf32, #tpu.memory_space<vmem>>, vector<10x1x80xf32>
    tpu.vector_store %arg5[%c0_763, %c0_764, %c0_765], %668 {strides = array<i32>} : memref<10x10x80xf32, #tpu.memory_space<vmem>>, vector<10x1x80xf32>,
    %c0_766 = arith.constant 0 : index
    %c9_767 = arith.constant 9 : index
    %c0_768 = arith.constant 0 : index
    %671 = vector.load %arg5[%c0_766, %c9_767, %c0_768] : memref<10x10x80xf32, #tpu.memory_space<vmem>>, vector<10x1x80xf32>
    tpu.vector_store %arg5[%c0_766, %c9_767, %c0_768], %669 {strides = array<i32>} : memref<10x10x80xf32, #tpu.memory_space<vmem>>, vector<10x1x80xf32>,
    %c1_769 = arith.constant 1 : index
    %c0_770 = arith.constant 0 : index
    %c0_771 = arith.constant 0 : index
    %672 = vector.load %arg5[%c1_769, %c0_770, %c0_771] : memref<10x10x80xf32, #tpu.memory_space<vmem>>, vector<1x10x80xf32>
    %c8_772 = arith.constant 8 : index
    %c0_773 = arith.constant 0 : index
    %c0_774 = arith.constant 0 : index
    %673 = vector.load %arg5[%c8_772, %c0_773, %c0_774] : memref<10x10x80xf32, #tpu.memory_space<vmem>>, vector<1x10x80xf32>
    %c0_775 = arith.constant 0 : index
    %c0_776 = arith.constant 0 : index
    %c0_777 = arith.constant 0 : index
    %674 = vector.load %arg5[%c0_775, %c0_776, %c0_777] : memref<10x10x80xf32, #tpu.memory_space<vmem>>, vector<1x10x80xf32>
    tpu.vector_store %arg5[%c0_775, %c0_776, %c0_777], %672 {strides = array<i32>} : memref<10x10x80xf32, #tpu.memory_space<vmem>>, vector<1x10x80xf32>,
    %c9_778 = arith.constant 9 : index
    %c0_779 = arith.constant 0 : index
    %c0_780 = arith.constant 0 : index
    %675 = vector.load %arg5[%c9_778, %c0_779, %c0_780] : memref<10x10x80xf32, #tpu.memory_space<vmem>>, vector<1x10x80xf32>
    tpu.vector_store %arg5[%c9_778, %c0_779, %c0_780], %673 {strides = array<i32>} : memref<10x10x80xf32, #tpu.memory_space<vmem>>, vector<1x10x80xf32>,
    %cst_781 = arith.constant 0.000000e+00 : f32
    %676 = vector.broadcast %cst_781 : f32 to vector<64x64xf32>
    %c0_782 = arith.constant 0 : index
    %c0_783 = arith.constant 0 : index
    %c0_784 = arith.constant 0 : index
    %677 = vector.load %arg5[%c0_782, %c0_783, %c0_784] : memref<10x10x80xf32, #tpu.memory_space<vmem>>, vector<8x8x80xf32>
    %678 = vector.shape_cast %677 : vector<8x8x80xf32> to vector<64x80xf32>
    %679 = arith.truncf %678 : vector<64x80xf32> to vector<64x80xbf16>
    %c72_785 = arith.constant 72 : index
    %c0_786 = arith.constant 0 : index
    %c0_787 = arith.constant 0 : index
    %680 = vector.load %arg2[%c72_785, %c0_786, %c0_787] : memref<81x80x64xbf16, #tpu.memory_space<vmem>>, vector<1x80x64xbf16>
    %681 = vector.shape_cast %680 : vector<1x80x64xbf16> to vector<80x64xbf16>
    %cst_788 = arith.constant dense<0.000000e+00> : vector<64x64xf32>
    %682 = tpu.matmul %679, %681, %cst_788 {dimension_numbers = #tpu.dot_dimension_numbers<[1], [0], [0], [1], [0, 0, 1, 1], [], []>} : vector<64x80xbf16>, vector<80x64xbf16>, vector<64x64xf32> -> vector<64x64xf32>
    %683 = arith.addf %676, %682 : vector<64x64xf32>
    %c0_789 = arith.constant 0 : index
    %c1_790 = arith.constant 1 : index
    %c0_791 = arith.constant 0 : index
    %684 = vector.load %arg5[%c0_789, %c1_790, %c0_791] : memref<10x10x80xf32, #tpu.memory_space<vmem>>, vector<8x8x80xf32>
    %685 = vector.shape_cast %684 : vector<8x8x80xf32> to vector<64x80xf32>
    %686 = arith.truncf %685 : vector<64x80xf32> to vector<64x80xbf16>
    %c73 = arith.constant 73 : index
    %c0_792 = arith.constant 0 : index
    %c0_793 = arith.constant 0 : index
    %687 = vector.load %arg2[%c73, %c0_792, %c0_793] : memref<81x80x64xbf16, #tpu.memory_space<vmem>>, vector<1x80x64xbf16>
    %688 = vector.shape_cast %687 : vector<1x80x64xbf16> to vector<80x64xbf16>
    %cst_794 = arith.constant dense<0.000000e+00> : vector<64x64xf32>
    %689 = tpu.matmul %686, %688, %cst_794 {dimension_numbers = #tpu.dot_dimension_numbers<[1], [0], [0], [1], [0, 0, 1, 1], [], []>} : vector<64x80xbf16>, vector<80x64xbf16>, vector<64x64xf32> -> vector<64x64xf32>
    %690 = arith.addf %683, %689 : vector<64x64xf32>
    %c0_795 = arith.constant 0 : index
    %c2_796 = arith.constant 2 : index
    %c0_797 = arith.constant 0 : index
    %691 = vector.load %arg5[%c0_795, %c2_796, %c0_797] : memref<10x10x80xf32, #tpu.memory_space<vmem>>, vector<8x8x80xf32>
    %692 = vector.shape_cast %691 : vector<8x8x80xf32> to vector<64x80xf32>
    %693 = arith.truncf %692 : vector<64x80xf32> to vector<64x80xbf16>
    %c74 = arith.constant 74 : index
    %c0_798 = arith.constant 0 : index
    %c0_799 = arith.constant 0 : index
    %694 = vector.load %arg2[%c74, %c0_798, %c0_799] : memref<81x80x64xbf16, #tpu.memory_space<vmem>>, vector<1x80x64xbf16>
    %695 = vector.shape_cast %694 : vector<1x80x64xbf16> to vector<80x64xbf16>
    %cst_800 = arith.constant dense<0.000000e+00> : vector<64x64xf32>
    %696 = tpu.matmul %693, %695, %cst_800 {dimension_numbers = #tpu.dot_dimension_numbers<[1], [0], [0], [1], [0, 0, 1, 1], [], []>} : vector<64x80xbf16>, vector<80x64xbf16>, vector<64x64xf32> -> vector<64x64xf32>
    %697 = arith.addf %690, %696 : vector<64x64xf32>
    %c1_801 = arith.constant 1 : index
    %c0_802 = arith.constant 0 : index
    %c0_803 = arith.constant 0 : index
    %698 = vector.load %arg5[%c1_801, %c0_802, %c0_803] : memref<10x10x80xf32, #tpu.memory_space<vmem>>, vector<8x8x80xf32>
    %699 = vector.shape_cast %698 : vector<8x8x80xf32> to vector<64x80xf32>
    %700 = arith.truncf %699 : vector<64x80xf32> to vector<64x80xbf16>
    %c75 = arith.constant 75 : index
    %c0_804 = arith.constant 0 : index
    %c0_805 = arith.constant 0 : index
    %701 = vector.load %arg2[%c75, %c0_804, %c0_805] : memref<81x80x64xbf16, #tpu.memory_space<vmem>>, vector<1x80x64xbf16>
    %702 = vector.shape_cast %701 : vector<1x80x64xbf16> to vector<80x64xbf16>
    %cst_806 = arith.constant dense<0.000000e+00> : vector<64x64xf32>
    %703 = tpu.matmul %700, %702, %cst_806 {dimension_numbers = #tpu.dot_dimension_numbers<[1], [0], [0], [1], [0, 0, 1, 1], [], []>} : vector<64x80xbf16>, vector<80x64xbf16>, vector<64x64xf32> -> vector<64x64xf32>
    %704 = arith.addf %697, %703 : vector<64x64xf32>
    %c1_807 = arith.constant 1 : index
    %c1_808 = arith.constant 1 : index
    %c0_809 = arith.constant 0 : index
    %705 = vector.load %arg5[%c1_807, %c1_808, %c0_809] : memref<10x10x80xf32, #tpu.memory_space<vmem>>, vector<8x8x80xf32>
    %706 = vector.shape_cast %705 : vector<8x8x80xf32> to vector<64x80xf32>
    %707 = arith.truncf %706 : vector<64x80xf32> to vector<64x80xbf16>
    %c76 = arith.constant 76 : index
    %c0_810 = arith.constant 0 : index
    %c0_811 = arith.constant 0 : index
    %708 = vector.load %arg2[%c76, %c0_810, %c0_811] : memref<81x80x64xbf16, #tpu.memory_space<vmem>>, vector<1x80x64xbf16>
    %709 = vector.shape_cast %708 : vector<1x80x64xbf16> to vector<80x64xbf16>
    %cst_812 = arith.constant dense<0.000000e+00> : vector<64x64xf32>
    %710 = tpu.matmul %707, %709, %cst_812 {dimension_numbers = #tpu.dot_dimension_numbers<[1], [0], [0], [1], [0, 0, 1, 1], [], []>} : vector<64x80xbf16>, vector<80x64xbf16>, vector<64x64xf32> -> vector<64x64xf32>
    %711 = arith.addf %704, %710 : vector<64x64xf32>
    %c1_813 = arith.constant 1 : index
    %c2_814 = arith.constant 2 : index
    %c0_815 = arith.constant 0 : index
    %712 = vector.load %arg5[%c1_813, %c2_814, %c0_815] : memref<10x10x80xf32, #tpu.memory_space<vmem>>, vector<8x8x80xf32>
    %713 = vector.shape_cast %712 : vector<8x8x80xf32> to vector<64x80xf32>
    %714 = arith.truncf %713 : vector<64x80xf32> to vector<64x80xbf16>
    %c77 = arith.constant 77 : index
    %c0_816 = arith.constant 0 : index
    %c0_817 = arith.constant 0 : index
    %715 = vector.load %arg2[%c77, %c0_816, %c0_817] : memref<81x80x64xbf16, #tpu.memory_space<vmem>>, vector<1x80x64xbf16>
    %716 = vector.shape_cast %715 : vector<1x80x64xbf16> to vector<80x64xbf16>
    %cst_818 = arith.constant dense<0.000000e+00> : vector<64x64xf32>
    %717 = tpu.matmul %714, %716, %cst_818 {dimension_numbers = #tpu.dot_dimension_numbers<[1], [0], [0], [1], [0, 0, 1, 1], [], []>} : vector<64x80xbf16>, vector<80x64xbf16>, vector<64x64xf32> -> vector<64x64xf32>
    %718 = arith.addf %711, %717 : vector<64x64xf32>
    %c2_819 = arith.constant 2 : index
    %c0_820 = arith.constant 0 : index
    %c0_821 = arith.constant 0 : index
    %719 = vector.load %arg5[%c2_819, %c0_820, %c0_821] : memref<10x10x80xf32, #tpu.memory_space<vmem>>, vector<8x8x80xf32>
    %720 = vector.shape_cast %719 : vector<8x8x80xf32> to vector<64x80xf32>
    %721 = arith.truncf %720 : vector<64x80xf32> to vector<64x80xbf16>
    %c78 = arith.constant 78 : index
    %c0_822 = arith.constant 0 : index
    %c0_823 = arith.constant 0 : index
    %722 = vector.load %arg2[%c78, %c0_822, %c0_823] : memref<81x80x64xbf16, #tpu.memory_space<vmem>>, vector<1x80x64xbf16>
    %723 = vector.shape_cast %722 : vector<1x80x64xbf16> to vector<80x64xbf16>
    %cst_824 = arith.constant dense<0.000000e+00> : vector<64x64xf32>
    %724 = tpu.matmul %721, %723, %cst_824 {dimension_numbers = #tpu.dot_dimension_numbers<[1], [0], [0], [1], [0, 0, 1, 1], [], []>} : vector<64x80xbf16>, vector<80x64xbf16>, vector<64x64xf32> -> vector<64x64xf32>
    %725 = arith.addf %718, %724 : vector<64x64xf32>
    %c2_825 = arith.constant 2 : index
    %c1_826 = arith.constant 1 : index
    %c0_827 = arith.constant 0 : index
    %726 = vector.load %arg5[%c2_825, %c1_826, %c0_827] : memref<10x10x80xf32, #tpu.memory_space<vmem>>, vector<8x8x80xf32>
    %727 = vector.shape_cast %726 : vector<8x8x80xf32> to vector<64x80xf32>
    %728 = arith.truncf %727 : vector<64x80xf32> to vector<64x80xbf16>
    %c79 = arith.constant 79 : index
    %c0_828 = arith.constant 0 : index
    %c0_829 = arith.constant 0 : index
    %729 = vector.load %arg2[%c79, %c0_828, %c0_829] : memref<81x80x64xbf16, #tpu.memory_space<vmem>>, vector<1x80x64xbf16>
    %730 = vector.shape_cast %729 : vector<1x80x64xbf16> to vector<80x64xbf16>
    %cst_830 = arith.constant dense<0.000000e+00> : vector<64x64xf32>
    %731 = tpu.matmul %728, %730, %cst_830 {dimension_numbers = #tpu.dot_dimension_numbers<[1], [0], [0], [1], [0, 0, 1, 1], [], []>} : vector<64x80xbf16>, vector<80x64xbf16>, vector<64x64xf32> -> vector<64x64xf32>
    %732 = arith.addf %725, %731 : vector<64x64xf32>
    %c2_831 = arith.constant 2 : index
    %c2_832 = arith.constant 2 : index
    %c0_833 = arith.constant 0 : index
    %733 = vector.load %arg5[%c2_831, %c2_832, %c0_833] : memref<10x10x80xf32, #tpu.memory_space<vmem>>, vector<8x8x80xf32>
    %734 = vector.shape_cast %733 : vector<8x8x80xf32> to vector<64x80xf32>
    %735 = arith.truncf %734 : vector<64x80xf32> to vector<64x80xbf16>
    %c80 = arith.constant 80 : index
    %c0_834 = arith.constant 0 : index
    %c0_835 = arith.constant 0 : index
    %736 = vector.load %arg2[%c80, %c0_834, %c0_835] : memref<81x80x64xbf16, #tpu.memory_space<vmem>>, vector<1x80x64xbf16>
    %737 = vector.shape_cast %736 : vector<1x80x64xbf16> to vector<80x64xbf16>
    %cst_836 = arith.constant dense<0.000000e+00> : vector<64x64xf32>
    %738 = tpu.matmul %735, %737, %cst_836 {dimension_numbers = #tpu.dot_dimension_numbers<[1], [0], [0], [1], [0, 0, 1, 1], [], []>} : vector<64x80xbf16>, vector<80x64xbf16>, vector<64x64xf32> -> vector<64x64xf32>
    %739 = arith.addf %732, %738 : vector<64x64xf32>
    %740 = arith.addf %739, %578 : vector<64x64xf32>
    %cst_837 = arith.constant 0.000000e+00 : f32
    %741 = vector.broadcast %cst_837 : f32 to vector<64x64xf32>
    %742 = arith.cmpf oge, %740, %741 : vector<64x64xf32>
    %cst_838 = arith.constant 0.00999999977 : f32
    %743 = vector.broadcast %cst_838 : f32 to vector<64x64xf32>
    %744 = arith.mulf %740, %743 : vector<64x64xf32>
    %745 = arith.select %742, %740, %744 : vector<64x64xi1>, vector<64x64xf32>
    %746 = arith.truncf %745 : vector<64x64xf32> to vector<64x64xbf16>
    %c1_839 = arith.constant 1 : index
    %c0_840 = arith.constant 0 : index
    %c0_841 = arith.constant 0 : index
    %747 = vector.load %arg3[%c1_839, %c0_840, %c0_841] : memref<2x64x64xbf16, #tpu.memory_space<vmem>>, vector<1x64x64xbf16>
    %748 = vector.shape_cast %747 : vector<1x64x64xbf16> to vector<64x64xbf16>
    %cst_842 = arith.constant dense<0.000000e+00> : vector<64x64xf32>
    %749 = tpu.matmul %746, %748, %cst_842 {dimension_numbers = #tpu.dot_dimension_numbers<[1], [0], [0], [1], [0, 0, 1, 1], [], []>} : vector<64x64xbf16>, vector<64x64xbf16>, vector<64x64xf32> -> vector<64x64xf32>
    %c0_843 = arith.constant 0 : index
    %c0_844 = arith.constant 0 : index
    %c0_845 = arith.constant 0 : index
    %750 = vector.load %arg4[%c0_843, %c0_844, %c0_845] : memref<1x64x64xf32, #tpu.memory_space<vmem>>, vector<1x64x64xf32>
    %751 = vector.shape_cast %750 : vector<1x64x64xf32> to vector<64x64xf32>
    %752 = vector.shape_cast %749 : vector<64x64xf32> to vector<1x64x64xf32>
    tpu.vector_store %arg4[%c0_843, %c0_844, %c0_845], %752 {strides = array<i32>} : memref<1x64x64xf32, #tpu.memory_space<vmem>>, vector<1x64x64xf32>,
    return
  }
  func.func @transform_0(%arg0: i32) -> (i32, i32, i32, i32) {
    %c0_i32 = arith.constant 0 : i32
    %c0_i32_0 = arith.constant 0 : i32
    %c0_i32_1 = arith.constant 0 : i32
    %c0_i32_2 = arith.constant 0 : i32
    return %arg0, %c0_i32, %c0_i32_0, %c0_i32_1 : i32, i32, i32, i32
  }
  func.func @transform_1(%arg0: i32) -> (i32, i32, i32) {
    %c0_i32 = arith.constant 0 : i32
    %c0_i32_0 = arith.constant 0 : i32
    %c0_i32_1 = arith.constant 0 : i32
    %c0_i32_2 = arith.constant 0 : i32
    return %c0_i32, %c0_i32_0, %c0_i32_1 : i32, i32, i32
  }
  func.func @transform_2(%arg0: i32) -> (i32, i32, i32) {
    %c0_i32 = arith.constant 0 : i32
    %c0_i32_0 = arith.constant 0 : i32
    %c0_i32_1 = arith.constant 0 : i32
    %c0_i32_2 = arith.constant 0 : i32
    return %c0_i32, %c0_i32_0, %c0_i32_1 : i32, i32, i32
  }
  func.func @transform_3(%arg0: i32) -> (i32, i32, i32) {
    %c0_i32 = arith.constant 0 : i32
    %c0_i32_0 = arith.constant 0 : i32
    %c0_i32_1 = arith.constant 0 : i32
    return %arg0, %c0_i32, %c0_i32_0 : i32, i32, i32
  }
}

</mosaic_0001>

<bundles_post_ra>
// kernel: tpu_custom_call.1
= control target key start
LH: loop header
LB: loop body
LE: loop exit
PB: predicated region body
PF: predicated region fallthrough
CT: control target
= control target key end

     0   :  { %8 = vsyncpa [#allocation4], 0  ;;  %s23120_s0 = inlined_call_operand.vmem [shape: f32[2,8,8,64], index: 0, kind: input, shape index: {}]   ;;  %s23121_s1 = inlined_call_operand.vmem [shape: bf16[81,80,64], index: 1, kind: input, shape index: {}]   ;;  %s23122_s2 = inlined_call_operand.vmem [shape: bf16[2,64,64], index: 2, kind: input, shape index: {}]   ;;  %s23123_s3 = inlined_call_operand.hbm [shape: f32[2,64,64], index: 3, kind: output, shape index: {}]  }
   0x1   :  { %10 = vsyncpa [#allocation4 + $0x1], 0  ;;  %s19087_s12 = smov 0   ;;  %s19089_s13 = smov 0  }
   0x2   :  { %s19091_s14 = smov 0   ;;  %s19093_s15 = smov 0  }
   0x3 LB: > { %s19108_s16 = sadd.s32 4294967295, %s19060_s15   ;;  %s14147_s17 = sadd.s32 4294967294, %s19060_s15   ;;  %s19060_s15 = sphi %s19093_s15, %s23129_s15   ;;  %s19056_s14 = sphi %s19091_s14, %s23128_s14   ;;  %s19052_s13 = sphi %s19089_s13, %s23127_s13   ;;  %s19048_s12 = sphi %s19087_s12, %s23126_s12  }
   0x4   : > { %s19112_s18 = sadd.s32 1, %s19060_s15   ;;  %s91_s19 = sadd.s32 1, %s19056_s14 }
   0x5   : > { %s88_s20 = ssub.s32 %s19060_s15, %s19112_s18  ;;  %p101_p0 = scmp.ne.s32.totalorder %s19056_s14, %s19052_s13 }
   0x6   : > { %p89_p1 = scmp.eq.s32.totalorder %s88_s20, 0  ;;  %p102_p2 = scmp.eq.s32.totalorder %s19108_s16, 1 }
   0x7   : > { %p107_p3 = scmp.ne.s32.totalorder %s19052_s13, %s19048_s12  ;;  %p108_p4 = scmp.eq.s32.totalorder %s14147_s17, 1 }
   0x8   : > { %s19123_s21 = scalar_select %p89_p1, %s19056_s14, %s91_s19  }
   0x9   : > { %p19125_p5 = por %p102_p2, %p101_p0  ;;  %p19129_p6 = por %p108_p4, %p107_p3 }
   0xa   : > { %p14150_p7 = scmp.ge.s32.totalorder %s19060_s15, 1  ;;  %p140_p8 = scmp.lt.s32.totalorder %s19060_s15, 3 }
   0xc   : > { %p141_p9 = pnand %p14150_p7, %p140_p8 }
   0xd   : > { %p164_p10 = scmp.lt.s32.totalorder (!%p141_p9), %s19108_s16, 1  ;;  %v18584_v0 = vld [vmem:[%s23121_s1 + $0x28] sm:$0xff] (!%p141_p9)   ;;  %vm170_vm0 = vcmask (!%p141_p9), 654336   ;;  %v18585_v1 = vld [vmem:[%s23121_s1 + $0x30] sm:$0xff] (!%p141_p9)   ;;  %vm172_vm1 = vcmask (!%p141_p9), 648192   ;;  %v19062_v2 = vmov (!%p141_p9), 0.0  }
   0xe   : > { %144 = sbr.rel (%p141_p9) target bundleno = 6079 (0x17bf), region = 32  ;;  %16459 = vmatprep.subr.bf16.mxu0 (!%p141_p9), %v18584_v0  ;;  %178 = vst.msk [vmem:[#allocation2 + $0x30] sm:$0xff] (!%p141_p9), %vm170_vm0, %v19062_v2  ;;  %171 = vst.msk [vmem:[#allocation2] sm:$0xff] (!%p141_p9), %vm170_vm0, %v19062_v2  ;;  %v18586_v3 = vld [vmem:[%s23121_s1 + $0x38] sm:$0xff] (!%p141_p9)   ;;  %s19063_s8 = smov (!%p141_p9), 8   ;;  %v18587_v8 = vld [vmem:[%s23121_s1 + $0x40] sm:$0xff] (!%p141_p9)  }
   0xf   : > { %179 = vst.msk [vmem:[#allocation2 + $0x38] sm:$0x3] (!%p141_p9), %vm172_vm1, %v19062_v2  ;;  %173 = vst.msk [vmem:[#allocation2 + $0x8] sm:$0x3] (!%p141_p9), %vm172_vm1, %v19062_v2  ;;  %16460 = vmatpush3.bf16.msra.mxu0 (!%p141_p9), %v18584_v0  ;;  %v18588_v11 = vld [vmem:[%s23121_s1 + $0x48] sm:$0xff] (!%p141_p9)   ;;  %v18589_v14 = vld [vmem:[%s23121_s1] sm:$0xff] (!%p141_p9)  }
  0x10   : > { %174 = vst.msk [vmem:[#allocation2 + $0x10] sm:$0xff] (!%p141_p9), %vm170_vm0, %v19062_v2  ;;  %176 = vst.msk [vmem:[#allocation2 + $0x20] sm:$0xff] (!%p141_p9), %vm170_vm0, %v19062_v2  ;;  %16461 = vmatprep.subr.bf16.mxu0 (!%p141_p9), %v18585_v1  ;;  %vm233_vm2 = vcmask (!%p141_p9), 588864   ;;  %v18590_v29 = vld [vmem:[%s23121_s1 + $0x8] sm:$0xff] (!%p141_p9)   ;;  %v18591_v33 = vld [vmem:[%s23121_s1 + $0x10] sm:$0xff] (!%p141_p9)   ;;  %s19064_s7 = smov (!%p141_p9), 120  }
  0x11   : > { %175 = vst.msk [vmem:[#allocation2 + $0x18] sm:$0x3] (!%p141_p9), %vm172_vm1, %v19062_v2  ;;  %177 = vst.msk [vmem:[#allocation2 + $0x28] sm:$0x3] (!%p141_p9), %vm172_vm1, %v19062_v2  ;;  %v18592_v39 = vld [vmem:[%s23121_s1 + $0x18] sm:$0xff] (!%p141_p9)   ;;  %v18593_v41 = vld [vmem:[%s23121_s1 + $0x20] sm:$0xff] (!%p141_p9)  }
  0x12   : > { %180 = vst.msk [vmem:[#allocation2 + $0x40] sm:$0xff] (!%p141_p9), %vm170_vm0, %v19062_v2  ;;  %182 = vst.msk [vmem:[#allocation2 + $0x50] sm:$0xff] (!%p141_p9), %vm170_vm0, %v19062_v2  ;;  %v18594_v42 = vld [vmem:[%s23121_s1 + $0x50] sm:$0xff] (!%p141_p9)   ;;  %v18595_v47 = vld [vmem:[%s23121_s1 + $0x58] sm:$0xff] (!%p141_p9)   ;;  %vm1632_vm11 = vcmask (!%p141_p9), 64512   ;;  %vm1634_vm12 = vcmask (!%p141_p9), 58368  }
  0x13   : > { %181 = vst.msk [vmem:[#allocation2 + $0x48] sm:$0x3] (!%p141_p9), %vm172_vm1, %v19062_v2  ;;  %183 = vst.msk [vmem:[#allocation2 + $0x58] sm:$0x3] (!%p141_p9), %vm172_vm1, %v19062_v2  ;;  %16462 = vmatpush3.bf16.msra.mxu0 (!%p141_p9), %v18585_v1  ;;  %v18596_v50 = vld [vmem:[%s23121_s1 + $0x60] sm:$0xff] (!%p141_p9)   ;;  %v18597_v54 = vld [vmem:[%s23121_s1 + $0x68] sm:$0xff] (!%p141_p9)  }
  0x14   : > { %184 = vst.msk [vmem:[#allocation2 + $0x60] sm:$0xff] (!%p141_p9), %vm170_vm0, %v19062_v2  ;;  %186 = vst.msk [vmem:[#allocation2 + $0x70] sm:$0xff] (!%p141_p9), %vm170_vm0, %v19062_v2  ;;  %16463 = vmatprep.subr.bf16.mxu0 (!%p141_p9), %v18586_v3  ;;  %v18598_v58 = vld [vmem:[%s23121_s1 + $0x70] sm:$0xff] (!%p141_p9)   ;;  %v18599_v59 = vld [vmem:[%s23121_s1 + $0x78] sm:$0xff] (!%p141_p9)   ;;  %vm1714_vm13 = vcmask (!%p141_p9), 654912   ;;  %vm1716_vm14 = vcmask (!%p141_p9), 648768  }
  0x15   : > { %s165_s26 = scalar_select %p164_p10, %s19108_s16, 1  ;;  %185 = vst.msk [vmem:[#allocation2 + $0x68] sm:$0x3] %vm172_vm1, %v19062_v2  ;;  %187 = vst.msk [vmem:[#allocation2 + $0x78] sm:$0x3] %vm172_vm1, %v19062_v2  ;;  %v242_v34 = vld [vmem:[#allocation2] sm:$0xff] }
  0x16   : > { %188 = vst.msk [vmem:[#allocation2 + $0x80] sm:$0xff] %vm170_vm0, %v19062_v2  ;;  %190 = vst.msk [vmem:[#allocation2 + $0x90] sm:$0xff] %vm170_vm0, %v19062_v2  ;;  %v264_v19 = vld [vmem:[#allocation2 + $0x1] sm:$0xff]  ;;  %vm1756_vm15 = vcmask 647168   ;;  %s161_s28 = sand.u32 1, %s19052_s13   ;;  %s15713_s4 = sshll.u32 %s19108_s16, 10 }
  0x17   : > { %189 = vst.msk [vmem:[#allocation2 + $0x88] sm:$0x3] %vm172_vm1, %v19062_v2  ;;  %191 = vst.msk [vmem:[#allocation2 + $0x98] sm:$0x3] %vm172_vm1, %v19062_v2  ;;  %s15712_s29 = sshll.u32 %s165_s26, 6  ;;  %16464 = vmatpush3.bf16.msra.mxu0 %v18586_v3  ;;  %v501_v53 = vld [vmem:[#allocation2 + $0x2] sm:$0xff]  ;;  %s23071_s10 = scalar_lea.hbm %s23123_s3, %s15713_s4 }
  0x18   : > { %s168_s5 = scalar_lea.vmem %s23120_s0, %s15712_s29  ;;  %16465 = vmatprep.subr.bf16.mxu0 %v18587_v8  ;;  %v18600_v0 = vld [vmem:[%s23121_s1 + $0x80] sm:$0xff]   ;;  %v18601_v3 = vld [vmem:[%s23121_s1 + $0x88] sm:$0xff]   ;;  %s14151_s29 = sshll.u32 %s161_s28, 6 }
  0x19   : > { %v194_v4 = vld [vmem:[%s168_s5 + $0x10] sm:$0xff]  ;;  %v192_v5 = vld [vmem:[%s168_s5] sm:$0xff]  ;;  %v195_v6 = vld [vmem:[%s168_s5 + $0x18] sm:$0xff]  ;;  %s163_s30 = scalar_lea.vmem [#allocation3], %s14151_s29  ;;  %s23078_s16 = scalar_lea.sflag [#allocation4], %s161_s28 }
  0x1a   : > { %212 = vrot.lane.b32.xlu1 %v194_v4, %s19063_s8  ;;  %208 = vrot.lane.b32.xlu0 %v192_v5, %s19063_s8  ;;  %v193_v7 = vld [vmem:[%s168_s5 + $0x8] sm:$0xff]  ;;  %v196_v9 = vld [vmem:[%s168_s5 + $0x20] sm:$0xff]  ;;  %s19065_s17 = smov [#allocation3]  }
  0x1b   : > { %v197_v10 = vld [vmem:[%s168_s5 + $0x28] sm:$0xff]  ;;  %v198_v12 = vld [vmem:[%s168_s5 + $0x30] sm:$0xff]  ;;  %v199_v13 = vld [vmem:[%s168_s5 + $0x38] sm:$0xff]  ;;  %16466 = vmatpush3.bf16.msra.mxu0 %v18587_v8  ;;  %s14085_s5 = sshll.u32 %s163_s30, 4  ;;  %s19002_s19 = sshll.u32 %s19065_s17, 4  ;;  %s23074_s5 = int_to_ptr.vmem [resolvable:$true] %s14085_s5  ;;  %s19003_s19 = int_to_ptr.vmem [resolvable:$false] %s19002_s19 }
  0x1c   : > { %16467 = vmatprep.subr.bf16.mxu0 %v18588_v11  ;;  %s18998_s11 = scalar_lea.vmem %s23074_s5, 1024  ;;  %s19004_s20 = scalar_lea.vmem %s19003_s19, 2048 }
  0x1d   : > { %p18999_p11 = scmp.ne.s32.totalorder %s23074_s5, %s18998_s11  ;;  %p19005_p0 = scmp.lt.s32.totalorder %s23074_s5, %s19003_s19 }
  0x1e   : > { %214 = vrot.lane.b32.xlu1 %v195_v6, %s19063_s8  ;;  %210 = vrot.lane.b32.xlu0 %v193_v7, %s19063_s8  ;;  %v18602_v6 = vld [vmem:[%s23121_s1 + $0x90] sm:$0xff]   ;;  %p19006_p1 = scmp.lt.s32.totalorder %s19004_s20, %s18998_s11 }
  0x1f   : > { %16468 = vmatpush3.bf16.msra.mxu0 %v18588_v11  ;;  %v18605_v11 = vld [vmem:[%s23121_s1 + $0xa8] sm:$0xff]   ;;  %p19000_p12 = pnand %p18999_p11, %p19125_p5 }
  0x20   : > { %16477 = vmatprep.subr.bf16.mxu0 %v18589_v14  ;;  %p19007_p2 = por %p19006_p1, %p19005_p0 }
  0x21   : > { %p19001_p13 = pneg %p19000_p12 }
  0x22   : > { %216 = vrot.lane.b32.xlu0 %v196_v9, %s19063_s8  ;;  %218 = vrot.lane.b32.xlu1 %v197_v10, %s19063_s8  ;;  %v18603_v9 = vld [vmem:[%s23121_s1 + $0x98] sm:$0xff]   ;;  %v18604_v10 = vld [vmem:[%s23121_s1 + $0xa0] sm:$0xff]  }
  0x23   : > { %p19008_p3 = pnand %p19007_p2, %p19001_p13 }
  0x26   : > { %220 = vrot.lane.b32.xlu0 %v198_v12, %s19063_s8  ;;  %222 = vrot.lane.b32.xlu1 %v199_v13, %s19063_s8 }
  0x8c   : > { %v213_v15 = vpop.permute.xlu1 %212  ;;  %v209_v16 = vpop.permute.xlu0 %208 }
  0x8d   : > { %236 = vst.msk [vmem:[#allocation2 + $0x31] sm:$0xff] %vm233_vm2, %v213_v15  ;;  %234 = vst.msk [vmem:[#allocation2 + $0x11] sm:$0xff] %vm233_vm2, %v209_v16  ;;  %v18607_v16 = vld [vmem:[%s23121_s1 + $0xb8] sm:$0xff]  }
  0x90   : > { %v215_v17 = vpop.permute.xlu1 %214  ;;  %v211_v18 = vpop.permute.xlu0 %210 }
  0x91   : > { %237 = vst.msk [vmem:[#allocation2 + $0x41] sm:$0xff] %vm233_vm2, %v215_v17  ;;  %235 = vst.msk [vmem:[#allocation2 + $0x21] sm:$0xff] %vm233_vm2, %v211_v18 }
  0x94   : > { %v217_v20 = vpop.permute.xlu0 %216  ;;  %v19190_v21 = vld [vmem:[#allocation2 + $0x11] sm:$0xff]  ;;  %v219_v22 = vpop.permute.xlu1 %218 }
  0x95   : > { %238 = vst.msk [vmem:[#allocation2 + $0x51] sm:$0xff] %vm233_vm2, %v217_v20  ;;  %v272_v23 = vpack.c.bf16 %v19190_v21, %v264_v19  ;;  %239 = vst.msk [vmem:[#allocation2 + $0x61] sm:$0xff] %vm233_vm2, %v219_v22  ;;  %v19195_v24 = vld [vmem:[#allocation2 + $0x31] sm:$0xff]  ;;  %v18608_v19 = vld [vmem:[%s23121_s1 + $0xc0] sm:$0xff]  }
  0x96   : > { %v19222_v35 = vld [vmem:[#allocation2 + $0x10] sm:$0xff]  ;;  %v18609_v20 = vld [vmem:[%s23121_s1 + $0xc8] sm:$0xff]  }
  0x97   : > { %16469 = vmatprep.mubr.msk.bf16.mxu0 %vm170_vm0, %v272_v23  ;;  %v250_v40 = vpack.c.bf16 %v19222_v35, %v242_v34  ;;  %v19247_v44 = vld [vmem:[#allocation2 + $0x30] sm:$0xff] }
  0x98   : > { %v221_v25 = vpop.permute.xlu0 %220  ;;  %v19198_v26 = vld [vmem:[#allocation2 + $0x21] sm:$0xff]  ;;  %v223_v27 = vpop.permute.xlu1 %222  ;;  %v19272_v52 = vld [vmem:[#allocation2 + $0x12] sm:$0xff] }
  0x99   : > { %240 = vst.msk [vmem:[#allocation2 + $0x71] sm:$0xff] %vm233_vm2, %v221_v25  ;;  %v19203_v28 = vpack.c.bf16 %v19195_v24, %v19198_v26  ;;  %241 = vst.msk [vmem:[#allocation2 + $0x81] sm:$0xff] %vm233_vm2, %v223_v27  ;;  %v19211_v30 = vld [vmem:[#allocation2 + $0x41] sm:$0xff]  ;;  %v509_v57 = vpack.c.bf16 %v19272_v52, %v501_v53  ;;  %v19290_v60 = vld [vmem:[#allocation2 + $0x32] sm:$0xff]  ;;  %v785_v18 = vpack.c.bf16 %v19198_v26, %v19190_v21 }
  0x9a   : > { %v244_v43 = vld [vmem:[#allocation2 + $0x20] sm:$0xff]  ;;  %v18610_v21 = vld [vmem:[%s23121_s1 + $0xd0] sm:$0xff]   ;;  %v786_v22 = vpack.c.bf16 %v19211_v30, %v19195_v24  ;;  %v18611_v25 = vld [vmem:[%s23121_s1 + $0xd8] sm:$0xff]  }
  0x9b   : > { %16470 = vmatmul.mubr.msk.bf16.vlgmr.msra.gmra.mrb[0].mxu0 %vm170_vm0, %v19203_v28  ;;  %v19251_v46 = vld [vmem:[#allocation2 + $0x40] sm:$0xff]  ;;  %v19257_v48 = vpack.c.bf16 %v19247_v44, %v244_v43  ;;  %v647_v8 = vpack.c.bf16 %v244_v43, %v19222_v35 }
  0x9c   : > { %16478 = vmatpush3.bf16.msra.mxu0 %v18589_v14  ;;  %v19213_v31 = vld [vmem:[#allocation2 + $0x51] sm:$0xff]  ;;  %v19224_v36 = vld [vmem:[#allocation2 + $0x61] sm:$0xff]  ;;  %v648_v12 = vpack.c.bf16 %v19251_v46, %v19247_v44 }
  0x9d   : > { %16479 = vmatprep.subr.bf16.mxu0 %v18590_v29  ;;  %v19217_v32 = vpack.c.bf16 %v19213_v31, %v19211_v30  ;;  %v19249_v45 = vld [vmem:[#allocation2 + $0x50] sm:$0xff]  ;;  %v248_v55 = vld [vmem:[#allocation2 + $0x60] sm:$0xff]  ;;  %v787_v23 = vpack.c.bf16 %v19224_v36, %v19213_v31  ;;  %v18613_v30 = vld [vmem:[%s23121_s1 + $0xe8] sm:$0xff]  }
  0x9e   : > { %v19261_v49 = vpack.c.bf16 %v19249_v45, %v19251_v46  ;;  %v19292_v61 = vld [vmem:[#allocation2 + $0x22] sm:$0xff]  ;;  %v19294_v62 = vld [vmem:[#allocation2 + $0x52] sm:$0xff]  ;;  %v649_v13 = vpack.c.bf16 %v248_v55, %v19249_v45 }
  0x9f   : > { %16473 = vmatprep.mubr.msk.bf16.mxu0 %vm170_vm0, %v19217_v32  ;;  %v19296_v63 = vld [vmem:[#allocation2 + $0x42] sm:$0xff]  ;;  %v19303_v1 = vpack.c.bf16 %v19290_v60, %v19292_v61  ;;  %v18606_v14 = vld [vmem:[%s23121_s1 + $0xb0] sm:$0xff]  }
  0xa0   : > { %16480 = vmatpush3.bf16.msra.mxu0 %v18590_v29  ;;  %v19228_v37 = vld [vmem:[#allocation2 + $0x71] sm:$0xff]  ;;  %v19307_v2 = vpack.c.bf16 %v19294_v62, %v19296_v63  ;;  %v19318_v5 = vld [vmem:[#allocation2 + $0x62] sm:$0xff]  ;;  %v923_v29 = vpack.c.bf16 %v19292_v61, %v19272_v52  ;;  %v924_v34 = vpack.c.bf16 %v19296_v63, %v19290_v60 }
  0xa1   : > { %16481 = vmatprep.subr.bf16.mxu0 %v18591_v33  ;;  %v19232_v38 = vpack.c.bf16 %v19228_v37, %v19224_v36  ;;  %v19270_v51 = vld [vmem:[#allocation2 + $0x70] sm:$0xff]  ;;  %v19348_v15 = vld [vmem:[#allocation2 + $0x80] sm:$0xff]  ;;  %v925_v35 = vpack.c.bf16 %v19318_v5, %v19294_v62  ;;  %v18621_v44 = vld [vmem:[%s23121_s1 + $0x128] sm:$0xff]  }
  0xa2   : > { %v19278_v56 = vpack.c.bf16 %v19270_v51, %v248_v55  ;;  %v19314_v4 = vld [vmem:[#allocation2 + $0x72] sm:$0xff]  ;;  %v650_v17 = vpack.c.bf16 %v19348_v15, %v19270_v51  ;;  %v19377_v26 = vld [vmem:[#allocation2 + $0x81] sm:$0xff] }
  0xa3   : > { %16474 = vmatmul.mubr.msk.bf16.gmra.mrb[4].mxu0 %vm170_vm0, %v19232_v38  ;;  %v19325_v7 = vpack.c.bf16 %v19314_v4, %v19318_v5  ;;  %v18612_v24 = vld [vmem:[%s23121_s1 + $0xe0] sm:$0xff]   ;;  %v788_v27 = vpack.c.bf16 %v19377_v26, %v19228_v37  ;;  %v18614_v31 = vld [vmem:[%s23121_s1 + $0xf0] sm:$0xff]   ;;  %v18627_v52 = vld [vmem:[%s23121_s1 + $0x158] sm:$0xff]  }
  0xa4   : > { %16482 = vmatpush3.bf16.msra.mxu0 %v18591_v33  ;;  %16487 = vmatprep.mubr.msk.bf16.mxu0 %vm170_vm0, %v250_v40  ;;  %v18615_v33 = vld [vmem:[%s23121_s1 + $0xf8] sm:$0xff]   ;;  %v18616_v36 = vld [vmem:[%s23121_s1 + $0x100] sm:$0xff]   ;;  %v19432_v45 = vld [vmem:[#allocation2 + $0x90] sm:$0xff] }
  0xa5   : > { %16483 = vmatprep.subr.bf16.mxu0 %v18592_v39  ;;  %v19405_v37 = vld [vmem:[#allocation2 + $0x82] sm:$0xff]  ;;  %v18622_v46 = vld [vmem:[%s23121_s1 + $0x130] sm:$0xff]  }
  0xa6   : > { %v926_v40 = vpack.c.bf16 %v19405_v37, %v19314_v4  ;;  %v18620_v43 = vld [vmem:[%s23121_s1 + $0x120] sm:$0xff]   ;;  %v1199_v51 = vld [vmem:[#allocation2 + $0x91] sm:$0xff] }
  0xa7   : > { %v1203_v53 = vpack.c.bf16 %v1199_v51, %v19377_v26 }
  0xa8   : > { %16484 = vmatpush3.bf16.msra.mxu0 %v18592_v39  ;;  %v18617_v39 = vld [vmem:[%s23121_s1 + $0x108] sm:$0xff]  }
  0xa9   : > { %16485 = vmatprep.subr.bf16.mxu0 %v18593_v41 }
  0xac   : > { %16486 = vmatpush3.bf16.msra.mxu0 %v18593_v41  ;;  %v18618_v41 = vld [vmem:[%s23121_s1 + $0x110] sm:$0xff]  }
  0xad   : > { %16495 = vmatprep.subr.bf16.mxu0 %v18594_v42 }
  0xaf   : > { %16488 = vmatmul.mubr.msk.bf16.vlgmr.msra.gmra.mrb[0].mxu0 %vm170_vm0, %v19257_v48 }
  0xb0   : > { %16491 = vmatprep.mubr.msk.bf16.mxu0 %vm170_vm0, %v19261_v49  ;;  %16496 = vmatpush3.bf16.msra.mxu0 %v18594_v42  ;;  %v18619_v42 = vld [vmem:[%s23121_s1 + $0x118] sm:$0xff]  }
  0xb1   : > { %16497 = vmatprep.subr.bf16.mxu0 %v18595_v47 }
  0xb4   : > { %16498 = vmatpush3.bf16.msra.mxu0 %v18595_v47  ;;  %v1065_v47 = vpack.c.bf16 %v19432_v45, %v19348_v15 }
  0xb5   : > { %16499 = vmatprep.subr.bf16.mxu0 %v18596_v50 }
  0xb7   : > { %16492 = vmatmul.mubr.msk.bf16.gmra.mrb[4].mxu0 %vm170_vm0, %v19278_v56 }
  0xb8   : > { %16500 = vmatpush3.bf16.msra.mxu0 %v18596_v50  ;;  %16505 = vmatprep.mubr.msk.bf16.mxu0 %vm170_vm0, %v509_v57  ;;  %v18625_v50 = vld [vmem:[%s23121_s1 + $0x148] sm:$0xff]  }
  0xb9   : > { %16501 = vmatprep.subr.bf16.mxu0 %v18597_v54 }
  0xbc   : > { %16502 = vmatpush3.bf16.msra.mxu0 %v18597_v54 }
  0xbd   : > { %16503 = vmatprep.subr.bf16.mxu0 %v18598_v58 }
  0xc0   : > { %16504 = vmatpush3.bf16.msra.mxu0 %v18598_v58 }
  0xc1   : > { %16513 = vmatprep.subr.bf16.mxu0 %v18599_v59 }
  0xc3   : > { %16506 = vmatmul.mubr.msk.bf16.vlgmr.msra.gmra.mrb[0].mxu0 %vm170_vm0, %v19303_v1 }
  0xc4   : > { %16509 = vmatprep.mubr.msk.bf16.mxu0 %vm170_vm0, %v19307_v2  ;;  %16514 = vmatpush3.bf16.msra.mxu0 %v18599_v59 }
  0xc5   : > { %16515 = vmatprep.subr.bf16.mxu0 %v18600_v0 }
  0xc8   : > { %16516 = vmatpush3.bf16.msra.mxu0 %v18600_v0 }
  0xc9   : > { %16517 = vmatprep.subr.bf16.mxu0 %v18601_v3 }
  0xcb   : > { %16510 = vmatmul.mubr.msk.bf16.gmra.mrb[4].mxu0 %vm170_vm0, %v19325_v7 }
  0xcc   : > { %16518 = vmatpush3.bf16.msra.mxu0 %v18601_v3  ;;  %16523 = vmatprep.mubr.msk.bf16.mxu0 %vm170_vm0, %v647_v8  ;;  %v1533_v8 = vld [vmem:[#allocation2 + $0x8] sm:$0x3] }
  0xcd   : > { %16519 = vmatprep.subr.bf16.mxu0 %v18602_v6 }
  0xd0   : > { %16520 = vmatpush3.bf16.msra.mxu0 %v18602_v6 }
  0xd1   : > { %16521 = vmatprep.subr.bf16.mxu0 %v18603_v9 }
  0xd4   : > { %16522 = vmatpush3.bf16.msra.mxu0 %v18603_v9  ;;  %v18997_v9 = vld [vmem:[#allocation2] sm:$0xff] }
  0xd5   : > { %16531 = vmatprep.subr.bf16.mxu0 %v18604_v10 }
  0xd7   : > { %16524 = vmatmul.mubr.msk.bf16.vlgmr.msra.gmra.mrb[0].mxu0 %vm170_vm0, %v648_v12 }
  0xd8   : > { %16527 = vmatprep.mubr.msk.bf16.mxu0 %vm170_vm0, %v649_v13  ;;  %16532 = vmatpush3.bf16.msra.mxu0 %v18604_v10 }
  0xd9   : > { %16533 = vmatprep.subr.bf16.mxu0 %v18605_v11 }
  0xdc   : > { %16534 = vmatpush3.bf16.msra.mxu0 %v18605_v11 }
  0xdd   : > { %16535 = vmatprep.subr.bf16.mxu0 %v18606_v14 }
  0xdf   : > { %16528 = vmatmul.mubr.msk.bf16.gmra.mrb[4].mxu0 %vm170_vm0, %v650_v17 }
  0xe0   : > { %16536 = vmatpush3.bf16.msra.mxu0 %v18606_v14  ;;  %16541 = vmatprep.mubr.msk.bf16.mxu0 %vm170_vm0, %v785_v18 }
  0xe1   : > { %16537 = vmatprep.subr.bf16.mxu0 %v18607_v16 }
  0xe4   : > { %16538 = vmatpush3.bf16.msra.mxu0 %v18607_v16 }
  0xe5   : > { %16539 = vmatprep.subr.bf16.mxu0 %v18608_v19 }
  0xe8   : > { %16540 = vmatpush3.bf16.msra.mxu0 %v18608_v19 }
  0xe9   : > { %16549 = vmatprep.subr.bf16.mxu0 %v18609_v20 }
  0xeb   : > { %16542 = vmatmul.mubr.msk.bf16.vlgmr.msra.gmra.mrb[0].mxu0 %vm170_vm0, %v786_v22 }
  0xec   : > { %16545 = vmatprep.mubr.msk.bf16.mxu0 %vm170_vm0, %v787_v23  ;;  %16550 = vmatpush3.bf16.msra.mxu0 %v18609_v20 }
  0xed   : > { %16551 = vmatprep.subr.bf16.mxu0 %v18610_v21 }
  0xf0   : > { %16552 = vmatpush3.bf16.msra.mxu0 %v18610_v21 }
  0xf1   : > { %16553 = vmatprep.subr.bf16.mxu0 %v18611_v25 }
  0xf3   : > { %16546 = vmatmul.mubr.msk.bf16.gmra.mrb[4].mxu0 %vm170_vm0, %v788_v27  ;;  %v18629_v27 = vld [vmem:[%s23121_s1 + $0x190] sm:$0xff]  }
  0xf4   : > { %16554 = vmatpush3.bf16.msra.mxu0 %v18611_v25  ;;  %16559 = vmatprep.mubr.msk.bf16.mxu0 %vm170_vm0, %v923_v29  ;;  %v18630_v29 = vld [vmem:[%s23121_s1 + $0x208] sm:$0xff]  }
  0xf5   : > { %16555 = vmatprep.subr.bf16.mxu0 %v18612_v24  ;;  %16693 = vmatprep.subr.bf16.mxu1 %v18630_v29 }
  0xf6   : > { %16694 = vmatpush3.bf16.msra.mxu1 %v18630_v29 }
  0xf8   : > { %16556 = vmatpush3.bf16.msra.mxu0 %v18612_v24 }
  0xf9   : > { %16557 = vmatprep.subr.bf16.mxu0 %v18613_v30 }
  0xfc   : > { %16558 = vmatpush3.bf16.msra.mxu0 %v18613_v30 }
  0xfd   : > { %16567 = vmatprep.subr.bf16.mxu0 %v18614_v31 }
  0xff   : > { %16560 = vmatmul.mubr.msk.bf16.vlgmr.msra.gmra.mrb[0].mxu0 %vm170_vm0, %v924_v34 }
 0x100   : > { %16563 = vmatprep.mubr.msk.bf16.mxu0 %vm170_vm0, %v925_v35  ;;  %16568 = vmatpush3.bf16.msra.mxu0 %v18614_v31  ;;  %v18631_v35 = vld [vmem:[%s23121_s1 + $0x198] sm:$0xff]  }
 0x101   : > { %16569 = vmatprep.subr.bf16.mxu0 %v18615_v33 }
 0x104   : > { %16570 = vmatpush3.bf16.msra.mxu0 %v18615_v33 }
 0x105   : > { %16571 = vmatprep.subr.bf16.mxu0 %v18616_v36 }
 0x107   : > { %16564 = vmatmul.mubr.msk.bf16.gmra.mrb[4].mxu0 %vm170_vm0, %v926_v40  ;;  %v18633_v40 = vld [vmem:[%s23121_s1 + $0x1a0] sm:$0xff]  }
 0x108   : > { %16572 = vmatpush3.bf16.msra.mxu0 %v18616_v36  ;;  %16577 = vmatprep.mubr.msk.bf16.mxu0 %vm170_vm0, %v19257_v48  ;;  %v18623_v48 = vld [vmem:[%s23121_s1 + $0x138] sm:$0xff]   ;;  %v18632_v36 = vld [vmem:[%s23121_s1 + $0x210] sm:$0xff]  }
 0x109   : > { %16573 = vmatprep.subr.bf16.mxu0 %v18617_v39  ;;  %16695 = vmatprep.subr.bf16.mxu1 %v18632_v36 }
 0x10a   : > { %16696 = vmatpush3.bf16.msra.mxu1 %v18632_v36 }
 0x10c   : > { %16574 = vmatpush3.bf16.msra.mxu0 %v18617_v39 }
 0x10d   : > { %16575 = vmatprep.subr.bf16.mxu0 %v18618_v41 }
 0x110   : > { %16576 = vmatpush3.bf16.msra.mxu0 %v18618_v41  ;;  %v18634_v41 = vld [vmem:[%s23121_s1 + $0x218] sm:$0xff]  }
 0x111   : > { %16585 = vmatprep.subr.bf16.mxu0 %v18619_v42  ;;  %16697 = vmatprep.subr.bf16.mxu1 %v18634_v41 }
 0x112   : > { %16698 = vmatpush3.bf16.msra.mxu1 %v18634_v41 }
 0x113   : > { %16578 = vmatmul.mubr.msk.bf16.vlgmr.msra.gmra.mrb[0].mxu0 %vm170_vm0, %v19261_v49  ;;  %v18624_v49 = vld [vmem:[%s23121_s1 + $0x140] sm:$0xff]  }
 0x114   : > { %16581 = vmatprep.mubr.msk.bf16.mxu0 %vm170_vm0, %v19278_v56  ;;  %16586 = vmatpush3.bf16.msra.mxu0 %v18619_v42 }
 0x115   : > { %16587 = vmatprep.subr.bf16.mxu0 %v18620_v43 }
 0x118   : > { %16588 = vmatpush3.bf16.msra.mxu0 %v18620_v43 }
 0x119   : > { %16589 = vmatprep.subr.bf16.mxu0 %v18621_v44 }
 0x11b   : > { %16582 = vmatmul.mubr.msk.bf16.gmra.mrb[4].mxu0 %vm170_vm0, %v1065_v47 }
 0x11c   : > { %16590 = vmatpush3.bf16.msra.mxu0 %v18621_v44  ;;  %16595 = vmatprep.mubr.msk.bf16.mxu0 %vm170_vm0, %v19203_v28  ;;  %v18626_v28 = vld [vmem:[%s23121_s1 + $0x150] sm:$0xff]   ;;  %v18635_v44 = vld [vmem:[%s23121_s1 + $0x1a8] sm:$0xff]  }
 0x11d   : > { %16591 = vmatprep.subr.bf16.mxu0 %v18622_v46 }
 0x120   : > { %16592 = vmatpush3.bf16.msra.mxu0 %v18622_v46  ;;  %v18636_v46 = vld [vmem:[%s23121_s1 + $0x220] sm:$0xff]  }
 0x121   : > { %16593 = vmatprep.subr.bf16.mxu0 %v18623_v48  ;;  %16699 = vmatprep.subr.bf16.mxu1 %v18636_v46 }
 0x122   : > { %16700 = vmatpush3.bf16.msra.mxu1 %v18636_v46  ;;  %v18640_v46 = vld [vmem:[%s23121_s1 + $0x170] sm:$0xff]  }
 0x124   : > { %16594 = vmatpush3.bf16.msra.mxu0 %v18623_v48 }
 0x125   : > { %16603 = vmatprep.subr.bf16.mxu0 %v18624_v49 }
 0x127   : > { %16596 = vmatmul.mubr.msk.bf16.vlgmr.msra.gmra.mrb[0].mxu0 %vm170_vm0, %v19217_v32  ;;  %v18628_v32 = vld [vmem:[%s23121_s1 + $0x160] sm:$0xff]  }
 0x128   : > { %16599 = vmatprep.mubr.msk.bf16.mxu0 %vm170_vm0, %v19232_v38  ;;  %16604 = vmatpush3.bf16.msra.mxu0 %v18624_v49  ;;  %v1337_v38 = vld [vmem:[#allocation2 + $0x92] sm:$0xff] }
 0x129   : > { %16605 = vmatprep.subr.bf16.mxu0 %v18625_v50  ;;  %v1341_v54 = vpack.c.bf16 %v1337_v38, %v19405_v37  ;;  %v18637_v49 = vld [vmem:[%s23121_s1 + $0x1b0] sm:$0xff]  }
 0x12c   : > { %16606 = vmatpush3.bf16.msra.mxu0 %v18625_v50  ;;  %v18638_v50 = vld [vmem:[%s23121_s1 + $0x228] sm:$0xff]  }
 0x12d   : > { %16607 = vmatprep.subr.bf16.mxu0 %v18626_v28  ;;  %16701 = vmatprep.subr.bf16.mxu1 %v18638_v50 }
 0x12e   : > { %16702 = vmatpush3.bf16.msra.mxu1 %v18638_v50 }
 0x12f   : > { %16600 = vmatmul.mubr.msk.bf16.gmra.mrb[4].mxu0 %vm170_vm0, %v1203_v53 }
 0x130   : > { %16608 = vmatpush3.bf16.msra.mxu0 %v18626_v28  ;;  %16613 = vmatprep.mubr.msk.bf16.mxu0 %vm170_vm0, %v19303_v1 }
 0x131   : > { %16609 = vmatprep.subr.bf16.mxu0 %v18627_v52 }
 0x134   : > { %16610 = vmatpush3.bf16.msra.mxu0 %v18627_v52 }
 0x135   : > { %16611 = vmatprep.subr.bf16.mxu0 %v18628_v32 }
 0x138   : > { %16612 = vmatpush3.bf16.msra.mxu0 %v18628_v32 }
 0x139   : > { %16621 = vmatprep.subr.bf16.mxu0 %v18629_v27 }
 0x13b   : > { %16614 = vmatmul.mubr.msk.bf16.vlgmr.msra.gmra.mrb[0].mxu0 %vm170_vm0, %v19307_v2 }
 0x13c   : > { %16617 = vmatprep.mubr.msk.bf16.mxu0 %vm170_vm0, %v19325_v7  ;;  %16622 = vmatpush3.bf16.msra.mxu0 %v18629_v27 }
 0x13d   : > { %16623 = vmatprep.subr.bf16.mxu0 %v18631_v35 }
 0x140   : > { %16624 = vmatpush3.bf16.msra.mxu0 %v18631_v35 }
 0x141   : > { %16625 = vmatprep.subr.bf16.mxu0 %v18633_v40 }
 0x143   : > { %16618 = vmatmul.mubr.msk.bf16.gmra.mrb[4].mxu0 %vm170_vm0, %v1341_v54  ;;  %v19577_v54 = vld [vmem:[%s23121_s1 + $0x168] sm:$0xff]  }
 0x144   : > { %16626 = vmatpush3.bf16.msra.mxu0 %v18633_v40 }
 0x145   : > { %16627 = vmatprep.subr.bf16.mxu0 %v18635_v44 }
 0x148   : > { %16628 = vmatpush3.bf16.msra.mxu0 %v18635_v44 }
 0x149   : > { %16629 = vmatprep.subr.bf16.mxu0 %v18637_v49 }
 0x14c   : > { %16630 = vmatpush3.bf16.msra.mxu0 %v18637_v49 }
 0x14d   : > { %16639 = vmatprep.subr.bf16.mxu0 %v19577_v54 }
 0x20e   : > { %v16615_v55 = vpop.f32.mrb[0].mxu0 }
 0x20f   : > { %vm1470_vm3 = vcmp.ge.f32.partialorder %v16615_v55, 0.0  ;;  %v1478_v56 = vmul.f32 0.01, %v16615_v55  ;;  %v1429_v57 = vpop.f32.mrb[1].mxu0 }
 0x210   : > { %v16616_v58 = vpop.f32.mrb[2].mxu0  ;;  %v1476_v59 = vmul.f32 0.01, %v1429_v57  ;;  %vm1468_vm5 = vcmp.ge.f32.partialorder %v1429_v57, 0.0 }
 0x211   : > { %vm1471_vm4 = vcmp.ge.f32.partialorder %v16616_v58, 0.0  ;;  %v1479_v60 = vmul.f32 0.01, %v16616_v58  ;;  %v1432_v61 = vpop.f32.mrb[3].mxu0  ;;  %v19474_v62 = vsel %vm1470_vm3, %v16615_v55, %v1478_v56  ;;  %v19585_v55 = vld [vmem:[%s23121_s1 + $0x230] sm:$0xff]  }
 0x212   : > { %1504 = vrot.lane.b32.xlu0 %v19474_v62, %s19063_s8  ;;  %v1477_v63 = vmul.f32 0.01, %v1432_v61  ;;  %vm1469_vm6 = vcmp.ge.f32.partialorder %v1432_v61, 0.0  ;;  %v19482_v1 = vsel %vm1468_vm5, %v1429_v57, %v1476_v59  ;;  %16711 = vmatprep.subr.bf16.mxu1 %v19585_v55 }
 0x213   : > { %v19478_v0 = vsel %vm1471_vm4, %v16616_v58, %v1479_v60  ;;  %v1551_v60 = vld [vmem:[#allocation2 + $0x98] sm:$0x3] }
 0x214   : > { %1506 = vrot.lane.b32.xlu1 %v19478_v0, %s19063_s8  ;;  %v19486_v4 = vsel %vm1469_vm6, %v1432_v61, %v1477_v63 }
 0x216   : > { %1500 = vrot.lane.b32.xlu0 %v19482_v1, %s19063_s8  ;;  %v16619_v2 = vpop.f32.mrb[4].mxu0 }
 0x217   : > { %v1445_v3 = vpop.f32.mrb[5].mxu0  ;;  %v1482_v6 = vmul.f32 0.01, %v16619_v2  ;;  %vm1474_vm7 = vcmp.ge.f32.partialorder %v16619_v2, 0.0 }
 0x218   : > { %1502 = vrot.lane.b32.xlu1 %v19486_v4, %s19063_s8  ;;  %v16620_v5 = vpop.f32.mrb[6].mxu0  ;;  %v1480_v11 = vmul.f32 0.01, %v1445_v3  ;;  %vm1472_vm9 = vcmp.ge.f32.partialorder %v1445_v3, 0.0 }
 0x219   : > { %v1448_v7 = vpop.f32.mrb[7].mxu0  ;;  %v1483_v10 = vmul.f32 0.01, %v16620_v5  ;;  %vm1475_vm8 = vcmp.ge.f32.partialorder %v16620_v5, 0.0  ;;  %v19492_v12 = vsel %vm1474_vm7, %v16619_v2, %v1482_v6 }
 0x21a   : > { %1572 = vrot.lane.b32.xlu0 %v18997_v9, %s19064_s7  ;;  %v1481_v13 = vmul.f32 0.01, %v1448_v7  ;;  %vm1473_vm10 = vcmp.ge.f32.partialorder %v1448_v7, 0.0  ;;  %v19500_v15 = vsel %vm1472_vm9, %v1445_v3, %v1480_v11 }
 0x21b   : > { %v19496_v14 = vsel %vm1475_vm8, %v16620_v5, %v1483_v10 }
 0x21c   : > { %1574 = vrot.lane.b32.xlu1 %v1533_v8, %s19064_s7  ;;  %v19504_v16 = vsel %vm1473_vm10, %v1448_v7, %v1481_v13 }
 0x21e   : > { %1512 = vrot.lane.b32.xlu0 %v19492_v12, %s19063_s8 }
 0x220   : > { %1514 = vrot.lane.b32.xlu1 %v19496_v14, %s19063_s8 }
 0x222   : > { %1508 = vrot.lane.b32.xlu0 %v19500_v15, %s19063_s8 }
 0x224   : > { %1510 = vrot.lane.b32.xlu1 %v19504_v16, %s19063_s8 }
 0x226   : > { %1654 = vrot.lane.b32.xlu0 %v18997_v9, %s19063_s8 }
 0x228   : > { %1656 = vrot.lane.b32.xlu1 %v1533_v8, %s19063_s8 }
 0x284   : > { %v1505_v17 = vpop.permute.xlu0 %1504 }
 0x285   : > { %1526 = vst.msk [vmem:[#allocation2 + $0x31] sm:$0xff] %vm233_vm2, %v1505_v17 }
 0x286   : > { %v1507_v18 = vpop.permute.xlu1 %1506 }
 0x287   : > { %1527 = vst.msk [vmem:[#allocation2 + $0x41] sm:$0xff] %vm233_vm2, %v1507_v18 }
 0x288   : > { %v1501_v19 = vpop.permute.xlu0 %1500 }
 0x289   : > { %1524 = vst.msk [vmem:[#allocation2 + $0x11] sm:$0xff] %vm233_vm2, %v1501_v19 }
 0x28a   : > { %v1503_v20 = vpop.permute.xlu1 %1502 }
 0x28b   : > { %1525 = vst.msk [vmem:[#allocation2 + $0x21] sm:$0xff] %vm233_vm2, %v1503_v20 }
 0x28c   : > { %v1573_v21 = vpop.permute.xlu0 %1572  ;;  %v1538_v22 = vld [vmem:[#allocation2 + $0x30] sm:$0xff]  ;;  %v1539_v23 = vld [vmem:[#allocation2 + $0x38] sm:$0x3] }
 0x28d   : > { %1633 = vst.msk [vmem:[#allocation2] sm:$0xff] %vm1632_vm11, %v1573_v21  ;;  %1584 = vrot.lane.b32.xlu0 %v1538_v22, %s19064_s7  ;;  %1586 = vrot.lane.b32.xlu1 %v1539_v23, %s19064_s7 }
 0x28e   : > { %v1575_v25 = vpop.permute.xlu1 %1574  ;;  %v1540_v42 = vld [vmem:[#allocation2 + $0x40] sm:$0xff]  ;;  %v1541_v43 = vld [vmem:[#allocation2 + $0x48] sm:$0x3] }
 0x28f   : > { %1635 = vst.msk [vmem:[#allocation2 + $0x8] sm:$0x3] %vm1634_vm12, %v1575_v25 }
 0x290   : > { %v1513_v26 = vpop.permute.xlu0 %1512  ;;  %v1535_v30 = vld [vmem:[#allocation2 + $0x18] sm:$0x3]  ;;  %v1534_v33 = vld [vmem:[#allocation2 + $0x10] sm:$0xff] }
 0x291   : > { %1530 = vst.msk [vmem:[#allocation2 + $0x71] sm:$0xff] %vm233_vm2, %v1513_v26  ;;  %1666 = vrot.lane.b32.xlu0 %v1538_v22, %s19063_s8  ;;  %1668 = vrot.lane.b32.xlu1 %v1539_v23, %s19063_s8 }
 0x292   : > { %v1515_v24 = vpop.permute.xlu1 %1514  ;;  %v1536_v28 = vld [vmem:[#allocation2 + $0x20] sm:$0xff]  ;;  %v1537_v51 = vld [vmem:[#allocation2 + $0x28] sm:$0x3] }
 0x293   : > { %1531 = vst.msk [vmem:[#allocation2 + $0x81] sm:$0xff] %vm233_vm2, %v1515_v24 }
 0x294   : > { %v1509_v31 = vpop.permute.xlu0 %1508 }
 0x295   : > { %1528 = vst.msk [vmem:[#allocation2 + $0x51] sm:$0xff] %vm233_vm2, %v1509_v31  ;;  %1576 = vrot.lane.b32.xlu0 %v1534_v33, %s19064_s7  ;;  %1578 = vrot.lane.b32.xlu1 %v1535_v30, %s19064_s7 }
 0x296   : > { %v1511_v34 = vpop.permute.xlu1 %1510 }
 0x297   : > { %1529 = vst.msk [vmem:[#allocation2 + $0x61] sm:$0xff] %vm233_vm2, %v1511_v34 }
 0x298   : > { %v1655_v37 = vpop.permute.xlu0 %1654  ;;  %v1546_v52 = vld [vmem:[#allocation2 + $0x70] sm:$0xff]  ;;  %v1547_v53 = vld [vmem:[#allocation2 + $0x78] sm:$0x3] }
 0x299   : > { %1658 = vrot.lane.b32.xlu0 %v1534_v33, %s19063_s8  ;;  %1660 = vrot.lane.b32.xlu1 %v1535_v30, %s19063_s8  ;;  %1715 = vst.msk [vmem:[#allocation2] sm:$0xff] %vm1714_vm13, %v1655_v37 }
 0x29a   : > { %v1657_v39 = vpop.permute.xlu1 %1656  ;;  %v1549_v56 = vld [vmem:[#allocation2 + $0x88] sm:$0x3]  ;;  %v1548_v57 = vld [vmem:[#allocation2 + $0x80] sm:$0xff] }
 0x29b   : > { %1717 = vst.msk [vmem:[#allocation2 + $0x8] sm:$0x3] %vm1716_vm14, %v1657_v39 }
 0x29c   : > { %v1542_v32 = vld [vmem:[#allocation2 + $0x50] sm:$0xff]  ;;  %v1543_v38 = vld [vmem:[#allocation2 + $0x58] sm:$0x3] }
 0x29d   : > { %1588 = vrot.lane.b32.xlu0 %v1540_v42, %s19064_s7  ;;  %1590 = vrot.lane.b32.xlu1 %v1541_v43, %s19064_s7 }
 0x29e   : > { %v1545_v58 = vld [vmem:[#allocation2 + $0x68] sm:$0x3]  ;;  %v1544_v59 = vld [vmem:[#allocation2 + $0x60] sm:$0xff] }
 0x2a0   : > { %v1736_v47 = vld [vmem:[#allocation2 + $0x1] sm:$0x1] }
 0x2a1   : > { %1670 = vrot.lane.b32.xlu0 %v1540_v42, %s19063_s8  ;;  %1672 = vrot.lane.b32.xlu1 %v1541_v43, %s19063_s8  ;;  %1757 = vst.msk [vmem:[#allocation2] sm:$0x1] %vm1756_vm15, %v1736_v47 }
 0x2a2   : > { %v1746_v48 = vld [vmem:[#allocation2 + $0x8] sm:$0x1] }
 0x2a3   : > { %1767 = vst.msk [vmem:[#allocation2 + $0x9] sm:$0x1] %vm1756_vm15, %v1746_v48  ;;  %v18643_v48 = vld [vmem:[%s23121_s1 + $0x238] sm:$0xff]  }
 0x2a5   : > { %1580 = vrot.lane.b32.xlu0 %v1536_v28, %s19064_s7  ;;  %1582 = vrot.lane.b32.xlu1 %v1537_v51, %s19064_s7 }
 0x2a9   : > { %1662 = vrot.lane.b32.xlu0 %v1536_v28, %s19063_s8  ;;  %1664 = vrot.lane.b32.xlu1 %v1537_v51, %s19063_s8  ;;  %v18642_v28 = vld [vmem:[%s23121_s1 + $0x178] sm:$0xff]   ;;  %v18645_v51 = vld [vmem:[%s23121_s1 + $0x240] sm:$0xff]  }
 0x2ad   : > { %1600 = vrot.lane.b32.xlu0 %v1546_v52, %s19064_s7  ;;  %1602 = vrot.lane.b32.xlu1 %v1547_v53, %s19064_s7 }
 0x2b1   : > { %1682 = vrot.lane.b32.xlu0 %v1546_v52, %s19063_s8  ;;  %1684 = vrot.lane.b32.xlu1 %v1547_v53, %s19063_s8 }
 0x2b5   : > { %1592 = vrot.lane.b32.xlu0 %v1542_v32, %s19064_s7  ;;  %1594 = vrot.lane.b32.xlu1 %v1543_v38, %s19064_s7 }
 0x2b9   : > { %1674 = vrot.lane.b32.xlu0 %v1542_v32, %s19063_s8  ;;  %1676 = vrot.lane.b32.xlu1 %v1543_v38, %s19063_s8 }
 0x2bd   : > { %1604 = vrot.lane.b32.xlu0 %v1548_v57, %s19064_s7  ;;  %1606 = vrot.lane.b32.xlu1 %v1549_v56, %s19064_s7 }
 0x2c1   : > { %1598 = vrot.lane.b32.xlu1 %v1545_v58, %s19064_s7  ;;  %1596 = vrot.lane.b32.xlu0 %v1544_v59, %s19064_s7 }
 0x2c5   : > { %1680 = vrot.lane.b32.xlu1 %v1545_v58, %s19063_s8  ;;  %1678 = vrot.lane.b32.xlu0 %v1544_v59, %s19063_s8  ;;  %v18646_v58 = vld [vmem:[%s23121_s1 + $0x188] sm:$0xff]   ;;  %v18649_v59 = vld [vmem:[%s23121_s1 + $0x250] sm:$0xff]  }
 0x2c9   : > { %1688 = vrot.lane.b32.xlu1 %v1549_v56, %s19063_s8  ;;  %1686 = vrot.lane.b32.xlu0 %v1548_v57, %s19063_s8 }
 0x2cd   : > { %1608 = vrot.lane.b32.xlu0 %v19432_v45, %s19064_s7  ;;  %1690 = vrot.lane.b32.xlu1 %v19432_v45, %s19063_s8 }
 0x2d1   : > { %1610 = vrot.lane.b32.xlu0 %v1551_v60, %s19064_s7  ;;  %1692 = vrot.lane.b32.xlu1 %v1551_v60, %s19063_s8 }
 0x2ff   : > { %v1585_v61 = vpop.permute.xlu0 %1584  ;;  %v1587_v63 = vpop.permute.xlu1 %1586 }
 0x300   : > { %1640 = vst.msk [vmem:[#allocation2 + $0x30] sm:$0xff] %vm1632_vm11, %v1585_v61 }
 0x301   : > { %1641 = vst.msk [vmem:[#allocation2 + $0x38] sm:$0x3] %vm1634_vm12, %v1587_v63 }
 0x303   : > { %v1667_v2 = vpop.permute.xlu0 %1666  ;;  %v1669_v3 = vpop.permute.xlu1 %1668 }
 0x304   : > { %1722 = vst.msk [vmem:[#allocation2 + $0x30] sm:$0xff] %vm1714_vm13, %v1667_v2 }
 0x305   : > { %1723 = vst.msk [vmem:[#allocation2 + $0x38] sm:$0x3] %vm1716_vm14, %v1669_v3 }
 0x307   : > { %v1577_v5 = vpop.permute.xlu0 %1576  ;;  %v1579_v6 = vpop.permute.xlu1 %1578 }
 0x308   : > { %1636 = vst.msk [vmem:[#allocation2 + $0x10] sm:$0xff] %vm1632_vm11, %v1577_v5 }
 0x309   : > { %1637 = vst.msk [vmem:[#allocation2 + $0x18] sm:$0x3] %vm1634_vm12, %v1579_v6  ;;  %v18648_v6 = vld [vmem:[%s23121_s1 + $0x1b8] sm:$0xff]  }
 0x30b   : > { %v1739_v45 = vld [vmem:[#allocation2 + $0x31] sm:$0x1]  ;;  %v1659_v8 = vpop.permute.xlu0 %1658  ;;  %v1661_v9 = vpop.permute.xlu1 %1660 }
 0x30c   : > { %v1749_v7 = vld [vmem:[#allocation2 + $0x38] sm:$0x1]  ;;  %1760 = vst.msk [vmem:[#allocation2 + $0x30] sm:$0x1] %vm1756_vm15, %v1739_v45 }
 0x30d   : > { %1770 = vst.msk [vmem:[#allocation2 + $0x39] sm:$0x1] %vm1756_vm15, %v1749_v7  ;;  %v1813_v42 = vld [vmem:[#allocation2 + $0x31] sm:$0xff] }
 0x30e   : > { %1718 = vst.msk [vmem:[#allocation2 + $0x10] sm:$0xff] %vm1714_vm13, %v1659_v8  ;;  %v19690_v45 = vld [vmem:[%s23121_s1 + $0x258] sm:$0xff]  }
 0x30f   : > { %1719 = vst.msk [vmem:[#allocation2 + $0x18] sm:$0x3] %vm1716_vm14, %v1661_v9  ;;  %v1589_v10 = vpop.permute.xlu0 %1588  ;;  %v1591_v11 = vpop.permute.xlu1 %1590 }
 0x310   : > { %1642 = vst.msk [vmem:[#allocation2 + $0x40] sm:$0xff] %vm1632_vm11, %v1589_v10 }
 0x311   : > { %1643 = vst.msk [vmem:[#allocation2 + $0x48] sm:$0x3] %vm1634_vm12, %v1591_v11 }
 0x313   : > { %v1671_v18 = vpop.permute.xlu0 %1670  ;;  %v1673_v19 = vpop.permute.xlu1 %1672 }
 0x314   : > { %1724 = vst.msk [vmem:[#allocation2 + $0x40] sm:$0xff] %vm1714_vm13, %v1671_v18 }
 0x315   : > { %v1737_v13 = vld [vmem:[#allocation2 + $0x11] sm:$0x1]  ;;  %1725 = vst.msk [vmem:[#allocation2 + $0x48] sm:$0x3] %vm1716_vm14, %v1673_v19 }
 0x316   : > { %v1747_v17 = vld [vmem:[#allocation2 + $0x18] sm:$0x1]  ;;  %1758 = vst.msk [vmem:[#allocation2 + $0x10] sm:$0x1] %vm1756_vm15, %v1737_v13 }
 0x317   : > { %1768 = vst.msk [vmem:[#allocation2 + $0x19] sm:$0x1] %vm1756_vm15, %v1747_v17  ;;  %v1581_v20 = vpop.permute.xlu0 %1580  ;;  %v1583_v21 = vpop.permute.xlu1 %1582  ;;  %v1811_v31 = vld [vmem:[#allocation2 + $0x11] sm:$0xff] }
 0x318   : > { %1638 = vst.msk [vmem:[#allocation2 + $0x20] sm:$0xff] %vm1632_vm11, %v1581_v20 }
 0x319   : > { %1639 = vst.msk [vmem:[#allocation2 + $0x28] sm:$0x3] %vm1634_vm12, %v1583_v21 }
 0x31b   : > { %v1663_v25 = vpop.permute.xlu0 %1662  ;;  %v1665_v26 = vpop.permute.xlu1 %1664  ;;  %v1740_v24 = vld [vmem:[#allocation2 + $0x41] sm:$0x1] }
 0x31c   : > { %v1750_v27 = vld [vmem:[#allocation2 + $0x48] sm:$0x1]  ;;  %1720 = vst.msk [vmem:[#allocation2 + $0x20] sm:$0xff] %vm1714_vm13, %v1663_v25 }
 0x31d   : > { %v19622_v22 = vld [vmem:[#allocation2 + $0x10] sm:$0xff]  ;;  %1721 = vst.msk [vmem:[#allocation2 + $0x28] sm:$0x3] %vm1716_vm14, %v1665_v26  ;;  %v2326_v37 = vld [vmem:[#allocation2 + $0x41] sm:$0xff] }
 0x31e   : > { %v1778_v23 = vld [vmem:[#allocation2 + $0x18] sm:$0x3]  ;;  %1782 = vst.msk [vmem:[#allocation2] sm:$0xff] %vm170_vm0, %v19622_v22  ;;  %v2332_v47 = vpack.c.bf16 %v2326_v37, %v1813_v42 }
 0x31f   : > { %1783 = vst.msk [vmem:[#allocation2 + $0x8] sm:$0x3] %vm172_vm1, %v1778_v23  ;;  %v1601_v29 = vpop.permute.xlu0 %1600  ;;  %v1603_v30 = vpop.permute.xlu1 %1602 }
 0x320   : > { %1761 = vst.msk [vmem:[#allocation2 + $0x40] sm:$0x1] %vm1756_vm15, %v1740_v24  ;;  %1771 = vst.msk [vmem:[#allocation2 + $0x49] sm:$0x1] %vm1756_vm15, %v1750_v27 }
 0x321   : > { %1648 = vst.msk [vmem:[#allocation2 + $0x70] sm:$0xff] %vm1632_vm11, %v1601_v29 }
 0x322   : > { %1649 = vst.msk [vmem:[#allocation2 + $0x78] sm:$0x3] %vm1634_vm12, %v1603_v30 }
 0x323   : > { %v1738_v34 = vld [vmem:[#allocation2 + $0x21] sm:$0x1]  ;;  %v1683_v35 = vpop.permute.xlu0 %1682  ;;  %v1685_v36 = vpop.permute.xlu1 %1684 }
 0x324   : > { %1759 = vst.msk [vmem:[#allocation2 + $0x20] sm:$0x1] %vm1756_vm15, %v1738_v34  ;;  %v1748_v39 = vld [vmem:[#allocation2 + $0x28] sm:$0x1]  ;;  %v2048_v34 = vld [vmem:[#allocation2 + $0x12] sm:$0xff] }
 0x325   : > { %1730 = vst.msk [vmem:[#allocation2 + $0x70] sm:$0xff] %vm1714_vm13, %v1683_v35  ;;  %v2324_v41 = vld [vmem:[#allocation2 + $0x21] sm:$0xff] }
 0x326   : > { %v1810_v33 = vld [vmem:[#allocation2 + $0x1] sm:$0xff]  ;;  %1731 = vst.msk [vmem:[#allocation2 + $0x78] sm:$0x3] %vm1716_vm14, %v1685_v36  ;;  %v2331_v43 = vpack.c.bf16 %v2324_v41, %v1811_v31  ;;  %v19637_v44 = vpack.c.bf16 %v1813_v42, %v2324_v41 }
 0x327   : > { %v1818_v40 = vpack.c.bf16 %v1811_v31, %v1810_v33  ;;  %1769 = vst.msk [vmem:[#allocation2 + $0x29] sm:$0x1] %vm1756_vm15, %v1748_v39  ;;  %v1593_v49 = vpop.permute.xlu0 %1592  ;;  %v1595_v50 = vpop.permute.xlu1 %1594  ;;  %v19699_v13 = vld [vmem:[#allocation2] sm:$0xff] }
 0x328   : > { %16703 = vmatprep.mubr.msk.bf16.mxu1 %vm170_vm0, %v2331_v43  ;;  %1644 = vst.msk [vmem:[#allocation2 + $0x50] sm:$0xff] %vm1632_vm11, %v1593_v49  ;;  %v1795_v26 = vpack.c.bf16 %v19622_v22, %v19699_v13  ;;  %v19733_v43 = vld [vmem:[#allocation2 + $0x40] sm:$0xff]  ;;  %v2050_v49 = vld [vmem:[#allocation2 + $0x32] sm:$0xff] }
 0x329   : > { %16631 = vmatprep.mubr.msk.bf16.mxu0 %vm170_vm0, %v1818_v40  ;;  %16704 = vmatmul.mubr.msk.bf16.vlgmr.msra.gmra.mrb[0].mxu1 %vm170_vm0, %v2332_v47  ;;  %1645 = vst.msk [vmem:[#allocation2 + $0x58] sm:$0x3] %vm1634_vm12, %v1595_v50  ;;  %v19729_v40 = vld [vmem:[#allocation2 + $0x30] sm:$0xff]  ;;  %v2051_v47 = vld [vmem:[#allocation2 + $0x42] sm:$0xff] }
 0x32a   : > { %16632 = vmatmul.mubr.msk.bf16.vlgmr.msra.gmra.mrb[8].mxu0 %vm170_vm0, %v19637_v44  ;;  %16712 = vmatpush3.bf16.msra.mxu1 %v19585_v55  ;;  %v18647_v55 = vld [vmem:[%s23121_s1 + $0x248] sm:$0xff]  }
 0x32b   : > { %16640 = vmatpush3.bf16.msra.mxu0 %v19577_v54  ;;  %16713 = vmatprep.subr.bf16.mxu1 %v18643_v48  ;;  %v1675_v32 = vpop.permute.xlu0 %1674  ;;  %v1677_v38 = vpop.permute.xlu1 %1676  ;;  %v18644_v54 = vld [vmem:[%s23121_s1 + $0x180] sm:$0xff]  }
 0x32c   : > { %16641 = vmatprep.subr.bf16.mxu0 %v18640_v46  ;;  %v1743_v52 = vld [vmem:[#allocation2 + $0x71] sm:$0x1]  ;;  %1726 = vst.msk [vmem:[#allocation2 + $0x50] sm:$0xff] %vm1714_vm13, %v1675_v32  ;;  %v18653_v32 = vld [vmem:[%s23121_s1 + $0x260] sm:$0xff]  }
 0x32d   : > { %v1753_v53 = vld [vmem:[#allocation2 + $0x78] sm:$0x1]  ;;  %1764 = vst.msk [vmem:[#allocation2 + $0x70] sm:$0x1] %vm1756_vm15, %v1743_v52  ;;  %v2470_v52 = vpack.c.bf16 %v2051_v47, %v2050_v49 }
 0x32e   : > { %1774 = vst.msk [vmem:[#allocation2 + $0x79] sm:$0x1] %vm1756_vm15, %v1753_v53  ;;  %16714 = vmatpush3.bf16.msra.mxu1 %v18643_v48  ;;  %v1817_v11 = vld [vmem:[#allocation2 + $0x71] sm:$0xff]  ;;  %v19709_v24 = vld [vmem:[#allocation2 + $0x22] sm:$0xff] }
 0x32f   : > { %1727 = vst.msk [vmem:[#allocation2 + $0x58] sm:$0x3] %vm1716_vm14, %v1677_v38  ;;  %16642 = vmatpush3.bf16.msra.mxu0 %v18640_v46  ;;  %16715 = vmatprep.subr.bf16.mxu1 %v18645_v51  ;;  %v1605_v56 = vpop.permute.xlu0 %1604  ;;  %v1607_v57 = vpop.permute.xlu1 %1606  ;;  %v2469_v36 = vpack.c.bf16 %v19709_v24, %v2048_v34  ;;  %v18650_v46 = vld [vmem:[%s23121_s1 + $0x1c0] sm:$0xff]   ;;  %v18652_v53 = vld [vmem:[%s23121_s1 + $0x1c8] sm:$0xff]  }
 0x330   : > { %16643 = vmatprep.subr.bf16.mxu0 %v18642_v28  ;;  %1650 = vst.msk [vmem:[#allocation2 + $0x80] sm:$0xff] %vm1632_vm11, %v1605_v56 }
 0x331   : > { %1651 = vst.msk [vmem:[#allocation2 + $0x88] sm:$0x3] %vm1634_vm12, %v1607_v57  ;;  %v2047_v57 = vld [vmem:[#allocation2 + $0x2] sm:$0xff] }
 0x332   : > { %16716 = vmatpush3.bf16.msra.mxu1 %v18645_v51 }
 0x333   : > { %16644 = vmatpush3.bf16.msra.mxu0 %v18642_v28  ;;  %16717 = vmatprep.subr.bf16.mxu1 %v18647_v55  ;;  %v1741_v60 = vld [vmem:[#allocation2 + $0x51] sm:$0x1]  ;;  %v1597_v63 = vpop.permute.xlu0 %1596  ;;  %v1599_v2 = vpop.permute.xlu1 %1598 }
 0x334   : > { %16645 = vmatprep.subr.bf16.mxu0 %v18644_v54  ;;  %1762 = vst.msk [vmem:[#allocation2 + $0x50] sm:$0x1] %vm1756_vm15, %v1741_v60  ;;  %v18654_v60 = vld [vmem:[%s23121_s1 + $0x1d0] sm:$0xff]  }
 0x335   : > { %1646 = vst.msk [vmem:[#allocation2 + $0x60] sm:$0xff] %vm1632_vm11, %v1597_v63  ;;  %v18655_v63 = vld [vmem:[%s23121_s1 + $0x268] sm:$0xff]  }
 0x336   : > { %v1751_v61 = vld [vmem:[#allocation2 + $0x58] sm:$0x1]  ;;  %1647 = vst.msk [vmem:[#allocation2 + $0x68] sm:$0x3] %vm1634_vm12, %v1599_v2  ;;  %16718 = vmatpush3.bf16.msra.mxu1 %v18647_v55  ;;  %v2055_v2 = vpack.c.bf16 %v2048_v34, %v2047_v57  ;;  %v2194_v34 = vpack.c.bf16 %v19733_v43, %v19729_v40 }
 0x337   : > { %1772 = vst.msk [vmem:[#allocation2 + $0x59] sm:$0x1] %vm1756_vm15, %v1751_v61  ;;  %v1815_v3 = vld [vmem:[#allocation2 + $0x51] sm:$0xff]  ;;  %16646 = vmatpush3.bf16.msra.mxu0 %v18644_v54  ;;  %16719 = vmatprep.subr.bf16.mxu1 %v18649_v59  ;;  %v1679_v7 = vpop.permute.xlu0 %1678  ;;  %v1681_v8 = vpop.permute.xlu1 %1680 }
 0x338   : > { %v19682_v5 = vpack.c.bf16 %v1815_v3, %v2326_v37  ;;  %16647 = vmatprep.subr.bf16.mxu0 %v18646_v58  ;;  %1728 = vst.msk [vmem:[#allocation2 + $0x60] sm:$0xff] %vm1714_vm13, %v1679_v7  ;;  %v19723_v37 = vld [vmem:[#allocation2 + $0x20] sm:$0xff]  ;;  %v18657_v7 = vld [vmem:[%s23121_s1 + $0x270] sm:$0xff]  }
 0x339   : > { %1729 = vst.msk [vmem:[#allocation2 + $0x68] sm:$0x3] %vm1716_vm14, %v1681_v8  ;;  %v1796_v42 = vpack.c.bf16 %v19729_v40, %v19723_v37  ;;  %v18658_v8 = vld [vmem:[%s23121_s1 + $0x1e0] sm:$0xff]  }
 0x33a   : > { %16635 = vmatprep.mubr.msk.bf16.mxu0 %vm170_vm0, %v19682_v5  ;;  %16720 = vmatpush3.bf16.msra.mxu1 %v18649_v59 }
 0x33b   : > { %16648 = vmatpush3.bf16.msra.mxu0 %v18646_v58  ;;  %16729 = vmatprep.subr.bf16.mxu1 %v19690_v45  ;;  %v1687_v9 = vpop.permute.xlu0 %1686  ;;  %v1689_v10 = vpop.permute.xlu1 %1688  ;;  %v19726_v39 = vld [vmem:[#allocation2 + $0x50] sm:$0xff] }
 0x33c   : > { %16657 = vmatprep.subr.bf16.mxu0 %v18648_v6  ;;  %1732 = vst.msk [vmem:[#allocation2 + $0x80] sm:$0xff] %vm1714_vm13, %v1687_v9  ;;  %v19741_v48 = vpack.c.bf16 %v19726_v39, %v19733_v43  ;;  %v19765_v58 = vld [vmem:[#allocation2 + $0x70] sm:$0xff]  ;;  %v18659_v9 = vld [vmem:[%s23121_s1 + $0x278] sm:$0xff]  }
 0x33d   : > { %1733 = vst.msk [vmem:[#allocation2 + $0x88] sm:$0x3] %vm1716_vm14, %v1689_v10  ;;  %v19796_v10 = vpack.c.bf16 %v2050_v49, %v19709_v24  ;;  %v18665_v24 = vld [vmem:[%s23121_s1 + $0x290] sm:$0xff]  }
 0x33e   : > { %v2052_v38 = vld [vmem:[#allocation2 + $0x52] sm:$0xff] }
 0x33f   : > { %v1742_v17 = vld [vmem:[#allocation2 + $0x61] sm:$0x1]  ;;  %v1609_v19 = vpop.permute.xlu0 %1608  ;;  %v1691_v20 = vpop.permute.xlu1 %1690 }
 0x340   : > { %v1752_v18 = vld [vmem:[#allocation2 + $0x68] sm:$0x1]  ;;  %1763 = vst.msk [vmem:[#allocation2 + $0x60] sm:$0x1] %vm1756_vm15, %v1742_v17  ;;  %v19801_v17 = vpack.c.bf16 %v2052_v38, %v2051_v47 }
 0x341   : > { %v1816_v21 = vld [vmem:[#allocation2 + $0x61] sm:$0xff]  ;;  %1773 = vst.msk [vmem:[#allocation2 + $0x69] sm:$0x1] %vm1756_vm15, %v1752_v18 }
 0x342   : > { %1652 = vst.msk [vmem:[#allocation2 + $0x90] sm:$0xff] %vm1632_vm11, %v1609_v19  ;;  %v19704_v23 = vpack.c.bf16 %v1817_v11, %v1816_v21  ;;  %v2333_v25 = vpack.c.bf16 %v1816_v21, %v1815_v3  ;;  %v2054_v3 = vld [vmem:[#allocation2 + $0x72] sm:$0xff]  ;;  %v18661_v18 = vld [vmem:[%s23121_s1 + $0x280] sm:$0xff]  }
 0x343   : > { %1734 = vst.msk [vmem:[#allocation2 + $0x90] sm:$0xff] %vm1714_vm13, %v1691_v20  ;;  %v1744_v27 = vld [vmem:[#allocation2 + $0x81] sm:$0x1]  ;;  %v1611_v30 = vpop.permute.xlu0 %1610  ;;  %v1693_v31 = vpop.permute.xlu1 %1692  ;;  %v18662_v19 = vld [vmem:[%s23121_s1 + $0x1f0] sm:$0xff]   ;;  %v18663_v20 = vld [vmem:[%s23121_s1 + $0x288] sm:$0xff]  }
 0x344   : > { %16636 = vmatmul.mubr.msk.bf16.gmra.mrb[12].mxu0 %vm170_vm0, %v19704_v23  ;;  %16707 = vmatprep.mubr.msk.bf16.mxu1 %vm170_vm0, %v2333_v25  ;;  %v1754_v29 = vld [vmem:[#allocation2 + $0x88] sm:$0x1]  ;;  %1765 = vst.msk [vmem:[#allocation2 + $0x80] sm:$0x1] %vm1756_vm15, %v1744_v27  ;;  %v18664_v25 = vld [vmem:[%s23121_s1 + $0x1f8] sm:$0xff]  }
 0x345   : > { %16649 = vmatprep.mubr.msk.bf16.mxu0 %vm170_vm0, %v1795_v26  ;;  %v19715_v33 = vld [vmem:[#allocation2 + $0x81] sm:$0xff]  ;;  %1775 = vst.msk [vmem:[#allocation2 + $0x89] sm:$0x1] %vm1756_vm15, %v1754_v29  ;;  %v2193_v26 = vpack.c.bf16 %v19723_v37, %v19622_v22 }
 0x346   : > { %1653 = vst.msk [vmem:[#allocation2 + $0x98] sm:$0x3] %vm1634_vm12, %v1611_v30  ;;  %v2334_v35 = vpack.c.bf16 %v19715_v33, %v1817_v11  ;;  %v18660_v11 = vld [vmem:[%s23121_s1 + $0x1e8] sm:$0xff]   ;;  %v18666_v22 = vld [vmem:[%s23121_s1 + $0x200] sm:$0xff]   ;;  %v18667_v30 = vld [vmem:[%s23121_s1 + $0x298] sm:$0xff]  }
 0x347   : > { %1735 = vst.msk [vmem:[#allocation2 + $0x98] sm:$0x3] %vm1716_vm14, %v1693_v31  ;;  %v19759_v55 = vld [vmem:[#allocation2 + $0x60] sm:$0xff] }
 0x348   : > { %16708 = vmatmul.mubr.msk.bf16.gmra.mrb[4].mxu1 %vm170_vm0, %v2334_v35  ;;  %v19744_v50 = vld [vmem:[#allocation2 + $0x62] sm:$0xff]  ;;  %v1798_v59 = vpack.c.bf16 %v19765_v58, %v19759_v55  ;;  %v2195_v35 = vpack.c.bf16 %v19759_v55, %v19726_v39  ;;  %v18671_v39 = vld [vmem:[%s23121_s1 + $0x2b8] sm:$0xff]  }
 0x349   : > { %16721 = vmatprep.mubr.msk.bf16.mxu1 %vm170_vm0, %v2469_v36  ;;  %v2471_v56 = vpack.c.bf16 %v19744_v50, %v2052_v38  ;;  %v2058_v21 = vpack.c.bf16 %v2054_v3, %v19744_v50  ;;  %v18668_v31 = vld [vmem:[%s23121_s1 + $0x2a0] sm:$0xff]   ;;  %v18669_v36 = vld [vmem:[%s23121_s1 + $0x2a8] sm:$0xff]  }
 0x34a   : > { %v1745_v41 = vld [vmem:[#allocation2 + $0x91] sm:$0x1] }
 0x34b   : > { %1766 = vst.msk [vmem:[#allocation2 + $0x90] sm:$0x1] %vm1756_vm15, %v1745_v41  ;;  %v19746_v28 = vld [vmem:[#allocation2 + $0x80] sm:$0xff] }
 0x34c   : > { %16650 = vmatmul.mubr.msk.bf16.vlgmr.msra.gmra.mrb[8].mxu0 %vm170_vm0, %v1796_v42  ;;  %1785 = vst.msk [vmem:[#allocation2 + $0x90] sm:$0xff] %vm170_vm0, %v19746_v28  ;;  %v1781_v54 = vld [vmem:[#allocation2 + $0x88] sm:$0x3]  ;;  %v2196_v37 = vpack.c.bf16 %v19746_v28, %v19765_v58 }
 0x34d   : > { %16658 = vmatpush3.bf16.msra.mxu0 %v18648_v6  ;;  %16653 = vmatprep.mubr.msk.bf16.mxu0 %vm170_vm0, %v19741_v48  ;;  %v19773_v61 = vld [vmem:[#allocation2 + $0x82] sm:$0xff] }
 0x34e   : > { %v1755_v51 = vld [vmem:[#allocation2 + $0x98] sm:$0x1]  ;;  %16659 = vmatprep.subr.bf16.mxu0 %v18650_v46  ;;  %v2472_v6 = vpack.c.bf16 %v19773_v61, %v2054_v3 }
 0x34f   : > { %1776 = vst.msk [vmem:[#allocation2 + $0x99] sm:$0x1] %vm1756_vm15, %v1755_v51 }
 0x350   : > { %1786 = vst.msk [vmem:[#allocation2 + $0x98] sm:$0x3] %vm172_vm1, %v1781_v54  ;;  %16722 = vmatmul.mubr.msk.bf16.vlgmr.msra.gmra.mrb[0].mxu1 %vm170_vm0, %v2470_v52 }
 0x351   : > { %16660 = vmatpush3.bf16.msra.mxu0 %v18650_v46  ;;  %16730 = vmatpush3.bf16.msra.mxu1 %v19690_v45  ;;  %v18656_v45 = vld [vmem:[%s23121_s1 + $0x1d8] sm:$0xff]  }
 0x352   : > { %16725 = vmatprep.mubr.msk.bf16.mxu1 %vm170_vm0, %v2471_v56  ;;  %16661 = vmatprep.subr.bf16.mxu0 %v18652_v53 }
 0x353   : > { %16731 = vmatprep.subr.bf16.mxu1 %v18653_v32  ;;  %v19829_v27 = vld [vmem:[#allocation2 + $0x90] sm:$0xff] }
 0x354   : > { %16654 = vmatmul.mubr.msk.bf16.gmra.mrb[12].mxu0 %vm170_vm0, %v1798_v59  ;;  %v2610_v29 = vpack.c.bf16 %v19829_v27, %v19746_v28 }
 0x355   : > { %16662 = vmatpush3.bf16.msra.mxu0 %v18652_v53  ;;  %16732 = vmatpush3.bf16.msra.mxu1 %v18653_v32 }
 0x356   : > { %16667 = vmatprep.mubr.msk.bf16.mxu0 %vm170_vm0, %v2055_v2  ;;  %16663 = vmatprep.subr.bf16.mxu0 %v18654_v60 }
 0x357   : > { %16733 = vmatprep.subr.bf16.mxu1 %v18655_v63  ;;  %v2744_v40 = vld [vmem:[#allocation2 + $0x91] sm:$0xff] }
 0x358   : > { %16726 = vmatmul.mubr.msk.bf16.gmra.mrb[4].mxu1 %vm170_vm0, %v2472_v6  ;;  %v2748_v41 = vpack.c.bf16 %v2744_v40, %v19715_v33  ;;  %v2882_v33 = vld [vmem:[#allocation2 + $0x92] sm:$0xff] }
 0x359   : > { %16664 = vmatpush3.bf16.msra.mxu0 %v18654_v60  ;;  %16734 = vmatpush3.bf16.msra.mxu1 %v18655_v63 }
 0x35a   : > { %16739 = vmatprep.mubr.msk.bf16.mxu1 %vm170_vm0, %v1796_v42  ;;  %16665 = vmatprep.subr.bf16.mxu0 %v18656_v45  ;;  %v2886_v42 = vpack.c.bf16 %v2882_v33, %v19773_v61 }
 0x35b   : > { %16735 = vmatprep.subr.bf16.mxu1 %v18657_v7 }
 0x35d   : > { %16666 = vmatpush3.bf16.msra.mxu0 %v18656_v45  ;;  %16736 = vmatpush3.bf16.msra.mxu1 %v18657_v7 }
 0x35e   : > { %16675 = vmatprep.subr.bf16.mxu0 %v18658_v8  ;;  %16737 = vmatprep.subr.bf16.mxu1 %v18659_v9 }
 0x360   : > { %16668 = vmatmul.mubr.msk.bf16.vlgmr.msra.gmra.mrb[8].mxu0 %vm170_vm0, %v19796_v10 }
 0x361   : > { %16671 = vmatprep.mubr.msk.bf16.mxu0 %vm170_vm0, %v19801_v17  ;;  %16676 = vmatpush3.bf16.msra.mxu0 %v18658_v8 }
 0x362   : > { %16738 = vmatpush3.bf16.msra.mxu1 %v18659_v9  ;;  %16677 = vmatprep.subr.bf16.mxu0 %v18660_v11 }
 0x363   : > { %16747 = vmatprep.subr.bf16.mxu1 %v18661_v18 }
 0x365   : > { %16740 = vmatmul.mubr.msk.bf16.vlgmr.msra.gmra.mrb[0].mxu1 %vm170_vm0, %v19741_v48  ;;  %16678 = vmatpush3.bf16.msra.mxu0 %v18660_v11 }
 0x366   : > { %16743 = vmatprep.mubr.msk.bf16.mxu1 %vm170_vm0, %v1798_v59  ;;  %16748 = vmatpush3.bf16.msra.mxu1 %v18661_v18 }
 0x367   : > { %16679 = vmatprep.subr.bf16.mxu0 %v18662_v19  ;;  %16749 = vmatprep.subr.bf16.mxu1 %v18663_v20 }
 0x368   : > { %16672 = vmatmul.mubr.msk.bf16.gmra.mrb[12].mxu0 %vm170_vm0, %v2058_v21 }
 0x369   : > { %16680 = vmatpush3.bf16.msra.mxu0 %v18662_v19  ;;  %16685 = vmatprep.mubr.msk.bf16.mxu0 %vm170_vm0, %v2193_v26 }
 0x36a   : > { %16750 = vmatpush3.bf16.msra.mxu1 %v18663_v20  ;;  %16681 = vmatprep.subr.bf16.mxu0 %v18664_v25 }
 0x36b   : > { %16751 = vmatprep.subr.bf16.mxu1 %v18665_v24 }
 0x36d   : > { %16744 = vmatmul.mubr.msk.bf16.gmra.mrb[4].mxu1 %vm170_vm0, %v2610_v29  ;;  %16682 = vmatpush3.bf16.msra.mxu0 %v18664_v25  ;;  %v3078_v29 = vld [vmem:[#allocation2 + $0x8] sm:$0x3] }
 0x36e   : > { %16752 = vmatpush3.bf16.msra.mxu1 %v18665_v24  ;;  %16757 = vmatprep.mubr.msk.bf16.mxu1 %vm170_vm0, %v19637_v44  ;;  %v18670_v44 = vld [vmem:[%s23121_s1 + $0x2b0] sm:$0xff]  }
 0x36f   : > { %16683 = vmatprep.subr.bf16.mxu0 %v18666_v22  ;;  %16753 = vmatprep.subr.bf16.mxu1 %v18667_v30 }
 0x371   : > { %16684 = vmatpush3.bf16.msra.mxu0 %v18666_v22 }
 0x372   : > { %16754 = vmatpush3.bf16.msra.mxu1 %v18667_v30 }
 0x373   : > { %16755 = vmatprep.subr.bf16.mxu1 %v18668_v31 }
 0x374   : > { %16686 = vmatmul.mubr.msk.bf16.vlgmr.msra.gmra.mrb[8].mxu0 %vm170_vm0, %v2194_v34 }
 0x375   : > { %16689 = vmatprep.mubr.msk.bf16.mxu0 %vm170_vm0, %v2195_v35 }
 0x376   : > { %16756 = vmatpush3.bf16.msra.mxu1 %v18668_v31 }
 0x377   : > { %16765 = vmatprep.subr.bf16.mxu1 %v18669_v36 }
 0x379   : > { %16758 = vmatmul.mubr.msk.bf16.vlgmr.msra.gmra.mrb[0].mxu1 %vm170_vm0, %v19682_v5  ;;  %v18672_v5 = vld [vmem:[%s23121_s1 + $0x2c0] sm:$0xff]  }
 0x37a   : > { %16761 = vmatprep.mubr.msk.bf16.mxu1 %vm170_vm0, %v19704_v23  ;;  %16766 = vmatpush3.bf16.msra.mxu1 %v18669_v36  ;;  %v18673_v23 = vld [vmem:[%s23121_s1 + $0x2c8] sm:$0xff]  }
 0x37b   : > { %16767 = vmatprep.subr.bf16.mxu1 %v18670_v44 }
 0x37c   : > { %16690 = vmatmul.mubr.msk.bf16.gmra.mrb[12].mxu0 %vm170_vm0, %v2196_v37 }
 0x37e   : > { %16768 = vmatpush3.bf16.msra.mxu1 %v18670_v44 }
 0x37f   : > { %16769 = vmatprep.subr.bf16.mxu1 %v18671_v39 }
 0x381   : > { %16762 = vmatmul.mubr.msk.bf16.gmra.mrb[4].mxu1 %vm170_vm0, %v2748_v41 }
 0x382   : > { %16770 = vmatpush3.bf16.msra.mxu1 %v18671_v39  ;;  %16775 = vmatprep.mubr.msk.bf16.mxu1 %vm170_vm0, %v19796_v10 }
 0x383   : > { %16771 = vmatprep.subr.bf16.mxu1 %v18672_v5 }
 0x386   : > { %16772 = vmatpush3.bf16.msra.mxu1 %v18672_v5 }
 0x387   : > { %16773 = vmatprep.subr.bf16.mxu1 %v18673_v23 }
 0x38a   : > { %16774 = vmatpush3.bf16.msra.mxu1 %v18673_v23  ;;  %v18674_v23 = vld [vmem:[%s23121_s1 + $0x2f8] sm:$0xff]  }
 0x38b   : > { %16783 = vmatprep.subr.bf16.mxu0 %v18674_v23 }
 0x38c   : > { %16784 = vmatpush3.bf16.msra.mxu0 %v18674_v23 }
 0x38d   : > { %16776 = vmatmul.mubr.msk.bf16.vlgmr.msra.gmra.mrb[0].mxu1 %vm170_vm0, %v19801_v17 }
 0x38e   : > { %16779 = vmatprep.mubr.msk.bf16.mxu1 %vm170_vm0, %v2058_v21 }
 0x395   : > { %16780 = vmatmul.mubr.msk.bf16.gmra.mrb[4].mxu1 %vm170_vm0, %v2886_v42 }
 0x447   : > { %v16687_v43 = vpop.f32.mrb[8].mxu0 }
 0x448   : > { %v2284_v46 = vpop.f32.mrb[9].mxu0 }
 0x449   : > { %v16688_v47 = vpop.f32.mrb[10].mxu0 }
 0x44a   : > { %v2287_v48 = vpop.f32.mrb[11].mxu0 }
 0x44f   : > { %v16691_v49 = vpop.f32.mrb[12].mxu0 }
 0x450   : > { %v2300_v50 = vpop.f32.mrb[13].mxu0 }
 0x451   : > { %v16692_v28 = vpop.f32.mrb[14].mxu0 }
 0x452   : > { %v2303_v51 = vpop.f32.mrb[15].mxu0 }
 0x460   : > { %v16777_v52 = vpop.f32.mrb[0].mxu1 }
 0x461   : > { %v17957_v53 = vadd.f32 %v16777_v52, %v16687_v43  ;;  %v2974_v32 = vpop.f32.mrb[1].mxu1 }
 0x462   : > { %v17958_v38 = vadd.f32 %v2974_v32, %v2284_v46  ;;  %v16778_v54 = vpop.f32.mrb[2].mxu1  ;;  %v18678_v32 = vld [vmem:[%s23121_s1 + $0x318] sm:$0xff]  }
 0x463   : > { %v17959_v55 = vadd.f32 %v16778_v54, %v16688_v47  ;;  %v2977_v56 = vpop.f32.mrb[3].mxu1  ;;  %v3023_v59 = vmul.f32 0.01, %v17957_v53  ;;  %vm3015_vm5 = vcmp.ge.f32.partialorder %v17957_v53, 0.0 }
 0x464   : > { %v3021_v57 = vmul.f32 0.01, %v17958_v38  ;;  %v17960_v58 = vadd.f32 %v2977_v56, %v2287_v48  ;;  %vm3013_vm3 = vcmp.ge.f32.partialorder %v17958_v38, 0.0  ;;  %v18675_v48 = vld [vmem:[%s23121_s1 + $0x300] sm:$0xff]  }
 0x465   : > { %v3024_v63 = vmul.f32 0.01, %v17959_v55  ;;  %vm3016_vm6 = vcmp.ge.f32.partialorder %v17959_v55, 0.0  ;;  %v3031_v9 = vsel %vm3015_vm5, %v17957_v53, %v3023_v59  ;;  %16785 = vmatprep.subr.bf16.mxu0 %v18675_v48  ;;  %v18677_v53 = vld [vmem:[%s23121_s1 + $0x310] sm:$0xff]  }
 0x466   : > { %v3022_v60 = vmul.f32 0.01, %v17960_v58  ;;  %v3029_v61 = vsel %vm3013_vm3, %v17958_v38, %v3021_v57  ;;  %vm3014_vm4 = vcmp.ge.f32.partialorder %v17960_v58, 0.0  ;;  %16786 = vmatpush3.bf16.msra.mxu0 %v18675_v48  ;;  %v19947_v59 = vld [vmem:[%s23121_s1 + $0x2d0] sm:$0xff]   ;;  %v18680_v48 = vld [vmem:[%s23121_s1 + $0x2d8] sm:$0xff]  }
 0x467   : > { %3045 = vrot.lane.b32.xlu0 %v3029_v61, %s19063_s8  ;;  %v3032_v19 = vsel %vm3016_vm6, %v17959_v55, %v3024_v63 }
 0x468   : > { %v16781_v2 = vpop.f32.mrb[4].mxu1  ;;  %v3030_v3 = vsel %vm3014_vm4, %v17960_v58, %v3022_v60 }
 0x469   : > { %v17961_v6 = vadd.f32 %v16781_v2, %v16691_v49  ;;  %3047 = vrot.lane.b32.xlu1 %v3030_v3, %s19063_s8  ;;  %v2990_v45 = vpop.f32.mrb[5].mxu1  ;;  %v3096_v3 = vld [vmem:[#allocation2 + $0x98] sm:$0x3] }
 0x46a   : > { %v17962_v7 = vadd.f32 %v2990_v45, %v2300_v50  ;;  %v16782_v8 = vpop.f32.mrb[6].mxu1  ;;  %v18676_v50 = vld [vmem:[%s23121_s1 + $0x308] sm:$0xff]  }
 0x46b   : > { %v17963_v10 = vadd.f32 %v16782_v8, %v16692_v28  ;;  %3049 = vrot.lane.b32.xlu0 %v3031_v9, %s19063_s8  ;;  %v2993_v11 = vpop.f32.mrb[7].mxu1  ;;  %v3027_v20 = vmul.f32 0.01, %v17961_v6  ;;  %vm3019_vm9 = vcmp.ge.f32.partialorder %v17961_v6, 0.0  ;;  %16787 = vmatprep.subr.bf16.mxu0 %v18676_v50 }
 0x46c   : > { %v3025_v17 = vmul.f32 0.01, %v17962_v7  ;;  %v17964_v18 = vadd.f32 %v2993_v11, %v2303_v51  ;;  %vm3017_vm7 = vcmp.ge.f32.partialorder %v17962_v7, 0.0  ;;  %16788 = vmatpush3.bf16.msra.mxu0 %v18676_v50 }
 0x46d   : > { %3051 = vrot.lane.b32.xlu1 %v3032_v19, %s19063_s8  ;;  %v3035_v24 = vsel %vm3019_vm9, %v17961_v6, %v3027_v20  ;;  %v3028_v22 = vmul.f32 0.01, %v17963_v10  ;;  %vm3020_vm10 = vcmp.ge.f32.partialorder %v17963_v10, 0.0  ;;  %16789 = vmatprep.subr.bf16.mxu0 %v18677_v53 }
 0x46e   : > { %v3026_v21 = vmul.f32 0.01, %v17964_v18  ;;  %v3033_v25 = vsel %vm3017_vm7, %v17962_v7, %v3025_v17  ;;  %vm3018_vm8 = vcmp.ge.f32.partialorder %v17964_v18, 0.0 }
 0x46f   : > { %3053 = vrot.lane.b32.xlu0 %v3033_v25, %s19063_s8  ;;  %v3036_v30 = vsel %vm3020_vm10, %v17963_v10, %v3028_v22 }
 0x470   : > { %v3034_v26 = vsel %vm3018_vm8, %v17964_v18, %v3026_v21  ;;  %16790 = vmatpush3.bf16.msra.mxu0 %v18677_v53  ;;  %v18682_v53 = vld [vmem:[%s23121_s1 + $0x2e8] sm:$0xff]  }
 0x471   : > { %3055 = vrot.lane.b32.xlu1 %v3034_v26, %s19063_s8  ;;  %16791 = vmatprep.subr.bf16.mxu0 %v18678_v32 }
 0x473   : > { %3057 = vrot.lane.b32.xlu0 %v3035_v24, %s19063_s8 }
 0x474   : > { %16792 = vmatpush3.bf16.msra.mxu0 %v18678_v32 }
 0x475   : > { %3117 = vrot.lane.b32.xlu1 %v19699_v13, %s19064_s7  ;;  %16801 = vmatprep.subr.bf16.mxu0 %v19947_v59 }
 0x477   : > { %3119 = vrot.lane.b32.xlu0 %v3078_v29, %s19064_s7 }
 0x479   : > { %3197 = vrot.lane.b32.xlu1 %v19699_v13, %s19063_s8 }
 0x47b   : > { %3199 = vrot.lane.b32.xlu0 %v3078_v29, %s19063_s8 }
 0x47d   : > { %3059 = vrot.lane.b32.xlu1 %v3036_v30, %s19063_s8 }
 0x4d9   : > { %v3046_v31 = vpop.permute.xlu0 %3045 }
 0x4da   : > { %3069 = vst.msk [vmem:[#allocation2 + $0x11] sm:$0xff] %vm233_vm2, %v3046_v31 }
 0x4db   : > { %v3048_v34 = vpop.permute.xlu1 %3047 }
 0x4dc   : > { %3070 = vst.msk [vmem:[#allocation2 + $0x21] sm:$0xff] %vm233_vm2, %v3048_v34 }
 0x4dd   : > { %v3050_v35 = vpop.permute.xlu0 %3049 }
 0x4de   : > { %3071 = vst.msk [vmem:[#allocation2 + $0x31] sm:$0xff] %vm233_vm2, %v3050_v35 }
 0x4df   : > { %v3052_v36 = vpop.permute.xlu1 %3051 }
 0x4e0   : > { %3072 = vst.msk [vmem:[#allocation2 + $0x41] sm:$0xff] %vm233_vm2, %v3052_v36 }
 0x4e1   : > { %v3054_v44 = vpop.permute.xlu0 %3053  ;;  %v3080_v42 = vld [vmem:[#allocation2 + $0x18] sm:$0x3]  ;;  %v3079_v46 = vld [vmem:[#allocation2 + $0x10] sm:$0xff] }
 0x4e2   : > { %3073 = vst.msk [vmem:[#allocation2 + $0x51] sm:$0xff] %vm233_vm2, %v3054_v44 }
 0x4e3   : > { %v3056_v13 = vpop.permute.xlu1 %3055  ;;  %v3081_v38 = vld [vmem:[#allocation2 + $0x20] sm:$0xff]  ;;  %v3082_v54 = vld [vmem:[#allocation2 + $0x28] sm:$0x3] }
 0x4e4   : > { %3074 = vst.msk [vmem:[#allocation2 + $0x61] sm:$0xff] %vm233_vm2, %v3056_v13 }
 0x4e5   : > { %v3058_v37 = vpop.permute.xlu0 %3057  ;;  %v3083_v39 = vld [vmem:[#allocation2 + $0x30] sm:$0xff]  ;;  %v3084_v40 = vld [vmem:[#allocation2 + $0x38] sm:$0x3] }
 0x4e6   : > { %3075 = vst.msk [vmem:[#allocation2 + $0x71] sm:$0xff] %vm233_vm2, %v3058_v37  ;;  %3129 = vrot.lane.b32.xlu0 %v3083_v39, %s19064_s7  ;;  %3131 = vrot.lane.b32.xlu1 %v3084_v40, %s19064_s7 }
 0x4e7   : > { %v3118_v41 = vpop.permute.xlu1 %3117  ;;  %v3085_v51 = vld [vmem:[#allocation2 + $0x40] sm:$0xff]  ;;  %v3086_v52 = vld [vmem:[#allocation2 + $0x48] sm:$0x3] }
 0x4e8   : > { %3177 = vst.msk [vmem:[#allocation2] sm:$0xff] %vm1632_vm11, %v3118_v41 }
 0x4e9   : > { %v3120_v5 = vpop.permute.xlu0 %3119  ;;  %v3087_v57 = vld [vmem:[#allocation2 + $0x50] sm:$0xff]  ;;  %v3088_v58 = vld [vmem:[#allocation2 + $0x58] sm:$0x3] }
 0x4ea   : > { %3178 = vst.msk [vmem:[#allocation2 + $0x8] sm:$0x3] %vm1634_vm12, %v3120_v5  ;;  %3209 = vrot.lane.b32.xlu0 %v3083_v39, %s19063_s8  ;;  %3211 = vrot.lane.b32.xlu1 %v3084_v40, %s19063_s8 }
 0x4eb   : > { %v3198_v33 = vpop.permute.xlu1 %3197  ;;  %v3090_v60 = vld [vmem:[#allocation2 + $0x68] sm:$0x3]  ;;  %v3089_v61 = vld [vmem:[#allocation2 + $0x60] sm:$0xff] }
 0x4ec   : > { %3257 = vst.msk [vmem:[#allocation2] sm:$0xff] %vm1714_vm13, %v3198_v33 }
 0x4ed   : > { %v3200_v43 = vpop.permute.xlu0 %3199  ;;  %v3091_v55 = vld [vmem:[#allocation2 + $0x70] sm:$0xff]  ;;  %v3092_v56 = vld [vmem:[#allocation2 + $0x78] sm:$0x3] }
 0x4ee   : > { %3258 = vst.msk [vmem:[#allocation2 + $0x8] sm:$0x3] %vm1716_vm14, %v3200_v43  ;;  %3123 = vrot.lane.b32.xlu0 %v3080_v42, %s19064_s7  ;;  %3121 = vrot.lane.b32.xlu1 %v3079_v46, %s19064_s7 }
 0x4ef   : > { %v3060_v47 = vpop.permute.xlu1 %3059 }
 0x4f0   : > { %3076 = vst.msk [vmem:[#allocation2 + $0x81] sm:$0xff] %vm233_vm2, %v3060_v47 }
 0x4f2   : > { %3203 = vrot.lane.b32.xlu0 %v3080_v42, %s19063_s8  ;;  %3201 = vrot.lane.b32.xlu1 %v3079_v46, %s19063_s8 }
 0x4f3   : > { %v3277_v49 = vld [vmem:[#allocation2 + $0x1] sm:$0x1] }
 0x4f4   : > { %3297 = vst.msk [vmem:[#allocation2] sm:$0x1] %vm1756_vm15, %v3277_v49 }
 0x4f5   : > { %v3287_v28 = vld [vmem:[#allocation2 + $0x8] sm:$0x1] }
 0x4f6   : > { %3307 = vst.msk [vmem:[#allocation2 + $0x9] sm:$0x1] %vm1756_vm15, %v3287_v28  ;;  %3133 = vrot.lane.b32.xlu0 %v3085_v51, %s19064_s7  ;;  %3135 = vrot.lane.b32.xlu1 %v3086_v52, %s19064_s7  ;;  %v18681_v28 = vld [vmem:[%s23121_s1 + $0x2e0] sm:$0xff]  }
 0x4f7   : > { %v3093_v63 = vld [vmem:[#allocation2 + $0x80] sm:$0xff]  ;;  %v3094_v2 = vld [vmem:[#allocation2 + $0x88] sm:$0x3] }
 0x4fa   : > { %3213 = vrot.lane.b32.xlu0 %v3085_v51, %s19063_s8  ;;  %3215 = vrot.lane.b32.xlu1 %v3086_v52, %s19063_s8 }
 0x4fe   : > { %3125 = vrot.lane.b32.xlu0 %v3081_v38, %s19064_s7  ;;  %3127 = vrot.lane.b32.xlu1 %v3082_v54, %s19064_s7 }
 0x502   : > { %3205 = vrot.lane.b32.xlu0 %v3081_v38, %s19063_s8  ;;  %3207 = vrot.lane.b32.xlu1 %v3082_v54, %s19063_s8 }
 0x506   : > { %3145 = vrot.lane.b32.xlu0 %v3091_v55, %s19064_s7  ;;  %3147 = vrot.lane.b32.xlu1 %v3092_v56, %s19064_s7 }
 0x50a   : > { %3137 = vrot.lane.b32.xlu0 %v3087_v57, %s19064_s7  ;;  %3139 = vrot.lane.b32.xlu1 %v3088_v58, %s19064_s7 }
 0x50e   : > { %3217 = vrot.lane.b32.xlu0 %v3087_v57, %s19063_s8  ;;  %3219 = vrot.lane.b32.xlu1 %v3088_v58, %s19063_s8 }
 0x512   : > { %3143 = vrot.lane.b32.xlu1 %v3090_v60, %s19064_s7  ;;  %3141 = vrot.lane.b32.xlu0 %v3089_v61, %s19064_s7 }
 0x516   : > { %3223 = vrot.lane.b32.xlu1 %v3090_v60, %s19063_s8  ;;  %3221 = vrot.lane.b32.xlu0 %v3089_v61, %s19063_s8 }
 0x51a   : > { %3227 = vrot.lane.b32.xlu1 %v3092_v56, %s19063_s8  ;;  %3225 = vrot.lane.b32.xlu0 %v3091_v55, %s19063_s8 }
 0x51e   : > { %3229 = vrot.lane.b32.xlu1 %v3093_v63, %s19063_s8  ;;  %3149 = vrot.lane.b32.xlu0 %v3093_v63, %s19064_s7  ;;  %v18684_v63 = vld [vmem:[%s23121_s1 + $0x320] sm:$0xff]  }
 0x522   : > { %3231 = vrot.lane.b32.xlu1 %v3094_v2, %s19063_s8  ;;  %3151 = vrot.lane.b32.xlu0 %v3094_v2, %s19064_s7 }
 0x526   : > { %3233 = vrot.lane.b32.xlu1 %v19829_v27, %s19063_s8  ;;  %3153 = vrot.lane.b32.xlu0 %v19829_v27, %s19064_s7 }
 0x52a   : > { %3235 = vrot.lane.b32.xlu1 %v3096_v3, %s19063_s8  ;;  %3155 = vrot.lane.b32.xlu0 %v3096_v3, %s19064_s7 }
 0x558   : > { %v3130_v6 = vpop.permute.xlu0 %3129  ;;  %v3132_v45 = vpop.permute.xlu1 %3131 }
 0x559   : > { %3183 = vst.msk [vmem:[#allocation2 + $0x30] sm:$0xff] %vm1632_vm11, %v3130_v6 }
 0x55a   : > { %3184 = vst.msk [vmem:[#allocation2 + $0x38] sm:$0x3] %vm1634_vm12, %v3132_v45 }
 0x55c   : > { %v3210_v7 = vpop.permute.xlu0 %3209  ;;  %v3212_v8 = vpop.permute.xlu1 %3211 }
 0x55d   : > { %3263 = vst.msk [vmem:[#allocation2 + $0x30] sm:$0xff] %vm1714_vm13, %v3210_v7 }
 0x55e   : > { %3264 = vst.msk [vmem:[#allocation2 + $0x38] sm:$0x3] %vm1716_vm14, %v3212_v8 }
 0x560   : > { %v3124_v9 = vpop.permute.xlu0 %3123  ;;  %v3122_v10 = vpop.permute.xlu1 %3121 }
 0x561   : > { %3180 = vst.msk [vmem:[#allocation2 + $0x18] sm:$0x3] %vm1634_vm12, %v3124_v9 }
 0x562   : > { %3179 = vst.msk [vmem:[#allocation2 + $0x10] sm:$0xff] %vm1632_vm11, %v3122_v10 }
 0x564   : > { %v3280_v27 = vld [vmem:[#allocation2 + $0x31] sm:$0x1]  ;;  %v3204_v17 = vpop.permute.xlu0 %3203  ;;  %v3202_v18 = vpop.permute.xlu1 %3201 }
 0x565   : > { %v3290_v11 = vld [vmem:[#allocation2 + $0x38] sm:$0x1]  ;;  %3300 = vst.msk [vmem:[#allocation2 + $0x30] sm:$0x1] %vm1756_vm15, %v3280_v27 }
 0x566   : > { %3310 = vst.msk [vmem:[#allocation2 + $0x39] sm:$0x1] %vm1756_vm15, %v3290_v11  ;;  %v20007_v46 = vld [vmem:[#allocation2 + $0x31] sm:$0xff] }
 0x567   : > { %3260 = vst.msk [vmem:[#allocation2 + $0x18] sm:$0x3] %vm1716_vm14, %v3204_v17 }
 0x568   : > { %3259 = vst.msk [vmem:[#allocation2 + $0x10] sm:$0xff] %vm1714_vm13, %v3202_v18  ;;  %v3134_v19 = vpop.permute.xlu0 %3133  ;;  %v3136_v20 = vpop.permute.xlu1 %3135 }
 0x569   : > { %3185 = vst.msk [vmem:[#allocation2 + $0x40] sm:$0xff] %vm1632_vm11, %v3134_v19 }
 0x56a   : > { %3186 = vst.msk [vmem:[#allocation2 + $0x48] sm:$0x3] %vm1634_vm12, %v3136_v20 }
 0x56c   : > { %v3214_v26 = vpop.permute.xlu0 %3213  ;;  %v3216_v24 = vpop.permute.xlu1 %3215 }
 0x56d   : > { %3265 = vst.msk [vmem:[#allocation2 + $0x40] sm:$0xff] %vm1714_vm13, %v3214_v26 }
 0x56e   : > { %v3288_v21 = vld [vmem:[#allocation2 + $0x18] sm:$0x1]  ;;  %3266 = vst.msk [vmem:[#allocation2 + $0x48] sm:$0x3] %vm1716_vm14, %v3216_v24 }
 0x56f   : > { %v3278_v25 = vld [vmem:[#allocation2 + $0x11] sm:$0x1]  ;;  %3308 = vst.msk [vmem:[#allocation2 + $0x19] sm:$0x1] %vm1756_vm15, %v3288_v21 }
 0x570   : > { %3298 = vst.msk [vmem:[#allocation2 + $0x10] sm:$0x1] %vm1756_vm15, %v3278_v25  ;;  %v3126_v29 = vpop.permute.xlu0 %3125  ;;  %v3128_v22 = vpop.permute.xlu1 %3127  ;;  %v19999_v23 = vld [vmem:[#allocation2 + $0x11] sm:$0xff] }
 0x571   : > { %3181 = vst.msk [vmem:[#allocation2 + $0x20] sm:$0xff] %vm1632_vm11, %v3126_v29 }
 0x572   : > { %3182 = vst.msk [vmem:[#allocation2 + $0x28] sm:$0x3] %vm1634_vm12, %v3128_v22 }
 0x574   : > { %v3206_v34 = vpop.permute.xlu0 %3205  ;;  %v3208_v35 = vpop.permute.xlu1 %3207  ;;  %v3281_v44 = vld [vmem:[#allocation2 + $0x41] sm:$0x1] }
 0x575   : > { %v3291_v36 = vld [vmem:[#allocation2 + $0x48] sm:$0x1]  ;;  %3261 = vst.msk [vmem:[#allocation2 + $0x20] sm:$0xff] %vm1714_vm13, %v3206_v34 }
 0x576   : > { %v3318_v30 = vld [vmem:[#allocation2 + $0x18] sm:$0x3]  ;;  %3262 = vst.msk [vmem:[#allocation2 + $0x28] sm:$0x3] %vm1716_vm14, %v3208_v35  ;;  %v20031_v32 = vld [vmem:[#allocation2 + $0x41] sm:$0xff] }
 0x577   : > { %v19988_v31 = vld [vmem:[#allocation2 + $0x10] sm:$0xff]  ;;  %3322 = vst.msk [vmem:[#allocation2 + $0x8] sm:$0x3] %vm172_vm1, %v3318_v30 }
 0x578   : > { %3321 = vst.msk [vmem:[#allocation2] sm:$0xff] %vm170_vm0, %v19988_v31  ;;  %v3146_v13 = vpop.permute.xlu0 %3145  ;;  %v3148_v37 = vpop.permute.xlu1 %3147  ;;  %v20083_v30 = vld [vmem:[#allocation2 + $0x30] sm:$0xff] }
 0x579   : > { %3311 = vst.msk [vmem:[#allocation2 + $0x49] sm:$0x1] %vm1756_vm15, %v3291_v36  ;;  %3301 = vst.msk [vmem:[#allocation2 + $0x40] sm:$0x1] %vm1756_vm15, %v3281_v44  ;;  %v18685_v44 = vld [vmem:[%s23121_s1 + $0x328] sm:$0xff]  }
 0x57a   : > { %3191 = vst.msk [vmem:[#allocation2 + $0x70] sm:$0xff] %vm1632_vm11, %v3146_v13 }
 0x57b   : > { %3192 = vst.msk [vmem:[#allocation2 + $0x78] sm:$0x3] %vm1634_vm12, %v3148_v37 }
 0x57c   : > { %v3279_v40 = vld [vmem:[#allocation2 + $0x21] sm:$0x1]  ;;  %v3138_v41 = vpop.permute.xlu0 %3137  ;;  %v3140_v5 = vpop.permute.xlu1 %3139 }
 0x57d   : > { %3299 = vst.msk [vmem:[#allocation2 + $0x20] sm:$0x1] %vm1756_vm15, %v3279_v40  ;;  %v3289_v33 = vld [vmem:[#allocation2 + $0x28] sm:$0x1]  ;;  %v18686_v40 = vld [vmem:[%s23121_s1 + $0x330] sm:$0xff]  }
 0x57e   : > { %3187 = vst.msk [vmem:[#allocation2 + $0x50] sm:$0xff] %vm1632_vm11, %v3138_v41  ;;  %v20005_v43 = vld [vmem:[#allocation2 + $0x21] sm:$0xff] }
 0x57f   : > { %v3348_v39 = vld [vmem:[#allocation2 + $0x1] sm:$0xff]  ;;  %3188 = vst.msk [vmem:[#allocation2 + $0x58] sm:$0x3] %vm1634_vm12, %v3140_v5  ;;  %v20012_v47 = vpack.c.bf16 %v20007_v46, %v20005_v43 }
 0x580   : > { %v3356_v42 = vpack.c.bf16 %v19999_v23, %v3348_v39  ;;  %3309 = vst.msk [vmem:[#allocation2 + $0x29] sm:$0x1] %vm1756_vm15, %v3289_v33  ;;  %v3218_v49 = vpop.permute.xlu0 %3217  ;;  %v3220_v50 = vpop.permute.xlu1 %3219  ;;  %v20059_v8 = vld [vmem:[#allocation2] sm:$0xff] }
 0x581   : > { %3267 = vst.msk [vmem:[#allocation2 + $0x50] sm:$0xff] %vm1714_vm13, %v3218_v49  ;;  %v3333_v19 = vpack.c.bf16 %v19988_v31, %v20059_v8  ;;  %v20090_v36 = vld [vmem:[#allocation2 + $0x40] sm:$0xff] }
 0x582   : > { %16793 = vmatprep.mubr.msk.bf16.mxu0 %vm170_vm0, %v3356_v42  ;;  %3268 = vst.msk [vmem:[#allocation2 + $0x58] sm:$0x3] %vm1716_vm14, %v3220_v50  ;;  %v3585_v5 = vld [vmem:[#allocation2 + $0x2] sm:$0xff]  ;;  %v18687_v42 = vld [vmem:[%s23121_s1 + $0x338] sm:$0xff]  }
 0x583   : > { %16794 = vmatmul.mubr.msk.bf16.vlgmr.msra.gmra.mrb[16].mxu0 %vm170_vm0, %v20012_v47 }
 0x584   : > { %16802 = vmatpush3.bf16.msra.mxu0 %v19947_v59  ;;  %v3142_v51 = vpop.permute.xlu0 %3141  ;;  %v3144_v52 = vpop.permute.xlu1 %3143  ;;  %v18683_v59 = vld [vmem:[%s23121_s1 + $0x2f0] sm:$0xff]   ;;  %v20079_v26 = vld [vmem:[#allocation2 + $0x20] sm:$0xff] }
 0x585   : > { %16803 = vmatprep.subr.bf16.mxu0 %v18680_v48  ;;  %3189 = vst.msk [vmem:[#allocation2 + $0x60] sm:$0xff] %vm1632_vm11, %v3142_v51  ;;  %v20088_v35 = vpack.c.bf16 %v20083_v30, %v20079_v26 }
 0x586   : > { %3190 = vst.msk [vmem:[#allocation2 + $0x68] sm:$0x3] %vm1634_vm12, %v3144_v52  ;;  %v18688_v52 = vld [vmem:[%s23121_s1 + $0x340] sm:$0xff]  }
 0x588   : > { %16804 = vmatpush3.bf16.msra.mxu0 %v18680_v48  ;;  %v3222_v54 = vpop.permute.xlu0 %3221  ;;  %v3224_v55 = vpop.permute.xlu1 %3223  ;;  %v3282_v57 = vld [vmem:[#allocation2 + $0x51] sm:$0x1]  ;;  %v20118_v48 = vld [vmem:[#allocation2 + $0x12] sm:$0xff] }
 0x589   : > { %16805 = vmatprep.subr.bf16.mxu0 %v18681_v28  ;;  %v3292_v38 = vld [vmem:[#allocation2 + $0x58] sm:$0x1]  ;;  %3269 = vst.msk [vmem:[#allocation2 + $0x60] sm:$0xff] %vm1714_vm13, %v3222_v54  ;;  %v3593_v51 = vpack.c.bf16 %v20118_v48, %v3585_v5 }
 0x58a   : > { %v20033_v56 = vld [vmem:[#allocation2 + $0x51] sm:$0xff]  ;;  %3312 = vst.msk [vmem:[#allocation2 + $0x59] sm:$0x1] %vm1756_vm15, %v3292_v38  ;;  %3302 = vst.msk [vmem:[#allocation2 + $0x50] sm:$0x1] %vm1756_vm15, %v3282_v57  ;;  %v20135_v38 = vld [vmem:[#allocation2 + $0x22] sm:$0xff] }
 0x58b   : > { %3270 = vst.msk [vmem:[#allocation2 + $0x68] sm:$0x3] %vm1716_vm14, %v3224_v55  ;;  %v20040_v58 = vpack.c.bf16 %v20033_v56, %v20031_v32  ;;  %v20139_v55 = vld [vmem:[#allocation2 + $0x32] sm:$0xff]  ;;  %v20141_v57 = vld [vmem:[#allocation2 + $0x42] sm:$0xff] }
 0x58c   : > { %16806 = vmatpush3.bf16.msra.mxu0 %v18681_v28  ;;  %v3226_v60 = vpop.permute.xlu0 %3225  ;;  %v3228_v61 = vpop.permute.xlu1 %3227 }
 0x58d   : > { %16807 = vmatprep.subr.bf16.mxu0 %v18682_v53  ;;  %16797 = vmatprep.mubr.msk.bf16.mxu0 %vm170_vm0, %v20040_v58  ;;  %3271 = vst.msk [vmem:[#allocation2 + $0x70] sm:$0xff] %vm1714_vm13, %v3226_v60  ;;  %v18690_v60 = vld [vmem:[%s23121_s1 + $0x350] sm:$0xff]  }
 0x58e   : > { %3272 = vst.msk [vmem:[#allocation2 + $0x78] sm:$0x3] %vm1716_vm14, %v3228_v61 }
 0x590   : > { %16808 = vmatpush3.bf16.msra.mxu0 %v18682_v53  ;;  %v3150_v3 = vpop.permute.xlu0 %3149  ;;  %v3230_v6 = vpop.permute.xlu1 %3229  ;;  %v3283_v45 = vld [vmem:[#allocation2 + $0x61] sm:$0x1]  ;;  %v18689_v53 = vld [vmem:[%s23121_s1 + $0x348] sm:$0xff]  }
 0x591   : > { %16809 = vmatprep.subr.bf16.mxu0 %v18683_v59  ;;  %3193 = vst.msk [vmem:[#allocation2 + $0x80] sm:$0xff] %vm1632_vm11, %v3150_v3  ;;  %v20081_v24 = vld [vmem:[#allocation2 + $0x50] sm:$0xff] }
 0x592   : > { %v3293_v2 = vld [vmem:[#allocation2 + $0x68] sm:$0x1]  ;;  %3273 = vst.msk [vmem:[#allocation2 + $0x80] sm:$0xff] %vm1714_vm13, %v3230_v6  ;;  %v20099_v13 = vpack.c.bf16 %v20081_v24, %v20090_v36  ;;  %v20137_v54 = vld [vmem:[#allocation2 + $0x52] sm:$0xff] }
 0x593   : > { %3313 = vst.msk [vmem:[#allocation2 + $0x69] sm:$0x1] %vm1756_vm15, %v3293_v2  ;;  %3303 = vst.msk [vmem:[#allocation2 + $0x60] sm:$0x1] %vm1756_vm15, %v3283_v45  ;;  %v20057_v7 = vld [vmem:[#allocation2 + $0x61] sm:$0xff]  ;;  %v20152_v61 = vpack.c.bf16 %v20137_v54, %v20141_v57 }
 0x594   : > { %16810 = vmatpush3.bf16.msra.mxu0 %v18683_v59  ;;  %v3152_v10 = vpop.permute.xlu0 %3151  ;;  %v3232_v27 = vpop.permute.xlu1 %3231  ;;  %v3284_v17 = vld [vmem:[#allocation2 + $0x71] sm:$0x1]  ;;  %v20145_v59 = vpack.c.bf16 %v20139_v55, %v20135_v38  ;;  %v18692_v45 = vld [vmem:[%s23121_s1 + $0x360] sm:$0xff]  }
 0x595   : > { %16819 = vmatprep.subr.bf16.mxu0 %v18684_v63  ;;  %v3294_v9 = vld [vmem:[#allocation2 + $0x78] sm:$0x1]  ;;  %3194 = vst.msk [vmem:[#allocation2 + $0x88] sm:$0x3] %vm1634_vm12, %v3152_v10  ;;  %v18693_v10 = vld [vmem:[%s23121_s1 + $0x368] sm:$0xff]  }
 0x596   : > { %v20061_v11 = vld [vmem:[#allocation2 + $0x71] sm:$0xff]  ;;  %3314 = vst.msk [vmem:[#allocation2 + $0x79] sm:$0x1] %vm1756_vm15, %v3294_v9  ;;  %3304 = vst.msk [vmem:[#allocation2 + $0x70] sm:$0x1] %vm1756_vm15, %v3284_v17  ;;  %v3731_v9 = vpack.c.bf16 %v20079_v26, %v19988_v31  ;;  %v3732_v31 = vpack.c.bf16 %v20090_v36, %v20083_v30  ;;  %v3869_v26 = vpack.c.bf16 %v20005_v43, %v19999_v23  ;;  %v18700_v43 = vld [vmem:[%s23121_s1 + $0x3a0] sm:$0xff]  }
 0x597   : > { %v20067_v18 = vpack.c.bf16 %v20061_v11, %v20057_v7  ;;  %3274 = vst.msk [vmem:[#allocation2 + $0x88] sm:$0x3] %vm1716_vm14, %v3232_v27  ;;  %v18694_v27 = vld [vmem:[%s23121_s1 + $0x370] sm:$0xff]   ;;  %v18695_v17 = vld [vmem:[%s23121_s1 + $0x378] sm:$0xff]   ;;  %v3870_v23 = vpack.c.bf16 %v20031_v32, %v20007_v46  ;;  %v18701_v30 = vld [vmem:[%s23121_s1 + $0x3a8] sm:$0xff]   ;;  %v4008_v36 = vpack.c.bf16 %v20141_v57, %v20139_v55 }
 0x598   : > { %v3154_v20 = vpop.permute.xlu0 %3153  ;;  %v3234_v21 = vpop.permute.xlu1 %3233  ;;  %v18702_v32 = vld [vmem:[%s23121_s1 + $0x3b0] sm:$0xff]  }
 0x599   : > { %16798 = vmatmul.mubr.msk.bf16.gmra.mrb[20].mxu0 %vm170_vm0, %v20067_v18  ;;  %v3285_v25 = vld [vmem:[#allocation2 + $0x81] sm:$0x1]  ;;  %3195 = vst.msk [vmem:[#allocation2 + $0x90] sm:$0xff] %vm1632_vm11, %v3154_v20 }
 0x59a   : > { %16811 = vmatprep.mubr.msk.bf16.mxu0 %vm170_vm0, %v3333_v19  ;;  %3305 = vst.msk [vmem:[#allocation2 + $0x80] sm:$0x1] %vm1756_vm15, %v3285_v25  ;;  %v3331_v33 = vld [vmem:[#allocation2 + $0x60] sm:$0xff]  ;;  %v18697_v25 = vld [vmem:[%s23121_s1 + $0x388] sm:$0xff]  }
 0x59b   : > { %3275 = vst.msk [vmem:[#allocation2 + $0x90] sm:$0xff] %vm1714_vm13, %v3234_v21  ;;  %v20163_v3 = vld [vmem:[#allocation2 + $0x62] sm:$0xff]  ;;  %v3733_v19 = vpack.c.bf16 %v3331_v33, %v20081_v24  ;;  %v18698_v24 = vld [vmem:[%s23121_s1 + $0x390] sm:$0xff]  }
 0x59c   : > { %v3156_v29 = vpop.permute.xlu0 %3155  ;;  %v3236_v22 = vpop.permute.xlu1 %3235  ;;  %v18696_v20 = vld [vmem:[%s23121_s1 + $0x380] sm:$0xff]  }
 0x59d   : > { %3196 = vst.msk [vmem:[#allocation2 + $0x98] sm:$0x3] %vm1634_vm12, %v3156_v29  ;;  %v20111_v41 = vld [vmem:[#allocation2 + $0x70] sm:$0xff]  ;;  %v18699_v29 = vld [vmem:[%s23121_s1 + $0x398] sm:$0xff]  }
 0x59e   : > { %v3295_v34 = vld [vmem:[#allocation2 + $0x88] sm:$0x1]  ;;  %3276 = vst.msk [vmem:[#allocation2 + $0x98] sm:$0x3] %vm1716_vm14, %v3236_v22  ;;  %v20121_v28 = vpack.c.bf16 %v20111_v41, %v3331_v33  ;;  %v20161_v2 = vld [vmem:[#allocation2 + $0x72] sm:$0xff]  ;;  %v3871_v22 = vpack.c.bf16 %v20057_v7, %v20033_v56  ;;  %v4007_v56 = vpack.c.bf16 %v20135_v38, %v20118_v48 }
 0x59f   : > { %3315 = vst.msk [vmem:[#allocation2 + $0x89] sm:$0x1] %vm1756_vm15, %v3295_v34  ;;  %v20167_v6 = vpack.c.bf16 %v20161_v2, %v20163_v3  ;;  %v20221_v34 = vld [vmem:[#allocation2 + $0x81] sm:$0xff]  ;;  %v18703_v7 = vld [vmem:[%s23121_s1 + $0x3b8] sm:$0xff]  }
 0x5a0   : > { %v3872_v46 = vpack.c.bf16 %v20221_v34, %v20061_v11  ;;  %v18704_v11 = vld [vmem:[%s23121_s1 + $0x3c0] sm:$0xff]   ;;  %v18707_v33 = vld [vmem:[%s23121_s1 + $0x3d8] sm:$0xff]   ;;  %v18709_v48 = vld [vmem:[%s23121_s1 + $0x3e8] sm:$0xff]  }
 0x5a1   : > { %16812 = vmatmul.mubr.msk.bf16.vlgmr.msra.gmra.mrb[16].mxu0 %vm170_vm0, %v20088_v35  ;;  %v20105_v37 = vld [vmem:[#allocation2 + $0x80] sm:$0xff] }
 0x5a2   : > { %16820 = vmatpush3.bf16.msra.mxu0 %v18684_v63  ;;  %16815 = vmatprep.mubr.msk.bf16.mxu0 %vm170_vm0, %v20099_v13  ;;  %v3286_v39 = vld [vmem:[#allocation2 + $0x91] sm:$0x1]  ;;  %v18691_v63 = vld [vmem:[%s23121_s1 + $0x358] sm:$0xff]   ;;  %v3734_v21 = vpack.c.bf16 %v20105_v37, %v20111_v41 }
 0x5a3   : > { %16821 = vmatprep.subr.bf16.mxu0 %v18685_v44  ;;  %3306 = vst.msk [vmem:[#allocation2 + $0x90] sm:$0x1] %vm1756_vm15, %v3286_v39  ;;  %v4009_v39 = vpack.c.bf16 %v20163_v3, %v20137_v54  ;;  %v18717_v54 = vld [vmem:[%s23121_s1 + $0x428] sm:$0xff]  }
 0x5a4   : > { %3323 = vst.msk [vmem:[#allocation2 + $0x90] sm:$0xff] %vm170_vm0, %v20105_v37 }
 0x5a5   : > { %v3296_v50 = vld [vmem:[#allocation2 + $0x98] sm:$0x1] }
 0x5a6   : > { %16822 = vmatpush3.bf16.msra.mxu0 %v18685_v44  ;;  %v3320_v49 = vld [vmem:[#allocation2 + $0x88] sm:$0x3]  ;;  %3316 = vst.msk [vmem:[#allocation2 + $0x99] sm:$0x1] %vm1756_vm15, %v3296_v50 }
 0x5a7   : > { %16823 = vmatprep.subr.bf16.mxu0 %v18686_v40  ;;  %3324 = vst.msk [vmem:[#allocation2 + $0x98] sm:$0x3] %vm172_vm1, %v3320_v49  ;;  %v18705_v44 = vld [vmem:[%s23121_s1 + $0x3c8] sm:$0xff]   ;;  %v18710_v49 = vld [vmem:[%s23121_s1 + $0x3f0] sm:$0xff]  }
 0x5a8   : > { %v4006_v41 = vld [vmem:[#allocation2 + $0x82] sm:$0xff] }
 0x5a9   : > { %16816 = vmatmul.mubr.msk.bf16.gmra.mrb[20].mxu0 %vm170_vm0, %v20121_v28  ;;  %v4010_v5 = vpack.c.bf16 %v4006_v41, %v20161_v2 }
 0x5aa   : > { %16824 = vmatpush3.bf16.msra.mxu0 %v18686_v40  ;;  %16829 = vmatprep.mubr.msk.bf16.mxu0 %vm170_vm0, %v3593_v51  ;;  %v18706_v40 = vld [vmem:[%s23121_s1 + $0x3d0] sm:$0xff]  }
 0x5ab   : > { %16825 = vmatprep.subr.bf16.mxu0 %v18687_v42  ;;  %v20273_v50 = vld [vmem:[#allocation2 + $0x90] sm:$0xff] }
 0x5ac   : > { %v4148_v51 = vpack.c.bf16 %v20273_v50, %v20105_v37  ;;  %v18714_v37 = vld [vmem:[%s23121_s1 + $0x410] sm:$0xff]  }
 0x5ae   : > { %16826 = vmatpush3.bf16.msra.mxu0 %v18687_v42  ;;  %v18708_v42 = vld [vmem:[%s23121_s1 + $0x3e0] sm:$0xff]  }
 0x5af   : > { %16827 = vmatprep.subr.bf16.mxu0 %v18688_v52 }
 0x5b2   : > { %16828 = vmatpush3.bf16.msra.mxu0 %v18688_v52  ;;  %v18715_v52 = vld [vmem:[%s23121_s1 + $0x418] sm:$0xff]  }
 0x5b3   : > { %16837 = vmatprep.subr.bf16.mxu0 %v18689_v53 }
 0x5b5   : > { %16830 = vmatmul.mubr.msk.bf16.vlgmr.msra.gmra.mrb[16].mxu0 %vm170_vm0, %v20145_v59 }
 0x5b6   : > { %16833 = vmatprep.mubr.msk.bf16.mxu0 %vm170_vm0, %v20152_v61  ;;  %16838 = vmatpush3.bf16.msra.mxu0 %v18689_v53  ;;  %v4282_v53 = vld [vmem:[#allocation2 + $0x91] sm:$0xff] }
 0x5b7   : > { %16839 = vmatprep.subr.bf16.mxu0 %v18690_v60  ;;  %v4286_v38 = vpack.c.bf16 %v4282_v53, %v20221_v34  ;;  %v18723_v53 = vld [vmem:[%s23121_s1 + $0x480] sm:$0xff]  }
 0x5ba   : > { %16840 = vmatpush3.bf16.msra.mxu0 %v18690_v60 }
 0x5bb   : > { %16841 = vmatprep.subr.bf16.mxu0 %v18691_v63 }
 0x5bd   : > { %16834 = vmatmul.mubr.msk.bf16.gmra.mrb[20].mxu0 %vm170_vm0, %v20167_v6 }
 0x5be   : > { %16842 = vmatpush3.bf16.msra.mxu0 %v18691_v63  ;;  %16847 = vmatprep.mubr.msk.bf16.mxu0 %vm170_vm0, %v3731_v9 }
 0x5bf   : > { %16843 = vmatprep.subr.bf16.mxu0 %v18692_v45 }
 0x5c2   : > { %16844 = vmatpush3.bf16.msra.mxu0 %v18692_v45 }
 0x5c3   : > { %16845 = vmatprep.subr.bf16.mxu0 %v18693_v10 }
 0x5c6   : > { %16846 = vmatpush3.bf16.msra.mxu0 %v18693_v10 }
 0x5c7   : > { %16855 = vmatprep.subr.bf16.mxu0 %v18694_v27 }
 0x5c9   : > { %16848 = vmatmul.mubr.msk.bf16.vlgmr.msra.gmra.mrb[16].mxu0 %vm170_vm0, %v3732_v31 }
 0x5ca   : > { %16851 = vmatprep.mubr.msk.bf16.mxu0 %vm170_vm0, %v3733_v19  ;;  %16856 = vmatpush3.bf16.msra.mxu0 %v18694_v27 }
 0x5cb   : > { %16857 = vmatprep.subr.bf16.mxu0 %v18695_v17 }
 0x5ce   : > { %16858 = vmatpush3.bf16.msra.mxu0 %v18695_v17 }
 0x5cf   : > { %16859 = vmatprep.subr.bf16.mxu0 %v18696_v20 }
 0x5d1   : > { %16852 = vmatmul.mubr.msk.bf16.gmra.mrb[20].mxu0 %vm170_vm0, %v3734_v21 }
 0x5d2   : > { %16860 = vmatpush3.bf16.msra.mxu0 %v18696_v20  ;;  %16865 = vmatprep.mubr.msk.bf16.mxu0 %vm170_vm0, %v3869_v26 }
 0x5d3   : > { %16861 = vmatprep.subr.bf16.mxu0 %v18697_v25 }
 0x5d6   : > { %16862 = vmatpush3.bf16.msra.mxu0 %v18697_v25 }
 0x5d7   : > { %16863 = vmatprep.subr.bf16.mxu0 %v18698_v24 }
 0x5da   : > { %16864 = vmatpush3.bf16.msra.mxu0 %v18698_v24 }
 0x5db   : > { %16873 = vmatprep.subr.bf16.mxu0 %v18699_v29 }
 0x5dd   : > { %16866 = vmatmul.mubr.msk.bf16.vlgmr.msra.gmra.mrb[16].mxu0 %vm170_vm0, %v3870_v23 }
 0x5de   : > { %16869 = vmatprep.mubr.msk.bf16.mxu0 %vm170_vm0, %v3871_v22  ;;  %16874 = vmatpush3.bf16.msra.mxu0 %v18699_v29  ;;  %v4624_v22 = vld [vmem:[#allocation2 + $0x8] sm:$0x3] }
 0x5df   : > { %16875 = vmatprep.subr.bf16.mxu0 %v18700_v43 }
 0x5e2   : > { %16876 = vmatpush3.bf16.msra.mxu0 %v18700_v43 }
 0x5e3   : > { %16877 = vmatprep.subr.bf16.mxu0 %v18701_v30 }
 0x5e5   : > { %16870 = vmatmul.mubr.msk.bf16.gmra.mrb[20].mxu0 %vm170_vm0, %v3872_v46 }
 0x5e6   : > { %16878 = vmatpush3.bf16.msra.mxu0 %v18701_v30  ;;  %16883 = vmatprep.mubr.msk.bf16.mxu0 %vm170_vm0, %v4007_v56 }
 0x5e7   : > { %16879 = vmatprep.subr.bf16.mxu0 %v18702_v32 }
 0x5ea   : > { %16880 = vmatpush3.bf16.msra.mxu0 %v18702_v32 }
 0x5eb   : > { %16881 = vmatprep.subr.bf16.mxu0 %v18703_v7 }
 0x5ee   : > { %16882 = vmatpush3.bf16.msra.mxu0 %v18703_v7 }
 0x5ef   : > { %16891 = vmatprep.subr.bf16.mxu0 %v18704_v11 }
 0x5f1   : > { %16884 = vmatmul.mubr.msk.bf16.vlgmr.msra.gmra.mrb[16].mxu0 %vm170_vm0, %v4008_v36 }
 0x5f2   : > { %16887 = vmatprep.mubr.msk.bf16.mxu0 %vm170_vm0, %v4009_v39  ;;  %16892 = vmatpush3.bf16.msra.mxu0 %v18704_v11 }
 0x5f3   : > { %16893 = vmatprep.subr.bf16.mxu0 %v18705_v44 }
 0x5f6   : > { %16894 = vmatpush3.bf16.msra.mxu0 %v18705_v44 }
 0x5f7   : > { %16895 = vmatprep.subr.bf16.mxu0 %v18706_v40 }
 0x5f9   : > { %16888 = vmatmul.mubr.msk.bf16.gmra.mrb[20].mxu0 %vm170_vm0, %v4010_v5  ;;  %v18719_v5 = vld [vmem:[%s23121_s1 + $0x460] sm:$0xff]  }
 0x5fa   : > { %16896 = vmatpush3.bf16.msra.mxu0 %v18706_v40  ;;  %16901 = vmatprep.mubr.msk.bf16.mxu0 %vm170_vm0, %v20088_v35  ;;  %v18711_v35 = vld [vmem:[%s23121_s1 + $0x3f8] sm:$0xff]  }
 0x5fb   : > { %16897 = vmatprep.subr.bf16.mxu0 %v18707_v33  ;;  %16945 = vmatprep.subr.bf16.mxu1 %v18719_v5 }
 0x5fc   : > { %16946 = vmatpush3.bf16.msra.mxu1 %v18719_v5 }
 0x5fe   : > { %16898 = vmatpush3.bf16.msra.mxu0 %v18707_v33 }
 0x5ff   : > { %16899 = vmatprep.subr.bf16.mxu0 %v18708_v42 }
 0x602   : > { %16900 = vmatpush3.bf16.msra.mxu0 %v18708_v42 }
 0x603   : > { %16909 = vmatprep.subr.bf16.mxu0 %v18709_v48 }
 0x605   : > { %16902 = vmatmul.mubr.msk.bf16.vlgmr.msra.gmra.mrb[16].mxu0 %vm170_vm0, %v20099_v13  ;;  %v18712_v13 = vld [vmem:[%s23121_s1 + $0x400] sm:$0xff]  }
 0x606   : > { %16905 = vmatprep.mubr.msk.bf16.mxu0 %vm170_vm0, %v20121_v28  ;;  %16910 = vmatpush3.bf16.msra.mxu0 %v18709_v48  ;;  %v18713_v28 = vld [vmem:[%s23121_s1 + $0x408] sm:$0xff]  }
 0x607   : > { %16911 = vmatprep.subr.bf16.mxu0 %v18710_v49 }
 0x60a   : > { %16912 = vmatpush3.bf16.msra.mxu0 %v18710_v49 }
 0x60b   : > { %16913 = vmatprep.subr.bf16.mxu0 %v18711_v35 }
 0x60d   : > { %16906 = vmatmul.mubr.msk.bf16.gmra.mrb[20].mxu0 %vm170_vm0, %v4148_v51 }
 0x60e   : > { %16914 = vmatpush3.bf16.msra.mxu0 %v18711_v35  ;;  %16919 = vmatprep.mubr.msk.bf16.mxu0 %vm170_vm0, %v20012_v47  ;;  %v18716_v47 = vld [vmem:[%s23121_s1 + $0x420] sm:$0xff]   ;;  %v18720_v35 = vld [vmem:[%s23121_s1 + $0x468] sm:$0xff]  }
 0x60f   : > { %16915 = vmatprep.subr.bf16.mxu0 %v18712_v13  ;;  %16947 = vmatprep.subr.bf16.mxu1 %v18720_v35 }
 0x610   : > { %16948 = vmatpush3.bf16.msra.mxu1 %v18720_v35 }
 0x612   : > { %16916 = vmatpush3.bf16.msra.mxu0 %v18712_v13 }
 0x613   : > { %16917 = vmatprep.subr.bf16.mxu0 %v18713_v28 }
 0x616   : > { %16918 = vmatpush3.bf16.msra.mxu0 %v18713_v28  ;;  %v18721_v28 = vld [vmem:[%s23121_s1 + $0x470] sm:$0xff]  }
 0x617   : > { %16927 = vmatprep.subr.bf16.mxu0 %v18714_v37  ;;  %16949 = vmatprep.subr.bf16.mxu1 %v18721_v28 }
 0x618   : > { %16950 = vmatpush3.bf16.msra.mxu1 %v18721_v28  ;;  %v18726_v28 = vld [vmem:[%s23121_s1 + $0x448] sm:$0xff]  }
 0x619   : > { %16920 = vmatmul.mubr.msk.bf16.vlgmr.msra.gmra.mrb[16].mxu0 %vm170_vm0, %v20040_v58  ;;  %v18718_v58 = vld [vmem:[%s23121_s1 + $0x430] sm:$0xff]  }
 0x61a   : > { %16923 = vmatprep.mubr.msk.bf16.mxu0 %vm170_vm0, %v20067_v18  ;;  %16928 = vmatpush3.bf16.msra.mxu0 %v18714_v37  ;;  %v4420_v18 = vld [vmem:[#allocation2 + $0x92] sm:$0xff] }
 0x61b   : > { %16929 = vmatprep.subr.bf16.mxu0 %v18715_v52  ;;  %v4424_v55 = vpack.c.bf16 %v4420_v18, %v4006_v41 }
 0x61e   : > { %16930 = vmatpush3.bf16.msra.mxu0 %v18715_v52 }
 0x61f   : > { %16931 = vmatprep.subr.bf16.mxu0 %v18716_v47 }
 0x621   : > { %16924 = vmatmul.mubr.msk.bf16.gmra.mrb[20].mxu0 %vm170_vm0, %v4286_v38 }
 0x622   : > { %16932 = vmatpush3.bf16.msra.mxu0 %v18716_v47  ;;  %16937 = vmatprep.mubr.msk.bf16.mxu0 %vm170_vm0, %v20145_v59  ;;  %v18722_v47 = vld [vmem:[%s23121_s1 + $0x478] sm:$0xff]  }
 0x623   : > { %16933 = vmatprep.subr.bf16.mxu0 %v18717_v54  ;;  %16951 = vmatprep.subr.bf16.mxu1 %v18722_v47 }
 0x624   : > { %16952 = vmatpush3.bf16.msra.mxu1 %v18722_v47  ;;  %v18727_v47 = vld [vmem:[%s23121_s1 + $0x450] sm:$0xff]  }
 0x625   : > { %16953 = vmatprep.subr.bf16.mxu1 %v18723_v53 }
 0x626   : > { %16934 = vmatpush3.bf16.msra.mxu0 %v18717_v54 }
 0x627   : > { %16935 = vmatprep.subr.bf16.mxu0 %v18718_v58 }
 0x628   : > { %16954 = vmatpush3.bf16.msra.mxu1 %v18723_v53 }
 0x62a   : > { %16936 = vmatpush3.bf16.msra.mxu0 %v18718_v58 }
 0x62d   : > { %16938 = vmatmul.mubr.msk.bf16.vlgmr.msra.gmra.mrb[16].mxu0 %vm170_vm0, %v20152_v61 }
 0x62e   : > { %16941 = vmatprep.mubr.msk.bf16.mxu0 %vm170_vm0, %v20167_v6 }
 0x635   : > { %16942 = vmatmul.mubr.msk.bf16.gmra.mrb[20].mxu0 %vm170_vm0, %v4424_v55 }
 0x700   : > { %v16939_v57 = vpop.f32.mrb[16].mxu0 }
 0x701   : > { %v4512_v59 = vpop.f32.mrb[17].mxu0  ;;  %v4553_v60 = vadd.f32 %v16939_v57, %v19474_v62 }
 0x702   : > { %v4551_v63 = vadd.f32 %v4512_v59, %v19482_v1  ;;  %v16940_v2 = vpop.f32.mrb[18].mxu0  ;;  %v20410_v59 = vld [vmem:[%s23121_s1 + $0x438] sm:$0xff]  }
 0x703   : > { %v4515_v3 = vpop.f32.mrb[19].mxu0  ;;  %v4554_v9 = vadd.f32 %v16940_v2, %v19478_v0  ;;  %v4569_v10 = vmul.f32 0.01, %v4553_v60  ;;  %vm4561_vm5 = vcmp.ge.f32.partialorder %v4553_v60, 0.0  ;;  %16963 = vmatprep.subr.bf16.mxu1 %v20410_v59 }
 0x704   : > { %vm4559_vm3 = vcmp.ge.f32.partialorder %v4551_v63, 0.0  ;;  %v4567_v45 = vmul.f32 0.01, %v4551_v63  ;;  %v4552_v61 = vadd.f32 %v4515_v3, %v19486_v4 }
 0x705   : > { %v4570_v62 = vmul.f32 0.01, %v4554_v9  ;;  %vm4562_vm6 = vcmp.ge.f32.partialorder %v4554_v9, 0.0  ;;  %v20328_v20 = vsel %vm4561_vm5, %v4553_v60, %v4569_v10 }
 0x706   : > { %vm4560_vm4 = vcmp.ge.f32.partialorder %v4552_v61, 0.0  ;;  %v4568_v6 = vmul.f32 0.01, %v4552_v61  ;;  %v20318_v27 = vsel %vm4559_vm3, %v4551_v63, %v4567_v45  ;;  %v4642_v45 = vld [vmem:[#allocation2 + $0x98] sm:$0x3] }
 0x707   : > { %4591 = vrot.lane.b32.xlu0 %v20318_v27, %s19063_s8  ;;  %v20333_v24 = vsel %vm4562_vm6, %v4554_v9, %v4570_v62 }
 0x708   : > { %v16943_v31 = vpop.f32.mrb[20].mxu0  ;;  %v20322_v1 = vsel %vm4560_vm4, %v4552_v61, %v4568_v6 }
 0x709   : > { %4593 = vrot.lane.b32.xlu1 %v20322_v1, %s19063_s8  ;;  %v4528_v0 = vpop.f32.mrb[21].mxu0  ;;  %v4557_v4 = vadd.f32 %v16943_v31, %v19492_v12 }
 0x70a   : > { %v4555_v17 = vadd.f32 %v4528_v0, %v19500_v15  ;;  %v16944_v19 = vpop.f32.mrb[22].mxu0 }
 0x70b   : > { %4595 = vrot.lane.b32.xlu0 %v20328_v20, %s19063_s8  ;;  %v4531_v21 = vpop.f32.mrb[23].mxu0  ;;  %v4573_v29 = vmul.f32 0.01, %v4557_v4  ;;  %vm4565_vm9 = vcmp.ge.f32.partialorder %v4557_v4, 0.0  ;;  %v4558_v43 = vadd.f32 %v16944_v19, %v19496_v14 }
 0x70c   : > { %vm4563_vm7 = vcmp.ge.f32.partialorder %v4555_v17, 0.0  ;;  %v4571_v25 = vmul.f32 0.01, %v4555_v17  ;;  %v4556_v26 = vadd.f32 %v4531_v21, %v19504_v16 }
 0x70d   : > { %4597 = vrot.lane.b32.xlu1 %v20333_v24, %s19063_s8  ;;  %v20345_v16 = vsel %vm4565_vm9, %v4557_v4, %v4573_v29  ;;  %v4574_v30 = vmul.f32 0.01, %v4558_v43  ;;  %vm4566_vm10 = vcmp.ge.f32.partialorder %v4558_v43, 0.0 }
 0x70e   : > { %vm4564_vm8 = vcmp.ge.f32.partialorder %v4556_v26, 0.0  ;;  %v4572_v12 = vmul.f32 0.01, %v4556_v26  ;;  %v20337_v15 = vsel %vm4563_vm7, %v4555_v17, %v4571_v25 }
 0x70f   : > { %4599 = vrot.lane.b32.xlu0 %v20337_v15, %s19063_s8  ;;  %v20356_v34 = vsel %vm4566_vm10, %v4558_v43, %v4574_v30 }
 0x710   : > { %v20341_v23 = vsel %vm4564_vm8, %v4556_v26, %v4572_v12 }
 0x711   : > { %4601 = vrot.lane.b32.xlu1 %v20341_v23, %s19063_s8 }
 0x713   : > { %4603 = vrot.lane.b32.xlu0 %v20345_v16, %s19063_s8 }
 0x715   : > { %4663 = vrot.lane.b32.xlu1 %v20059_v8, %s19064_s7 }
 0x717   : > { %4665 = vrot.lane.b32.xlu0 %v4624_v22, %s19064_s7 }
 0x719   : > { %4743 = vrot.lane.b32.xlu1 %v20059_v8, %s19063_s8 }
 0x71b   : > { %4745 = vrot.lane.b32.xlu0 %v4624_v22, %s19063_s8 }
 0x71d   : > { %4605 = vrot.lane.b32.xlu1 %v20356_v34, %s19063_s8 }
 0x779   : > { %v4592_v46 = vpop.permute.xlu0 %4591 }
 0x77a   : > { %4615 = vst.msk [vmem:[#allocation2 + $0x11] sm:$0xff] %vm233_vm2, %v4592_v46 }
 0x77b   : > { %v4594_v14 = vpop.permute.xlu1 %4593 }
 0x77c   : > { %4616 = vst.msk [vmem:[#allocation2 + $0x21] sm:$0xff] %vm233_vm2, %v4594_v14 }
 0x77d   : > { %v4596_v32 = vpop.permute.xlu0 %4595 }
 0x77e   : > { %4617 = vst.msk [vmem:[#allocation2 + $0x31] sm:$0xff] %vm233_vm2, %v4596_v32 }
 0x77f   : > { %v4598_v56 = vpop.permute.xlu1 %4597 }
 0x780   : > { %4618 = vst.msk [vmem:[#allocation2 + $0x41] sm:$0xff] %vm233_vm2, %v4598_v56 }
 0x781   : > { %v4600_v8 = vpop.permute.xlu0 %4599  ;;  %v4626_v33 = vld [vmem:[#allocation2 + $0x18] sm:$0x3]  ;;  %v4625_v48 = vld [vmem:[#allocation2 + $0x10] sm:$0xff] }
 0x782   : > { %4619 = vst.msk [vmem:[#allocation2 + $0x51] sm:$0xff] %vm233_vm2, %v4600_v8 }
 0x783   : > { %v4602_v7 = vpop.permute.xlu1 %4601  ;;  %v4627_v38 = vld [vmem:[#allocation2 + $0x20] sm:$0xff]  ;;  %v4628_v54 = vld [vmem:[#allocation2 + $0x28] sm:$0x3] }
 0x784   : > { %4620 = vst.msk [vmem:[#allocation2 + $0x61] sm:$0xff] %vm233_vm2, %v4602_v7 }
 0x785   : > { %v4604_v11 = vpop.permute.xlu0 %4603  ;;  %v4629_v36 = vld [vmem:[#allocation2 + $0x30] sm:$0xff]  ;;  %v4630_v44 = vld [vmem:[#allocation2 + $0x38] sm:$0x3] }
 0x786   : > { %4621 = vst.msk [vmem:[#allocation2 + $0x71] sm:$0xff] %vm233_vm2, %v4604_v11  ;;  %4675 = vrot.lane.b32.xlu0 %v4629_v36, %s19064_s7  ;;  %4677 = vrot.lane.b32.xlu1 %v4630_v44, %s19064_s7 }
 0x787   : > { %v4664_v39 = vpop.permute.xlu1 %4663  ;;  %v4631_v13 = vld [vmem:[#allocation2 + $0x40] sm:$0xff]  ;;  %v4632_v52 = vld [vmem:[#allocation2 + $0x48] sm:$0x3] }
 0x788   : > { %4723 = vst.msk [vmem:[#allocation2] sm:$0xff] %vm1632_vm11, %v4664_v39 }
 0x789   : > { %v4666_v40 = vpop.permute.xlu0 %4665  ;;  %v4633_v55 = vld [vmem:[#allocation2 + $0x50] sm:$0xff]  ;;  %v4634_v57 = vld [vmem:[#allocation2 + $0x58] sm:$0x3] }
 0x78a   : > { %4724 = vst.msk [vmem:[#allocation2 + $0x8] sm:$0x3] %vm1634_vm12, %v4666_v40  ;;  %4755 = vrot.lane.b32.xlu0 %v4629_v36, %s19063_s8  ;;  %4757 = vrot.lane.b32.xlu1 %v4630_v44, %s19063_s8 }
 0x78b   : > { %v4744_v41 = vpop.permute.xlu1 %4743  ;;  %v4636_v60 = vld [vmem:[#allocation2 + $0x68] sm:$0x3]  ;;  %v4635_v63 = vld [vmem:[#allocation2 + $0x60] sm:$0xff] }
 0x78c   : > { %4803 = vst.msk [vmem:[#allocation2] sm:$0xff] %vm1714_vm13, %v4744_v41 }
 0x78d   : > { %v4746_v42 = vpop.permute.xlu0 %4745  ;;  %v4637_v58 = vld [vmem:[#allocation2 + $0x70] sm:$0xff]  ;;  %v4638_v18 = vld [vmem:[#allocation2 + $0x78] sm:$0x3] }
 0x78e   : > { %4804 = vst.msk [vmem:[#allocation2 + $0x8] sm:$0x3] %vm1716_vm14, %v4746_v42  ;;  %4669 = vrot.lane.b32.xlu0 %v4626_v33, %s19064_s7  ;;  %4667 = vrot.lane.b32.xlu1 %v4625_v48, %s19064_s7 }
 0x78f   : > { %v4606_v49 = vpop.permute.xlu1 %4605 }
 0x790   : > { %4622 = vst.msk [vmem:[#allocation2 + $0x81] sm:$0xff] %vm233_vm2, %v4606_v49  ;;  %v18725_v49 = vld [vmem:[%s23121_s1 + $0x440] sm:$0xff]  }
 0x792   : > { %4749 = vrot.lane.b32.xlu0 %v4626_v33, %s19063_s8  ;;  %4747 = vrot.lane.b32.xlu1 %v4625_v48, %s19063_s8 }
 0x793   : > { %v4823_v51 = vld [vmem:[#allocation2 + $0x1] sm:$0x1] }
 0x794   : > { %4843 = vst.msk [vmem:[#allocation2] sm:$0x1] %vm1756_vm15, %v4823_v51 }
 0x795   : > { %v4833_v37 = vld [vmem:[#allocation2 + $0x8] sm:$0x1] }
 0x796   : > { %4853 = vst.msk [vmem:[#allocation2 + $0x9] sm:$0x1] %vm1756_vm15, %v4833_v37  ;;  %4679 = vrot.lane.b32.xlu0 %v4631_v13, %s19064_s7  ;;  %4681 = vrot.lane.b32.xlu1 %v4632_v52, %s19064_s7 }
 0x797   : > { %v4639_v2 = vld [vmem:[#allocation2 + $0x80] sm:$0xff]  ;;  %v4640_v3 = vld [vmem:[#allocation2 + $0x88] sm:$0x3] }
 0x79a   : > { %4759 = vrot.lane.b32.xlu0 %v4631_v13, %s19063_s8  ;;  %4761 = vrot.lane.b32.xlu1 %v4632_v52, %s19063_s8 }
 0x79e   : > { %4671 = vrot.lane.b32.xlu0 %v4627_v38, %s19064_s7  ;;  %4673 = vrot.lane.b32.xlu1 %v4628_v54, %s19064_s7 }
 0x7a2   : > { %4751 = vrot.lane.b32.xlu0 %v4627_v38, %s19063_s8  ;;  %4753 = vrot.lane.b32.xlu1 %v4628_v54, %s19063_s8 }
 0x7a6   : > { %4691 = vrot.lane.b32.xlu0 %v4637_v58, %s19064_s7  ;;  %4693 = vrot.lane.b32.xlu1 %v4638_v18, %s19064_s7 }
 0x7aa   : > { %4683 = vrot.lane.b32.xlu0 %v4633_v55, %s19064_s7  ;;  %4685 = vrot.lane.b32.xlu1 %v4634_v57, %s19064_s7 }
 0x7ae   : > { %4763 = vrot.lane.b32.xlu0 %v4633_v55, %s19063_s8  ;;  %4765 = vrot.lane.b32.xlu1 %v4634_v57, %s19063_s8 }
 0x7b2   : > { %4689 = vrot.lane.b32.xlu1 %v4636_v60, %s19064_s7  ;;  %4687 = vrot.lane.b32.xlu0 %v4635_v63, %s19064_s7 }
 0x7b6   : > { %4769 = vrot.lane.b32.xlu1 %v4636_v60, %s19063_s8  ;;  %4767 = vrot.lane.b32.xlu0 %v4635_v63, %s19063_s8 }
 0x7ba   : > { %4773 = vrot.lane.b32.xlu1 %v4638_v18, %s19063_s8  ;;  %4771 = vrot.lane.b32.xlu0 %v4637_v58, %s19063_s8 }
 0x7be   : > { %4775 = vrot.lane.b32.xlu1 %v4639_v2, %s19063_s8  ;;  %4695 = vrot.lane.b32.xlu0 %v4639_v2, %s19064_s7  ;;  %v18729_v2 = vld [vmem:[%s23121_s1 + $0x488] sm:$0xff]  }
 0x7c2   : > { %4777 = vrot.lane.b32.xlu1 %v4640_v3, %s19063_s8  ;;  %4697 = vrot.lane.b32.xlu0 %v4640_v3, %s19064_s7 }
 0x7c6   : > { %4779 = vrot.lane.b32.xlu1 %v20273_v50, %s19063_s8  ;;  %4699 = vrot.lane.b32.xlu0 %v20273_v50, %s19064_s7 }
 0x7ca   : > { %4781 = vrot.lane.b32.xlu1 %v4642_v45, %s19063_s8  ;;  %4701 = vrot.lane.b32.xlu0 %v4642_v45, %s19064_s7 }
 0x7f8   : > { %v4676_v9 = vpop.permute.xlu0 %4675  ;;  %v4678_v61 = vpop.permute.xlu1 %4677 }
 0x7f9   : > { %4729 = vst.msk [vmem:[#allocation2 + $0x30] sm:$0xff] %vm1632_vm11, %v4676_v9 }
 0x7fa   : > { %4730 = vst.msk [vmem:[#allocation2 + $0x38] sm:$0x3] %vm1634_vm12, %v4678_v61 }
 0x7fc   : > { %v4756_v10 = vpop.permute.xlu0 %4755  ;;  %v4758_v6 = vpop.permute.xlu1 %4757 }
 0x7fd   : > { %4809 = vst.msk [vmem:[#allocation2 + $0x30] sm:$0xff] %vm1714_vm13, %v4756_v10 }
 0x7fe   : > { %4810 = vst.msk [vmem:[#allocation2 + $0x38] sm:$0x3] %vm1716_vm14, %v4758_v6 }
 0x800   : > { %v4670_v62 = vpop.permute.xlu0 %4669  ;;  %v4668_v31 = vpop.permute.xlu1 %4667 }
 0x801   : > { %4726 = vst.msk [vmem:[#allocation2 + $0x18] sm:$0x3] %vm1634_vm12, %v4670_v62 }
 0x802   : > { %4725 = vst.msk [vmem:[#allocation2 + $0x10] sm:$0xff] %vm1632_vm11, %v4668_v31 }
 0x804   : > { %v4750_v50 = vpop.permute.xlu0 %4749  ;;  %v4748_v0 = vpop.permute.xlu1 %4747  ;;  %v4826_v17 = vld [vmem:[#allocation2 + $0x31] sm:$0x1] }
 0x805   : > { %v4836_v4 = vld [vmem:[#allocation2 + $0x38] sm:$0x1]  ;;  %4806 = vst.msk [vmem:[#allocation2 + $0x18] sm:$0x3] %vm1716_vm14, %v4750_v50 }
 0x806   : > { %4805 = vst.msk [vmem:[#allocation2 + $0x10] sm:$0xff] %vm1714_vm13, %v4748_v0  ;;  %v20470_v42 = vld [vmem:[#allocation2 + $0x31] sm:$0xff] }
 0x807   : > { %4856 = vst.msk [vmem:[#allocation2 + $0x39] sm:$0x1] %vm1756_vm15, %v4836_v4  ;;  %4846 = vst.msk [vmem:[#allocation2 + $0x30] sm:$0x1] %vm1756_vm15, %v4826_v17 }
 0x808   : > { %v4680_v19 = vpop.permute.xlu0 %4679  ;;  %v4682_v21 = vpop.permute.xlu1 %4681 }
 0x809   : > { %4731 = vst.msk [vmem:[#allocation2 + $0x40] sm:$0xff] %vm1632_vm11, %v4680_v19 }
 0x80a   : > { %4732 = vst.msk [vmem:[#allocation2 + $0x48] sm:$0x3] %vm1634_vm12, %v4682_v21 }
 0x80c   : > { %v4760_v26 = vpop.permute.xlu0 %4759  ;;  %v4762_v29 = vpop.permute.xlu1 %4761  ;;  %v4834_v12 = vld [vmem:[#allocation2 + $0x18] sm:$0x1] }
 0x80d   : > { %v4824_v25 = vld [vmem:[#allocation2 + $0x11] sm:$0x1]  ;;  %4811 = vst.msk [vmem:[#allocation2 + $0x40] sm:$0xff] %vm1714_vm13, %v4760_v26 }
 0x80e   : > { %4844 = vst.msk [vmem:[#allocation2 + $0x10] sm:$0x1] %vm1756_vm15, %v4824_v25  ;;  %4854 = vst.msk [vmem:[#allocation2 + $0x19] sm:$0x1] %vm1756_vm15, %v4834_v12  ;;  %v20462_v40 = vld [vmem:[#allocation2 + $0x11] sm:$0xff] }
 0x80f   : > { %4812 = vst.msk [vmem:[#allocation2 + $0x48] sm:$0x3] %vm1716_vm14, %v4762_v29 }
 0x810   : > { %v4672_v43 = vpop.permute.xlu0 %4671  ;;  %v4674_v22 = vpop.permute.xlu1 %4673 }
 0x811   : > { %4727 = vst.msk [vmem:[#allocation2 + $0x20] sm:$0xff] %vm1632_vm11, %v4672_v43 }
 0x812   : > { %4728 = vst.msk [vmem:[#allocation2 + $0x28] sm:$0x3] %vm1634_vm12, %v4674_v22 }
 0x814   : > { %v4752_v46 = vpop.permute.xlu0 %4751  ;;  %v4754_v14 = vpop.permute.xlu1 %4753  ;;  %v4827_v8 = vld [vmem:[#allocation2 + $0x41] sm:$0x1] }
 0x815   : > { %v20451_v30 = vld [vmem:[#allocation2 + $0x10] sm:$0xff]  ;;  %v4864_v32 = vld [vmem:[#allocation2 + $0x18] sm:$0x3]  ;;  %4807 = vst.msk [vmem:[#allocation2 + $0x20] sm:$0xff] %vm1714_vm13, %v4752_v46 }
 0x816   : > { %4867 = vst.msk [vmem:[#allocation2] sm:$0xff] %vm170_vm0, %v20451_v30  ;;  %v4837_v56 = vld [vmem:[#allocation2 + $0x48] sm:$0x1]  ;;  %v20546_v46 = vld [vmem:[#allocation2 + $0x30] sm:$0xff] }
 0x817   : > { %4808 = vst.msk [vmem:[#allocation2 + $0x28] sm:$0x3] %vm1716_vm14, %v4754_v14  ;;  %v20494_v53 = vld [vmem:[#allocation2 + $0x41] sm:$0xff] }
 0x818   : > { %4868 = vst.msk [vmem:[#allocation2 + $0x8] sm:$0x3] %vm172_vm1, %v4864_v32  ;;  %v4692_v7 = vpop.permute.xlu0 %4691  ;;  %v4694_v11 = vpop.permute.xlu1 %4693 }
 0x819   : > { %4857 = vst.msk [vmem:[#allocation2 + $0x49] sm:$0x1] %vm1756_vm15, %v4837_v56  ;;  %4847 = vst.msk [vmem:[#allocation2 + $0x40] sm:$0x1] %vm1756_vm15, %v4827_v8  ;;  %v18730_v56 = vld [vmem:[%s23121_s1 + $0x490] sm:$0xff]  }
 0x81a   : > { %4737 = vst.msk [vmem:[#allocation2 + $0x70] sm:$0xff] %vm1632_vm11, %v4692_v7 }
 0x81b   : > { %4738 = vst.msk [vmem:[#allocation2 + $0x78] sm:$0x3] %vm1634_vm12, %v4694_v11 }
 0x81c   : > { %v4684_v36 = vpop.permute.xlu0 %4683  ;;  %v4686_v44 = vpop.permute.xlu1 %4685  ;;  %v4825_v35 = vld [vmem:[#allocation2 + $0x21] sm:$0x1] }
 0x81d   : > { %4733 = vst.msk [vmem:[#allocation2 + $0x50] sm:$0xff] %vm1632_vm11, %v4684_v36  ;;  %v20522_v6 = vld [vmem:[#allocation2] sm:$0xff]  ;;  %v18731_v36 = vld [vmem:[%s23121_s1 + $0x498] sm:$0xff]  }
 0x81e   : > { %v4835_v41 = vld [vmem:[#allocation2 + $0x28] sm:$0x1]  ;;  %4734 = vst.msk [vmem:[#allocation2 + $0x58] sm:$0x3] %vm1634_vm12, %v4686_v44  ;;  %v4879_v19 = vpack.c.bf16 %v20451_v30, %v20522_v6 }
 0x81f   : > { %v4894_v39 = vld [vmem:[#allocation2 + $0x1] sm:$0xff]  ;;  %4855 = vst.msk [vmem:[#allocation2 + $0x29] sm:$0x1] %vm1756_vm15, %v4835_v41  ;;  %4845 = vst.msk [vmem:[#allocation2 + $0x20] sm:$0x1] %vm1756_vm15, %v4825_v35  ;;  %v20581_v35 = vld [vmem:[#allocation2 + $0x12] sm:$0xff] }
 0x820   : > { %v4902_v5 = vpack.c.bf16 %v20462_v40, %v4894_v39  ;;  %v20468_v33 = vld [vmem:[#allocation2 + $0x21] sm:$0xff]  ;;  %v4764_v51 = vpop.permute.xlu0 %4763  ;;  %v4766_v13 = vpop.permute.xlu1 %4765 }
 0x821   : > { %v20474_v48 = vpack.c.bf16 %v20470_v42, %v20468_v33  ;;  %4813 = vst.msk [vmem:[#allocation2 + $0x50] sm:$0xff] %vm1714_vm13, %v4764_v51  ;;  %v20553_v32 = vld [vmem:[#allocation2 + $0x40] sm:$0xff] }
 0x822   : > { %16955 = vmatprep.mubr.msk.bf16.mxu1 %vm170_vm0, %v4902_v5  ;;  %4814 = vst.msk [vmem:[#allocation2 + $0x58] sm:$0x3] %vm1716_vm14, %v4766_v13  ;;  %v5131_v41 = vld [vmem:[#allocation2 + $0x2] sm:$0xff] }
 0x823   : > { %16956 = vmatmul.mubr.msk.bf16.vlgmr.msra.gmra.mrb[8].mxu1 %vm170_vm0, %v20474_v48 }
 0x824   : > { %16964 = vmatpush3.bf16.msra.mxu1 %v20410_v59  ;;  %v4688_v37 = vpop.permute.xlu0 %4687  ;;  %v4690_v52 = vpop.permute.xlu1 %4689  ;;  %v18728_v59 = vld [vmem:[%s23121_s1 + $0x458] sm:$0xff]  }
 0x825   : > { %16965 = vmatprep.subr.bf16.mxu1 %v18725_v49  ;;  %4735 = vst.msk [vmem:[#allocation2 + $0x60] sm:$0xff] %vm1632_vm11, %v4688_v37  ;;  %v5139_v37 = vpack.c.bf16 %v20581_v35, %v5131_v41 }
 0x826   : > { %4736 = vst.msk [vmem:[#allocation2 + $0x68] sm:$0x3] %vm1634_vm12, %v4690_v52  ;;  %v20541_v29 = vld [vmem:[#allocation2 + $0x20] sm:$0xff]  ;;  %v18733_v52 = vld [vmem:[%s23121_s1 + $0x4a8] sm:$0xff]  }
 0x827   : > { %v20551_v14 = vpack.c.bf16 %v20546_v46, %v20541_v29 }
 0x828   : > { %16966 = vmatpush3.bf16.msra.mxu1 %v18725_v49  ;;  %v4768_v38 = vpop.permute.xlu0 %4767  ;;  %v4770_v54 = vpop.permute.xlu1 %4769  ;;  %v4828_v55 = vld [vmem:[#allocation2 + $0x51] sm:$0x1]  ;;  %v18732_v49 = vld [vmem:[%s23121_s1 + $0x4a0] sm:$0xff]  }
 0x829   : > { %16967 = vmatprep.subr.bf16.mxu1 %v18726_v28  ;;  %v4838_v58 = vld [vmem:[#allocation2 + $0x58] sm:$0x1]  ;;  %4815 = vst.msk [vmem:[#allocation2 + $0x60] sm:$0xff] %vm1714_vm13, %v4768_v38  ;;  %v20598_v38 = vld [vmem:[#allocation2 + $0x22] sm:$0xff] }
 0x82a   : > { %v20496_v18 = vld [vmem:[#allocation2 + $0x51] sm:$0xff]  ;;  %4816 = vst.msk [vmem:[#allocation2 + $0x68] sm:$0x3] %vm1716_vm14, %v4770_v54 }
 0x82b   : > { %4858 = vst.msk [vmem:[#allocation2 + $0x59] sm:$0x1] %vm1756_vm15, %v4838_v58  ;;  %v20503_v57 = vpack.c.bf16 %v20496_v18, %v20494_v53  ;;  %4848 = vst.msk [vmem:[#allocation2 + $0x50] sm:$0x1] %vm1756_vm15, %v4828_v55  ;;  %v20602_v58 = vld [vmem:[#allocation2 + $0x32] sm:$0xff]  ;;  %v20604_v55 = vld [vmem:[#allocation2 + $0x42] sm:$0xff] }
 0x82c   : > { %16968 = vmatpush3.bf16.msra.mxu1 %v18726_v28  ;;  %v4772_v60 = vpop.permute.xlu0 %4771  ;;  %v4774_v63 = vpop.permute.xlu1 %4773 }
 0x82d   : > { %16969 = vmatprep.subr.bf16.mxu1 %v18727_v47  ;;  %16959 = vmatprep.mubr.msk.bf16.mxu1 %vm170_vm0, %v20503_v57  ;;  %4817 = vst.msk [vmem:[#allocation2 + $0x70] sm:$0xff] %vm1714_vm13, %v4772_v60  ;;  %v18735_v60 = vld [vmem:[%s23121_s1 + $0x4b8] sm:$0xff]  }
 0x82e   : > { %4818 = vst.msk [vmem:[#allocation2 + $0x78] sm:$0x3] %vm1716_vm14, %v4774_v63 }
 0x830   : > { %16970 = vmatpush3.bf16.msra.mxu1 %v18727_v47  ;;  %v4696_v3 = vpop.permute.xlu0 %4695  ;;  %v4776_v45 = vpop.permute.xlu1 %4775  ;;  %v4829_v61 = vld [vmem:[#allocation2 + $0x61] sm:$0x1]  ;;  %v18734_v47 = vld [vmem:[%s23121_s1 + $0x4b0] sm:$0xff]  }
 0x831   : > { %16971 = vmatprep.subr.bf16.mxu1 %v18728_v59  ;;  %v4839_v9 = vld [vmem:[#allocation2 + $0x68] sm:$0x1]  ;;  %4739 = vst.msk [vmem:[#allocation2 + $0x80] sm:$0xff] %vm1632_vm11, %v4696_v3 }
 0x832   : > { %4859 = vst.msk [vmem:[#allocation2 + $0x69] sm:$0x1] %vm1756_vm15, %v4839_v9  ;;  %4849 = vst.msk [vmem:[#allocation2 + $0x60] sm:$0x1] %vm1756_vm15, %v4829_v61  ;;  %v20520_v10 = vld [vmem:[#allocation2 + $0x61] sm:$0xff]  ;;  %v20544_v12 = vld [vmem:[#allocation2 + $0x50] sm:$0xff] }
 0x833   : > { %4819 = vst.msk [vmem:[#allocation2 + $0x80] sm:$0xff] %vm1714_vm13, %v4776_v45  ;;  %v20561_v7 = vpack.c.bf16 %v20544_v12, %v20553_v32  ;;  %v20600_v54 = vld [vmem:[#allocation2 + $0x52] sm:$0xff]  ;;  %v18737_v61 = vld [vmem:[%s23121_s1 + $0x4c8] sm:$0xff]  }
 0x834   : > { %16972 = vmatpush3.bf16.msra.mxu1 %v18728_v59  ;;  %v4698_v62 = vpop.permute.xlu0 %4697  ;;  %v4778_v31 = vpop.permute.xlu1 %4777  ;;  %v4830_v4 = vld [vmem:[#allocation2 + $0x71] sm:$0x1]  ;;  %v20608_v59 = vpack.c.bf16 %v20602_v58, %v20598_v38  ;;  %v20615_v63 = vpack.c.bf16 %v20600_v54, %v20604_v55 }
 0x835   : > { %16981 = vmatprep.subr.bf16.mxu1 %v18729_v2  ;;  %v4840_v50 = vld [vmem:[#allocation2 + $0x78] sm:$0x1]  ;;  %4740 = vst.msk [vmem:[#allocation2 + $0x88] sm:$0x3] %vm1634_vm12, %v4698_v62  ;;  %v5277_v62 = vpack.c.bf16 %v20541_v29, %v20451_v30  ;;  %v5278_v30 = vpack.c.bf16 %v20553_v32, %v20546_v46  ;;  %v5415_v29 = vpack.c.bf16 %v20468_v33, %v20462_v40  ;;  %v18745_v33 = vld [vmem:[%s23121_s1 + $0x508] sm:$0xff]   ;;  %v18746_v46 = vld [vmem:[%s23121_s1 + $0x510] sm:$0xff]  }
 0x836   : > { %v20524_v0 = vld [vmem:[#allocation2 + $0x71] sm:$0xff]  ;;  %4860 = vst.msk [vmem:[#allocation2 + $0x79] sm:$0x1] %vm1756_vm15, %v4840_v50  ;;  %4850 = vst.msk [vmem:[#allocation2 + $0x70] sm:$0x1] %vm1756_vm15, %v4830_v4  ;;  %v18740_v4 = vld [vmem:[%s23121_s1 + $0x4e0] sm:$0xff]   ;;  %v5416_v40 = vpack.c.bf16 %v20494_v53, %v20470_v42 }
 0x837   : > { %v20530_v17 = vpack.c.bf16 %v20524_v0, %v20520_v10  ;;  %4820 = vst.msk [vmem:[#allocation2 + $0x88] sm:$0x3] %vm1716_vm14, %v4778_v31  ;;  %v18738_v31 = vld [vmem:[%s23121_s1 + $0x4d0] sm:$0xff]   ;;  %v18739_v50 = vld [vmem:[%s23121_s1 + $0x4d8] sm:$0xff]  }
 0x838   : > { %v4700_v21 = vpop.permute.xlu0 %4699  ;;  %v4780_v25 = vpop.permute.xlu1 %4779  ;;  %v18747_v53 = vld [vmem:[%s23121_s1 + $0x518] sm:$0xff]  }
 0x839   : > { %16960 = vmatmul.mubr.msk.bf16.gmra.mrb[12].mxu1 %vm170_vm0, %v20530_v17  ;;  %4741 = vst.msk [vmem:[#allocation2 + $0x90] sm:$0xff] %vm1632_vm11, %v4700_v21  ;;  %v4877_v5 = vld [vmem:[#allocation2 + $0x60] sm:$0xff]  ;;  %v18741_v21 = vld [vmem:[%s23121_s1 + $0x4e8] sm:$0xff]  }
 0x83a   : > { %16973 = vmatprep.mubr.msk.bf16.mxu1 %vm170_vm0, %v4879_v19  ;;  %v4831_v26 = vld [vmem:[#allocation2 + $0x81] sm:$0x1]  ;;  %4821 = vst.msk [vmem:[#allocation2 + $0x90] sm:$0xff] %vm1714_vm13, %v4780_v25  ;;  %v20626_v45 = vld [vmem:[#allocation2 + $0x62] sm:$0xff]  ;;  %v5279_v19 = vpack.c.bf16 %v4877_v5, %v20544_v12  ;;  %v18743_v12 = vld [vmem:[%s23121_s1 + $0x4f8] sm:$0xff]  }
 0x83b   : > { %4851 = vst.msk [vmem:[#allocation2 + $0x80] sm:$0x1] %vm1756_vm15, %v4831_v26  ;;  %v18742_v26 = vld [vmem:[%s23121_s1 + $0x4f0] sm:$0xff]  }
 0x83c   : > { %v4702_v43 = vpop.permute.xlu0 %4701  ;;  %v4782_v22 = vpop.permute.xlu1 %4781 }
 0x83d   : > { %4742 = vst.msk [vmem:[#allocation2 + $0x98] sm:$0x3] %vm1634_vm12, %v4702_v43  ;;  %v20574_v39 = vld [vmem:[#allocation2 + $0x70] sm:$0xff]  ;;  %v18744_v43 = vld [vmem:[%s23121_s1 + $0x500] sm:$0xff]  }
 0x83e   : > { %v4841_v8 = vld [vmem:[#allocation2 + $0x88] sm:$0x1]  ;;  %4822 = vst.msk [vmem:[#allocation2 + $0x98] sm:$0x3] %vm1716_vm14, %v4782_v22  ;;  %v20584_v13 = vpack.c.bf16 %v20574_v39, %v4877_v5  ;;  %v20624_v3 = vld [vmem:[#allocation2 + $0x72] sm:$0xff]  ;;  %v5417_v22 = vpack.c.bf16 %v20520_v10, %v20496_v18  ;;  %v5553_v18 = vpack.c.bf16 %v20598_v38, %v20581_v35  ;;  %v18748_v10 = vld [vmem:[%s23121_s1 + $0x520] sm:$0xff]  }
 0x83f   : > { %4861 = vst.msk [vmem:[#allocation2 + $0x89] sm:$0x1] %vm1756_vm15, %v4841_v8  ;;  %v20630_v9 = vpack.c.bf16 %v20624_v3, %v20626_v45  ;;  %v20684_v32 = vld [vmem:[#allocation2 + $0x81] sm:$0xff]  ;;  %v18750_v8 = vld [vmem:[%s23121_s1 + $0x530] sm:$0xff]  }
 0x840   : > { %v5418_v42 = vpack.c.bf16 %v20684_v32, %v20524_v0  ;;  %v18749_v0 = vld [vmem:[%s23121_s1 + $0x528] sm:$0xff]   ;;  %v18752_v5 = vld [vmem:[%s23121_s1 + $0x540] sm:$0xff]   ;;  %v18754_v35 = vld [vmem:[%s23121_s1 + $0x550] sm:$0xff]  }
 0x841   : > { %16974 = vmatmul.mubr.msk.bf16.vlgmr.msra.gmra.mrb[8].mxu1 %vm170_vm0, %v20551_v14  ;;  %v4832_v11 = vld [vmem:[#allocation2 + $0x91] sm:$0x1] }
 0x842   : > { %16982 = vmatpush3.bf16.msra.mxu1 %v18729_v2  ;;  %16977 = vmatprep.mubr.msk.bf16.mxu1 %vm170_vm0, %v20561_v7  ;;  %v20571_v44 = vld [vmem:[#allocation2 + $0x80] sm:$0xff]  ;;  %4852 = vst.msk [vmem:[#allocation2 + $0x90] sm:$0x1] %vm1756_vm15, %v4832_v11  ;;  %v5555_v11 = vpack.c.bf16 %v20626_v45, %v20600_v54  ;;  %v18762_v54 = vld [vmem:[%s23121_s1 + $0x590] sm:$0xff]  }
 0x843   : > { %16983 = vmatprep.subr.bf16.mxu1 %v18730_v56  ;;  %4869 = vst.msk [vmem:[#allocation2 + $0x90] sm:$0xff] %vm170_vm0, %v20571_v44  ;;  %v18736_v2 = vld [vmem:[%s23121_s1 + $0x4c0] sm:$0xff]   ;;  %v5280_v25 = vpack.c.bf16 %v20571_v44, %v20574_v39 }
 0x845   : > { %v4842_v51 = vld [vmem:[#allocation2 + $0x98] sm:$0x1] }
 0x846   : > { %16984 = vmatpush3.bf16.msra.mxu1 %v18730_v56  ;;  %v4866_v28 = vld [vmem:[#allocation2 + $0x88] sm:$0x3]  ;;  %4862 = vst.msk [vmem:[#allocation2 + $0x99] sm:$0x1] %vm1756_vm15, %v4842_v51  ;;  %v5554_v56 = vpack.c.bf16 %v20604_v55, %v20602_v58  ;;  %v18755_v51 = vld [vmem:[%s23121_s1 + $0x558] sm:$0xff]  }
 0x847   : > { %16985 = vmatprep.subr.bf16.mxu1 %v18731_v36  ;;  %4870 = vst.msk [vmem:[#allocation2 + $0x98] sm:$0x3] %vm172_vm1, %v4866_v28  ;;  %v5552_v39 = vld [vmem:[#allocation2 + $0x82] sm:$0xff] }
 0x848   : > { %v5556_v41 = vpack.c.bf16 %v5552_v39, %v20624_v3 }
 0x849   : > { %16978 = vmatmul.mubr.msk.bf16.gmra.mrb[12].mxu1 %vm170_vm0, %v20584_v13 }
 0x84a   : > { %16986 = vmatpush3.bf16.msra.mxu1 %v18731_v36  ;;  %16991 = vmatprep.mubr.msk.bf16.mxu1 %vm170_vm0, %v5139_v37  ;;  %v18751_v36 = vld [vmem:[%s23121_s1 + $0x538] sm:$0xff]   ;;  %v20736_v28 = vld [vmem:[#allocation2 + $0x90] sm:$0xff] }
 0x84b   : > { %16987 = vmatprep.subr.bf16.mxu1 %v18732_v49  ;;  %v5694_v37 = vpack.c.bf16 %v20736_v28, %v20571_v44  ;;  %v18759_v44 = vld [vmem:[%s23121_s1 + $0x578] sm:$0xff]  }
 0x84e   : > { %16988 = vmatpush3.bf16.msra.mxu1 %v18732_v49  ;;  %v18753_v49 = vld [vmem:[%s23121_s1 + $0x548] sm:$0xff]  }
 0x84f   : > { %16989 = vmatprep.subr.bf16.mxu1 %v18733_v52 }
 0x852   : > { %16990 = vmatpush3.bf16.msra.mxu1 %v18733_v52  ;;  %v18760_v52 = vld [vmem:[%s23121_s1 + $0x580] sm:$0xff]  }
 0x853   : > { %16999 = vmatprep.subr.bf16.mxu1 %v18734_v47 }
 0x855   : > { %16992 = vmatmul.mubr.msk.bf16.vlgmr.msra.gmra.mrb[8].mxu1 %vm170_vm0, %v20608_v59 }
 0x856   : > { %16995 = vmatprep.mubr.msk.bf16.mxu1 %vm170_vm0, %v20615_v63  ;;  %17000 = vmatpush3.bf16.msra.mxu1 %v18734_v47  ;;  %v5828_v47 = vld [vmem:[#allocation2 + $0x91] sm:$0xff] }
 0x857   : > { %17001 = vmatprep.subr.bf16.mxu1 %v18735_v60  ;;  %v5832_v38 = vpack.c.bf16 %v5828_v47, %v20684_v32  ;;  %v18768_v47 = vld [vmem:[%s23121_s1 + $0x5e8] sm:$0xff]  }
 0x85a   : > { %17002 = vmatpush3.bf16.msra.mxu1 %v18735_v60 }
 0x85b   : > { %17003 = vmatprep.subr.bf16.mxu1 %v18736_v2 }
 0x85d   : > { %16996 = vmatmul.mubr.msk.bf16.gmra.mrb[12].mxu1 %vm170_vm0, %v20630_v9 }
 0x85e   : > { %17004 = vmatpush3.bf16.msra.mxu1 %v18736_v2  ;;  %17009 = vmatprep.mubr.msk.bf16.mxu1 %vm170_vm0, %v5277_v62 }
 0x85f   : > { %17005 = vmatprep.subr.bf16.mxu1 %v18737_v61 }
 0x862   : > { %17006 = vmatpush3.bf16.msra.mxu1 %v18737_v61 }
 0x863   : > { %17007 = vmatprep.subr.bf16.mxu1 %v18738_v31 }
 0x866   : > { %17008 = vmatpush3.bf16.msra.mxu1 %v18738_v31 }
 0x867   : > { %17017 = vmatprep.subr.bf16.mxu1 %v18739_v50 }
 0x869   : > { %17010 = vmatmul.mubr.msk.bf16.vlgmr.msra.gmra.mrb[8].mxu1 %vm170_vm0, %v5278_v30 }
 0x86a   : > { %17013 = vmatprep.mubr.msk.bf16.mxu1 %vm170_vm0, %v5279_v19  ;;  %17018 = vmatpush3.bf16.msra.mxu1 %v18739_v50 }
 0x86b   : > { %17019 = vmatprep.subr.bf16.mxu1 %v18740_v4 }
 0x86e   : > { %17020 = vmatpush3.bf16.msra.mxu1 %v18740_v4 }
 0x86f   : > { %17021 = vmatprep.subr.bf16.mxu1 %v18741_v21 }
 0x871   : > { %17014 = vmatmul.mubr.msk.bf16.gmra.mrb[12].mxu1 %vm170_vm0, %v5280_v25 }
 0x872   : > { %17022 = vmatpush3.bf16.msra.mxu1 %v18741_v21  ;;  %17027 = vmatprep.mubr.msk.bf16.mxu1 %vm170_vm0, %v5415_v29 }
 0x873   : > { %17023 = vmatprep.subr.bf16.mxu1 %v18742_v26 }
 0x876   : > { %17024 = vmatpush3.bf16.msra.mxu1 %v18742_v26 }
 0x877   : > { %17025 = vmatprep.subr.bf16.mxu1 %v18743_v12 }
 0x87a   : > { %17026 = vmatpush3.bf16.msra.mxu1 %v18743_v12 }
 0x87b   : > { %17035 = vmatprep.subr.bf16.mxu1 %v18744_v43 }
 0x87d   : > { %17028 = vmatmul.mubr.msk.bf16.vlgmr.msra.gmra.mrb[8].mxu1 %vm170_vm0, %v5416_v40 }
 0x87e   : > { %17031 = vmatprep.mubr.msk.bf16.mxu1 %vm170_vm0, %v5417_v22  ;;  %17036 = vmatpush3.bf16.msra.mxu1 %v18744_v43 }
 0x87f   : > { %17037 = vmatprep.subr.bf16.mxu1 %v18745_v33 }
 0x882   : > { %17038 = vmatpush3.bf16.msra.mxu1 %v18745_v33  ;;  %v6162_v33 = vld [vmem:[#allocation2 + $0x8] sm:$0x3] }
 0x883   : > { %17039 = vmatprep.subr.bf16.mxu1 %v18746_v46 }
 0x885   : > { %17032 = vmatmul.mubr.msk.bf16.gmra.mrb[12].mxu1 %vm170_vm0, %v5418_v42 }
 0x886   : > { %17040 = vmatpush3.bf16.msra.mxu1 %v18746_v46  ;;  %17045 = vmatprep.mubr.msk.bf16.mxu1 %vm170_vm0, %v5553_v18 }
 0x887   : > { %17041 = vmatprep.subr.bf16.mxu1 %v18747_v53 }
 0x88a   : > { %17042 = vmatpush3.bf16.msra.mxu1 %v18747_v53 }
 0x88b   : > { %17043 = vmatprep.subr.bf16.mxu1 %v18748_v10 }
 0x88e   : > { %17044 = vmatpush3.bf16.msra.mxu1 %v18748_v10 }
 0x88f   : > { %17053 = vmatprep.subr.bf16.mxu1 %v18749_v0 }
 0x891   : > { %17046 = vmatmul.mubr.msk.bf16.vlgmr.msra.gmra.mrb[8].mxu1 %vm170_vm0, %v5554_v56 }
 0x892   : > { %17049 = vmatprep.mubr.msk.bf16.mxu1 %vm170_vm0, %v5555_v11  ;;  %17054 = vmatpush3.bf16.msra.mxu1 %v18749_v0 }
 0x893   : > { %17055 = vmatprep.subr.bf16.mxu1 %v18750_v8 }
 0x896   : > { %17056 = vmatpush3.bf16.msra.mxu1 %v18750_v8 }
 0x897   : > { %17057 = vmatprep.subr.bf16.mxu1 %v18751_v36 }
 0x899   : > { %17050 = vmatmul.mubr.msk.bf16.gmra.mrb[12].mxu1 %vm170_vm0, %v5556_v41  ;;  %v18764_v41 = vld [vmem:[%s23121_s1 + $0x5c8] sm:$0xff]  }
 0x89a   : > { %17058 = vmatpush3.bf16.msra.mxu1 %v18751_v36  ;;  %17063 = vmatprep.mubr.msk.bf16.mxu1 %vm170_vm0, %v20551_v14  ;;  %v18756_v14 = vld [vmem:[%s23121_s1 + $0x560] sm:$0xff]  }
 0x89b   : > { %17059 = vmatprep.subr.bf16.mxu1 %v18752_v5  ;;  %17107 = vmatprep.subr.bf16.mxu0 %v18764_v41 }
 0x89c   : > { %17108 = vmatpush3.bf16.msra.mxu0 %v18764_v41 }
 0x89e   : > { %17060 = vmatpush3.bf16.msra.mxu1 %v18752_v5 }
 0x89f   : > { %17061 = vmatprep.subr.bf16.mxu1 %v18753_v49 }
 0x8a2   : > { %17062 = vmatpush3.bf16.msra.mxu1 %v18753_v49 }
 0x8a3   : > { %17071 = vmatprep.subr.bf16.mxu1 %v18754_v35 }
 0x8a5   : > { %17064 = vmatmul.mubr.msk.bf16.vlgmr.msra.gmra.mrb[8].mxu1 %vm170_vm0, %v20561_v7  ;;  %v18757_v7 = vld [vmem:[%s23121_s1 + $0x568] sm:$0xff]  }
 0x8a6   : > { %17067 = vmatprep.mubr.msk.bf16.mxu1 %vm170_vm0, %v20584_v13  ;;  %17072 = vmatpush3.bf16.msra.mxu1 %v18754_v35  ;;  %v18758_v13 = vld [vmem:[%s23121_s1 + $0x570] sm:$0xff]  }
 0x8a7   : > { %17073 = vmatprep.subr.bf16.mxu1 %v18755_v51 }
 0x8aa   : > { %17074 = vmatpush3.bf16.msra.mxu1 %v18755_v51 }
 0x8ab   : > { %17075 = vmatprep.subr.bf16.mxu1 %v18756_v14 }
 0x8ad   : > { %17068 = vmatmul.mubr.msk.bf16.gmra.mrb[12].mxu1 %vm170_vm0, %v5694_v37 }
 0x8ae   : > { %17076 = vmatpush3.bf16.msra.mxu1 %v18756_v14  ;;  %17081 = vmatprep.mubr.msk.bf16.mxu1 %vm170_vm0, %v20474_v48  ;;  %v18761_v48 = vld [vmem:[%s23121_s1 + $0x588] sm:$0xff]   ;;  %v18765_v14 = vld [vmem:[%s23121_s1 + $0x5d0] sm:$0xff]  }
 0x8af   : > { %17077 = vmatprep.subr.bf16.mxu1 %v18757_v7  ;;  %17109 = vmatprep.subr.bf16.mxu0 %v18765_v14 }
 0x8b0   : > { %17110 = vmatpush3.bf16.msra.mxu0 %v18765_v14 }
 0x8b2   : > { %17078 = vmatpush3.bf16.msra.mxu1 %v18757_v7 }
 0x8b3   : > { %17079 = vmatprep.subr.bf16.mxu1 %v18758_v13 }
 0x8b6   : > { %17080 = vmatpush3.bf16.msra.mxu1 %v18758_v13  ;;  %v18766_v13 = vld [vmem:[%s23121_s1 + $0x5d8] sm:$0xff]  }
 0x8b7   : > { %17089 = vmatprep.subr.bf16.mxu1 %v18759_v44  ;;  %17111 = vmatprep.subr.bf16.mxu0 %v18766_v13 }
 0x8b8   : > { %17112 = vmatpush3.bf16.msra.mxu0 %v18766_v13  ;;  %v18771_v13 = vld [vmem:[%s23121_s1 + $0x5b0] sm:$0xff]  }
 0x8b9   : > { %17082 = vmatmul.mubr.msk.bf16.vlgmr.msra.gmra.mrb[8].mxu1 %vm170_vm0, %v20503_v57  ;;  %v18763_v57 = vld [vmem:[%s23121_s1 + $0x598] sm:$0xff]  }
 0x8ba   : > { %17085 = vmatprep.mubr.msk.bf16.mxu1 %vm170_vm0, %v20530_v17  ;;  %17090 = vmatpush3.bf16.msra.mxu1 %v18759_v44  ;;  %v5966_v17 = vld [vmem:[#allocation2 + $0x92] sm:$0xff] }
 0x8bb   : > { %17091 = vmatprep.subr.bf16.mxu1 %v18760_v52  ;;  %v5970_v58 = vpack.c.bf16 %v5966_v17, %v5552_v39 }
 0x8be   : > { %17092 = vmatpush3.bf16.msra.mxu1 %v18760_v52 }
 0x8bf   : > { %17093 = vmatprep.subr.bf16.mxu1 %v18761_v48 }
 0x8c1   : > { %17086 = vmatmul.mubr.msk.bf16.gmra.mrb[12].mxu1 %vm170_vm0, %v5832_v38 }
 0x8c2   : > { %17094 = vmatpush3.bf16.msra.mxu1 %v18761_v48  ;;  %17099 = vmatprep.mubr.msk.bf16.mxu1 %vm170_vm0, %v20608_v59  ;;  %v18767_v48 = vld [vmem:[%s23121_s1 + $0x5e0] sm:$0xff]  }
 0x8c3   : > { %17095 = vmatprep.subr.bf16.mxu1 %v18762_v54  ;;  %17113 = vmatprep.subr.bf16.mxu0 %v18767_v48 }
 0x8c4   : > { %17114 = vmatpush3.bf16.msra.mxu0 %v18767_v48  ;;  %v18772_v48 = vld [vmem:[%s23121_s1 + $0x5b8] sm:$0xff]  }
 0x8c5   : > { %17115 = vmatprep.subr.bf16.mxu0 %v18768_v47 }
 0x8c6   : > { %17096 = vmatpush3.bf16.msra.mxu1 %v18762_v54 }
 0x8c7   : > { %17097 = vmatprep.subr.bf16.mxu1 %v18763_v57 }
 0x8c8   : > { %17116 = vmatpush3.bf16.msra.mxu0 %v18768_v47 }
 0x8ca   : > { %17098 = vmatpush3.bf16.msra.mxu1 %v18763_v57 }
 0x8cd   : > { %17100 = vmatmul.mubr.msk.bf16.vlgmr.msra.gmra.mrb[8].mxu1 %vm170_vm0, %v20615_v63 }
 0x8ce   : > { %17103 = vmatprep.mubr.msk.bf16.mxu1 %vm170_vm0, %v20630_v9 }
 0x8d5   : > { %17104 = vmatmul.mubr.msk.bf16.gmra.mrb[12].mxu1 %vm170_vm0, %v5970_v58 }
 0x9a0   : > { %v17101_v55 = vpop.f32.mrb[8].mxu1 }
 0x9a1   : > { %v6058_v59 = vpop.f32.mrb[9].mxu1  ;;  %v6107_v45 = vmul.f32 0.01, %v17101_v55  ;;  %vm6099_vm5 = vcmp.ge.f32.partialorder %v17101_v55, 0.0 }
 0x9a2   : > { %vm6097_vm3 = vcmp.ge.f32.partialorder %v6058_v59, 0.0  ;;  %v6105_v60 = vmul.f32 0.01, %v6058_v59  ;;  %v17102_v2 = vpop.f32.mrb[10].mxu1 }
 0x9a3   : > { %v6061_v3 = vpop.f32.mrb[11].mxu1  ;;  %v6108_v63 = vmul.f32 0.01, %v17102_v2  ;;  %vm6100_vm6 = vcmp.ge.f32.partialorder %v17102_v2, 0.0  ;;  %v6115_v50 = vsel %vm6099_vm5, %v17101_v55, %v6107_v45 }
 0x9a4   : > { %vm6098_vm4 = vcmp.ge.f32.partialorder %v6061_v3, 0.0  ;;  %v6106_v61 = vmul.f32 0.01, %v6061_v3  ;;  %v6113_v62 = vsel %vm6097_vm3, %v6058_v59, %v6105_v60  ;;  %v20841_v59 = vld [vmem:[%s23121_s1 + $0x5a0] sm:$0xff]  }
 0x9a5   : > { %6129 = vrot.lane.b32.xlu0 %v6113_v62, %s19063_s8  ;;  %v6116_v21 = vsel %vm6100_vm6, %v17102_v2, %v6108_v63  ;;  %17125 = vmatprep.subr.bf16.mxu0 %v20841_v59 }
 0x9a6   : > { %v6114_v31 = vsel %vm6098_vm4, %v6061_v3, %v6106_v61  ;;  %v6180_v61 = vld [vmem:[#allocation2 + $0x98] sm:$0x3] }
 0x9a7   : > { %6131 = vrot.lane.b32.xlu1 %v6114_v31, %s19063_s8 }
 0x9a8   : > { %v17105_v9 = vpop.f32.mrb[12].mxu1 }
 0x9a9   : > { %6133 = vrot.lane.b32.xlu0 %v6115_v50, %s19063_s8  ;;  %v6074_v30 = vpop.f32.mrb[13].mxu1  ;;  %v6111_v26 = vmul.f32 0.01, %v17105_v9  ;;  %vm6103_vm9 = vcmp.ge.f32.partialorder %v17105_v9, 0.0 }
 0x9aa   : > { %vm6101_vm7 = vcmp.ge.f32.partialorder %v6074_v30, 0.0  ;;  %v6109_v4 = vmul.f32 0.01, %v6074_v30  ;;  %v17106_v19 = vpop.f32.mrb[14].mxu1 }
 0x9ab   : > { %6135 = vrot.lane.b32.xlu1 %v6116_v21, %s19063_s8  ;;  %v6077_v25 = vpop.f32.mrb[15].mxu1  ;;  %v6119_v40 = vsel %vm6103_vm9, %v17105_v9, %v6111_v26  ;;  %v6112_v22 = vmul.f32 0.01, %v17106_v19  ;;  %vm6104_vm10 = vcmp.ge.f32.partialorder %v17106_v19, 0.0 }
 0x9ac   : > { %vm6102_vm8 = vcmp.ge.f32.partialorder %v6077_v25, 0.0  ;;  %v6110_v29 = vmul.f32 0.01, %v6077_v25  ;;  %v6117_v12 = vsel %vm6101_vm7, %v6074_v30, %v6109_v4 }
 0x9ad   : > { %6137 = vrot.lane.b32.xlu0 %v6117_v12, %s19063_s8  ;;  %v6120_v46 = vsel %vm6104_vm10, %v17106_v19, %v6112_v22 }
 0x9ae   : > { %v6118_v43 = vsel %vm6102_vm8, %v6077_v25, %v6110_v29 }
 0x9af   : > { %6139 = vrot.lane.b32.xlu1 %v6118_v43, %s19063_s8 }
 0x9b1   : > { %6141 = vrot.lane.b32.xlu0 %v6119_v40, %s19063_s8 }
 0x9b3   : > { %6201 = vrot.lane.b32.xlu1 %v20522_v6, %s19064_s7 }
 0x9b5   : > { %6203 = vrot.lane.b32.xlu0 %v6162_v33, %s19064_s7 }
 0x9b7   : > { %6281 = vrot.lane.b32.xlu1 %v20522_v6, %s19063_s8 }
 0x9b9   : > { %6283 = vrot.lane.b32.xlu0 %v6162_v33, %s19063_s8 }
 0x9bb   : > { %6143 = vrot.lane.b32.xlu1 %v6120_v46, %s19063_s8 }
 0xa17   : > { %v6130_v32 = vpop.permute.xlu0 %6129 }
 0xa18   : > { %6153 = vst.msk [vmem:[#allocation2 + $0x11] sm:$0xff] %vm233_vm2, %v6130_v32 }
 0xa19   : > { %v6132_v42 = vpop.permute.xlu1 %6131 }
 0xa1a   : > { %6154 = vst.msk [vmem:[#allocation2 + $0x21] sm:$0xff] %vm233_vm2, %v6132_v42 }
 0xa1b   : > { %v6134_v53 = vpop.permute.xlu0 %6133 }
 0xa1c   : > { %6155 = vst.msk [vmem:[#allocation2 + $0x31] sm:$0xff] %vm233_vm2, %v6134_v53 }
 0xa1d   : > { %v6136_v18 = vpop.permute.xlu1 %6135 }
 0xa1e   : > { %6156 = vst.msk [vmem:[#allocation2 + $0x41] sm:$0xff] %vm233_vm2, %v6136_v18 }
 0xa1f   : > { %v6138_v10 = vpop.permute.xlu0 %6137  ;;  %v6164_v49 = vld [vmem:[#allocation2 + $0x18] sm:$0x3]  ;;  %v6163_v35 = vld [vmem:[#allocation2 + $0x10] sm:$0xff] }
 0xa20   : > { %6157 = vst.msk [vmem:[#allocation2 + $0x51] sm:$0xff] %vm233_vm2, %v6138_v10 }
 0xa21   : > { %v6140_v6 = vpop.permute.xlu1 %6139  ;;  %v6165_v38 = vld [vmem:[#allocation2 + $0x20] sm:$0xff]  ;;  %v6166_v54 = vld [vmem:[#allocation2 + $0x28] sm:$0x3] }
 0xa22   : > { %6158 = vst.msk [vmem:[#allocation2 + $0x61] sm:$0xff] %vm233_vm2, %v6140_v6 }
 0xa23   : > { %v6142_v0 = vpop.permute.xlu0 %6141  ;;  %v6167_v56 = vld [vmem:[#allocation2 + $0x30] sm:$0xff]  ;;  %v6168_v8 = vld [vmem:[#allocation2 + $0x38] sm:$0x3] }
 0xa24   : > { %6159 = vst.msk [vmem:[#allocation2 + $0x71] sm:$0xff] %vm233_vm2, %v6142_v0  ;;  %6213 = vrot.lane.b32.xlu0 %v6167_v56, %s19064_s7  ;;  %6215 = vrot.lane.b32.xlu1 %v6168_v8, %s19064_s7 }
 0xa25   : > { %v6202_v11 = vpop.permute.xlu1 %6201  ;;  %v6169_v7 = vld [vmem:[#allocation2 + $0x40] sm:$0xff]  ;;  %v6170_v52 = vld [vmem:[#allocation2 + $0x48] sm:$0x3] }
 0xa26   : > { %6261 = vst.msk [vmem:[#allocation2] sm:$0xff] %vm1632_vm11, %v6202_v11 }
 0xa27   : > { %v6204_v36 = vpop.permute.xlu0 %6203  ;;  %v6171_v58 = vld [vmem:[#allocation2 + $0x50] sm:$0xff]  ;;  %v6172_v55 = vld [vmem:[#allocation2 + $0x58] sm:$0x3] }
 0xa28   : > { %6262 = vst.msk [vmem:[#allocation2 + $0x8] sm:$0x3] %vm1634_vm12, %v6204_v36  ;;  %6293 = vrot.lane.b32.xlu0 %v6167_v56, %s19063_s8  ;;  %6295 = vrot.lane.b32.xlu1 %v6168_v8, %s19063_s8 }
 0xa29   : > { %v6282_v39 = vpop.permute.xlu1 %6281  ;;  %v6174_v60 = vld [vmem:[#allocation2 + $0x68] sm:$0x3]  ;;  %v6173_v2 = vld [vmem:[#allocation2 + $0x60] sm:$0xff] }
 0xa2a   : > { %6341 = vst.msk [vmem:[#allocation2] sm:$0xff] %vm1714_vm13, %v6282_v39 }
 0xa2b   : > { %v6284_v5 = vpop.permute.xlu0 %6283  ;;  %v6175_v57 = vld [vmem:[#allocation2 + $0x70] sm:$0xff]  ;;  %v6176_v17 = vld [vmem:[#allocation2 + $0x78] sm:$0x3] }
 0xa2c   : > { %6342 = vst.msk [vmem:[#allocation2 + $0x8] sm:$0x3] %vm1716_vm14, %v6284_v5  ;;  %6207 = vrot.lane.b32.xlu0 %v6164_v49, %s19064_s7  ;;  %6205 = vrot.lane.b32.xlu1 %v6163_v35, %s19064_s7 }
 0xa2d   : > { %v6144_v51 = vpop.permute.xlu1 %6143 }
 0xa2e   : > { %6160 = vst.msk [vmem:[#allocation2 + $0x81] sm:$0xff] %vm233_vm2, %v6144_v51  ;;  %v18770_v51 = vld [vmem:[%s23121_s1 + $0x5a8] sm:$0xff]  }
 0xa30   : > { %6287 = vrot.lane.b32.xlu0 %v6164_v49, %s19063_s8  ;;  %6285 = vrot.lane.b32.xlu1 %v6163_v35, %s19063_s8 }
 0xa31   : > { %v6361_v37 = vld [vmem:[#allocation2 + $0x1] sm:$0x1] }
 0xa32   : > { %6381 = vst.msk [vmem:[#allocation2] sm:$0x1] %vm1756_vm15, %v6361_v37 }
 0xa33   : > { %v6371_v44 = vld [vmem:[#allocation2 + $0x8] sm:$0x1] }
 0xa34   : > { %6391 = vst.msk [vmem:[#allocation2 + $0x9] sm:$0x1] %vm1756_vm15, %v6371_v44  ;;  %6217 = vrot.lane.b32.xlu0 %v6169_v7, %s19064_s7  ;;  %6219 = vrot.lane.b32.xlu1 %v6170_v52, %s19064_s7 }
 0xa35   : > { %v6177_v3 = vld [vmem:[#allocation2 + $0x80] sm:$0xff]  ;;  %v6178_v45 = vld [vmem:[#allocation2 + $0x88] sm:$0x3] }
 0xa38   : > { %6297 = vrot.lane.b32.xlu0 %v6169_v7, %s19063_s8  ;;  %6299 = vrot.lane.b32.xlu1 %v6170_v52, %s19063_s8 }
 0xa3c   : > { %6209 = vrot.lane.b32.xlu0 %v6165_v38, %s19064_s7  ;;  %6211 = vrot.lane.b32.xlu1 %v6166_v54, %s19064_s7 }
 0xa40   : > { %6289 = vrot.lane.b32.xlu0 %v6165_v38, %s19063_s8  ;;  %6291 = vrot.lane.b32.xlu1 %v6166_v54, %s19063_s8 }
 0xa44   : > { %6229 = vrot.lane.b32.xlu0 %v6175_v57, %s19064_s7  ;;  %6231 = vrot.lane.b32.xlu1 %v6176_v17, %s19064_s7 }
 0xa48   : > { %6221 = vrot.lane.b32.xlu0 %v6171_v58, %s19064_s7  ;;  %6223 = vrot.lane.b32.xlu1 %v6172_v55, %s19064_s7 }
 0xa4c   : > { %6301 = vrot.lane.b32.xlu0 %v6171_v58, %s19063_s8  ;;  %6303 = vrot.lane.b32.xlu1 %v6172_v55, %s19063_s8 }
 0xa50   : > { %6227 = vrot.lane.b32.xlu1 %v6174_v60, %s19064_s7  ;;  %6225 = vrot.lane.b32.xlu0 %v6173_v2, %s19064_s7 }
 0xa54   : > { %6307 = vrot.lane.b32.xlu1 %v6174_v60, %s19063_s8  ;;  %6305 = vrot.lane.b32.xlu0 %v6173_v2, %s19063_s8 }
 0xa58   : > { %6311 = vrot.lane.b32.xlu1 %v6176_v17, %s19063_s8  ;;  %6309 = vrot.lane.b32.xlu0 %v6175_v57, %s19063_s8 }
 0xa5c   : > { %6313 = vrot.lane.b32.xlu1 %v6177_v3, %s19063_s8  ;;  %6233 = vrot.lane.b32.xlu0 %v6177_v3, %s19064_s7  ;;  %v18774_v3 = vld [vmem:[%s23121_s1 + $0x5f0] sm:$0xff]  }
 0xa60   : > { %6315 = vrot.lane.b32.xlu1 %v6178_v45, %s19063_s8  ;;  %6235 = vrot.lane.b32.xlu0 %v6178_v45, %s19064_s7 }
 0xa64   : > { %6317 = vrot.lane.b32.xlu1 %v20736_v28, %s19063_s8  ;;  %6237 = vrot.lane.b32.xlu0 %v20736_v28, %s19064_s7 }
 0xa68   : > { %6319 = vrot.lane.b32.xlu1 %v6180_v61, %s19063_s8  ;;  %6239 = vrot.lane.b32.xlu0 %v6180_v61, %s19064_s7 }
 0xa96   : > { %v6214_v62 = vpop.permute.xlu0 %6213  ;;  %v6216_v63 = vpop.permute.xlu1 %6215 }
 0xa97   : > { %6267 = vst.msk [vmem:[#allocation2 + $0x30] sm:$0xff] %vm1632_vm11, %v6214_v62 }
 0xa98   : > { %6268 = vst.msk [vmem:[#allocation2 + $0x38] sm:$0x3] %vm1634_vm12, %v6216_v63 }
 0xa9a   : > { %v6294_v31 = vpop.permute.xlu0 %6293  ;;  %v6296_v9 = vpop.permute.xlu1 %6295 }
 0xa9b   : > { %6347 = vst.msk [vmem:[#allocation2 + $0x30] sm:$0xff] %vm1714_vm13, %v6294_v31 }
 0xa9c   : > { %6348 = vst.msk [vmem:[#allocation2 + $0x38] sm:$0x3] %vm1716_vm14, %v6296_v9 }
 0xa9e   : > { %v6208_v50 = vpop.permute.xlu0 %6207  ;;  %v6206_v30 = vpop.permute.xlu1 %6205 }
 0xa9f   : > { %6264 = vst.msk [vmem:[#allocation2 + $0x18] sm:$0x3] %vm1634_vm12, %v6208_v50 }
 0xaa0   : > { %6263 = vst.msk [vmem:[#allocation2 + $0x10] sm:$0xff] %vm1632_vm11, %v6206_v30 }
 0xaa2   : > { %v6288_v28 = vpop.permute.xlu0 %6287  ;;  %v6286_v4 = vpop.permute.xlu1 %6285  ;;  %v6364_v21 = vld [vmem:[#allocation2 + $0x31] sm:$0x1] }
 0xaa3   : > { %v6374_v19 = vld [vmem:[#allocation2 + $0x38] sm:$0x1]  ;;  %6344 = vst.msk [vmem:[#allocation2 + $0x18] sm:$0x3] %vm1716_vm14, %v6288_v28 }
 0xaa4   : > { %6343 = vst.msk [vmem:[#allocation2 + $0x10] sm:$0xff] %vm1714_vm13, %v6286_v4  ;;  %v20901_v49 = vld [vmem:[#allocation2 + $0x31] sm:$0xff] }
 0xaa5   : > { %6394 = vst.msk [vmem:[#allocation2 + $0x39] sm:$0x1] %vm1756_vm15, %v6374_v19  ;;  %6384 = vst.msk [vmem:[#allocation2 + $0x30] sm:$0x1] %vm1756_vm15, %v6364_v21 }
 0xaa6   : > { %v6218_v25 = vpop.permute.xlu0 %6217  ;;  %v6220_v26 = vpop.permute.xlu1 %6219 }
 0xaa7   : > { %6269 = vst.msk [vmem:[#allocation2 + $0x40] sm:$0xff] %vm1632_vm11, %v6218_v25 }
 0xaa8   : > { %6270 = vst.msk [vmem:[#allocation2 + $0x48] sm:$0x3] %vm1634_vm12, %v6220_v26 }
 0xaaa   : > { %v6298_v12 = vpop.permute.xlu0 %6297  ;;  %v6300_v43 = vpop.permute.xlu1 %6299  ;;  %v6372_v40 = vld [vmem:[#allocation2 + $0x18] sm:$0x1] }
 0xaab   : > { %v6362_v29 = vld [vmem:[#allocation2 + $0x11] sm:$0x1]  ;;  %6349 = vst.msk [vmem:[#allocation2 + $0x40] sm:$0xff] %vm1714_vm13, %v6298_v12 }
 0xaac   : > { %6382 = vst.msk [vmem:[#allocation2 + $0x10] sm:$0x1] %vm1756_vm15, %v6362_v29  ;;  %6392 = vst.msk [vmem:[#allocation2 + $0x19] sm:$0x1] %vm1756_vm15, %v6372_v40  ;;  %v20893_v36 = vld [vmem:[#allocation2 + $0x11] sm:$0xff] }
 0xaad   : > { %6350 = vst.msk [vmem:[#allocation2 + $0x48] sm:$0x3] %vm1716_vm14, %v6300_v43 }
 0xaae   : > { %v6210_v33 = vpop.permute.xlu0 %6209  ;;  %v6212_v22 = vpop.permute.xlu1 %6211 }
 0xaaf   : > { %6265 = vst.msk [vmem:[#allocation2 + $0x20] sm:$0xff] %vm1632_vm11, %v6210_v33 }
 0xab0   : > { %6266 = vst.msk [vmem:[#allocation2 + $0x28] sm:$0x3] %vm1634_vm12, %v6212_v22 }
 0xab2   : > { %v6290_v32 = vpop.permute.xlu0 %6289  ;;  %v6292_v42 = vpop.permute.xlu1 %6291  ;;  %v6365_v10 = vld [vmem:[#allocation2 + $0x41] sm:$0x1] }
 0xab3   : > { %v20882_v46 = vld [vmem:[#allocation2 + $0x10] sm:$0xff]  ;;  %v6402_v53 = vld [vmem:[#allocation2 + $0x18] sm:$0x3]  ;;  %6345 = vst.msk [vmem:[#allocation2 + $0x20] sm:$0xff] %vm1714_vm13, %v6290_v32 }
 0xab4   : > { %6405 = vst.msk [vmem:[#allocation2] sm:$0xff] %vm170_vm0, %v20882_v46  ;;  %v6375_v18 = vld [vmem:[#allocation2 + $0x48] sm:$0x1]  ;;  %v20977_v32 = vld [vmem:[#allocation2 + $0x30] sm:$0xff] }
 0xab5   : > { %6346 = vst.msk [vmem:[#allocation2 + $0x28] sm:$0x3] %vm1716_vm14, %v6292_v42  ;;  %v20925_v47 = vld [vmem:[#allocation2 + $0x41] sm:$0xff] }
 0xab6   : > { %6406 = vst.msk [vmem:[#allocation2 + $0x8] sm:$0x3] %vm172_vm1, %v6402_v53  ;;  %v6230_v6 = vpop.permute.xlu0 %6229  ;;  %v6232_v0 = vpop.permute.xlu1 %6231 }
 0xab7   : > { %6395 = vst.msk [vmem:[#allocation2 + $0x49] sm:$0x1] %vm1756_vm15, %v6375_v18  ;;  %6385 = vst.msk [vmem:[#allocation2 + $0x40] sm:$0x1] %vm1756_vm15, %v6365_v10  ;;  %v18775_v18 = vld [vmem:[%s23121_s1 + $0x5f8] sm:$0xff]  }
 0xab8   : > { %6275 = vst.msk [vmem:[#allocation2 + $0x70] sm:$0xff] %vm1632_vm11, %v6230_v6 }
 0xab9   : > { %6276 = vst.msk [vmem:[#allocation2 + $0x78] sm:$0x3] %vm1634_vm12, %v6232_v0 }
 0xaba   : > { %v6222_v56 = vpop.permute.xlu0 %6221  ;;  %v6224_v8 = vpop.permute.xlu1 %6223  ;;  %v6363_v14 = vld [vmem:[#allocation2 + $0x21] sm:$0x1] }
 0xabb   : > { %6271 = vst.msk [vmem:[#allocation2 + $0x50] sm:$0xff] %vm1632_vm11, %v6222_v56  ;;  %v20953_v9 = vld [vmem:[#allocation2] sm:$0xff] }
 0xabc   : > { %v6373_v39 = vld [vmem:[#allocation2 + $0x28] sm:$0x1]  ;;  %6272 = vst.msk [vmem:[#allocation2 + $0x58] sm:$0x3] %vm1634_vm12, %v6224_v8  ;;  %v6417_v25 = vpack.c.bf16 %v20882_v46, %v20953_v9  ;;  %v18776_v56 = vld [vmem:[%s23121_s1 + $0x600] sm:$0xff]  }
 0xabd   : > { %v6432_v11 = vld [vmem:[#allocation2 + $0x1] sm:$0xff]  ;;  %6393 = vst.msk [vmem:[#allocation2 + $0x29] sm:$0x1] %vm1756_vm15, %v6373_v39  ;;  %6383 = vst.msk [vmem:[#allocation2 + $0x20] sm:$0x1] %vm1756_vm15, %v6363_v14  ;;  %v21012_v14 = vld [vmem:[#allocation2 + $0x12] sm:$0xff] }
 0xabe   : > { %v6440_v41 = vpack.c.bf16 %v20893_v36, %v6432_v11  ;;  %v20899_v5 = vld [vmem:[#allocation2 + $0x21] sm:$0xff]  ;;  %v6302_v37 = vpop.permute.xlu0 %6301  ;;  %v6304_v7 = vpop.permute.xlu1 %6303 }
 0xabf   : > { %v20905_v35 = vpack.c.bf16 %v20901_v49, %v20899_v5  ;;  %6351 = vst.msk [vmem:[#allocation2 + $0x50] sm:$0xff] %vm1714_vm13, %v6302_v37  ;;  %v20984_v53 = vld [vmem:[#allocation2 + $0x40] sm:$0xff] }
 0xac0   : > { %17117 = vmatprep.mubr.msk.bf16.mxu0 %vm170_vm0, %v6440_v41  ;;  %6352 = vst.msk [vmem:[#allocation2 + $0x58] sm:$0x3] %vm1716_vm14, %v6304_v7  ;;  %v6669_v39 = vld [vmem:[#allocation2 + $0x2] sm:$0xff] }
 0xac1   : > { %17118 = vmatmul.mubr.msk.bf16.vlgmr.msra.gmra.mrb[24].mxu0 %vm170_vm0, %v20905_v35 }
 0xac2   : > { %17126 = vmatpush3.bf16.msra.mxu0 %v20841_v59  ;;  %v6226_v44 = vpop.permute.xlu0 %6225  ;;  %v6228_v52 = vpop.permute.xlu1 %6227  ;;  %v18773_v59 = vld [vmem:[%s23121_s1 + $0x5c0] sm:$0xff]  }
 0xac3   : > { %17127 = vmatprep.subr.bf16.mxu0 %v18770_v51  ;;  %6273 = vst.msk [vmem:[#allocation2 + $0x60] sm:$0xff] %vm1632_vm11, %v6226_v44  ;;  %v6677_v44 = vpack.c.bf16 %v21012_v14, %v6669_v39 }
 0xac4   : > { %6274 = vst.msk [vmem:[#allocation2 + $0x68] sm:$0x3] %vm1634_vm12, %v6228_v52  ;;  %v20972_v43 = vld [vmem:[#allocation2 + $0x20] sm:$0xff]  ;;  %v18778_v52 = vld [vmem:[%s23121_s1 + $0x610] sm:$0xff]  }
 0xac5   : > { %v20982_v42 = vpack.c.bf16 %v20977_v32, %v20972_v43 }
 0xac6   : > { %17128 = vmatpush3.bf16.msra.mxu0 %v18770_v51  ;;  %v6306_v38 = vpop.permute.xlu0 %6305  ;;  %v6308_v54 = vpop.permute.xlu1 %6307  ;;  %v6366_v58 = vld [vmem:[#allocation2 + $0x51] sm:$0x1]  ;;  %v18777_v51 = vld [vmem:[%s23121_s1 + $0x608] sm:$0xff]  }
 0xac7   : > { %17129 = vmatprep.subr.bf16.mxu0 %v18771_v13  ;;  %v6376_v57 = vld [vmem:[#allocation2 + $0x58] sm:$0x1]  ;;  %6353 = vst.msk [vmem:[#allocation2 + $0x60] sm:$0xff] %vm1714_vm13, %v6306_v38  ;;  %v21029_v38 = vld [vmem:[#allocation2 + $0x22] sm:$0xff] }
 0xac8   : > { %v20927_v17 = vld [vmem:[#allocation2 + $0x51] sm:$0xff]  ;;  %6354 = vst.msk [vmem:[#allocation2 + $0x68] sm:$0x3] %vm1716_vm14, %v6308_v54 }
 0xac9   : > { %6396 = vst.msk [vmem:[#allocation2 + $0x59] sm:$0x1] %vm1756_vm15, %v6376_v57  ;;  %v20934_v55 = vpack.c.bf16 %v20927_v17, %v20925_v47  ;;  %6386 = vst.msk [vmem:[#allocation2 + $0x50] sm:$0x1] %vm1756_vm15, %v6366_v58  ;;  %v21033_v57 = vld [vmem:[#allocation2 + $0x32] sm:$0xff]  ;;  %v21035_v58 = vld [vmem:[#allocation2 + $0x42] sm:$0xff] }
 0xaca   : > { %17130 = vmatpush3.bf16.msra.mxu0 %v18771_v13  ;;  %v6310_v60 = vpop.permute.xlu0 %6309  ;;  %v6312_v2 = vpop.permute.xlu1 %6311 }
 0xacb   : > { %17131 = vmatprep.subr.bf16.mxu0 %v18772_v48  ;;  %17121 = vmatprep.mubr.msk.bf16.mxu0 %vm170_vm0, %v20934_v55  ;;  %6355 = vst.msk [vmem:[#allocation2 + $0x70] sm:$0xff] %vm1714_vm13, %v6310_v60  ;;  %v18780_v60 = vld [vmem:[%s23121_s1 + $0x620] sm:$0xff]  }
 0xacc   : > { %6356 = vst.msk [vmem:[#allocation2 + $0x78] sm:$0x3] %vm1716_vm14, %v6312_v2 }
 0xace   : > { %17132 = vmatpush3.bf16.msra.mxu0 %v18772_v48  ;;  %v6234_v45 = vpop.permute.xlu0 %6233  ;;  %v6314_v61 = vpop.permute.xlu1 %6313  ;;  %v6367_v63 = vld [vmem:[#allocation2 + $0x61] sm:$0x1]  ;;  %v18779_v48 = vld [vmem:[%s23121_s1 + $0x618] sm:$0xff]  }
 0xacf   : > { %17133 = vmatprep.subr.bf16.mxu0 %v18773_v59  ;;  %v6377_v62 = vld [vmem:[#allocation2 + $0x68] sm:$0x1]  ;;  %6277 = vst.msk [vmem:[#allocation2 + $0x80] sm:$0xff] %vm1632_vm11, %v6234_v45 }
 0xad0   : > { %6397 = vst.msk [vmem:[#allocation2 + $0x69] sm:$0x1] %vm1756_vm15, %v6377_v62  ;;  %6387 = vst.msk [vmem:[#allocation2 + $0x60] sm:$0x1] %vm1756_vm15, %v6367_v63  ;;  %v20951_v31 = vld [vmem:[#allocation2 + $0x61] sm:$0xff]  ;;  %v20975_v40 = vld [vmem:[#allocation2 + $0x50] sm:$0xff] }
 0xad1   : > { %6357 = vst.msk [vmem:[#allocation2 + $0x80] sm:$0xff] %vm1714_vm13, %v6314_v61  ;;  %v20992_v6 = vpack.c.bf16 %v20975_v40, %v20984_v53  ;;  %v21031_v54 = vld [vmem:[#allocation2 + $0x52] sm:$0xff] }
 0xad2   : > { %17134 = vmatpush3.bf16.msra.mxu0 %v18773_v59  ;;  %v6236_v50 = vpop.permute.xlu0 %6235  ;;  %v6316_v30 = vpop.permute.xlu1 %6315  ;;  %v6368_v19 = vld [vmem:[#allocation2 + $0x71] sm:$0x1]  ;;  %v21039_v59 = vpack.c.bf16 %v21033_v57, %v21029_v38  ;;  %v21046_v2 = vpack.c.bf16 %v21031_v54, %v21035_v58 }
 0xad3   : > { %17143 = vmatprep.subr.bf16.mxu0 %v18774_v3  ;;  %v6378_v28 = vld [vmem:[#allocation2 + $0x78] sm:$0x1]  ;;  %6278 = vst.msk [vmem:[#allocation2 + $0x88] sm:$0x3] %vm1634_vm12, %v6236_v50  ;;  %v18782_v63 = vld [vmem:[%s23121_s1 + $0x630] sm:$0xff]   ;;  %v6815_v50 = vpack.c.bf16 %v20972_v43, %v20882_v46  ;;  %v6816_v46 = vpack.c.bf16 %v20984_v53, %v20977_v32  ;;  %v6953_v43 = vpack.c.bf16 %v20899_v5, %v20893_v36 }
 0xad4   : > { %v20955_v4 = vld [vmem:[#allocation2 + $0x71] sm:$0xff]  ;;  %6398 = vst.msk [vmem:[#allocation2 + $0x79] sm:$0x1] %vm1756_vm15, %v6378_v28  ;;  %6388 = vst.msk [vmem:[#allocation2 + $0x70] sm:$0x1] %vm1756_vm15, %v6368_v19  ;;  %v18784_v28 = vld [vmem:[%s23121_s1 + $0x640] sm:$0xff]   ;;  %v6954_v36 = vpack.c.bf16 %v20925_v47, %v20901_v49 }
 0xad5   : > { %v20961_v21 = vpack.c.bf16 %v20955_v4, %v20951_v31  ;;  %6358 = vst.msk [vmem:[#allocation2 + $0x88] sm:$0x3] %vm1716_vm14, %v6316_v30  ;;  %v18783_v30 = vld [vmem:[%s23121_s1 + $0x638] sm:$0xff]   ;;  %v18785_v19 = vld [vmem:[%s23121_s1 + $0x648] sm:$0xff]   ;;  %v18790_v5 = vld [vmem:[%s23121_s1 + $0x670] sm:$0xff]  }
 0xad6   : > { %v6238_v26 = vpop.permute.xlu0 %6237  ;;  %v6318_v29 = vpop.permute.xlu1 %6317  ;;  %v18791_v32 = vld [vmem:[%s23121_s1 + $0x678] sm:$0xff]   ;;  %v18792_v47 = vld [vmem:[%s23121_s1 + $0x680] sm:$0xff]  }
 0xad7   : > { %17122 = vmatmul.mubr.msk.bf16.gmra.mrb[28].mxu0 %vm170_vm0, %v20961_v21  ;;  %6279 = vst.msk [vmem:[#allocation2 + $0x90] sm:$0xff] %vm1632_vm11, %v6238_v26  ;;  %v6415_v41 = vld [vmem:[#allocation2 + $0x60] sm:$0xff]  ;;  %v18786_v26 = vld [vmem:[%s23121_s1 + $0x650] sm:$0xff]  }
 0xad8   : > { %17135 = vmatprep.mubr.msk.bf16.mxu0 %vm170_vm0, %v6417_v25  ;;  %v6369_v12 = vld [vmem:[#allocation2 + $0x81] sm:$0x1]  ;;  %6359 = vst.msk [vmem:[#allocation2 + $0x90] sm:$0xff] %vm1714_vm13, %v6318_v29  ;;  %v21057_v61 = vld [vmem:[#allocation2 + $0x62] sm:$0xff]  ;;  %v6817_v25 = vpack.c.bf16 %v6415_v41, %v20975_v40 }
 0xad9   : > { %6389 = vst.msk [vmem:[#allocation2 + $0x80] sm:$0x1] %vm1756_vm15, %v6369_v12  ;;  %v18787_v12 = vld [vmem:[%s23121_s1 + $0x658] sm:$0xff]   ;;  %v18788_v40 = vld [vmem:[%s23121_s1 + $0x660] sm:$0xff]  }
 0xada   : > { %v6240_v33 = vpop.permute.xlu0 %6239  ;;  %v6320_v22 = vpop.permute.xlu1 %6319 }
 0xadb   : > { %6280 = vst.msk [vmem:[#allocation2 + $0x98] sm:$0x3] %vm1634_vm12, %v6240_v33  ;;  %v21005_v11 = vld [vmem:[#allocation2 + $0x70] sm:$0xff]  ;;  %v18789_v33 = vld [vmem:[%s23121_s1 + $0x668] sm:$0xff]  }
 0xadc   : > { %v6379_v10 = vld [vmem:[#allocation2 + $0x88] sm:$0x1]  ;;  %6360 = vst.msk [vmem:[#allocation2 + $0x98] sm:$0x3] %vm1716_vm14, %v6320_v22  ;;  %v21015_v7 = vpack.c.bf16 %v21005_v11, %v6415_v41  ;;  %v21055_v45 = vld [vmem:[#allocation2 + $0x72] sm:$0xff]  ;;  %v6955_v22 = vpack.c.bf16 %v20951_v31, %v20927_v17  ;;  %v7091_v17 = vpack.c.bf16 %v21029_v38, %v21012_v14 }
 0xadd   : > { %6399 = vst.msk [vmem:[#allocation2 + $0x89] sm:$0x1] %vm1756_vm15, %v6379_v10  ;;  %v21061_v62 = vpack.c.bf16 %v21055_v45, %v21057_v61  ;;  %v21115_v53 = vld [vmem:[#allocation2 + $0x81] sm:$0xff]  ;;  %v18795_v10 = vld [vmem:[%s23121_s1 + $0x698] sm:$0xff]  }
 0xade   : > { %v6956_v49 = vpack.c.bf16 %v21115_v53, %v20955_v4  ;;  %v18793_v31 = vld [vmem:[%s23121_s1 + $0x688] sm:$0xff]   ;;  %v18794_v4 = vld [vmem:[%s23121_s1 + $0x690] sm:$0xff]   ;;  %v18799_v14 = vld [vmem:[%s23121_s1 + $0x6b8] sm:$0xff]  }
 0xadf   : > { %17136 = vmatmul.mubr.msk.bf16.vlgmr.msra.gmra.mrb[24].mxu0 %vm170_vm0, %v20982_v42  ;;  %v6370_v0 = vld [vmem:[#allocation2 + $0x91] sm:$0x1]  ;;  %v18797_v41 = vld [vmem:[%s23121_s1 + $0x6a8] sm:$0xff]  }
 0xae0   : > { %17144 = vmatpush3.bf16.msra.mxu0 %v18774_v3  ;;  %17139 = vmatprep.mubr.msk.bf16.mxu0 %vm170_vm0, %v20992_v6  ;;  %v21002_v8 = vld [vmem:[#allocation2 + $0x80] sm:$0xff]  ;;  %6390 = vst.msk [vmem:[#allocation2 + $0x90] sm:$0x1] %vm1756_vm15, %v6370_v0  ;;  %v18781_v3 = vld [vmem:[%s23121_s1 + $0x628] sm:$0xff]   ;;  %v7093_v0 = vpack.c.bf16 %v21057_v61, %v21031_v54  ;;  %v18807_v54 = vld [vmem:[%s23121_s1 + $0x6f8] sm:$0xff]  }
 0xae1   : > { %17145 = vmatprep.subr.bf16.mxu0 %v18775_v18  ;;  %6407 = vst.msk [vmem:[#allocation2 + $0x90] sm:$0xff] %vm170_vm0, %v21002_v8  ;;  %v6818_v29 = vpack.c.bf16 %v21002_v8, %v21005_v11 }
 0xae3   : > { %v6380_v37 = vld [vmem:[#allocation2 + $0x98] sm:$0x1] }
 0xae4   : > { %17146 = vmatpush3.bf16.msra.mxu0 %v18775_v18  ;;  %v6404_v13 = vld [vmem:[#allocation2 + $0x88] sm:$0x3]  ;;  %6400 = vst.msk [vmem:[#allocation2 + $0x99] sm:$0x1] %vm1756_vm15, %v6380_v37  ;;  %v7092_v18 = vpack.c.bf16 %v21035_v58, %v21033_v57  ;;  %v18800_v37 = vld [vmem:[%s23121_s1 + $0x6c0] sm:$0xff]  }
 0xae5   : > { %17147 = vmatprep.subr.bf16.mxu0 %v18776_v56  ;;  %6408 = vst.msk [vmem:[#allocation2 + $0x98] sm:$0x3] %vm172_vm1, %v6404_v13  ;;  %v7090_v11 = vld [vmem:[#allocation2 + $0x82] sm:$0xff] }
 0xae6   : > { %v7094_v39 = vpack.c.bf16 %v7090_v11, %v21055_v45 }
 0xae7   : > { %17140 = vmatmul.mubr.msk.bf16.gmra.mrb[28].mxu0 %vm170_vm0, %v21015_v7 }
 0xae8   : > { %17148 = vmatpush3.bf16.msra.mxu0 %v18776_v56  ;;  %17153 = vmatprep.mubr.msk.bf16.mxu0 %vm170_vm0, %v6677_v44  ;;  %v18796_v56 = vld [vmem:[%s23121_s1 + $0x6a0] sm:$0xff]   ;;  %v21167_v13 = vld [vmem:[#allocation2 + $0x90] sm:$0xff] }
 0xae9   : > { %17149 = vmatprep.subr.bf16.mxu0 %v18777_v51  ;;  %v7232_v44 = vpack.c.bf16 %v21167_v13, %v21002_v8  ;;  %v18804_v8 = vld [vmem:[%s23121_s1 + $0x6e0] sm:$0xff]  }
 0xaec   : > { %17150 = vmatpush3.bf16.msra.mxu0 %v18777_v51  ;;  %v18798_v51 = vld [vmem:[%s23121_s1 + $0x6b0] sm:$0xff]  }
 0xaed   : > { %17151 = vmatprep.subr.bf16.mxu0 %v18778_v52 }
 0xaf0   : > { %17152 = vmatpush3.bf16.msra.mxu0 %v18778_v52  ;;  %v18805_v52 = vld [vmem:[%s23121_s1 + $0x6e8] sm:$0xff]  }
 0xaf1   : > { %17161 = vmatprep.subr.bf16.mxu0 %v18779_v48 }
 0xaf3   : > { %17154 = vmatmul.mubr.msk.bf16.vlgmr.msra.gmra.mrb[24].mxu0 %vm170_vm0, %v21039_v59 }
 0xaf4   : > { %17157 = vmatprep.mubr.msk.bf16.mxu0 %vm170_vm0, %v21046_v2  ;;  %17162 = vmatpush3.bf16.msra.mxu0 %v18779_v48  ;;  %v7366_v48 = vld [vmem:[#allocation2 + $0x91] sm:$0xff] }
 0xaf5   : > { %17163 = vmatprep.subr.bf16.mxu0 %v18780_v60  ;;  %v7370_v38 = vpack.c.bf16 %v7366_v48, %v21115_v53 }
 0xaf8   : > { %17164 = vmatpush3.bf16.msra.mxu0 %v18780_v60 }
 0xaf9   : > { %17165 = vmatprep.subr.bf16.mxu0 %v18781_v3 }
 0xafb   : > { %17158 = vmatmul.mubr.msk.bf16.gmra.mrb[28].mxu0 %vm170_vm0, %v21061_v62 }
 0xafc   : > { %17166 = vmatpush3.bf16.msra.mxu0 %v18781_v3  ;;  %17171 = vmatprep.mubr.msk.bf16.mxu0 %vm170_vm0, %v6815_v50 }
 0xafd   : > { %17167 = vmatprep.subr.bf16.mxu0 %v18782_v63 }
 0xb00   : > { %17168 = vmatpush3.bf16.msra.mxu0 %v18782_v63 }
 0xb01   : > { %17169 = vmatprep.subr.bf16.mxu0 %v18783_v30 }
 0xb04   : > { %17170 = vmatpush3.bf16.msra.mxu0 %v18783_v30 }
 0xb05   : > { %17179 = vmatprep.subr.bf16.mxu0 %v18784_v28 }
 0xb07   : > { %17172 = vmatmul.mubr.msk.bf16.vlgmr.msra.gmra.mrb[24].mxu0 %vm170_vm0, %v6816_v46 }
 0xb08   : > { %17175 = vmatprep.mubr.msk.bf16.mxu0 %vm170_vm0, %v6817_v25  ;;  %17180 = vmatpush3.bf16.msra.mxu0 %v18784_v28 }
 0xb09   : > { %17181 = vmatprep.subr.bf16.mxu0 %v18785_v19 }
 0xb0c   : > { %17182 = vmatpush3.bf16.msra.mxu0 %v18785_v19 }
 0xb0d   : > { %17183 = vmatprep.subr.bf16.mxu0 %v18786_v26 }
 0xb0f   : > { %17176 = vmatmul.mubr.msk.bf16.gmra.mrb[28].mxu0 %vm170_vm0, %v6818_v29 }
 0xb10   : > { %17184 = vmatpush3.bf16.msra.mxu0 %v18786_v26  ;;  %17189 = vmatprep.mubr.msk.bf16.mxu0 %vm170_vm0, %v6953_v43 }
 0xb11   : > { %17185 = vmatprep.subr.bf16.mxu0 %v18787_v12 }
 0xb14   : > { %17186 = vmatpush3.bf16.msra.mxu0 %v18787_v12 }
 0xb15   : > { %17187 = vmatprep.subr.bf16.mxu0 %v18788_v40 }
 0xb18   : > { %17188 = vmatpush3.bf16.msra.mxu0 %v18788_v40 }
 0xb19   : > { %17197 = vmatprep.subr.bf16.mxu0 %v18789_v33 }
 0xb1b   : > { %17190 = vmatmul.mubr.msk.bf16.vlgmr.msra.gmra.mrb[24].mxu0 %vm170_vm0, %v6954_v36 }
 0xb1c   : > { %17193 = vmatprep.mubr.msk.bf16.mxu0 %vm170_vm0, %v6955_v22  ;;  %17198 = vmatpush3.bf16.msra.mxu0 %v18789_v33 }
 0xb1d   : > { %17199 = vmatprep.subr.bf16.mxu0 %v18790_v5 }
 0xb20   : > { %17200 = vmatpush3.bf16.msra.mxu0 %v18790_v5 }
 0xb21   : > { %17201 = vmatprep.subr.bf16.mxu0 %v18791_v32 }
 0xb23   : > { %17194 = vmatmul.mubr.msk.bf16.gmra.mrb[28].mxu0 %vm170_vm0, %v6956_v49 }
 0xb24   : > { %17202 = vmatpush3.bf16.msra.mxu0 %v18791_v32  ;;  %17207 = vmatprep.mubr.msk.bf16.mxu0 %vm170_vm0, %v7091_v17  ;;  %v7708_v17 = vld [vmem:[#allocation2 + $0x8] sm:$0x3] }
 0xb25   : > { %17203 = vmatprep.subr.bf16.mxu0 %v18792_v47 }
 0xb28   : > { %17204 = vmatpush3.bf16.msra.mxu0 %v18792_v47 }
 0xb29   : > { %17205 = vmatprep.subr.bf16.mxu0 %v18793_v31 }
 0xb2c   : > { %17206 = vmatpush3.bf16.msra.mxu0 %v18793_v31 }
 0xb2d   : > { %17215 = vmatprep.subr.bf16.mxu0 %v18794_v4 }
 0xb2f   : > { %17208 = vmatmul.mubr.msk.bf16.vlgmr.msra.gmra.mrb[24].mxu0 %vm170_vm0, %v7092_v18 }
 0xb30   : > { %17211 = vmatprep.mubr.msk.bf16.mxu0 %vm170_vm0, %v7093_v0  ;;  %17216 = vmatpush3.bf16.msra.mxu0 %v18794_v4 }
 0xb31   : > { %17217 = vmatprep.subr.bf16.mxu0 %v18795_v10 }
 0xb34   : > { %17218 = vmatpush3.bf16.msra.mxu0 %v18795_v10 }
 0xb35   : > { %17219 = vmatprep.subr.bf16.mxu0 %v18796_v56 }
 0xb37   : > { %17212 = vmatmul.mubr.msk.bf16.gmra.mrb[28].mxu0 %vm170_vm0, %v7094_v39 }
 0xb38   : > { %17220 = vmatpush3.bf16.msra.mxu0 %v18796_v56  ;;  %17225 = vmatprep.mubr.msk.bf16.mxu0 %vm170_vm0, %v20982_v42  ;;  %v18801_v42 = vld [vmem:[%s23121_s1 + $0x6c8] sm:$0xff]  }
 0xb39   : > { %17221 = vmatprep.subr.bf16.mxu0 %v18797_v41 }
 0xb3c   : > { %17222 = vmatpush3.bf16.msra.mxu0 %v18797_v41 }
 0xb3d   : > { %17223 = vmatprep.subr.bf16.mxu0 %v18798_v51 }
 0xb40   : > { %17224 = vmatpush3.bf16.msra.mxu0 %v18798_v51 }
 0xb41   : > { %17233 = vmatprep.subr.bf16.mxu0 %v18799_v14 }
 0xb43   : > { %17226 = vmatmul.mubr.msk.bf16.vlgmr.msra.gmra.mrb[24].mxu0 %vm170_vm0, %v20992_v6  ;;  %v18802_v6 = vld [vmem:[%s23121_s1 + $0x6d0] sm:$0xff]  }
 0xb44   : > { %17229 = vmatprep.mubr.msk.bf16.mxu0 %vm170_vm0, %v21015_v7  ;;  %17234 = vmatpush3.bf16.msra.mxu0 %v18799_v14  ;;  %v18803_v7 = vld [vmem:[%s23121_s1 + $0x6d8] sm:$0xff]   ;;  %v18809_v14 = vld [vmem:[%s23121_s1 + $0x730] sm:$0xff]  }
 0xb45   : > { %17235 = vmatprep.subr.bf16.mxu0 %v18800_v37  ;;  %17269 = vmatprep.subr.bf16.mxu1 %v18809_v14 }
 0xb46   : > { %17270 = vmatpush3.bf16.msra.mxu1 %v18809_v14 }
 0xb48   : > { %17236 = vmatpush3.bf16.msra.mxu0 %v18800_v37 }
 0xb49   : > { %17237 = vmatprep.subr.bf16.mxu0 %v18801_v42 }
 0xb4b   : > { %17230 = vmatmul.mubr.msk.bf16.gmra.mrb[28].mxu0 %vm170_vm0, %v7232_v44 }
 0xb4c   : > { %17238 = vmatpush3.bf16.msra.mxu0 %v18801_v42  ;;  %17243 = vmatprep.mubr.msk.bf16.mxu0 %vm170_vm0, %v20905_v35  ;;  %v18806_v35 = vld [vmem:[%s23121_s1 + $0x6f0] sm:$0xff]  }
 0xb4d   : > { %17239 = vmatprep.subr.bf16.mxu0 %v18802_v6 }
 0xb50   : > { %17240 = vmatpush3.bf16.msra.mxu0 %v18802_v6 }
 0xb51   : > { %17241 = vmatprep.subr.bf16.mxu0 %v18803_v7 }
 0xb54   : > { %17242 = vmatpush3.bf16.msra.mxu0 %v18803_v7  ;;  %v18810_v7 = vld [vmem:[%s23121_s1 + $0x738] sm:$0xff]  }
 0xb55   : > { %17251 = vmatprep.subr.bf16.mxu0 %v18804_v8  ;;  %17271 = vmatprep.subr.bf16.mxu1 %v18810_v7 }
 0xb56   : > { %17272 = vmatpush3.bf16.msra.mxu1 %v18810_v7 }
 0xb57   : > { %17244 = vmatmul.mubr.msk.bf16.vlgmr.msra.gmra.mrb[24].mxu0 %vm170_vm0, %v20934_v55  ;;  %v18808_v55 = vld [vmem:[%s23121_s1 + $0x700] sm:$0xff]  }
 0xb58   : > { %17247 = vmatprep.mubr.msk.bf16.mxu0 %vm170_vm0, %v20961_v21  ;;  %17252 = vmatpush3.bf16.msra.mxu0 %v18804_v8  ;;  %v7504_v21 = vld [vmem:[#allocation2 + $0x92] sm:$0xff] }
 0xb59   : > { %17253 = vmatprep.subr.bf16.mxu0 %v18805_v52  ;;  %v7508_v57 = vpack.c.bf16 %v7504_v21, %v7090_v11  ;;  %v18813_v21 = vld [vmem:[%s23121_s1 + $0x750] sm:$0xff]  }
 0xb5c   : > { %17254 = vmatpush3.bf16.msra.mxu0 %v18805_v52  ;;  %v18811_v52 = vld [vmem:[%s23121_s1 + $0x740] sm:$0xff]  }
 0xb5d   : > { %17255 = vmatprep.subr.bf16.mxu0 %v18806_v35  ;;  %17273 = vmatprep.subr.bf16.mxu1 %v18811_v52 }
 0xb5e   : > { %17274 = vmatpush3.bf16.msra.mxu1 %v18811_v52 }
 0xb5f   : > { %17248 = vmatmul.mubr.msk.bf16.gmra.mrb[28].mxu0 %vm170_vm0, %v7370_v38 }
 0xb60   : > { %17256 = vmatpush3.bf16.msra.mxu0 %v18806_v35  ;;  %17261 = vmatprep.mubr.msk.bf16.mxu0 %vm170_vm0, %v21039_v59 }
 0xb61   : > { %17257 = vmatprep.subr.bf16.mxu0 %v18807_v54 }
 0xb64   : > { %17258 = vmatpush3.bf16.msra.mxu0 %v18807_v54 }
 0xb65   : > { %17259 = vmatprep.subr.bf16.mxu0 %v18808_v55 }
 0xb68   : > { %17260 = vmatpush3.bf16.msra.mxu0 %v18808_v55  ;;  %v18812_v55 = vld [vmem:[%s23121_s1 + $0x748] sm:$0xff]  }
 0xb69   : > { %17275 = vmatprep.subr.bf16.mxu1 %v18812_v55 }
 0xb6a   : > { %17276 = vmatpush3.bf16.msra.mxu1 %v18812_v55 }
 0xb6b   : > { %17262 = vmatmul.mubr.msk.bf16.vlgmr.msra.gmra.mrb[24].mxu0 %vm170_vm0, %v21046_v2  ;;  %17277 = vmatprep.subr.bf16.mxu1 %v18813_v21 }
 0xb6c   : > { %17265 = vmatprep.mubr.msk.bf16.mxu0 %vm170_vm0, %v21061_v62 }
 0xb6e   : > { %17278 = vmatpush3.bf16.msra.mxu1 %v18813_v21  ;;  %v18816_v21 = vld [vmem:[%s23121_s1 + $0x718] sm:$0xff]  }
 0xb73   : > { %17266 = vmatmul.mubr.msk.bf16.gmra.mrb[28].mxu0 %vm170_vm0, %v7508_v57 }
 0xc3e   : > { %v17263_v58 = vpop.f32.mrb[24].mxu0 }
 0xc3f   : > { %v7637_v59 = vadd.f32 %v17263_v58, %v20328_v20  ;;  %v7596_v60 = vpop.f32.mrb[25].mxu0 }
 0xc40   : > { %v7635_v3 = vadd.f32 %v7596_v60, %v20318_v27  ;;  %v17264_v45 = vpop.f32.mrb[26].mxu0 }
 0xc41   : > { %v7653_v61 = vmul.f32 0.01, %v7637_v59  ;;  %v7638_v63 = vadd.f32 %v17264_v45, %v20333_v24  ;;  %v7599_v50 = vpop.f32.mrb[27].mxu0  ;;  %vm7645_vm3 = vcmp.ge.f32.partialorder %v7637_v59, 0.0 }
 0xc42   : > { %vm7643_vm4 = vcmp.ge.f32.partialorder %v7635_v3, 0.0  ;;  %v7651_v2 = vmul.f32 0.01, %v7635_v3  ;;  %v7636_v62 = vadd.f32 %v7599_v50, %v20322_v1 }
 0xc43   : > { %vm7646_vm5 = vcmp.ge.f32.partialorder %v7638_v63, 0.0  ;;  %v7654_v30 = vmul.f32 0.01, %v7638_v63  ;;  %v21216_v27 = vsel %vm7645_vm3, %v7637_v59, %v7653_v61  ;;  %v21312_v61 = vld [vmem:[%s23121_s1 + $0x708] sm:$0xff]  }
 0xc44   : > { %vm7644_vm6 = vcmp.ge.f32.partialorder %v7636_v62, 0.0  ;;  %v7652_v28 = vmul.f32 0.01, %v7636_v62  ;;  %v21212_v46 = vsel %vm7643_vm4, %v7635_v3, %v7651_v2  ;;  %17287 = vmatprep.subr.bf16.mxu1 %v21312_v61 }
 0xc45   : > { %7675 = vrot.lane.b32.xlu0 %v21212_v46, %s19063_s8  ;;  %v21218_v20 = vsel %vm7646_vm5, %v7638_v63, %v7654_v30  ;;  %v7726_v30 = vld [vmem:[#allocation2 + $0x98] sm:$0x3] }
 0xc46   : > { %v17267_v24 = vpop.f32.mrb[28].mxu0  ;;  %v21220_v19 = vsel %vm7644_vm6, %v7636_v62, %v7652_v28  ;;  %v10720_v25 = vpack.c.bf16 %v21218_v20, %v21216_v27 }
 0xc47   : > { %v7641_v1 = vadd.f32 %v17267_v24, %v20345_v16  ;;  %7677 = vrot.lane.b32.xlu1 %v21220_v19, %s19063_s8  ;;  %v10719_v26 = vpack.c.bf16 %v21220_v19, %v21212_v46  ;;  %v7612_v29 = vpop.f32.mrb[29].mxu0 }
 0xc48   : > { %v7639_v12 = vadd.f32 %v7612_v29, %v20337_v15  ;;  %v17268_v43 = vpop.f32.mrb[30].mxu0 }
 0xc49   : > { %v7657_v40 = vmul.f32 0.01, %v7641_v1  ;;  %v7642_v33 = vadd.f32 %v17268_v43, %v20356_v34  ;;  %7679 = vrot.lane.b32.xlu0 %v21216_v27, %s19063_s8  ;;  %v7615_v36 = vpop.f32.mrb[31].mxu0  ;;  %vm7649_vm7 = vcmp.ge.f32.partialorder %v7641_v1, 0.0 }
 0xc4a   : > { %vm7647_vm8 = vcmp.ge.f32.partialorder %v7639_v12, 0.0  ;;  %v7655_v16 = vmul.f32 0.01, %v7639_v12  ;;  %v7640_v5 = vadd.f32 %v7615_v36, %v20341_v23 }
 0xc4b   : > { %vm7650_vm9 = vcmp.ge.f32.partialorder %v7642_v33, 0.0  ;;  %v7658_v22 = vmul.f32 0.01, %v7642_v33  ;;  %7681 = vrot.lane.b32.xlu1 %v21218_v20, %s19063_s8  ;;  %v21240_v34 = vsel %vm7649_vm7, %v7641_v1, %v7657_v40 }
 0xc4c   : > { %vm7648_vm10 = vcmp.ge.f32.partialorder %v7640_v5, 0.0  ;;  %v7656_v15 = vmul.f32 0.01, %v7640_v5  ;;  %v21236_v32 = vsel %vm7647_vm8, %v7639_v12, %v7655_v16 }
 0xc4d   : > { %7683 = vrot.lane.b32.xlu0 %v21236_v32, %s19063_s8  ;;  %v21242_v53 = vsel %vm7650_vm9, %v7642_v33, %v7658_v22 }
 0xc4e   : > { %v21244_v49 = vsel %vm7648_vm10, %v7640_v5, %v7656_v15  ;;  %v10722_v23 = vpack.c.bf16 %v21242_v53, %v21240_v34 }
 0xc4f   : > { %7685 = vrot.lane.b32.xlu1 %v21244_v49, %s19063_s8  ;;  %v10721_v47 = vpack.c.bf16 %v21244_v49, %v21236_v32 }
 0xc51   : > { %7687 = vrot.lane.b32.xlu0 %v21240_v34, %s19063_s8 }
 0xc53   : > { %7747 = vrot.lane.b32.xlu1 %v20953_v9, %s19064_s7 }
 0xc55   : > { %7749 = vrot.lane.b32.xlu0 %v7708_v17, %s19064_s7 }
 0xc57   : > { %7827 = vrot.lane.b32.xlu1 %v20953_v9, %s19063_s8 }
 0xc59   : > { %7829 = vrot.lane.b32.xlu0 %v7708_v17, %s19063_s8 }
 0xc5b   : > { %7689 = vrot.lane.b32.xlu1 %v21242_v53, %s19063_s8 }
 0xcb7   : > { %v7676_v31 = vpop.permute.xlu0 %7675 }
 0xcb8   : > { %7699 = vst.msk [vmem:[#allocation2 + $0x11] sm:$0xff] %vm233_vm2, %v7676_v31 }
 0xcb9   : > { %v7678_v4 = vpop.permute.xlu1 %7677 }
 0xcba   : > { %7700 = vst.msk [vmem:[#allocation2 + $0x21] sm:$0xff] %vm233_vm2, %v7678_v4 }
 0xcbb   : > { %v7680_v18 = vpop.permute.xlu0 %7679 }
 0xcbc   : > { %7701 = vst.msk [vmem:[#allocation2 + $0x31] sm:$0xff] %vm233_vm2, %v7680_v18 }
 0xcbd   : > { %v7682_v10 = vpop.permute.xlu1 %7681 }
 0xcbe   : > { %7702 = vst.msk [vmem:[#allocation2 + $0x41] sm:$0xff] %vm233_vm2, %v7682_v10 }
 0xcbf   : > { %v7684_v0 = vpop.permute.xlu0 %7683  ;;  %v7710_v44 = vld [vmem:[#allocation2 + $0x18] sm:$0x3]  ;;  %v7709_v6 = vld [vmem:[#allocation2 + $0x10] sm:$0xff] }
 0xcc0   : > { %7703 = vst.msk [vmem:[#allocation2 + $0x51] sm:$0xff] %vm233_vm2, %v7684_v0 }
 0xcc1   : > { %v7686_v9 = vpop.permute.xlu1 %7685  ;;  %v7711_v57 = vld [vmem:[#allocation2 + $0x20] sm:$0xff]  ;;  %v7712_v58 = vld [vmem:[#allocation2 + $0x28] sm:$0x3] }
 0xcc2   : > { %7704 = vst.msk [vmem:[#allocation2 + $0x61] sm:$0xff] %vm233_vm2, %v7686_v9 }
 0xcc3   : > { %v7688_v56 = vpop.permute.xlu0 %7687  ;;  %v7713_v11 = vld [vmem:[#allocation2 + $0x30] sm:$0xff]  ;;  %v7714_v39 = vld [vmem:[#allocation2 + $0x38] sm:$0x3] }
 0xcc4   : > { %7705 = vst.msk [vmem:[#allocation2 + $0x71] sm:$0xff] %vm233_vm2, %v7688_v56  ;;  %7759 = vrot.lane.b32.xlu0 %v7713_v11, %s19064_s7  ;;  %7761 = vrot.lane.b32.xlu1 %v7714_v39, %s19064_s7 }
 0xcc5   : > { %v7748_v41 = vpop.permute.xlu1 %7747  ;;  %v7715_v48 = vld [vmem:[#allocation2 + $0x40] sm:$0xff]  ;;  %v7716_v54 = vld [vmem:[#allocation2 + $0x48] sm:$0x3] }
 0xcc6   : > { %7807 = vst.msk [vmem:[#allocation2] sm:$0xff] %vm1632_vm11, %v7748_v41 }
 0xcc7   : > { %v7750_v51 = vpop.permute.xlu0 %7749  ;;  %v7717_v3 = vld [vmem:[#allocation2 + $0x50] sm:$0xff]  ;;  %v7718_v45 = vld [vmem:[#allocation2 + $0x58] sm:$0x3] }
 0xcc8   : > { %7808 = vst.msk [vmem:[#allocation2 + $0x8] sm:$0x3] %vm1634_vm12, %v7750_v51  ;;  %7839 = vrot.lane.b32.xlu0 %v7713_v11, %s19063_s8  ;;  %7841 = vrot.lane.b32.xlu1 %v7714_v39, %s19063_s8 }
 0xcc9   : > { %v7828_v37 = vpop.permute.xlu1 %7827  ;;  %v7720_v63 = vld [vmem:[#allocation2 + $0x68] sm:$0x3]  ;;  %v7719_v50 = vld [vmem:[#allocation2 + $0x60] sm:$0xff] }
 0xcca   : > { %7887 = vst.msk [vmem:[#allocation2] sm:$0xff] %vm1714_vm13, %v7828_v37 }
 0xccb   : > { %v7830_v42 = vpop.permute.xlu0 %7829  ;;  %v7721_v59 = vld [vmem:[#allocation2 + $0x70] sm:$0xff]  ;;  %v7722_v60 = vld [vmem:[#allocation2 + $0x78] sm:$0x3] }
 0xccc   : > { %7888 = vst.msk [vmem:[#allocation2 + $0x8] sm:$0x3] %vm1716_vm14, %v7830_v42  ;;  %7753 = vrot.lane.b32.xlu0 %v7710_v44, %s19064_s7  ;;  %7751 = vrot.lane.b32.xlu1 %v7709_v6, %s19064_s7 }
 0xccd   : > { %v7690_v8 = vpop.permute.xlu1 %7689 }
 0xcce   : > { %7706 = vst.msk [vmem:[#allocation2 + $0x81] sm:$0xff] %vm233_vm2, %v7690_v8 }
 0xcd0   : > { %7833 = vrot.lane.b32.xlu0 %v7710_v44, %s19063_s8  ;;  %7831 = vrot.lane.b32.xlu1 %v7709_v6, %s19063_s8 }
 0xcd1   : > { %v7907_v35 = vld [vmem:[#allocation2 + $0x1] sm:$0x1] }
 0xcd2   : > { %7927 = vst.msk [vmem:[#allocation2] sm:$0x1] %vm1756_vm15, %v7907_v35 }
 0xcd3   : > { %v7917_v38 = vld [vmem:[#allocation2 + $0x8] sm:$0x1] }
 0xcd4   : > { %7937 = vst.msk [vmem:[#allocation2 + $0x9] sm:$0x1] %vm1756_vm15, %v7917_v38  ;;  %7763 = vrot.lane.b32.xlu0 %v7715_v48, %s19064_s7  ;;  %7765 = vrot.lane.b32.xlu1 %v7716_v54, %s19064_s7  ;;  %v18815_v38 = vld [vmem:[%s23121_s1 + $0x710] sm:$0xff]  }
 0xcd5   : > { %v7723_v2 = vld [vmem:[#allocation2 + $0x80] sm:$0xff]  ;;  %v7724_v62 = vld [vmem:[#allocation2 + $0x88] sm:$0x3] }
 0xcd8   : > { %7843 = vrot.lane.b32.xlu0 %v7715_v48, %s19063_s8  ;;  %7845 = vrot.lane.b32.xlu1 %v7716_v54, %s19063_s8 }
 0xcdc   : > { %7755 = vrot.lane.b32.xlu0 %v7711_v57, %s19064_s7  ;;  %7757 = vrot.lane.b32.xlu1 %v7712_v58, %s19064_s7 }
 0xce0   : > { %7835 = vrot.lane.b32.xlu0 %v7711_v57, %s19063_s8  ;;  %7837 = vrot.lane.b32.xlu1 %v7712_v58, %s19063_s8 }
 0xce4   : > { %7775 = vrot.lane.b32.xlu0 %v7721_v59, %s19064_s7  ;;  %7777 = vrot.lane.b32.xlu1 %v7722_v60, %s19064_s7 }
 0xce8   : > { %7767 = vrot.lane.b32.xlu0 %v7717_v3, %s19064_s7  ;;  %7769 = vrot.lane.b32.xlu1 %v7718_v45, %s19064_s7 }
 0xcec   : > { %7847 = vrot.lane.b32.xlu0 %v7717_v3, %s19063_s8  ;;  %7849 = vrot.lane.b32.xlu1 %v7718_v45, %s19063_s8 }
 0xcf0   : > { %7773 = vrot.lane.b32.xlu1 %v7720_v63, %s19064_s7  ;;  %7771 = vrot.lane.b32.xlu0 %v7719_v50, %s19064_s7 }
 0xcf4   : > { %7853 = vrot.lane.b32.xlu1 %v7720_v63, %s19063_s8  ;;  %7851 = vrot.lane.b32.xlu0 %v7719_v50, %s19063_s8 }
 0xcf8   : > { %7857 = vrot.lane.b32.xlu1 %v7722_v60, %s19063_s8  ;;  %7855 = vrot.lane.b32.xlu0 %v7721_v59, %s19063_s8  ;;  %v18817_v59 = vld [vmem:[%s23121_s1 + $0x720] sm:$0xff]  }
 0xcfc   : > { %7859 = vrot.lane.b32.xlu1 %v7723_v2, %s19063_s8  ;;  %7779 = vrot.lane.b32.xlu0 %v7723_v2, %s19064_s7 }
 0xd00   : > { %7861 = vrot.lane.b32.xlu1 %v7724_v62, %s19063_s8  ;;  %7781 = vrot.lane.b32.xlu0 %v7724_v62, %s19064_s7  ;;  %v18818_v62 = vld [vmem:[%s23121_s1 + $0x728] sm:$0xff]  }
 0xd04   : > { %7863 = vrot.lane.b32.xlu1 %v21167_v13, %s19063_s8  ;;  %7783 = vrot.lane.b32.xlu0 %v21167_v13, %s19064_s7 }
 0xd08   : > { %7865 = vrot.lane.b32.xlu1 %v7726_v30, %s19063_s8  ;;  %7785 = vrot.lane.b32.xlu0 %v7726_v30, %s19064_s7 }
 0xd36   : > { %v7760_v28 = vpop.permute.xlu0 %7759  ;;  %v7762_v24 = vpop.permute.xlu1 %7761 }
 0xd37   : > { %7813 = vst.msk [vmem:[#allocation2 + $0x30] sm:$0xff] %vm1632_vm11, %v7760_v28 }
 0xd38   : > { %7814 = vst.msk [vmem:[#allocation2 + $0x38] sm:$0x3] %vm1634_vm12, %v7762_v24  ;;  %v18819_v24 = vld [vmem:[%s23121_s1 + $0x758] sm:$0xff]  }
 0xd3a   : > { %v7840_v1 = vpop.permute.xlu0 %7839  ;;  %v7842_v29 = vpop.permute.xlu1 %7841 }
 0xd3b   : > { %7893 = vst.msk [vmem:[#allocation2 + $0x30] sm:$0xff] %vm1714_vm13, %v7840_v1 }
 0xd3c   : > { %7894 = vst.msk [vmem:[#allocation2 + $0x38] sm:$0x3] %vm1716_vm14, %v7842_v29 }
 0xd3e   : > { %v7754_v12 = vpop.permute.xlu0 %7753  ;;  %v7752_v43 = vpop.permute.xlu1 %7751 }
 0xd3f   : > { %7810 = vst.msk [vmem:[#allocation2 + $0x18] sm:$0x3] %vm1634_vm12, %v7754_v12 }
 0xd40   : > { %7809 = vst.msk [vmem:[#allocation2 + $0x10] sm:$0xff] %vm1632_vm11, %v7752_v43 }
 0xd42   : > { %v7834_v13 = vpop.permute.xlu0 %7833  ;;  %v7832_v40 = vpop.permute.xlu1 %7831  ;;  %v7910_v36 = vld [vmem:[#allocation2 + $0x31] sm:$0x1] }
 0xd43   : > { %v7920_v33 = vld [vmem:[#allocation2 + $0x38] sm:$0x1]  ;;  %7890 = vst.msk [vmem:[#allocation2 + $0x18] sm:$0x3] %vm1716_vm14, %v7834_v13 }
 0xd44   : > { %7889 = vst.msk [vmem:[#allocation2 + $0x10] sm:$0xff] %vm1714_vm13, %v7832_v40  ;;  %v21366_v37 = vld [vmem:[#allocation2 + $0x31] sm:$0xff] }
 0xd45   : > { %7940 = vst.msk [vmem:[#allocation2 + $0x39] sm:$0x1] %vm1756_vm15, %v7920_v33  ;;  %7930 = vst.msk [vmem:[#allocation2 + $0x30] sm:$0x1] %vm1756_vm15, %v7910_v36 }
 0xd46   : > { %v7764_v16 = vpop.permute.xlu0 %7763  ;;  %v7766_v5 = vpop.permute.xlu1 %7765 }
 0xd47   : > { %7815 = vst.msk [vmem:[#allocation2 + $0x40] sm:$0xff] %vm1632_vm11, %v7764_v16 }
 0xd48   : > { %7816 = vst.msk [vmem:[#allocation2 + $0x48] sm:$0x3] %vm1634_vm12, %v7766_v5 }
 0xd4a   : > { %v7844_v22 = vpop.permute.xlu0 %7843  ;;  %v7846_v15 = vpop.permute.xlu1 %7845  ;;  %v7918_v31 = vld [vmem:[#allocation2 + $0x18] sm:$0x1] }
 0xd4b   : > { %v7908_v17 = vld [vmem:[#allocation2 + $0x11] sm:$0x1]  ;;  %7895 = vst.msk [vmem:[#allocation2 + $0x40] sm:$0xff] %vm1714_vm13, %v7844_v22 }
 0xd4c   : > { %7896 = vst.msk [vmem:[#allocation2 + $0x48] sm:$0x3] %vm1716_vm14, %v7846_v15  ;;  %v21364_v14 = vld [vmem:[#allocation2 + $0x11] sm:$0xff] }
 0xd4d   : > { %7928 = vst.msk [vmem:[#allocation2 + $0x10] sm:$0x1] %vm1756_vm15, %v7908_v17  ;;  %7938 = vst.msk [vmem:[#allocation2 + $0x19] sm:$0x1] %vm1756_vm15, %v7918_v31 }
 0xd4e   : > { %v7756_v4 = vpop.permute.xlu0 %7755  ;;  %v7758_v18 = vpop.permute.xlu1 %7757 }
 0xd4f   : > { %7811 = vst.msk [vmem:[#allocation2 + $0x20] sm:$0xff] %vm1632_vm11, %v7756_v4 }
 0xd50   : > { %7812 = vst.msk [vmem:[#allocation2 + $0x28] sm:$0x3] %vm1634_vm12, %v7758_v18 }
 0xd52   : > { %v7836_v10 = vpop.permute.xlu0 %7835  ;;  %v7838_v0 = vpop.permute.xlu1 %7837  ;;  %v7911_v39 = vld [vmem:[#allocation2 + $0x41] sm:$0x1] }
 0xd53   : > { %7891 = vst.msk [vmem:[#allocation2 + $0x20] sm:$0xff] %vm1714_vm13, %v7836_v10  ;;  %v7921_v11 = vld [vmem:[#allocation2 + $0x48] sm:$0x1] }
 0xd54   : > { %v21353_v9 = vld [vmem:[#allocation2 + $0x10] sm:$0xff]  ;;  %v7948_v56 = vld [vmem:[#allocation2 + $0x18] sm:$0x3]  ;;  %7892 = vst.msk [vmem:[#allocation2 + $0x28] sm:$0x3] %vm1716_vm14, %v7838_v0  ;;  %v21396_v60 = vld [vmem:[#allocation2 + $0x41] sm:$0xff] }
 0xd55   : > { %7951 = vst.msk [vmem:[#allocation2] sm:$0xff] %vm170_vm0, %v21353_v9 }
 0xd56   : > { %7952 = vst.msk [vmem:[#allocation2 + $0x8] sm:$0x3] %vm172_vm1, %v7948_v56  ;;  %v7776_v41 = vpop.permute.xlu0 %7775  ;;  %v7778_v51 = vpop.permute.xlu1 %7777 }
 0xd57   : > { %7941 = vst.msk [vmem:[#allocation2 + $0x49] sm:$0x1] %vm1756_vm15, %v7921_v11  ;;  %7931 = vst.msk [vmem:[#allocation2 + $0x40] sm:$0x1] %vm1756_vm15, %v7911_v39  ;;  %v21448_v39 = vld [vmem:[#allocation2 + $0x30] sm:$0xff] }
 0xd58   : > { %7821 = vst.msk [vmem:[#allocation2 + $0x70] sm:$0xff] %vm1632_vm11, %v7776_v41 }
 0xd59   : > { %7822 = vst.msk [vmem:[#allocation2 + $0x78] sm:$0x3] %vm1634_vm12, %v7778_v51 }
 0xd5a   : > { %v7768_v42 = vpop.permute.xlu0 %7767  ;;  %v7770_v44 = vpop.permute.xlu1 %7769  ;;  %v7909_v48 = vld [vmem:[#allocation2 + $0x21] sm:$0x1] }
 0xd5b   : > { %v7919_v7 = vld [vmem:[#allocation2 + $0x28] sm:$0x1]  ;;  %7817 = vst.msk [vmem:[#allocation2 + $0x50] sm:$0xff] %vm1632_vm11, %v7768_v42  ;;  %v18820_v42 = vld [vmem:[%s23121_s1 + $0x760] sm:$0xff]  }
 0xd5c   : > { %v21368_v8 = vld [vmem:[#allocation2 + $0x21] sm:$0xff]  ;;  %7818 = vst.msk [vmem:[#allocation2 + $0x58] sm:$0x3] %vm1634_vm12, %v7770_v44 }
 0xd5d   : > { %v7978_v6 = vld [vmem:[#allocation2 + $0x1] sm:$0xff]  ;;  %7939 = vst.msk [vmem:[#allocation2 + $0x29] sm:$0x1] %vm1756_vm15, %v7919_v7  ;;  %v21376_v35 = vpack.c.bf16 %v21366_v37, %v21368_v8  ;;  %7929 = vst.msk [vmem:[#allocation2 + $0x20] sm:$0x1] %vm1756_vm15, %v7909_v48 }
 0xd5e   : > { %v7986_v52 = vpack.c.bf16 %v21364_v14, %v7978_v6  ;;  %v7848_v54 = vpop.permute.xlu0 %7847  ;;  %v7850_v55 = vpop.permute.xlu1 %7849  ;;  %v21424_v40 = vld [vmem:[#allocation2] sm:$0xff] }
 0xd5f   : > { %7897 = vst.msk [vmem:[#allocation2 + $0x50] sm:$0xff] %vm1714_vm13, %v7848_v54  ;;  %v7963_v17 = vpack.c.bf16 %v21353_v9, %v21424_v40  ;;  %v21455_v51 = vld [vmem:[#allocation2 + $0x40] sm:$0xff] }
 0xd60   : > { %17279 = vmatprep.mubr.msk.bf16.mxu1 %vm170_vm0, %v7986_v52  ;;  %7898 = vst.msk [vmem:[#allocation2 + $0x58] sm:$0x3] %vm1716_vm14, %v7850_v55  ;;  %v18821_v52 = vld [vmem:[%s23121_s1 + $0x768] sm:$0xff]  }
 0xd61   : > { %17280 = vmatmul.mubr.msk.bf16.vlgmr.msra.gmra.mrb[16].mxu1 %vm170_vm0, %v21376_v35  ;;  %v8215_v54 = vld [vmem:[#allocation2 + $0x2] sm:$0xff] }
 0xd62   : > { %17288 = vmatpush3.bf16.msra.mxu1 %v21312_v61  ;;  %v7772_v57 = vpop.permute.xlu0 %7771  ;;  %v7774_v58 = vpop.permute.xlu1 %7773 }
 0xd63   : > { %17289 = vmatprep.subr.bf16.mxu1 %v18815_v38  ;;  %7819 = vst.msk [vmem:[#allocation2 + $0x60] sm:$0xff] %vm1632_vm11, %v7772_v57  ;;  %v21483_v57 = vld [vmem:[#allocation2 + $0x12] sm:$0xff] }
 0xd64   : > { %7820 = vst.msk [vmem:[#allocation2 + $0x68] sm:$0x3] %vm1634_vm12, %v7774_v58  ;;  %v21443_v10 = vld [vmem:[#allocation2 + $0x20] sm:$0xff] }
 0xd65   : > { %v21453_v41 = vpack.c.bf16 %v21448_v39, %v21443_v10 }
 0xd66   : > { %17290 = vmatpush3.bf16.msra.mxu1 %v18815_v38  ;;  %v7852_v3 = vpop.permute.xlu0 %7851  ;;  %v7854_v45 = vpop.permute.xlu1 %7853  ;;  %v7912_v50 = vld [vmem:[#allocation2 + $0x51] sm:$0x1] }
 0xd67   : > { %17291 = vmatprep.subr.bf16.mxu1 %v18816_v21  ;;  %v7922_v61 = vld [vmem:[#allocation2 + $0x58] sm:$0x1]  ;;  %7899 = vst.msk [vmem:[#allocation2 + $0x60] sm:$0xff] %vm1714_vm13, %v7852_v3 }
 0xd68   : > { %v21398_v63 = vld [vmem:[#allocation2 + $0x51] sm:$0xff]  ;;  %7900 = vst.msk [vmem:[#allocation2 + $0x68] sm:$0x3] %vm1716_vm14, %v7854_v45  ;;  %v8223_v45 = vpack.c.bf16 %v21483_v57, %v8215_v54  ;;  %v18840_v54 = vld [vmem:[%s23121_s1 + $0x800] sm:$0xff]  }
 0xd69   : > { %7942 = vst.msk [vmem:[#allocation2 + $0x59] sm:$0x1] %vm1756_vm15, %v7922_v61  ;;  %v21405_v2 = vpack.c.bf16 %v21398_v63, %v21396_v60  ;;  %7932 = vst.msk [vmem:[#allocation2 + $0x50] sm:$0x1] %vm1756_vm15, %v7912_v50  ;;  %v18823_v61 = vld [vmem:[%s23121_s1 + $0x778] sm:$0xff]   ;;  %v18824_v50 = vld [vmem:[%s23121_s1 + $0x780] sm:$0xff]  }
 0xd6a   : > { %17292 = vmatpush3.bf16.msra.mxu1 %v18816_v21  ;;  %v7856_v30 = vpop.permute.xlu0 %7855  ;;  %v7858_v28 = vpop.permute.xlu1 %7857  ;;  %v18822_v21 = vld [vmem:[%s23121_s1 + $0x770] sm:$0xff]  }
 0xd6b   : > { %17293 = vmatprep.subr.bf16.mxu1 %v18817_v59  ;;  %17283 = vmatprep.mubr.msk.bf16.mxu1 %vm170_vm0, %v21405_v2  ;;  %7901 = vst.msk [vmem:[#allocation2 + $0x70] sm:$0xff] %vm1714_vm13, %v7856_v30 }
 0xd6c   : > { %7902 = vst.msk [vmem:[#allocation2 + $0x78] sm:$0x3] %vm1716_vm14, %v7858_v28  ;;  %v21504_v28 = vld [vmem:[#allocation2 + $0x32] sm:$0xff] }
 0xd6e   : > { %17294 = vmatpush3.bf16.msra.mxu1 %v18817_v59  ;;  %v7780_v1 = vpop.permute.xlu0 %7779  ;;  %v7860_v29 = vpop.permute.xlu1 %7859  ;;  %v7913_v43 = vld [vmem:[#allocation2 + $0x61] sm:$0x1] }
 0xd6f   : > { %17295 = vmatprep.subr.bf16.mxu1 %v18818_v62  ;;  %v7923_v12 = vld [vmem:[#allocation2 + $0x68] sm:$0x1]  ;;  %7823 = vst.msk [vmem:[#allocation2 + $0x80] sm:$0xff] %vm1632_vm11, %v7780_v1 }
 0xd70   : > { %7943 = vst.msk [vmem:[#allocation2 + $0x69] sm:$0x1] %vm1756_vm15, %v7923_v12  ;;  %7933 = vst.msk [vmem:[#allocation2 + $0x60] sm:$0x1] %vm1756_vm15, %v7913_v43  ;;  %v21422_v13 = vld [vmem:[#allocation2 + $0x61] sm:$0xff]  ;;  %v21446_v0 = vld [vmem:[#allocation2 + $0x50] sm:$0xff] }
 0xd71   : > { %7903 = vst.msk [vmem:[#allocation2 + $0x80] sm:$0xff] %vm1714_vm13, %v7860_v29  ;;  %v21463_v6 = vpack.c.bf16 %v21446_v0, %v21455_v51  ;;  %v21502_v30 = vld [vmem:[#allocation2 + $0x52] sm:$0xff]  ;;  %v18825_v29 = vld [vmem:[%s23121_s1 + $0x788] sm:$0xff]  }
 0xd72   : > { %17296 = vmatpush3.bf16.msra.mxu1 %v18818_v62  ;;  %v7782_v33 = vpop.permute.xlu0 %7781  ;;  %v7862_v36 = vpop.permute.xlu1 %7861  ;;  %v7914_v22 = vld [vmem:[#allocation2 + $0x71] sm:$0x1]  ;;  %v21500_v62 = vld [vmem:[#allocation2 + $0x22] sm:$0xff] }
 0xd73   : > { %17305 = vmatprep.subr.bf16.mxu1 %v18819_v24  ;;  %v7924_v16 = vld [vmem:[#allocation2 + $0x78] sm:$0x1]  ;;  %7824 = vst.msk [vmem:[#allocation2 + $0x88] sm:$0x3] %vm1634_vm12, %v7782_v33  ;;  %v21510_v1 = vpack.c.bf16 %v21504_v28, %v21500_v62  ;;  %v18826_v43 = vld [vmem:[%s23121_s1 + $0x790] sm:$0xff]  }
 0xd74   : > { %v21426_v5 = vld [vmem:[#allocation2 + $0x71] sm:$0xff]  ;;  %7944 = vst.msk [vmem:[#allocation2 + $0x79] sm:$0x1] %vm1756_vm15, %v7924_v16  ;;  %7934 = vst.msk [vmem:[#allocation2 + $0x70] sm:$0x1] %vm1756_vm15, %v7914_v22 }
 0xd75   : > { %v21432_v15 = vpack.c.bf16 %v21426_v5, %v21422_v13  ;;  %7904 = vst.msk [vmem:[#allocation2 + $0x88] sm:$0x3] %vm1716_vm14, %v7862_v36  ;;  %v18827_v22 = vld [vmem:[%s23121_s1 + $0x798] sm:$0xff]  }
 0xd76   : > { %v7784_v31 = vpop.permute.xlu0 %7783  ;;  %v7864_v4 = vpop.permute.xlu1 %7863 }
 0xd77   : > { %17284 = vmatmul.mubr.msk.bf16.gmra.mrb[20].mxu1 %vm170_vm0, %v21432_v15  ;;  %7825 = vst.msk [vmem:[#allocation2 + $0x90] sm:$0xff] %vm1632_vm11, %v7784_v31  ;;  %v7961_v55 = vld [vmem:[#allocation2 + $0x60] sm:$0xff] }
 0xd78   : > { %17297 = vmatprep.mubr.msk.bf16.mxu1 %vm170_vm0, %v7963_v17  ;;  %v7915_v18 = vld [vmem:[#allocation2 + $0x81] sm:$0x1]  ;;  %7905 = vst.msk [vmem:[#allocation2 + $0x90] sm:$0xff] %vm1714_vm13, %v7864_v4  ;;  %v21528_v36 = vld [vmem:[#allocation2 + $0x62] sm:$0xff]  ;;  %v8361_v17 = vpack.c.bf16 %v21443_v10, %v21353_v9  ;;  %v8362_v9 = vpack.c.bf16 %v21455_v51, %v21448_v39  ;;  %v8363_v10 = vpack.c.bf16 %v7961_v55, %v21446_v0 }
 0xd79   : > { %7935 = vst.msk [vmem:[#allocation2 + $0x80] sm:$0x1] %vm1756_vm15, %v7915_v18  ;;  %v18828_v31 = vld [vmem:[%s23121_s1 + $0x7a0] sm:$0xff]   ;;  %v18829_v4 = vld [vmem:[%s23121_s1 + $0x7a8] sm:$0xff]   ;;  %v18830_v18 = vld [vmem:[%s23121_s1 + $0x7b0] sm:$0xff]   ;;  %v8499_v0 = vpack.c.bf16 %v21368_v8, %v21364_v14  ;;  %v8500_v14 = vpack.c.bf16 %v21396_v60, %v21366_v37 }
 0xd7a   : > { %v7786_v56 = vpop.permute.xlu0 %7785  ;;  %v7866_v11 = vpop.permute.xlu1 %7865  ;;  %v18832_v39 = vld [vmem:[%s23121_s1 + $0x7c0] sm:$0xff]   ;;  %v18833_v51 = vld [vmem:[%s23121_s1 + $0x7c8] sm:$0xff]   ;;  %v18835_v8 = vld [vmem:[%s23121_s1 + $0x7d8] sm:$0xff]  }
 0xd7b   : > { %7826 = vst.msk [vmem:[#allocation2 + $0x98] sm:$0x3] %vm1634_vm12, %v7786_v56  ;;  %v21476_v38 = vld [vmem:[#allocation2 + $0x70] sm:$0xff]  ;;  %v18831_v56 = vld [vmem:[%s23121_s1 + $0x7b8] sm:$0xff]   ;;  %v18837_v60 = vld [vmem:[%s23121_s1 + $0x7e8] sm:$0xff]  }
 0xd7c   : > { %v7925_v44 = vld [vmem:[#allocation2 + $0x88] sm:$0x1]  ;;  %7906 = vst.msk [vmem:[#allocation2 + $0x98] sm:$0x3] %vm1716_vm14, %v7866_v11  ;;  %v21486_v59 = vpack.c.bf16 %v21476_v38, %v7961_v55  ;;  %v21526_v33 = vld [vmem:[#allocation2 + $0x72] sm:$0xff]  ;;  %v8639_v55 = vpack.c.bf16 %v21528_v36, %v21502_v30 }
 0xd7d   : > { %7945 = vst.msk [vmem:[#allocation2 + $0x89] sm:$0x1] %vm1756_vm15, %v7925_v44  ;;  %v21532_v16 = vpack.c.bf16 %v21526_v33, %v21528_v36  ;;  %v8501_v44 = vpack.c.bf16 %v21422_v13, %v21398_v63  ;;  %v8637_v63 = vpack.c.bf16 %v21500_v62, %v21483_v57  ;;  %v18838_v13 = vld [vmem:[%s23121_s1 + $0x7f0] sm:$0xff]  }
 0xd7f   : > { %17298 = vmatmul.mubr.msk.bf16.vlgmr.msra.gmra.mrb[16].mxu1 %vm170_vm0, %v21453_v41  ;;  %v7916_v7 = vld [vmem:[#allocation2 + $0x91] sm:$0x1] }
 0xd80   : > { %17306 = vmatpush3.bf16.msra.mxu1 %v18819_v24  ;;  %17301 = vmatprep.mubr.msk.bf16.mxu1 %vm170_vm0, %v21463_v6  ;;  %v21473_v48 = vld [vmem:[#allocation2 + $0x80] sm:$0xff]  ;;  %7936 = vst.msk [vmem:[#allocation2 + $0x90] sm:$0x1] %vm1756_vm15, %v7916_v7 }
 0xd81   : > { %17307 = vmatprep.subr.bf16.mxu1 %v18820_v42  ;;  %7953 = vst.msk [vmem:[#allocation2 + $0x90] sm:$0xff] %vm170_vm0, %v21473_v48  ;;  %v21506_v24 = vld [vmem:[#allocation2 + $0x42] sm:$0xff]  ;;  %v8364_v11 = vpack.c.bf16 %v21473_v48, %v21476_v38 }
 0xd82   : > { %v21517_v12 = vpack.c.bf16 %v21502_v30, %v21506_v24  ;;  %v18836_v7 = vld [vmem:[%s23121_s1 + $0x7e0] sm:$0xff]   ;;  %v8638_v38 = vpack.c.bf16 %v21506_v24, %v21504_v28  ;;  %v18850_v28 = vld [vmem:[%s23121_s1 + $0x850] sm:$0xff]  }
 0xd83   : > { %v7926_v58 = vld [vmem:[#allocation2 + $0x98] sm:$0x1] }
 0xd84   : > { %17308 = vmatpush3.bf16.msra.mxu1 %v18820_v42  ;;  %v7950_v3 = vld [vmem:[#allocation2 + $0x88] sm:$0x3]  ;;  %7946 = vst.msk [vmem:[#allocation2 + $0x99] sm:$0x1] %vm1756_vm15, %v7926_v58  ;;  %v18834_v42 = vld [vmem:[%s23121_s1 + $0x7d0] sm:$0xff]  }
 0xd85   : > { %17309 = vmatprep.subr.bf16.mxu1 %v18821_v52  ;;  %7954 = vst.msk [vmem:[#allocation2 + $0x98] sm:$0x3] %vm172_vm1, %v7950_v3  ;;  %v8636_v57 = vld [vmem:[#allocation2 + $0x82] sm:$0xff]  ;;  %v18842_v3 = vld [vmem:[%s23121_s1 + $0x810] sm:$0xff]  }
 0xd86   : > { %v8640_v58 = vpack.c.bf16 %v8636_v57, %v21526_v33 }
 0xd87   : > { %17302 = vmatmul.mubr.msk.bf16.gmra.mrb[20].mxu1 %vm170_vm0, %v21486_v59 }
 0xd88   : > { %17310 = vmatpush3.bf16.msra.mxu1 %v18821_v52  ;;  %17315 = vmatprep.mubr.msk.bf16.mxu1 %vm170_vm0, %v8223_v45  ;;  %v21586_v52 = vld [vmem:[#allocation2 + $0x81] sm:$0xff]  ;;  %v18843_v45 = vld [vmem:[%s23121_s1 + $0x818] sm:$0xff]   ;;  %v21638_v62 = vld [vmem:[#allocation2 + $0x90] sm:$0xff] }
 0xd89   : > { %17311 = vmatprep.subr.bf16.mxu1 %v18822_v21  ;;  %v8502_v37 = vpack.c.bf16 %v21586_v52, %v21426_v5  ;;  %v18839_v5 = vld [vmem:[%s23121_s1 + $0x7f8] sm:$0xff]   ;;  %v8778_v30 = vpack.c.bf16 %v21638_v62, %v21473_v48  ;;  %v18849_v48 = vld [vmem:[%s23121_s1 + $0x848] sm:$0xff]  }
 0xd8c   : > { %17312 = vmatpush3.bf16.msra.mxu1 %v18822_v21  ;;  %v18841_v21 = vld [vmem:[%s23121_s1 + $0x808] sm:$0xff]   ;;  %v8912_v24 = vld [vmem:[#allocation2 + $0x91] sm:$0xff] }
 0xd8d   : > { %17313 = vmatprep.subr.bf16.mxu1 %v18823_v61 }
 0xd90   : > { %17314 = vmatpush3.bf16.msra.mxu1 %v18823_v61  ;;  %v18844_v61 = vld [vmem:[%s23121_s1 + $0x820] sm:$0xff]  }
 0xd91   : > { %17323 = vmatprep.subr.bf16.mxu1 %v18824_v50 }
 0xd93   : > { %17316 = vmatmul.mubr.msk.bf16.vlgmr.msra.gmra.mrb[16].mxu1 %vm170_vm0, %v21510_v1 }
 0xd94   : > { %17319 = vmatprep.mubr.msk.bf16.mxu1 %vm170_vm0, %v21517_v12  ;;  %17324 = vmatpush3.bf16.msra.mxu1 %v18824_v50  ;;  %v18845_v50 = vld [vmem:[%s23121_s1 + $0x828] sm:$0xff]  }
 0xd95   : > { %17325 = vmatprep.subr.bf16.mxu1 %v18825_v29 }
 0xd98   : > { %17326 = vmatpush3.bf16.msra.mxu1 %v18825_v29  ;;  %v8916_v29 = vpack.c.bf16 %v8912_v24, %v21586_v52  ;;  %v18856_v24 = vld [vmem:[%s23121_s1 + $0x8a8] sm:$0xff]  }
 0xd99   : > { %17327 = vmatprep.subr.bf16.mxu1 %v18826_v43 }
 0xd9b   : > { %17320 = vmatmul.mubr.msk.bf16.gmra.mrb[20].mxu1 %vm170_vm0, %v21532_v16 }
 0xd9c   : > { %17328 = vmatpush3.bf16.msra.mxu1 %v18826_v43  ;;  %17333 = vmatprep.mubr.msk.bf16.mxu1 %vm170_vm0, %v8361_v17  ;;  %v18852_v43 = vld [vmem:[%s23121_s1 + $0x860] sm:$0xff]  }
 0xd9d   : > { %17329 = vmatprep.subr.bf16.mxu1 %v18827_v22 }
 0xda0   : > { %17330 = vmatpush3.bf16.msra.mxu1 %v18827_v22 }
 0xda1   : > { %17331 = vmatprep.subr.bf16.mxu1 %v18828_v31 }
 0xda4   : > { %17332 = vmatpush3.bf16.msra.mxu1 %v18828_v31 }
 0xda5   : > { %17341 = vmatprep.subr.bf16.mxu1 %v18829_v4 }
 0xda7   : > { %17334 = vmatmul.mubr.msk.bf16.vlgmr.msra.gmra.mrb[16].mxu1 %vm170_vm0, %v8362_v9 }
 0xda8   : > { %17337 = vmatprep.mubr.msk.bf16.mxu1 %vm170_vm0, %v8363_v10  ;;  %17342 = vmatpush3.bf16.msra.mxu1 %v18829_v4 }
 0xda9   : > { %17343 = vmatprep.subr.bf16.mxu1 %v18830_v18 }
 0xdac   : > { %17344 = vmatpush3.bf16.msra.mxu1 %v18830_v18 }
 0xdad   : > { %17345 = vmatprep.subr.bf16.mxu1 %v18831_v56 }
 0xdaf   : > { %17338 = vmatmul.mubr.msk.bf16.gmra.mrb[20].mxu1 %vm170_vm0, %v8364_v11 }
 0xdb0   : > { %17346 = vmatpush3.bf16.msra.mxu1 %v18831_v56  ;;  %17351 = vmatprep.mubr.msk.bf16.mxu1 %vm170_vm0, %v8499_v0 }
 0xdb1   : > { %17347 = vmatprep.subr.bf16.mxu1 %v18832_v39 }
 0xdb4   : > { %17348 = vmatpush3.bf16.msra.mxu1 %v18832_v39 }
 0xdb5   : > { %17349 = vmatprep.subr.bf16.mxu1 %v18833_v51 }
 0xdb8   : > { %17350 = vmatpush3.bf16.msra.mxu1 %v18833_v51 }
 0xdb9   : > { %17359 = vmatprep.subr.bf16.mxu1 %v18834_v42 }
 0xdbb   : > { %17352 = vmatmul.mubr.msk.bf16.vlgmr.msra.gmra.mrb[16].mxu1 %vm170_vm0, %v8500_v14 }
 0xdbc   : > { %17355 = vmatprep.mubr.msk.bf16.mxu1 %vm170_vm0, %v8501_v44  ;;  %17360 = vmatpush3.bf16.msra.mxu1 %v18834_v42 }
 0xdbd   : > { %17361 = vmatprep.subr.bf16.mxu1 %v18835_v8 }
 0xdc0   : > { %17362 = vmatpush3.bf16.msra.mxu1 %v18835_v8 }
 0xdc1   : > { %17363 = vmatprep.subr.bf16.mxu1 %v18836_v7 }
 0xdc3   : > { %17356 = vmatmul.mubr.msk.bf16.gmra.mrb[20].mxu1 %vm170_vm0, %v8502_v37  ;;  %v9246_v37 = vld [vmem:[#allocation2 + $0x8] sm:$0x3] }
 0xdc4   : > { %17364 = vmatpush3.bf16.msra.mxu1 %v18836_v7  ;;  %17369 = vmatprep.mubr.msk.bf16.mxu1 %vm170_vm0, %v8637_v63 }
 0xdc5   : > { %17365 = vmatprep.subr.bf16.mxu1 %v18837_v60 }
 0xdc8   : > { %17366 = vmatpush3.bf16.msra.mxu1 %v18837_v60 }
 0xdc9   : > { %17367 = vmatprep.subr.bf16.mxu1 %v18838_v13 }
 0xdcc   : > { %17368 = vmatpush3.bf16.msra.mxu1 %v18838_v13 }
 0xdcd   : > { %17377 = vmatprep.subr.bf16.mxu1 %v18839_v5 }
 0xdcf   : > { %17370 = vmatmul.mubr.msk.bf16.vlgmr.msra.gmra.mrb[16].mxu1 %vm170_vm0, %v8638_v38 }
 0xdd0   : > { %17373 = vmatprep.mubr.msk.bf16.mxu1 %vm170_vm0, %v8639_v55  ;;  %17378 = vmatpush3.bf16.msra.mxu1 %v18839_v5 }
 0xdd1   : > { %17379 = vmatprep.subr.bf16.mxu1 %v18840_v54 }
 0xdd4   : > { %17380 = vmatpush3.bf16.msra.mxu1 %v18840_v54 }
 0xdd5   : > { %17381 = vmatprep.subr.bf16.mxu1 %v18841_v21 }
 0xdd7   : > { %17374 = vmatmul.mubr.msk.bf16.gmra.mrb[20].mxu1 %vm170_vm0, %v8640_v58 }
 0xdd8   : > { %17382 = vmatpush3.bf16.msra.mxu1 %v18841_v21  ;;  %17387 = vmatprep.mubr.msk.bf16.mxu1 %vm170_vm0, %v21453_v41  ;;  %v18846_v41 = vld [vmem:[%s23121_s1 + $0x830] sm:$0xff]  }
 0xdd9   : > { %17383 = vmatprep.subr.bf16.mxu1 %v18842_v3 }
 0xddc   : > { %17384 = vmatpush3.bf16.msra.mxu1 %v18842_v3 }
 0xddd   : > { %17385 = vmatprep.subr.bf16.mxu1 %v18843_v45 }
 0xde0   : > { %17386 = vmatpush3.bf16.msra.mxu1 %v18843_v45 }
 0xde1   : > { %17395 = vmatprep.subr.bf16.mxu1 %v18844_v61 }
 0xde3   : > { %17388 = vmatmul.mubr.msk.bf16.vlgmr.msra.gmra.mrb[16].mxu1 %vm170_vm0, %v21463_v6  ;;  %v18847_v6 = vld [vmem:[%s23121_s1 + $0x838] sm:$0xff]  }
 0xde4   : > { %17391 = vmatprep.mubr.msk.bf16.mxu1 %vm170_vm0, %v21486_v59  ;;  %17396 = vmatpush3.bf16.msra.mxu1 %v18844_v61  ;;  %v18848_v59 = vld [vmem:[%s23121_s1 + $0x840] sm:$0xff]  }
 0xde5   : > { %17397 = vmatprep.subr.bf16.mxu1 %v18845_v50 }
 0xde8   : > { %17398 = vmatpush3.bf16.msra.mxu1 %v18845_v50  ;;  %v18854_v50 = vld [vmem:[%s23121_s1 + $0x898] sm:$0xff]  }
 0xde9   : > { %17399 = vmatprep.subr.bf16.mxu1 %v18846_v41  ;;  %17431 = vmatprep.subr.bf16.mxu0 %v18854_v50 }
 0xdea   : > { %17432 = vmatpush3.bf16.msra.mxu0 %v18854_v50 }
 0xdeb   : > { %17392 = vmatmul.mubr.msk.bf16.gmra.mrb[20].mxu1 %vm170_vm0, %v8778_v30 }
 0xdec   : > { %17400 = vmatpush3.bf16.msra.mxu1 %v18846_v41  ;;  %17405 = vmatprep.mubr.msk.bf16.mxu1 %vm170_vm0, %v21376_v35  ;;  %v18851_v35 = vld [vmem:[%s23121_s1 + $0x858] sm:$0xff]  }
 0xded   : > { %17401 = vmatprep.subr.bf16.mxu1 %v18847_v6 }
 0xdf0   : > { %17402 = vmatpush3.bf16.msra.mxu1 %v18847_v6 }
 0xdf1   : > { %17403 = vmatprep.subr.bf16.mxu1 %v18848_v59 }
 0xdf4   : > { %17404 = vmatpush3.bf16.msra.mxu1 %v18848_v59 }
 0xdf5   : > { %17413 = vmatprep.subr.bf16.mxu1 %v18849_v48 }
 0xdf7   : > { %17406 = vmatmul.mubr.msk.bf16.vlgmr.msra.gmra.mrb[16].mxu1 %vm170_vm0, %v21405_v2  ;;  %v18853_v2 = vld [vmem:[%s23121_s1 + $0x868] sm:$0xff]  }
 0xdf8   : > { %17409 = vmatprep.mubr.msk.bf16.mxu1 %vm170_vm0, %v21432_v15  ;;  %17414 = vmatpush3.bf16.msra.mxu1 %v18849_v48  ;;  %v9050_v15 = vld [vmem:[#allocation2 + $0x92] sm:$0xff]  ;;  %v18855_v48 = vld [vmem:[%s23121_s1 + $0x8a0] sm:$0xff]  }
 0xdf9   : > { %17415 = vmatprep.subr.bf16.mxu1 %v18850_v28  ;;  %v9054_v33 = vpack.c.bf16 %v9050_v15, %v8636_v57  ;;  %17433 = vmatprep.subr.bf16.mxu0 %v18855_v48  ;;  %v18858_v15 = vld [vmem:[%s23121_s1 + $0x8b8] sm:$0xff]  }
 0xdfa   : > { %17434 = vmatpush3.bf16.msra.mxu0 %v18855_v48 }
 0xdfb   : > { %17435 = vmatprep.subr.bf16.mxu0 %v18856_v24 }
 0xdfc   : > { %17416 = vmatpush3.bf16.msra.mxu1 %v18850_v28 }
 0xdfd   : > { %17417 = vmatprep.subr.bf16.mxu1 %v18851_v35 }
 0xdfe   : > { %17436 = vmatpush3.bf16.msra.mxu0 %v18856_v24  ;;  %v18860_v24 = vld [vmem:[%s23121_s1 + $0x878] sm:$0xff]  }
 0xdff   : > { %17410 = vmatmul.mubr.msk.bf16.gmra.mrb[20].mxu1 %vm170_vm0, %v8916_v29 }
 0xe00   : > { %17418 = vmatpush3.bf16.msra.mxu1 %v18851_v35  ;;  %17423 = vmatprep.mubr.msk.bf16.mxu1 %vm170_vm0, %v21510_v1 }
 0xe01   : > { %17419 = vmatprep.subr.bf16.mxu1 %v18852_v43 }
 0xe04   : > { %17420 = vmatpush3.bf16.msra.mxu1 %v18852_v43 }
 0xe05   : > { %17421 = vmatprep.subr.bf16.mxu1 %v18853_v2 }
 0xe08   : > { %17422 = vmatpush3.bf16.msra.mxu1 %v18853_v2  ;;  %v18857_v2 = vld [vmem:[%s23121_s1 + $0x8b0] sm:$0xff]  }
 0xe09   : > { %17437 = vmatprep.subr.bf16.mxu0 %v18857_v2 }
 0xe0a   : > { %17438 = vmatpush3.bf16.msra.mxu0 %v18857_v2 }
 0xe0b   : > { %17424 = vmatmul.mubr.msk.bf16.vlgmr.msra.gmra.mrb[16].mxu1 %vm170_vm0, %v21517_v12  ;;  %17439 = vmatprep.subr.bf16.mxu0 %v18858_v15 }
 0xe0c   : > { %17427 = vmatprep.mubr.msk.bf16.mxu1 %vm170_vm0, %v21532_v16 }
 0xe0e   : > { %17440 = vmatpush3.bf16.msra.mxu0 %v18858_v15  ;;  %v18861_v15 = vld [vmem:[%s23121_s1 + $0x880] sm:$0xff]  }
 0xe13   : > { %17428 = vmatmul.mubr.msk.bf16.gmra.mrb[20].mxu1 %vm170_vm0, %v9054_v33 }
 0xede   : > { %v17425_v36 = vpop.f32.mrb[16].mxu1 }
 0xedf   : > { %v9142_v1 = vpop.f32.mrb[17].mxu1  ;;  %v9191_v4 = vmul.f32 0.01, %v17425_v36  ;;  %vm9183_vm5 = vcmp.ge.f32.partialorder %v17425_v36, 0.0 }
 0xee0   : > { %vm9181_vm3 = vcmp.ge.f32.partialorder %v9142_v1, 0.0  ;;  %v9189_v22 = vmul.f32 0.01, %v9142_v1  ;;  %v17426_v17 = vpop.f32.mrb[18].mxu1 }
 0xee1   : > { %v9145_v31 = vpop.f32.mrb[19].mxu1  ;;  %v9192_v12 = vmul.f32 0.01, %v17426_v17  ;;  %vm9184_vm6 = vcmp.ge.f32.partialorder %v17426_v17, 0.0  ;;  %v9199_v56 = vsel %vm9183_vm5, %v17425_v36, %v9191_v4  ;;  %v21743_v4 = vld [vmem:[%s23121_s1 + $0x870] sm:$0xff]  }
 0xee2   : > { %vm9182_vm4 = vcmp.ge.f32.partialorder %v9145_v31, 0.0  ;;  %v9190_v9 = vmul.f32 0.01, %v9145_v31  ;;  %v9197_v18 = vsel %vm9181_vm3, %v9142_v1, %v9189_v22  ;;  %17449 = vmatprep.subr.bf16.mxu0 %v21743_v4  ;;  %vm10755_vm3 = vcmask 523264  }
 0xee3   : > { %9213 = vrot.lane.b32.xlu0 %v9197_v18, %s19063_s8  ;;  %v9200_v51 = vsel %vm9184_vm6, %v17426_v17, %v9192_v12 }
 0xee4   : > { %v9198_v10 = vsel %vm9182_vm4, %v9145_v31, %v9190_v9 }
 0xee5   : > { %9215 = vrot.lane.b32.xlu1 %v9198_v10, %s19063_s8 }
 0xee6   : > { %v17429_v16 = vpop.f32.mrb[20].mxu1 }
 0xee7   : > { %9217 = vrot.lane.b32.xlu0 %v9199_v56, %s19063_s8  ;;  %v9158_v11 = vpop.f32.mrb[21].mxu1  ;;  %v9195_v14 = vmul.f32 0.01, %v17429_v16  ;;  %vm9187_vm9 = vcmp.ge.f32.partialorder %v17429_v16, 0.0 }
 0xee8   : > { %vm9185_vm7 = vcmp.ge.f32.partialorder %v9158_v11, 0.0  ;;  %v9193_v39 = vmul.f32 0.01, %v9158_v11  ;;  %v17430_v0 = vpop.f32.mrb[22].mxu1 }
 0xee9   : > { %9219 = vrot.lane.b32.xlu1 %v9200_v51, %s19063_s8  ;;  %v9161_v42 = vpop.f32.mrb[23].mxu1  ;;  %v9203_v52 = vsel %vm9187_vm9, %v17429_v16, %v9195_v14  ;;  %v9196_v60 = vmul.f32 0.01, %v17430_v0  ;;  %vm9188_vm10 = vcmp.ge.f32.partialorder %v17430_v0, 0.0  ;;  %v9264_v16 = vld [vmem:[#allocation2 + $0x98] sm:$0x3] }
 0xeea   : > { %vm9186_vm8 = vcmp.ge.f32.partialorder %v9161_v42, 0.0  ;;  %v9194_v8 = vmul.f32 0.01, %v9161_v42  ;;  %v9201_v44 = vsel %vm9185_vm7, %v9158_v11, %v9193_v39 }
 0xeeb   : > { %9221 = vrot.lane.b32.xlu0 %v9201_v44, %s19063_s8  ;;  %v9204_v63 = vsel %vm9188_vm10, %v17430_v0, %v9196_v60 }
 0xeec   : > { %v9202_v7 = vsel %vm9186_vm8, %v9161_v42, %v9194_v8 }
 0xeed   : > { %9223 = vrot.lane.b32.xlu1 %v9202_v7, %s19063_s8 }
 0xeef   : > { %9225 = vrot.lane.b32.xlu0 %v9203_v52, %s19063_s8 }
 0xef1   : > { %9285 = vrot.lane.b32.xlu1 %v21424_v40, %s19064_s7 }
 0xef3   : > { %9287 = vrot.lane.b32.xlu0 %v9246_v37, %s19064_s7 }
 0xef5   : > { %9365 = vrot.lane.b32.xlu1 %v21424_v40, %s19063_s8 }
 0xef7   : > { %9367 = vrot.lane.b32.xlu0 %v9246_v37, %s19063_s8 }
 0xef9   : > { %9227 = vrot.lane.b32.xlu1 %v9204_v63, %s19063_s8 }
 0xf55   : > { %v9214_v13 = vpop.permute.xlu0 %9213 }
 0xf56   : > { %9237 = vst.msk [vmem:[#allocation2 + $0x11] sm:$0xff] %vm233_vm2, %v9214_v13 }
 0xf57   : > { %v9216_v5 = vpop.permute.xlu1 %9215 }
 0xf58   : > { %9238 = vst.msk [vmem:[#allocation2 + $0x21] sm:$0xff] %vm233_vm2, %v9216_v5 }
 0xf59   : > { %v9218_v38 = vpop.permute.xlu0 %9217 }
 0xf5a   : > { %9239 = vst.msk [vmem:[#allocation2 + $0x31] sm:$0xff] %vm233_vm2, %v9218_v38 }
 0xf5b   : > { %v9220_v54 = vpop.permute.xlu1 %9219 }
 0xf5c   : > { %9240 = vst.msk [vmem:[#allocation2 + $0x41] sm:$0xff] %vm233_vm2, %v9220_v54 }
 0xf5d   : > { %v9222_v55 = vpop.permute.xlu0 %9221  ;;  %v9248_v30 = vld [vmem:[#allocation2 + $0x18] sm:$0x3]  ;;  %v9247_v6 = vld [vmem:[#allocation2 + $0x10] sm:$0xff] }
 0xf5e   : > { %9241 = vst.msk [vmem:[#allocation2 + $0x51] sm:$0xff] %vm233_vm2, %v9222_v55 }
 0xf5f   : > { %v9224_v40 = vpop.permute.xlu1 %9223  ;;  %v9249_v33 = vld [vmem:[#allocation2 + $0x20] sm:$0xff]  ;;  %v9250_v36 = vld [vmem:[#allocation2 + $0x28] sm:$0x3] }
 0xf60   : > { %9242 = vst.msk [vmem:[#allocation2 + $0x61] sm:$0xff] %vm233_vm2, %v9224_v40 }
 0xf61   : > { %v9226_v21 = vpop.permute.xlu0 %9225  ;;  %v9251_v57 = vld [vmem:[#allocation2 + $0x30] sm:$0xff]  ;;  %v9252_v58 = vld [vmem:[#allocation2 + $0x38] sm:$0x3] }
 0xf62   : > { %9243 = vst.msk [vmem:[#allocation2 + $0x71] sm:$0xff] %vm233_vm2, %v9226_v21  ;;  %9297 = vrot.lane.b32.xlu0 %v9251_v57, %s19064_s7  ;;  %9299 = vrot.lane.b32.xlu1 %v9252_v58, %s19064_s7 }
 0xf63   : > { %v9286_v3 = vpop.permute.xlu1 %9285  ;;  %v9253_v35 = vld [vmem:[#allocation2 + $0x40] sm:$0xff]  ;;  %v9254_v43 = vld [vmem:[#allocation2 + $0x48] sm:$0x3] }
 0xf64   : > { %9345 = vst.msk [vmem:[#allocation2] sm:$0xff] %vm1632_vm11, %v9286_v3 }
 0xf65   : > { %v9288_v45 = vpop.permute.xlu0 %9287  ;;  %v9255_v17 = vld [vmem:[#allocation2 + $0x50] sm:$0xff]  ;;  %v9256_v31 = vld [vmem:[#allocation2 + $0x58] sm:$0x3] }
 0xf66   : > { %9346 = vst.msk [vmem:[#allocation2 + $0x8] sm:$0x3] %vm1634_vm12, %v9288_v45  ;;  %9377 = vrot.lane.b32.xlu0 %v9251_v57, %s19063_s8  ;;  %9379 = vrot.lane.b32.xlu1 %v9252_v58, %s19063_s8 }
 0xf67   : > { %v9366_v61 = vpop.permute.xlu1 %9365  ;;  %v9258_v9 = vld [vmem:[#allocation2 + $0x68] sm:$0x3]  ;;  %v9257_v18 = vld [vmem:[#allocation2 + $0x60] sm:$0xff] }
 0xf68   : > { %9425 = vst.msk [vmem:[#allocation2] sm:$0xff] %vm1714_vm13, %v9366_v61 }
 0xf69   : > { %v9368_v41 = vpop.permute.xlu0 %9367  ;;  %v9259_v1 = vld [vmem:[#allocation2 + $0x70] sm:$0xff]  ;;  %v9260_v22 = vld [vmem:[#allocation2 + $0x78] sm:$0x3] }
 0xf6a   : > { %9426 = vst.msk [vmem:[#allocation2 + $0x8] sm:$0x3] %vm1716_vm14, %v9368_v41  ;;  %9291 = vrot.lane.b32.xlu0 %v9248_v30, %s19064_s7  ;;  %9289 = vrot.lane.b32.xlu1 %v9247_v6, %s19064_s7 }
 0xf6b   : > { %v9228_v59 = vpop.permute.xlu1 %9227 }
 0xf6c   : > { %9244 = vst.msk [vmem:[#allocation2 + $0x81] sm:$0xff] %vm233_vm2, %v9228_v59 }
 0xf6e   : > { %9371 = vrot.lane.b32.xlu0 %v9248_v30, %s19063_s8  ;;  %9369 = vrot.lane.b32.xlu1 %v9247_v6, %s19063_s8 }
 0xf6f   : > { %v9445_v28 = vld [vmem:[#allocation2 + $0x1] sm:$0x1] }
 0xf70   : > { %9465 = vst.msk [vmem:[#allocation2] sm:$0x1] %vm1756_vm15, %v9445_v28 }
 0xf71   : > { %v9455_v29 = vld [vmem:[#allocation2 + $0x8] sm:$0x1] }
 0xf72   : > { %9475 = vst.msk [vmem:[#allocation2 + $0x9] sm:$0x1] %vm1756_vm15, %v9455_v29  ;;  %9301 = vrot.lane.b32.xlu0 %v9253_v35, %s19064_s7  ;;  %9303 = vrot.lane.b32.xlu1 %v9254_v43, %s19064_s7 }
 0xf73   : > { %v9261_v12 = vld [vmem:[#allocation2 + $0x80] sm:$0xff]  ;;  %v9262_v10 = vld [vmem:[#allocation2 + $0x88] sm:$0x3] }
 0xf76   : > { %9381 = vrot.lane.b32.xlu0 %v9253_v35, %s19063_s8  ;;  %9383 = vrot.lane.b32.xlu1 %v9254_v43, %s19063_s8 }
 0xf7a   : > { %9293 = vrot.lane.b32.xlu0 %v9249_v33, %s19064_s7  ;;  %9295 = vrot.lane.b32.xlu1 %v9250_v36, %s19064_s7 }
 0xf7e   : > { %9373 = vrot.lane.b32.xlu0 %v9249_v33, %s19063_s8  ;;  %9375 = vrot.lane.b32.xlu1 %v9250_v36, %s19063_s8 }
 0xf82   : > { %9313 = vrot.lane.b32.xlu0 %v9259_v1, %s19064_s7  ;;  %9315 = vrot.lane.b32.xlu1 %v9260_v22, %s19064_s7 }
 0xf86   : > { %9305 = vrot.lane.b32.xlu0 %v9255_v17, %s19064_s7  ;;  %9307 = vrot.lane.b32.xlu1 %v9256_v31, %s19064_s7 }
 0xf8a   : > { %9385 = vrot.lane.b32.xlu0 %v9255_v17, %s19063_s8  ;;  %9387 = vrot.lane.b32.xlu1 %v9256_v31, %s19063_s8 }
 0xf8e   : > { %9311 = vrot.lane.b32.xlu1 %v9258_v9, %s19064_s7  ;;  %9309 = vrot.lane.b32.xlu0 %v9257_v18, %s19064_s7 }
 0xf92   : > { %9391 = vrot.lane.b32.xlu1 %v9258_v9, %s19063_s8  ;;  %9389 = vrot.lane.b32.xlu0 %v9257_v18, %s19063_s8 }
 0xf96   : > { %9395 = vrot.lane.b32.xlu1 %v9260_v22, %s19063_s8  ;;  %9393 = vrot.lane.b32.xlu0 %v9259_v1, %s19063_s8  ;;  %v18862_v1 = vld [vmem:[%s23121_s1 + $0x888] sm:$0xff]  }
 0xf9a   : > { %9397 = vrot.lane.b32.xlu1 %v9261_v12, %s19063_s8  ;;  %9317 = vrot.lane.b32.xlu0 %v9261_v12, %s19064_s7 }
 0xf9e   : > { %9399 = vrot.lane.b32.xlu1 %v9262_v10, %s19063_s8  ;;  %9319 = vrot.lane.b32.xlu0 %v9262_v10, %s19064_s7  ;;  %v18863_v10 = vld [vmem:[%s23121_s1 + $0x890] sm:$0xff]  }
 0xfa2   : > { %9401 = vrot.lane.b32.xlu1 %v21638_v62, %s19063_s8  ;;  %9321 = vrot.lane.b32.xlu0 %v21638_v62, %s19064_s7 }
 0xfa6   : > { %9403 = vrot.lane.b32.xlu1 %v9264_v16, %s19063_s8  ;;  %9323 = vrot.lane.b32.xlu0 %v9264_v16, %s19064_s7 }
 0xfd4   : > { %v9298_v56 = vpop.permute.xlu0 %9297  ;;  %v9300_v11 = vpop.permute.xlu1 %9299 }
 0xfd5   : > { %9351 = vst.msk [vmem:[#allocation2 + $0x30] sm:$0xff] %vm1632_vm11, %v9298_v56 }
 0xfd6   : > { %9352 = vst.msk [vmem:[#allocation2 + $0x38] sm:$0x3] %vm1634_vm12, %v9300_v11  ;;  %v18864_v11 = vld [vmem:[%s23121_s1 + $0x8c0] sm:$0xff]  }
 0xfd8   : > { %v9378_v39 = vpop.permute.xlu0 %9377  ;;  %v9380_v0 = vpop.permute.xlu1 %9379 }
 0xfd9   : > { %9431 = vst.msk [vmem:[#allocation2 + $0x30] sm:$0xff] %vm1714_vm13, %v9378_v39 }
 0xfda   : > { %9432 = vst.msk [vmem:[#allocation2 + $0x38] sm:$0x3] %vm1716_vm14, %v9380_v0 }
 0xfdc   : > { %v9292_v51 = vpop.permute.xlu0 %9291  ;;  %v9290_v42 = vpop.permute.xlu1 %9289 }
 0xfdd   : > { %9348 = vst.msk [vmem:[#allocation2 + $0x18] sm:$0x3] %vm1634_vm12, %v9292_v51 }
 0xfde   : > { %9347 = vst.msk [vmem:[#allocation2 + $0x10] sm:$0xff] %vm1632_vm11, %v9290_v42 }
 0xfe0   : > { %v9372_v62 = vpop.permute.xlu0 %9371  ;;  %v9370_v14 = vpop.permute.xlu1 %9369  ;;  %v9448_v8 = vld [vmem:[#allocation2 + $0x31] sm:$0x1] }
 0xfe1   : > { %v9458_v44 = vld [vmem:[#allocation2 + $0x38] sm:$0x1]  ;;  %9428 = vst.msk [vmem:[#allocation2 + $0x18] sm:$0x3] %vm1716_vm14, %v9372_v62 }
 0xfe2   : > { %9427 = vst.msk [vmem:[#allocation2 + $0x10] sm:$0xff] %vm1714_vm13, %v9370_v14  ;;  %v21795_v61 = vld [vmem:[#allocation2 + $0x31] sm:$0xff] }
 0xfe3   : > { %9468 = vst.msk [vmem:[#allocation2 + $0x30] sm:$0x1] %vm1756_vm15, %v9448_v8  ;;  %9478 = vst.msk [vmem:[#allocation2 + $0x39] sm:$0x1] %vm1756_vm15, %v9458_v44 }
 0xfe4   : > { %v9302_v7 = vpop.permute.xlu0 %9301  ;;  %v9304_v52 = vpop.permute.xlu1 %9303 }
 0xfe5   : > { %9353 = vst.msk [vmem:[#allocation2 + $0x40] sm:$0xff] %vm1632_vm11, %v9302_v7 }
 0xfe6   : > { %9354 = vst.msk [vmem:[#allocation2 + $0x48] sm:$0x3] %vm1634_vm12, %v9304_v52 }
 0xfe8   : > { %v9456_v37 = vld [vmem:[#allocation2 + $0x18] sm:$0x1]  ;;  %v9382_v60 = vpop.permute.xlu0 %9381  ;;  %v9384_v63 = vpop.permute.xlu1 %9383 }
 0xfe9   : > { %v9446_v13 = vld [vmem:[#allocation2 + $0x11] sm:$0x1]  ;;  %9476 = vst.msk [vmem:[#allocation2 + $0x19] sm:$0x1] %vm1756_vm15, %v9456_v37 }
 0xfea   : > { %9433 = vst.msk [vmem:[#allocation2 + $0x40] sm:$0xff] %vm1714_vm13, %v9382_v60  ;;  %v21797_v6 = vld [vmem:[#allocation2 + $0x11] sm:$0xff] }
 0xfeb   : > { %9434 = vst.msk [vmem:[#allocation2 + $0x48] sm:$0x3] %vm1716_vm14, %v9384_v63 }
 0xfec   : > { %9466 = vst.msk [vmem:[#allocation2 + $0x10] sm:$0x1] %vm1756_vm15, %v9446_v13  ;;  %v9294_v5 = vpop.permute.xlu0 %9293  ;;  %v9296_v38 = vpop.permute.xlu1 %9295 }
 0xfed   : > { %9349 = vst.msk [vmem:[#allocation2 + $0x20] sm:$0xff] %vm1632_vm11, %v9294_v5 }
 0xfee   : > { %9350 = vst.msk [vmem:[#allocation2 + $0x28] sm:$0x3] %vm1634_vm12, %v9296_v38 }
 0xff0   : > { %v9486_v54 = vld [vmem:[#allocation2 + $0x18] sm:$0x3]  ;;  %v9374_v55 = vpop.permute.xlu0 %9373  ;;  %v9376_v40 = vpop.permute.xlu1 %9375 }
 0xff1   : > { %9490 = vst.msk [vmem:[#allocation2 + $0x8] sm:$0x3] %vm172_vm1, %v9486_v54  ;;  %v9449_v57 = vld [vmem:[#allocation2 + $0x41] sm:$0x1] }
 0xff2   : > { %9429 = vst.msk [vmem:[#allocation2 + $0x20] sm:$0xff] %vm1714_vm13, %v9374_v55  ;;  %v9459_v58 = vld [vmem:[#allocation2 + $0x48] sm:$0x1] }
 0xff3   : > { %v21784_v21 = vld [vmem:[#allocation2 + $0x10] sm:$0xff]  ;;  %9430 = vst.msk [vmem:[#allocation2 + $0x28] sm:$0x3] %vm1716_vm14, %v9376_v40  ;;  %v21827_v22 = vld [vmem:[#allocation2 + $0x41] sm:$0xff] }
 0xff4   : > { %9489 = vst.msk [vmem:[#allocation2] sm:$0xff] %vm170_vm0, %v21784_v21  ;;  %v9314_v3 = vpop.permute.xlu0 %9313  ;;  %v9316_v45 = vpop.permute.xlu1 %9315 }
 0xff5   : > { %9469 = vst.msk [vmem:[#allocation2 + $0x40] sm:$0x1] %vm1756_vm15, %v9449_v57  ;;  %9479 = vst.msk [vmem:[#allocation2 + $0x49] sm:$0x1] %vm1756_vm15, %v9459_v58  ;;  %v21879_v58 = vld [vmem:[#allocation2 + $0x30] sm:$0xff] }
 0xff6   : > { %9359 = vst.msk [vmem:[#allocation2 + $0x70] sm:$0xff] %vm1632_vm11, %v9314_v3 }
 0xff7   : > { %9360 = vst.msk [vmem:[#allocation2 + $0x78] sm:$0x3] %vm1634_vm12, %v9316_v45 }
 0xff8   : > { %v9306_v50 = vpop.permute.xlu0 %9305  ;;  %v9308_v41 = vpop.permute.xlu1 %9307 }
 0xff9   : > { %9355 = vst.msk [vmem:[#allocation2 + $0x50] sm:$0xff] %vm1632_vm11, %v9306_v50  ;;  %v9447_v35 = vld [vmem:[#allocation2 + $0x21] sm:$0x1] }
 0xffa   : > { %v21799_v59 = vld [vmem:[#allocation2 + $0x21] sm:$0xff]  ;;  %9356 = vst.msk [vmem:[#allocation2 + $0x58] sm:$0x3] %vm1634_vm12, %v9308_v41 }
 0xffb   : > { %v9516_v30 = vld [vmem:[#allocation2 + $0x1] sm:$0xff]  ;;  %v21806_v28 = vpack.c.bf16 %v21795_v61, %v21799_v59  ;;  %9467 = vst.msk [vmem:[#allocation2 + $0x20] sm:$0x1] %vm1756_vm15, %v9447_v35  ;;  %v18866_v35 = vld [vmem:[%s23121_s1 + $0x8d0] sm:$0xff]  }
 0xffc   : > { %v9524_v48 = vpack.c.bf16 %v21797_v6, %v9516_v30  ;;  %v9457_v29 = vld [vmem:[#allocation2 + $0x28] sm:$0x1]  ;;  %v9386_v43 = vpop.permute.xlu0 %9385  ;;  %v9388_v2 = vpop.permute.xlu1 %9387  ;;  %v21855_v14 = vld [vmem:[#allocation2] sm:$0xff] }
 0xffd   : > { %9477 = vst.msk [vmem:[#allocation2 + $0x29] sm:$0x1] %vm1756_vm15, %v9457_v29  ;;  %v9501_v63 = vpack.c.bf16 %v21784_v21, %v21855_v14  ;;  %v21886_v50 = vld [vmem:[#allocation2 + $0x40] sm:$0xff]  ;;  %v18865_v41 = vld [vmem:[%s23121_s1 + $0x8c8] sm:$0xff]  }
 0xffe   : > { %17441 = vmatprep.mubr.msk.bf16.mxu0 %vm170_vm0, %v9524_v48  ;;  %9435 = vst.msk [vmem:[#allocation2 + $0x50] sm:$0xff] %vm1714_vm13, %v9386_v43  ;;  %v9753_v43 = vld [vmem:[#allocation2 + $0x2] sm:$0xff] }
 0xfff   : > { %17442 = vmatmul.mubr.msk.bf16.vlgmr.msra.gmra.mrb[32].mxu0 %vm170_vm0, %v21806_v28  ;;  %9436 = vst.msk [vmem:[#allocation2 + $0x58] sm:$0x3] %vm1716_vm14, %v9388_v2 }
0x1000   : > { %17450 = vmatpush3.bf16.msra.mxu0 %v21743_v4  ;;  %v9310_v33 = vpop.permute.xlu0 %9309  ;;  %v9312_v36 = vpop.permute.xlu1 %9311 }
0x1001   : > { %17451 = vmatprep.subr.bf16.mxu0 %v18860_v24  ;;  %9357 = vst.msk [vmem:[#allocation2 + $0x60] sm:$0xff] %vm1632_vm11, %v9310_v33 }
0x1002   : > { %9358 = vst.msk [vmem:[#allocation2 + $0x68] sm:$0x3] %vm1634_vm12, %v9312_v36  ;;  %v21874_v54 = vld [vmem:[#allocation2 + $0x20] sm:$0xff] }
0x1003   : > { %v21884_v45 = vpack.c.bf16 %v21879_v58, %v21874_v54 }
0x1004   : > { %17452 = vmatpush3.bf16.msra.mxu0 %v18860_v24  ;;  %v9390_v17 = vpop.permute.xlu0 %9389  ;;  %v9392_v31 = vpop.permute.xlu1 %9391 }
0x1005   : > { %17453 = vmatprep.subr.bf16.mxu0 %v18861_v15  ;;  %v9450_v9 = vld [vmem:[#allocation2 + $0x51] sm:$0x1]  ;;  %9437 = vst.msk [vmem:[#allocation2 + $0x60] sm:$0xff] %vm1714_vm13, %v9390_v17  ;;  %v21917_v17 = vld [vmem:[#allocation2 + $0x12] sm:$0xff] }
0x1006   : > { %v21829_v4 = vld [vmem:[#allocation2 + $0x51] sm:$0xff]  ;;  %9438 = vst.msk [vmem:[#allocation2 + $0x68] sm:$0x3] %vm1716_vm14, %v9392_v31  ;;  %v9761_v31 = vpack.c.bf16 %v21917_v17, %v9753_v43  ;;  %v18885_v43 = vld [vmem:[%s23121_s1 + $0x968] sm:$0xff]  }
0x1007   : > { %v9460_v18 = vld [vmem:[#allocation2 + $0x58] sm:$0x1]  ;;  %v21835_v12 = vpack.c.bf16 %v21829_v4, %v21827_v22  ;;  %9470 = vst.msk [vmem:[#allocation2 + $0x50] sm:$0x1] %vm1756_vm15, %v9450_v9  ;;  %v18868_v9 = vld [vmem:[%s23121_s1 + $0x8e0] sm:$0xff]  }
0x1008   : > { %17454 = vmatpush3.bf16.msra.mxu0 %v18861_v15  ;;  %9480 = vst.msk [vmem:[#allocation2 + $0x59] sm:$0x1] %vm1756_vm15, %v9460_v18  ;;  %v9394_v16 = vpop.permute.xlu0 %9393  ;;  %v9396_v56 = vpop.permute.xlu1 %9395  ;;  %v18867_v15 = vld [vmem:[%s23121_s1 + $0x8d8] sm:$0xff]   ;;  %v18869_v18 = vld [vmem:[%s23121_s1 + $0x8e8] sm:$0xff]  }
0x1009   : > { %17455 = vmatprep.subr.bf16.mxu0 %v18862_v1  ;;  %17445 = vmatprep.mubr.msk.bf16.mxu0 %vm170_vm0, %v21835_v12  ;;  %9439 = vst.msk [vmem:[#allocation2 + $0x70] sm:$0xff] %vm1714_vm13, %v9394_v16 }
0x100a   : > { %9440 = vst.msk [vmem:[#allocation2 + $0x78] sm:$0x3] %vm1716_vm14, %v9396_v56  ;;  %v21935_v56 = vld [vmem:[#allocation2 + $0x32] sm:$0xff] }
0x100c   : > { %17456 = vmatpush3.bf16.msra.mxu0 %v18862_v1  ;;  %v9318_v39 = vpop.permute.xlu0 %9317  ;;  %v9398_v0 = vpop.permute.xlu1 %9397  ;;  %v9451_v42 = vld [vmem:[#allocation2 + $0x61] sm:$0x1] }
0x100d   : > { %17457 = vmatprep.subr.bf16.mxu0 %v18863_v10  ;;  %v9461_v51 = vld [vmem:[#allocation2 + $0x68] sm:$0x1]  ;;  %9361 = vst.msk [vmem:[#allocation2 + $0x80] sm:$0xff] %vm1632_vm11, %v9318_v39 }
0x100e   : > { %9481 = vst.msk [vmem:[#allocation2 + $0x69] sm:$0x1] %vm1756_vm15, %v9461_v51  ;;  %9471 = vst.msk [vmem:[#allocation2 + $0x60] sm:$0x1] %vm1756_vm15, %v9451_v42  ;;  %v21853_v62 = vld [vmem:[#allocation2 + $0x61] sm:$0xff]  ;;  %v21877_v55 = vld [vmem:[#allocation2 + $0x50] sm:$0xff] }
0x100f   : > { %9441 = vst.msk [vmem:[#allocation2 + $0x80] sm:$0xff] %vm1714_vm13, %v9398_v0  ;;  %v21895_v30 = vpack.c.bf16 %v21877_v55, %v21886_v50  ;;  %v21933_v16 = vld [vmem:[#allocation2 + $0x52] sm:$0xff]  ;;  %v21941_v39 = vld [vmem:[#allocation2 + $0x42] sm:$0xff] }
0x1010   : > { %17458 = vmatpush3.bf16.msra.mxu0 %v18863_v10  ;;  %v9320_v8 = vpop.permute.xlu0 %9319  ;;  %v9400_v44 = vpop.permute.xlu1 %9399  ;;  %v9452_v52 = vld [vmem:[#allocation2 + $0x71] sm:$0x1]  ;;  %v21931_v10 = vld [vmem:[#allocation2 + $0x22] sm:$0xff]  ;;  %v21948_v51 = vpack.c.bf16 %v21933_v16, %v21941_v39  ;;  %v18871_v42 = vld [vmem:[%s23121_s1 + $0x8f8] sm:$0xff]  }
0x1011   : > { %17467 = vmatprep.subr.bf16.mxu0 %v18864_v11  ;;  %v21857_v7 = vld [vmem:[#allocation2 + $0x71] sm:$0xff]  ;;  %9362 = vst.msk [vmem:[#allocation2 + $0x88] sm:$0x3] %vm1634_vm12, %v9320_v8 }
0x1012   : > { %v9462_v37 = vld [vmem:[#allocation2 + $0x78] sm:$0x1]  ;;  %v21862_v60 = vpack.c.bf16 %v21857_v7, %v21853_v62  ;;  %9472 = vst.msk [vmem:[#allocation2 + $0x70] sm:$0x1] %vm1756_vm15, %v9452_v52  ;;  %v18870_v0 = vld [vmem:[%s23121_s1 + $0x8f0] sm:$0xff]  }
0x1013   : > { %9482 = vst.msk [vmem:[#allocation2 + $0x79] sm:$0x1] %vm1756_vm15, %v9462_v37  ;;  %v18872_v37 = vld [vmem:[%s23121_s1 + $0x900] sm:$0xff]  }
0x1014   : > { %9442 = vst.msk [vmem:[#allocation2 + $0x88] sm:$0x3] %vm1716_vm14, %v9400_v44  ;;  %17446 = vmatmul.mubr.msk.bf16.gmra.mrb[36].mxu0 %vm170_vm0, %v21862_v60  ;;  %v9322_v13 = vpop.permute.xlu0 %9321  ;;  %v9402_v5 = vpop.permute.xlu1 %9401 }
0x1015   : > { %17459 = vmatprep.mubr.msk.bf16.mxu0 %vm170_vm0, %v9501_v63  ;;  %9363 = vst.msk [vmem:[#allocation2 + $0x90] sm:$0xff] %vm1632_vm11, %v9322_v13  ;;  %v9499_v2 = vld [vmem:[#allocation2 + $0x60] sm:$0xff]  ;;  %v9899_v63 = vpack.c.bf16 %v21874_v54, %v21784_v21  ;;  %v18873_v13 = vld [vmem:[%s23121_s1 + $0x908] sm:$0xff]   ;;  %v9900_v21 = vpack.c.bf16 %v21886_v50, %v21879_v58  ;;  %v18879_v50 = vld [vmem:[%s23121_s1 + $0x938] sm:$0xff]  }
0x1016   : > { %v9453_v38 = vld [vmem:[#allocation2 + $0x81] sm:$0x1]  ;;  %9443 = vst.msk [vmem:[#allocation2 + $0x90] sm:$0xff] %vm1714_vm13, %v9402_v5  ;;  %v21959_v44 = vld [vmem:[#allocation2 + $0x62] sm:$0xff]  ;;  %v18874_v5 = vld [vmem:[%s23121_s1 + $0x910] sm:$0xff]   ;;  %v9901_v54 = vpack.c.bf16 %v9499_v2, %v21877_v55  ;;  %v10037_v55 = vpack.c.bf16 %v21799_v59, %v21797_v6  ;;  %v10038_v6 = vpack.c.bf16 %v21827_v22, %v21795_v61 }
0x1017   : > { %9473 = vst.msk [vmem:[#allocation2 + $0x80] sm:$0x1] %vm1756_vm15, %v9453_v38  ;;  %v18875_v38 = vld [vmem:[%s23121_s1 + $0x918] sm:$0xff]   ;;  %v18877_v58 = vld [vmem:[%s23121_s1 + $0x928] sm:$0xff]   ;;  %v18880_v59 = vld [vmem:[%s23121_s1 + $0x940] sm:$0xff]  }
0x1018   : > { %v9324_v40 = vpop.permute.xlu0 %9323  ;;  %v9404_v57 = vpop.permute.xlu1 %9403  ;;  %v18882_v22 = vld [vmem:[%s23121_s1 + $0x950] sm:$0xff]  }
0x1019   : > { %9364 = vst.msk [vmem:[#allocation2 + $0x98] sm:$0x3] %vm1634_vm12, %v9324_v40  ;;  %v21907_v29 = vld [vmem:[#allocation2 + $0x70] sm:$0xff]  ;;  %v18876_v40 = vld [vmem:[%s23121_s1 + $0x920] sm:$0xff]  }
0x101a   : > { %9444 = vst.msk [vmem:[#allocation2 + $0x98] sm:$0x3] %vm1716_vm14, %v9404_v57  ;;  %v21915_v1 = vpack.c.bf16 %v21907_v29, %v9499_v2  ;;  %v21957_v8 = vld [vmem:[#allocation2 + $0x72] sm:$0xff]  ;;  %v10177_v2 = vpack.c.bf16 %v21959_v44, %v21933_v16 }
0x101b   : > { %v9463_v3 = vld [vmem:[#allocation2 + $0x88] sm:$0x1]  ;;  %v21963_v52 = vpack.c.bf16 %v21957_v8, %v21959_v44 }
0x101c   : > { %9483 = vst.msk [vmem:[#allocation2 + $0x89] sm:$0x1] %vm1756_vm15, %v9463_v3  ;;  %17460 = vmatmul.mubr.msk.bf16.vlgmr.msra.gmra.mrb[32].mxu0 %vm170_vm0, %v21884_v45  ;;  %v18878_v3 = vld [vmem:[%s23121_s1 + $0x930] sm:$0xff]  }
0x101d   : > { %17468 = vmatpush3.bf16.msra.mxu0 %v18864_v11  ;;  %17463 = vmatprep.mubr.msk.bf16.mxu0 %vm170_vm0, %v21895_v30  ;;  %v9454_v48 = vld [vmem:[#allocation2 + $0x91] sm:$0x1]  ;;  %v21939_v11 = vpack.c.bf16 %v21935_v56, %v21931_v10 }
0x101e   : > { %17469 = vmatprep.subr.bf16.mxu0 %v18865_v41  ;;  %v21904_v24 = vld [vmem:[#allocation2 + $0x80] sm:$0xff]  ;;  %9474 = vst.msk [vmem:[#allocation2 + $0x90] sm:$0x1] %vm1756_vm15, %v9454_v48  ;;  %v18881_v48 = vld [vmem:[%s23121_s1 + $0x948] sm:$0xff]  }
0x101f   : > { %9491 = vst.msk [vmem:[#allocation2 + $0x90] sm:$0xff] %vm170_vm0, %v21904_v24  ;;  %v9902_v57 = vpack.c.bf16 %v21904_v24, %v21907_v29  ;;  %v10176_v29 = vpack.c.bf16 %v21941_v39, %v21935_v56  ;;  %v18895_v56 = vld [vmem:[%s23121_s1 + $0x9b8] sm:$0xff]  }
0x1021   : > { %17470 = vmatpush3.bf16.msra.mxu0 %v18865_v41  ;;  %v9464_v36 = vld [vmem:[#allocation2 + $0x98] sm:$0x1]  ;;  %v10039_v41 = vpack.c.bf16 %v21853_v62, %v21829_v4  ;;  %v10175_v4 = vpack.c.bf16 %v21931_v10, %v21917_v17 }
0x1022   : > { %17471 = vmatprep.subr.bf16.mxu0 %v18866_v35  ;;  %9484 = vst.msk [vmem:[#allocation2 + $0x99] sm:$0x1] %vm1756_vm15, %v9464_v36  ;;  %v18883_v62 = vld [vmem:[%s23121_s1 + $0x958] sm:$0xff]  }
0x1023   : > { %v9488_v33 = vld [vmem:[#allocation2 + $0x88] sm:$0x3]  ;;  %v18887_v17 = vld [vmem:[%s23121_s1 + $0x978] sm:$0xff]  }
0x1024   : > { %9492 = vst.msk [vmem:[#allocation2 + $0x98] sm:$0x3] %vm172_vm1, %v9488_v33  ;;  %17464 = vmatmul.mubr.msk.bf16.gmra.mrb[36].mxu0 %vm170_vm0, %v21915_v1  ;;  %v22046_v33 = vld [vmem:[#allocation2 + $0x82] sm:$0xff] }
0x1025   : > { %17472 = vmatpush3.bf16.msra.mxu0 %v18866_v35  ;;  %17477 = vmatprep.mubr.msk.bf16.mxu0 %vm170_vm0, %v9761_v31  ;;  %v22017_v35 = vld [vmem:[#allocation2 + $0x81] sm:$0xff]  ;;  %v10178_v36 = vpack.c.bf16 %v22046_v33, %v21957_v8 }
0x1026   : > { %17473 = vmatprep.subr.bf16.mxu0 %v18867_v15  ;;  %v10040_v61 = vpack.c.bf16 %v22017_v35, %v21857_v7  ;;  %v18884_v7 = vld [vmem:[%s23121_s1 + $0x960] sm:$0xff]   ;;  %v22072_v10 = vld [vmem:[#allocation2 + $0x90] sm:$0xff]  ;;  %v18900_v8 = vld [vmem:[%s23122_s2 + $0x8] sm:$0xff]  }
0x1027   : > { %v18888_v31 = vld [vmem:[%s23121_s1 + $0x980] sm:$0xff]   ;;  %v10316_v16 = vpack.c.bf16 %v22072_v10, %v21904_v24  ;;  %v18894_v24 = vld [vmem:[%s23121_s1 + $0x9b0] sm:$0xff]  }
0x1029   : > { %17474 = vmatpush3.bf16.msra.mxu0 %v18867_v15  ;;  %v18886_v15 = vld [vmem:[%s23121_s1 + $0x970] sm:$0xff]  }
0x102a   : > { %17475 = vmatprep.subr.bf16.mxu0 %v18868_v9 }
0x102b   : > { %v10450_v39 = vld [vmem:[#allocation2 + $0x91] sm:$0xff] }
0x102c   : > { %v10588_v44 = vld [vmem:[#allocation2 + $0x92] sm:$0xff] }
0x102d   : > { %17476 = vmatpush3.bf16.msra.mxu0 %v18868_v9  ;;  %v18889_v9 = vld [vmem:[%s23121_s1 + $0x988] sm:$0xff]  }
0x102e   : > { %17485 = vmatprep.subr.bf16.mxu0 %v18869_v18 }
0x1030   : > { %17478 = vmatmul.mubr.msk.bf16.vlgmr.msra.gmra.mrb[32].mxu0 %vm170_vm0, %v21939_v11 }
0x1031   : > { %17481 = vmatprep.mubr.msk.bf16.mxu0 %vm170_vm0, %v21948_v51  ;;  %17486 = vmatpush3.bf16.msra.mxu0 %v18869_v18  ;;  %v18890_v18 = vld [vmem:[%s23121_s1 + $0x990] sm:$0xff]  }
0x1032   : > { %17487 = vmatprep.subr.bf16.mxu0 %v18870_v0 }
0x1035   : > { %17488 = vmatpush3.bf16.msra.mxu0 %v18870_v0  ;;  %v10454_v0 = vpack.c.bf16 %v10450_v39, %v22017_v35 }
0x1036   : > { %17489 = vmatprep.subr.bf16.mxu0 %v18871_v42 }
0x1038   : > { %17482 = vmatmul.mubr.msk.bf16.gmra.mrb[36].mxu0 %vm170_vm0, %v21963_v52 }
0x1039   : > { %17490 = vmatpush3.bf16.msra.mxu0 %v18871_v42  ;;  %17495 = vmatprep.mubr.msk.bf16.mxu0 %vm170_vm0, %v9899_v63  ;;  %v18897_v42 = vld [vmem:[%s23121_s1 + $0x9c8] sm:$0xff]   ;;  %v18902_v63 = vld [vmem:[%s23122_s2 + $0x18] sm:$0xff]  }
0x103a   : > { %17491 = vmatprep.subr.bf16.mxu0 %v18872_v37 }
0x103d   : > { %17492 = vmatpush3.bf16.msra.mxu0 %v18872_v37  ;;  %v10592_v37 = vpack.c.bf16 %v10588_v44, %v22046_v33 }
0x103e   : > { %17493 = vmatprep.subr.bf16.mxu0 %v18873_v13 }
0x1041   : > { %17494 = vmatpush3.bf16.msra.mxu0 %v18873_v13 }
0x1042   : > { %17503 = vmatprep.subr.bf16.mxu0 %v18874_v5 }
0x1044   : > { %17496 = vmatmul.mubr.msk.bf16.vlgmr.msra.gmra.mrb[32].mxu0 %vm170_vm0, %v9900_v21 }
0x1045   : > { %17499 = vmatprep.mubr.msk.bf16.mxu0 %vm170_vm0, %v9901_v54  ;;  %17504 = vmatpush3.bf16.msra.mxu0 %v18874_v5 }
0x1046   : > { %17505 = vmatprep.subr.bf16.mxu0 %v18875_v38 }
0x1049   : > { %17506 = vmatpush3.bf16.msra.mxu0 %v18875_v38 }
0x104a   : > { %17507 = vmatprep.subr.bf16.mxu0 %v18876_v40 }
0x104c   : > { %17500 = vmatmul.mubr.msk.bf16.gmra.mrb[36].mxu0 %vm170_vm0, %v9902_v57 }
0x104d   : > { %17508 = vmatpush3.bf16.msra.mxu0 %v18876_v40  ;;  %17513 = vmatprep.mubr.msk.bf16.mxu0 %vm170_vm0, %v10037_v55  ;;  %v10906_v55 = vld [vmem:[#allocation2 + $0x8] sm:$0x3] }
0x104e   : > { %17509 = vmatprep.subr.bf16.mxu0 %v18877_v58 }
0x1051   : > { %17510 = vmatpush3.bf16.msra.mxu0 %v18877_v58 }
0x1052   : > { %17511 = vmatprep.subr.bf16.mxu0 %v18878_v3 }
0x1055   : > { %17512 = vmatpush3.bf16.msra.mxu0 %v18878_v3 }
0x1056   : > { %17521 = vmatprep.subr.bf16.mxu0 %v18879_v50 }
0x1058   : > { %17514 = vmatmul.mubr.msk.bf16.vlgmr.msra.gmra.mrb[32].mxu0 %vm170_vm0, %v10038_v6 }
0x1059   : > { %17517 = vmatprep.mubr.msk.bf16.mxu0 %vm170_vm0, %v10039_v41  ;;  %17522 = vmatpush3.bf16.msra.mxu0 %v18879_v50 }
0x105a   : > { %17523 = vmatprep.subr.bf16.mxu0 %v18880_v59 }
0x105d   : > { %17524 = vmatpush3.bf16.msra.mxu0 %v18880_v59 }
0x105e   : > { %17525 = vmatprep.subr.bf16.mxu0 %v18881_v48 }
0x1060   : > { %17518 = vmatmul.mubr.msk.bf16.gmra.mrb[36].mxu0 %vm170_vm0, %v10040_v61 }
0x1061   : > { %17526 = vmatpush3.bf16.msra.mxu0 %v18881_v48  ;;  %17531 = vmatprep.mubr.msk.bf16.mxu0 %vm170_vm0, %v10175_v4 }
0x1062   : > { %17527 = vmatprep.subr.bf16.mxu0 %v18882_v22 }
0x1065   : > { %17528 = vmatpush3.bf16.msra.mxu0 %v18882_v22 }
0x1066   : > { %17529 = vmatprep.subr.bf16.mxu0 %v18883_v62 }
0x1069   : > { %17530 = vmatpush3.bf16.msra.mxu0 %v18883_v62 }
0x106a   : > { %17539 = vmatprep.subr.bf16.mxu0 %v18884_v7 }
0x106c   : > { %17532 = vmatmul.mubr.msk.bf16.vlgmr.msra.gmra.mrb[32].mxu0 %vm170_vm0, %v10176_v29 }
0x106d   : > { %17535 = vmatprep.mubr.msk.bf16.mxu0 %vm170_vm0, %v10177_v2  ;;  %17540 = vmatpush3.bf16.msra.mxu0 %v18884_v7 }
0x106e   : > { %17541 = vmatprep.subr.bf16.mxu0 %v18885_v43 }
0x1071   : > { %17542 = vmatpush3.bf16.msra.mxu0 %v18885_v43  ;;  %v18903_v43 = vld [vmem:[%s23121_s1 + $0xa00] sm:$0xff]  }
0x1072   : > { %17543 = vmatprep.subr.bf16.mxu0 %v18886_v15  ;;  %17609 = vmatprep.subr.bf16.mxu1 %v18903_v43 }
0x1073   : > { %17610 = vmatpush3.bf16.msra.mxu1 %v18903_v43 }
0x1074   : > { %17536 = vmatmul.mubr.msk.bf16.gmra.mrb[36].mxu0 %vm170_vm0, %v10178_v36  ;;  %v18904_v36 = vld [vmem:[%s23121_s1 + $0xa08] sm:$0xff]  }
0x1075   : > { %17544 = vmatpush3.bf16.msra.mxu0 %v18886_v15  ;;  %17549 = vmatprep.mubr.msk.bf16.mxu0 %vm170_vm0, %v21884_v45  ;;  %v18891_v45 = vld [vmem:[%s23121_s1 + $0x998] sm:$0xff]  }
0x1076   : > { %17545 = vmatprep.subr.bf16.mxu0 %v18887_v17  ;;  %17611 = vmatprep.subr.bf16.mxu1 %v18904_v36 }
0x1077   : > { %17612 = vmatpush3.bf16.msra.mxu1 %v18904_v36  ;;  %v18909_v36 = vld [vmem:[%s23121_s1 + $0x9e0] sm:$0xff]  }
0x1079   : > { %17546 = vmatpush3.bf16.msra.mxu0 %v18887_v17 }
0x107a   : > { %17547 = vmatprep.subr.bf16.mxu0 %v18888_v31 }
0x107d   : > { %17548 = vmatpush3.bf16.msra.mxu0 %v18888_v31  ;;  %v18905_v31 = vld [vmem:[%s23121_s1 + $0xa10] sm:$0xff]  }
0x107e   : > { %17557 = vmatprep.subr.bf16.mxu0 %v18889_v9  ;;  %17613 = vmatprep.subr.bf16.mxu1 %v18905_v31 }
0x107f   : > { %17614 = vmatpush3.bf16.msra.mxu1 %v18905_v31 }
0x1080   : > { %17550 = vmatmul.mubr.msk.bf16.vlgmr.msra.gmra.mrb[32].mxu0 %vm170_vm0, %v21895_v30  ;;  %v18892_v30 = vld [vmem:[%s23121_s1 + $0x9a0] sm:$0xff]  }
0x1081   : > { %17553 = vmatprep.mubr.msk.bf16.mxu0 %vm170_vm0, %v21915_v1  ;;  %17558 = vmatpush3.bf16.msra.mxu0 %v18889_v9  ;;  %v18893_v1 = vld [vmem:[%s23121_s1 + $0x9a8] sm:$0xff]  }
0x1082   : > { %17559 = vmatprep.subr.bf16.mxu0 %v18890_v18 }
0x1085   : > { %17560 = vmatpush3.bf16.msra.mxu0 %v18890_v18 }
0x1086   : > { %17561 = vmatprep.subr.bf16.mxu0 %v18891_v45 }
0x1088   : > { %17554 = vmatmul.mubr.msk.bf16.gmra.mrb[36].mxu0 %vm170_vm0, %v10316_v16 }
0x1089   : > { %17562 = vmatpush3.bf16.msra.mxu0 %v18891_v45  ;;  %17567 = vmatprep.mubr.msk.bf16.mxu0 %vm170_vm0, %v21806_v28  ;;  %v18896_v28 = vld [vmem:[%s23121_s1 + $0x9c0] sm:$0xff]  }
0x108a   : > { %17563 = vmatprep.subr.bf16.mxu0 %v18892_v30 }
0x108d   : > { %17564 = vmatpush3.bf16.msra.mxu0 %v18892_v30  ;;  %v18906_v30 = vld [vmem:[%s23121_s1 + $0xa18] sm:$0xff]  }
0x108e   : > { %17565 = vmatprep.subr.bf16.mxu0 %v18893_v1  ;;  %17615 = vmatprep.subr.bf16.mxu1 %v18906_v30 }
0x108f   : > { %17616 = vmatpush3.bf16.msra.mxu1 %v18906_v30  ;;  %v18911_v30 = vld [vmem:[%s23121_s1 + $0x9f0] sm:$0xff]  }
0x1091   : > { %17566 = vmatpush3.bf16.msra.mxu0 %v18893_v1  ;;  %v18907_v1 = vld [vmem:[%s23121_s1 + $0xa20] sm:$0xff]  }
0x1092   : > { %17575 = vmatprep.subr.bf16.mxu0 %v18894_v24  ;;  %17617 = vmatprep.subr.bf16.mxu1 %v18907_v1 }
0x1093   : > { %17618 = vmatpush3.bf16.msra.mxu1 %v18907_v1 }
0x1094   : > { %17568 = vmatmul.mubr.msk.bf16.vlgmr.msra.gmra.mrb[32].mxu0 %vm170_vm0, %v21835_v12  ;;  %v18898_v12 = vld [vmem:[%s23121_s1 + $0x9d0] sm:$0xff]  }
0x1095   : > { %17571 = vmatprep.mubr.msk.bf16.mxu0 %vm170_vm0, %v21862_v60  ;;  %17576 = vmatpush3.bf16.msra.mxu0 %v18894_v24  ;;  %v18899_v60 = vld [vmem:[%s23122_s2] sm:$0xff]  }
0x1096   : > { %17577 = vmatprep.subr.bf16.mxu0 %v18895_v56 }
0x1099   : > { %17578 = vmatpush3.bf16.msra.mxu0 %v18895_v56 }
0x109a   : > { %17579 = vmatprep.subr.bf16.mxu0 %v18896_v28 }
0x109c   : > { %17572 = vmatmul.mubr.msk.bf16.gmra.mrb[36].mxu0 %vm170_vm0, %v10454_v0 }
0x109d   : > { %17580 = vmatpush3.bf16.msra.mxu0 %v18896_v28  ;;  %17585 = vmatprep.mubr.msk.bf16.mxu0 %vm170_vm0, %v21939_v11  ;;  %v18901_v11 = vld [vmem:[%s23122_s2 + $0x10] sm:$0xff]  }
0x109e   : > { %17581 = vmatprep.subr.bf16.mxu0 %v18897_v42 }
0x10a1   : > { %17582 = vmatpush3.bf16.msra.mxu0 %v18897_v42 }
0x10a2   : > { %17583 = vmatprep.subr.bf16.mxu0 %v18898_v12 }
0x10a5   : > { %17584 = vmatpush3.bf16.msra.mxu0 %v18898_v12  ;;  %v22230_v12 = vld [vmem:[%s23121_s1 + $0x9d8] sm:$0xff]  }
0x10a6   : > { %17593 = vmatprep.subr.bf16.mxu0 %v18899_v60  ;;  %17627 = vmatprep.subr.bf16.mxu1 %v22230_v12 }
0x10a8   : > { %17586 = vmatmul.mubr.msk.bf16.vlgmr.msra.gmra.mrb[32].mxu0 %vm170_vm0, %v21948_v51 }
0x10a9   : > { %17589 = vmatprep.mubr.msk.bf16.mxu0 %vm170_vm0, %v21963_v52  ;;  %17594 = vmatpush3.bf16.msra.mxu0 %v18899_v60 }
0x10aa   : > { %17595 = vmatprep.subr.bf16.mxu0 %v18900_v8 }
0x10ad   : > { %17596 = vmatpush3.bf16.msra.mxu0 %v18900_v8 }
0x10ae   : > { %17597 = vmatprep.subr.bf16.mxu0 %v18901_v11 }
0x10b0   : > { %17590 = vmatmul.mubr.msk.bf16.gmra.mrb[36].mxu0 %vm170_vm0, %v10592_v37  ;;  %v10924_v37 = vld [vmem:[#allocation2 + $0x98] sm:$0x3] }
0x10b1   : > { %17598 = vmatpush3.bf16.msra.mxu0 %v18901_v11  ;;  %17601 = vmatprep.mubr.msk.bf16.mxu0 %vm10755_vm3, %v10719_v26 }
0x10b2   : > { %17599 = vmatprep.subr.bf16.mxu0 %v18902_v63 }
0x10b5   : > { %17600 = vmatpush3.bf16.msra.mxu0 %v18902_v63 }
0x10b8   : > { %17602 = vmatmul.mubr.msk.bf16.vlgmr.msra.gmra.mrb[32].mxu0 %vm10755_vm3, %v10720_v25 }
0x10b9   : > { %17605 = vmatprep.mubr.msk.bf16.mxu0 %vm10755_vm3, %v10721_v47 }
0x10c0   : > { %17606 = vmatmul.mubr.msk.bf16.gmra.mrb[36].mxu0 %vm10755_vm3, %v10722_v23 }
0x118b   : > { %v17603_v46 = vpop.f32.mrb[32].mxu0 }
0x118c   : > { %v10802_v19 = vpop.f32.mrb[33].mxu0  ;;  %v10851_v13 = vmul.f32 0.01, %v17603_v46  ;;  %vm10843_vm6 = vcmp.ge.f32.partialorder %v17603_v46, 0.0 }
0x118d   : > { %vm10841_vm4 = vcmp.ge.f32.partialorder %v10802_v19, 0.0  ;;  %v10849_v26 = vmul.f32 0.01, %v10802_v19  ;;  %v17604_v51 = vpop.f32.mrb[34].mxu0 }
0x118e   : > { %v10805_v52 = vpop.f32.mrb[35].mxu0  ;;  %v10852_v25 = vmul.f32 0.01, %v17604_v51  ;;  %vm10844_vm7 = vcmp.ge.f32.partialorder %v17604_v51, 0.0  ;;  %v22150_v53 = vsel %vm10843_vm6, %v17603_v46, %v10851_v13 }
0x118f   : > { %vm10842_vm5 = vcmp.ge.f32.partialorder %v10805_v52, 0.0  ;;  %v10850_v27 = vmul.f32 0.01, %v10805_v52  ;;  %v22142_v20 = vsel %vm10841_vm4, %v10802_v19, %v10849_v26 }
0x1190   : > { %10873 = vrot.lane.b32.xlu0 %v22142_v20, %s19063_s8  ;;  %v22154_v5 = vsel %vm10844_vm7, %v17604_v51, %v10852_v25 }
0x1191   : > { %v22146_v32 = vsel %vm10842_vm5, %v10805_v52, %v10850_v27 }
0x1192   : > { %10875 = vrot.lane.b32.xlu1 %v22146_v32, %s19063_s8 }
0x1193   : > { %v17607_v34 = vpop.f32.mrb[36].mxu0 }
0x1194   : > { %10877 = vrot.lane.b32.xlu0 %v22150_v53, %s19063_s8  ;;  %v10818_v49 = vpop.f32.mrb[37].mxu0  ;;  %v10855_v38 = vmul.f32 0.01, %v17607_v34  ;;  %vm10847_vm10 = vcmp.ge.f32.partialorder %v17607_v34, 0.0 }
0x1195   : > { %vm10845_vm8 = vcmp.ge.f32.partialorder %v10818_v49, 0.0  ;;  %v10853_v23 = vmul.f32 0.01, %v10818_v49  ;;  %v17608_v47 = vpop.f32.mrb[38].mxu0 }
0x1196   : > { %10879 = vrot.lane.b32.xlu1 %v22154_v5, %s19063_s8  ;;  %v10821_v21 = vpop.f32.mrb[39].mxu0  ;;  %v22166_v58 = vsel %vm10847_vm10, %v17607_v34, %v10855_v38  ;;  %v10856_v3 = vmul.f32 0.01, %v17608_v47  ;;  %vm10848_vm4 = vcmp.ge.f32.partialorder %v17608_v47, 0.0 }
0x1197   : > { %vm10846_vm9 = vcmp.ge.f32.partialorder %v10821_v21, 0.0  ;;  %v10854_v54 = vmul.f32 0.01, %v10821_v21  ;;  %v22158_v40 = vsel %vm10845_vm8, %v10818_v49, %v10853_v23 }
0x1198   : > { %10881 = vrot.lane.b32.xlu0 %v22158_v40, %s19063_s8  ;;  %v22176_v50 = vsel %vm10848_vm4, %v17608_v47, %v10856_v3 }
0x1199   : > { %v22162_v57 = vsel %vm10846_vm9, %v10821_v21, %v10854_v54 }
0x119a   : > { %10883 = vrot.lane.b32.xlu1 %v22162_v57, %s19063_s8 }
0x119c   : > { %10885 = vrot.lane.b32.xlu0 %v22166_v58, %s19063_s8 }
0x119e   : > { %10945 = vrot.lane.b32.xlu1 %v21855_v14, %s19064_s7 }
0x11a0   : > { %10947 = vrot.lane.b32.xlu0 %v10906_v55, %s19064_s7 }
0x11a2   : > { %11025 = vrot.lane.b32.xlu1 %v21855_v14, %s19063_s8 }
0x11a4   : > { %11027 = vrot.lane.b32.xlu0 %v10906_v55, %s19063_s8 }
0x11a6   : > { %10887 = vrot.lane.b32.xlu1 %v22176_v50, %s19063_s8 }
0x1202   : > { %v10874_v6 = vpop.permute.xlu0 %10873 }
0x1203   : > { %10897 = vst.msk [vmem:[#allocation2 + $0x11] sm:$0xff] %vm233_vm2, %v10874_v6 }
0x1204   : > { %v10876_v59 = vpop.permute.xlu1 %10875 }
0x1205   : > { %10898 = vst.msk [vmem:[#allocation2 + $0x21] sm:$0xff] %vm233_vm2, %v10876_v59 }
0x1206   : > { %v10878_v41 = vpop.permute.xlu0 %10877 }
0x1207   : > { %10899 = vst.msk [vmem:[#allocation2 + $0x31] sm:$0xff] %vm233_vm2, %v10878_v41 }
0x1208   : > { %v10880_v48 = vpop.permute.xlu1 %10879 }
0x1209   : > { %10900 = vst.msk [vmem:[#allocation2 + $0x41] sm:$0xff] %vm233_vm2, %v10880_v48 }
0x120a   : > { %v10882_v14 = vpop.permute.xlu0 %10881  ;;  %v10908_v15 = vld [vmem:[#allocation2 + $0x18] sm:$0x3]  ;;  %v10907_v33 = vld [vmem:[#allocation2 + $0x10] sm:$0xff] }
0x120b   : > { %10901 = vst.msk [vmem:[#allocation2 + $0x51] sm:$0xff] %vm233_vm2, %v10882_v14 }
0x120c   : > { %v10884_v35 = vpop.permute.xlu1 %10883  ;;  %v10909_v24 = vld [vmem:[#allocation2 + $0x20] sm:$0xff]  ;;  %v10910_v56 = vld [vmem:[#allocation2 + $0x28] sm:$0x3] }
0x120d   : > { %10902 = vst.msk [vmem:[#allocation2 + $0x61] sm:$0xff] %vm233_vm2, %v10884_v35 }
0x120e   : > { %v10886_v61 = vpop.permute.xlu0 %10885  ;;  %v10911_v22 = vld [vmem:[#allocation2 + $0x30] sm:$0xff]  ;;  %v10912_v4 = vld [vmem:[#allocation2 + $0x38] sm:$0x3] }
0x120f   : > { %10903 = vst.msk [vmem:[#allocation2 + $0x71] sm:$0xff] %vm233_vm2, %v10886_v61  ;;  %10957 = vrot.lane.b32.xlu0 %v10911_v22, %s19064_s7  ;;  %10959 = vrot.lane.b32.xlu1 %v10912_v4, %s19064_s7 }
0x1210   : > { %v10946_v62 = vpop.permute.xlu1 %10945  ;;  %v10913_v18 = vld [vmem:[#allocation2 + $0x40] sm:$0xff]  ;;  %v10914_v16 = vld [vmem:[#allocation2 + $0x48] sm:$0x3] }
0x1211   : > { %11005 = vst.msk [vmem:[#allocation2] sm:$0xff] %vm1632_vm11, %v10946_v62 }
0x1212   : > { %v10948_v7 = vpop.permute.xlu0 %10947  ;;  %v10915_v0 = vld [vmem:[#allocation2 + $0x50] sm:$0xff]  ;;  %v10916_v42 = vld [vmem:[#allocation2 + $0x58] sm:$0x3] }
0x1213   : > { %11006 = vst.msk [vmem:[#allocation2 + $0x8] sm:$0x3] %vm1634_vm12, %v10948_v7  ;;  %11037 = vrot.lane.b32.xlu0 %v10911_v22, %s19063_s8  ;;  %11039 = vrot.lane.b32.xlu1 %v10912_v4, %s19063_s8 }
0x1214   : > { %v11026_v29 = vpop.permute.xlu1 %11025  ;;  %v10918_v60 = vld [vmem:[#allocation2 + $0x68] sm:$0x3]  ;;  %v10917_v8 = vld [vmem:[#allocation2 + $0x60] sm:$0xff] }
0x1215   : > { %11085 = vst.msk [vmem:[#allocation2] sm:$0xff] %vm1714_vm13, %v11026_v29 }
0x1216   : > { %v11028_v2 = vpop.permute.xlu0 %11027  ;;  %v10919_v28 = vld [vmem:[#allocation2 + $0x70] sm:$0xff]  ;;  %v10920_v39 = vld [vmem:[#allocation2 + $0x78] sm:$0x3] }
0x1217   : > { %11086 = vst.msk [vmem:[#allocation2 + $0x8] sm:$0x3] %vm1716_vm14, %v11028_v2  ;;  %10951 = vrot.lane.b32.xlu0 %v10908_v15, %s19064_s7  ;;  %10949 = vrot.lane.b32.xlu1 %v10907_v33, %s19064_s7 }
0x1218   : > { %v10888_v17 = vpop.permute.xlu1 %10887 }
0x1219   : > { %10904 = vst.msk [vmem:[#allocation2 + $0x81] sm:$0xff] %vm233_vm2, %v10888_v17 }
0x121b   : > { %11031 = vrot.lane.b32.xlu0 %v10908_v15, %s19063_s8  ;;  %11029 = vrot.lane.b32.xlu1 %v10907_v33, %s19063_s8 }
0x121c   : > { %v11105_v9 = vld [vmem:[#allocation2 + $0x1] sm:$0x1] }
0x121d   : > { %11125 = vst.msk [vmem:[#allocation2] sm:$0x1] %vm1756_vm15, %v11105_v9 }
0x121e   : > { %v11115_v45 = vld [vmem:[#allocation2 + $0x8] sm:$0x1] }
0x121f   : > { %11135 = vst.msk [vmem:[#allocation2 + $0x9] sm:$0x1] %vm1756_vm15, %v11115_v45  ;;  %10961 = vrot.lane.b32.xlu0 %v10913_v18, %s19064_s7  ;;  %10963 = vrot.lane.b32.xlu1 %v10914_v16, %s19064_s7 }
0x1220   : > { %v10921_v11 = vld [vmem:[#allocation2 + $0x80] sm:$0xff]  ;;  %v10922_v44 = vld [vmem:[#allocation2 + $0x88] sm:$0x3] }
0x1223   : > { %11041 = vrot.lane.b32.xlu0 %v10913_v18, %s19063_s8  ;;  %11043 = vrot.lane.b32.xlu1 %v10914_v16, %s19063_s8  ;;  %v18910_v18 = vld [vmem:[%s23121_s1 + $0x9e8] sm:$0xff]  }
0x1227   : > { %10953 = vrot.lane.b32.xlu0 %v10909_v24, %s19064_s7  ;;  %10955 = vrot.lane.b32.xlu1 %v10910_v56, %s19064_s7 }
0x122b   : > { %11033 = vrot.lane.b32.xlu0 %v10909_v24, %s19063_s8  ;;  %11035 = vrot.lane.b32.xlu1 %v10910_v56, %s19063_s8 }
0x122f   : > { %10973 = vrot.lane.b32.xlu0 %v10919_v28, %s19064_s7  ;;  %10975 = vrot.lane.b32.xlu1 %v10920_v39, %s19064_s7 }
0x1233   : > { %10965 = vrot.lane.b32.xlu0 %v10915_v0, %s19064_s7  ;;  %10967 = vrot.lane.b32.xlu1 %v10916_v42, %s19064_s7 }
0x1237   : > { %11045 = vrot.lane.b32.xlu0 %v10915_v0, %s19063_s8  ;;  %11047 = vrot.lane.b32.xlu1 %v10916_v42, %s19063_s8 }
0x123b   : > { %10971 = vrot.lane.b32.xlu1 %v10918_v60, %s19064_s7  ;;  %10969 = vrot.lane.b32.xlu0 %v10917_v8, %s19064_s7 }
0x123f   : > { %11051 = vrot.lane.b32.xlu1 %v10918_v60, %s19063_s8  ;;  %11049 = vrot.lane.b32.xlu0 %v10917_v8, %s19063_s8 }
0x1243   : > { %11055 = vrot.lane.b32.xlu1 %v10920_v39, %s19063_s8  ;;  %11053 = vrot.lane.b32.xlu0 %v10919_v28, %s19063_s8 }
0x1247   : > { %11057 = vrot.lane.b32.xlu1 %v10921_v11, %s19063_s8  ;;  %10977 = vrot.lane.b32.xlu0 %v10921_v11, %s19064_s7  ;;  %v18913_v11 = vld [vmem:[%s23121_s1 + $0xa28] sm:$0xff]  }
0x124b   : > { %11059 = vrot.lane.b32.xlu1 %v10922_v44, %s19063_s8  ;;  %10979 = vrot.lane.b32.xlu0 %v10922_v44, %s19064_s7 }
0x124f   : > { %11061 = vrot.lane.b32.xlu1 %v22072_v10, %s19063_s8  ;;  %10981 = vrot.lane.b32.xlu0 %v22072_v10, %s19064_s7 }
0x1253   : > { %11063 = vrot.lane.b32.xlu1 %v10924_v37, %s19063_s8  ;;  %10983 = vrot.lane.b32.xlu0 %v10924_v37, %s19064_s7 }
0x1281   : > { %v10958_v63 = vpop.permute.xlu0 %10957  ;;  %v10960_v46 = vpop.permute.xlu1 %10959 }
0x1282   : > { %11011 = vst.msk [vmem:[#allocation2 + $0x30] sm:$0xff] %vm1632_vm11, %v10958_v63 }
0x1283   : > { %11012 = vst.msk [vmem:[#allocation2 + $0x38] sm:$0x3] %vm1634_vm12, %v10960_v46 }
0x1285   : > { %v11038_v19 = vpop.permute.xlu0 %11037  ;;  %v11040_v26 = vpop.permute.xlu1 %11039 }
0x1286   : > { %11091 = vst.msk [vmem:[#allocation2 + $0x30] sm:$0xff] %vm1714_vm13, %v11038_v19 }
0x1287   : > { %11092 = vst.msk [vmem:[#allocation2 + $0x38] sm:$0x3] %vm1716_vm14, %v11040_v26 }
0x1289   : > { %v10952_v51 = vpop.permute.xlu0 %10951  ;;  %v10950_v52 = vpop.permute.xlu1 %10949 }
0x128a   : > { %11008 = vst.msk [vmem:[#allocation2 + $0x18] sm:$0x3] %vm1634_vm12, %v10952_v51 }
0x128b   : > { %11007 = vst.msk [vmem:[#allocation2 + $0x10] sm:$0xff] %vm1632_vm11, %v10950_v52 }
0x128d   : > { %v11032_v10 = vpop.permute.xlu0 %11031  ;;  %v11030_v13 = vpop.permute.xlu1 %11029  ;;  %v11108_v27 = vld [vmem:[#allocation2 + $0x31] sm:$0x1] }
0x128e   : > { %v11118_v25 = vld [vmem:[#allocation2 + $0x38] sm:$0x1]  ;;  %11088 = vst.msk [vmem:[#allocation2 + $0x18] sm:$0x3] %vm1716_vm14, %v11032_v10 }
0x128f   : > { %11087 = vst.msk [vmem:[#allocation2 + $0x10] sm:$0xff] %vm1714_vm13, %v11030_v13  ;;  %v22282_v22 = vld [vmem:[#allocation2 + $0x31] sm:$0xff] }
0x1290   : > { %11128 = vst.msk [vmem:[#allocation2 + $0x30] sm:$0x1] %vm1756_vm15, %v11108_v27  ;;  %11138 = vst.msk [vmem:[#allocation2 + $0x39] sm:$0x1] %vm1756_vm15, %v11118_v25 }
0x1291   : > { %v10962_v34 = vpop.permute.xlu0 %10961  ;;  %v10964_v49 = vpop.permute.xlu1 %10963 }
0x1292   : > { %11013 = vst.msk [vmem:[#allocation2 + $0x40] sm:$0xff] %vm1632_vm11, %v10962_v34 }
0x1293   : > { %11014 = vst.msk [vmem:[#allocation2 + $0x48] sm:$0x3] %vm1634_vm12, %v10964_v49 }
0x1295   : > { %v11116_v23 = vld [vmem:[#allocation2 + $0x18] sm:$0x1]  ;;  %v11042_v47 = vpop.permute.xlu0 %11041  ;;  %v11044_v21 = vpop.permute.xlu1 %11043 }
0x1296   : > { %v11106_v38 = vld [vmem:[#allocation2 + $0x11] sm:$0x1]  ;;  %11136 = vst.msk [vmem:[#allocation2 + $0x19] sm:$0x1] %vm1756_vm15, %v11116_v23 }
0x1297   : > { %11093 = vst.msk [vmem:[#allocation2 + $0x40] sm:$0xff] %vm1714_vm13, %v11042_v47  ;;  %v22284_v29 = vld [vmem:[#allocation2 + $0x11] sm:$0xff] }
0x1298   : > { %11094 = vst.msk [vmem:[#allocation2 + $0x48] sm:$0x3] %vm1716_vm14, %v11044_v21 }
0x1299   : > { %11126 = vst.msk [vmem:[#allocation2 + $0x10] sm:$0x1] %vm1756_vm15, %v11106_v38  ;;  %v10954_v54 = vpop.permute.xlu0 %10953  ;;  %v10956_v55 = vpop.permute.xlu1 %10955 }
0x129a   : > { %11009 = vst.msk [vmem:[#allocation2 + $0x20] sm:$0xff] %vm1632_vm11, %v10954_v54 }
0x129b   : > { %11010 = vst.msk [vmem:[#allocation2 + $0x28] sm:$0x3] %vm1634_vm12, %v10956_v55 }
0x129d   : > { %v11034_v3 = vpop.permute.xlu0 %11033  ;;  %v11036_v6 = vpop.permute.xlu1 %11035  ;;  %v11146_v41 = vld [vmem:[#allocation2 + $0x18] sm:$0x3] }
0x129e   : > { %11089 = vst.msk [vmem:[#allocation2 + $0x20] sm:$0xff] %vm1714_vm13, %v11034_v3  ;;  %v11109_v48 = vld [vmem:[#allocation2 + $0x41] sm:$0x1]  ;;  %v22366_v3 = vld [vmem:[#allocation2 + $0x30] sm:$0xff] }
0x129f   : > { %11090 = vst.msk [vmem:[#allocation2 + $0x28] sm:$0x3] %vm1716_vm14, %v11036_v6  ;;  %v11119_v14 = vld [vmem:[#allocation2 + $0x48] sm:$0x1] }
0x12a0   : > { %v22271_v59 = vld [vmem:[#allocation2 + $0x10] sm:$0xff]  ;;  %11150 = vst.msk [vmem:[#allocation2 + $0x8] sm:$0x3] %vm172_vm1, %v11146_v41  ;;  %v22314_v1 = vld [vmem:[#allocation2 + $0x41] sm:$0xff] }
0x12a1   : > { %11149 = vst.msk [vmem:[#allocation2] sm:$0xff] %vm170_vm0, %v22271_v59  ;;  %v10974_v35 = vpop.permute.xlu0 %10973  ;;  %v10976_v61 = vpop.permute.xlu1 %10975 }
0x12a2   : > { %11129 = vst.msk [vmem:[#allocation2 + $0x40] sm:$0x1] %vm1756_vm15, %v11109_v48  ;;  %11139 = vst.msk [vmem:[#allocation2 + $0x49] sm:$0x1] %vm1756_vm15, %v11119_v14  ;;  %v18914_v48 = vld [vmem:[%s23121_s1 + $0xa30] sm:$0xff]  }
0x12a3   : > { %11019 = vst.msk [vmem:[#allocation2 + $0x70] sm:$0xff] %vm1632_vm11, %v10974_v35 }
0x12a4   : > { %11020 = vst.msk [vmem:[#allocation2 + $0x78] sm:$0x3] %vm1634_vm12, %v10976_v61 }
0x12a5   : > { %v10966_v4 = vpop.permute.xlu0 %10965  ;;  %v10968_v62 = vpop.permute.xlu1 %10967  ;;  %v11107_v33 = vld [vmem:[#allocation2 + $0x21] sm:$0x1] }
0x12a6   : > { %v22286_v43 = vld [vmem:[#allocation2 + $0x21] sm:$0xff]  ;;  %11015 = vst.msk [vmem:[#allocation2 + $0x50] sm:$0xff] %vm1632_vm11, %v10966_v4  ;;  %v18915_v4 = vld [vmem:[%s23121_s1 + $0xa38] sm:$0xff]  }
0x12a7   : > { %11016 = vst.msk [vmem:[#allocation2 + $0x58] sm:$0x3] %vm1634_vm12, %v10968_v62  ;;  %v22293_v15 = vpack.c.bf16 %v22282_v22, %v22286_v43  ;;  %v11117_v17 = vld [vmem:[#allocation2 + $0x28] sm:$0x1] }
0x12a8   : > { %v11176_v7 = vld [vmem:[#allocation2 + $0x1] sm:$0xff]  ;;  %11127 = vst.msk [vmem:[#allocation2 + $0x20] sm:$0x1] %vm1756_vm15, %v11107_v33  ;;  %11137 = vst.msk [vmem:[#allocation2 + $0x29] sm:$0x1] %vm1756_vm15, %v11117_v17 }
0x12a9   : > { %v11184_v2 = vpack.c.bf16 %v22284_v29, %v11176_v7  ;;  %v11046_v31 = vpop.permute.xlu0 %11045  ;;  %v11048_v9 = vpop.permute.xlu1 %11047  ;;  %v22342_v26 = vld [vmem:[#allocation2] sm:$0xff] }
0x12aa   : > { %11095 = vst.msk [vmem:[#allocation2 + $0x50] sm:$0xff] %vm1714_vm13, %v11046_v31  ;;  %v11161_v34 = vpack.c.bf16 %v22271_v59, %v22342_v26  ;;  %v22373_v41 = vld [vmem:[#allocation2 + $0x40] sm:$0xff] }
0x12ab   : > { %17619 = vmatprep.mubr.msk.bf16.mxu1 %vm170_vm0, %v11184_v2  ;;  %11096 = vst.msk [vmem:[#allocation2 + $0x58] sm:$0x3] %vm1716_vm14, %v11048_v9  ;;  %v11413_v2 = vld [vmem:[#allocation2 + $0x2] sm:$0xff]  ;;  %v22404_v9 = vld [vmem:[#allocation2 + $0x12] sm:$0xff] }
0x12ac   : > { %17620 = vmatmul.mubr.msk.bf16.vlgmr.msra.gmra.mrb[24].mxu1 %vm170_vm0, %v22293_v15 }
0x12ad   : > { %17628 = vmatpush3.bf16.msra.mxu1 %v22230_v12  ;;  %v10970_v45 = vpop.permute.xlu0 %10969  ;;  %v10972_v16 = vpop.permute.xlu1 %10971  ;;  %v18912_v12 = vld [vmem:[%s23121_s1 + $0x9f8] sm:$0xff]  }
0x12ae   : > { %17629 = vmatprep.subr.bf16.mxu1 %v18909_v36  ;;  %11017 = vst.msk [vmem:[#allocation2 + $0x60] sm:$0xff] %vm1632_vm11, %v10970_v45  ;;  %v11421_v45 = vpack.c.bf16 %v22404_v9, %v11413_v2 }
0x12af   : > { %11018 = vst.msk [vmem:[#allocation2 + $0x68] sm:$0x3] %vm1634_vm12, %v10972_v16  ;;  %v22361_v21 = vld [vmem:[#allocation2 + $0x20] sm:$0xff]  ;;  %v18917_v16 = vld [vmem:[%s23121_s1 + $0xa48] sm:$0xff]  }
0x12b0   : > { %v22371_v6 = vpack.c.bf16 %v22366_v3, %v22361_v21 }
0x12b1   : > { %17630 = vmatpush3.bf16.msra.mxu1 %v18909_v36  ;;  %v11050_v24 = vpop.permute.xlu0 %11049  ;;  %v11052_v56 = vpop.permute.xlu1 %11051  ;;  %v11110_v39 = vld [vmem:[#allocation2 + $0x51] sm:$0x1]  ;;  %v18916_v36 = vld [vmem:[%s23121_s1 + $0xa40] sm:$0xff]  }
0x12b2   : > { %17631 = vmatprep.subr.bf16.mxu1 %v18910_v18  ;;  %v22316_v28 = vld [vmem:[#allocation2 + $0x51] sm:$0xff]  ;;  %11097 = vst.msk [vmem:[#allocation2 + $0x60] sm:$0xff] %vm1714_vm13, %v11050_v24  ;;  %v22418_v24 = vld [vmem:[#allocation2 + $0x22] sm:$0xff] }
0x12b3   : > { %v11120_v0 = vld [vmem:[#allocation2 + $0x58] sm:$0x1]  ;;  %11098 = vst.msk [vmem:[#allocation2 + $0x68] sm:$0x3] %vm1716_vm14, %v11052_v56  ;;  %v22322_v42 = vpack.c.bf16 %v22316_v28, %v22314_v1 }
0x12b4   : > { %11130 = vst.msk [vmem:[#allocation2 + $0x50] sm:$0x1] %vm1756_vm15, %v11110_v39  ;;  %11140 = vst.msk [vmem:[#allocation2 + $0x59] sm:$0x1] %vm1756_vm15, %v11120_v0  ;;  %v22422_v39 = vld [vmem:[#allocation2 + $0x32] sm:$0xff] }
0x12b5   : > { %17632 = vmatpush3.bf16.msra.mxu1 %v18910_v18  ;;  %17623 = vmatprep.mubr.msk.bf16.mxu1 %vm170_vm0, %v22322_v42  ;;  %v11054_v60 = vpop.permute.xlu0 %11053  ;;  %v11056_v8 = vpop.permute.xlu1 %11055  ;;  %v22426_v0 = vpack.c.bf16 %v22422_v39, %v22418_v24 }
0x12b6   : > { %17633 = vmatprep.subr.bf16.mxu1 %v18911_v30  ;;  %11099 = vst.msk [vmem:[#allocation2 + $0x70] sm:$0xff] %vm1714_vm13, %v11054_v60  ;;  %v18919_v60 = vld [vmem:[%s23121_s1 + $0xa58] sm:$0xff]  }
0x12b7   : > { %11100 = vst.msk [vmem:[#allocation2 + $0x78] sm:$0x3] %vm1716_vm14, %v11056_v8 }
0x12b9   : > { %17634 = vmatpush3.bf16.msra.mxu1 %v18911_v30  ;;  %v10978_v44 = vpop.permute.xlu0 %10977  ;;  %v11058_v37 = vpop.permute.xlu1 %11057  ;;  %v11111_v63 = vld [vmem:[#allocation2 + $0x61] sm:$0x1]  ;;  %v18918_v30 = vld [vmem:[%s23121_s1 + $0xa50] sm:$0xff]  }
0x12ba   : > { %17635 = vmatprep.subr.bf16.mxu1 %v18912_v12  ;;  %11021 = vst.msk [vmem:[#allocation2 + $0x80] sm:$0xff] %vm1632_vm11, %v10978_v44  ;;  %v11121_v46 = vld [vmem:[#allocation2 + $0x68] sm:$0x1] }
0x12bb   : > { %11131 = vst.msk [vmem:[#allocation2 + $0x60] sm:$0x1] %vm1756_vm15, %v11111_v63  ;;  %11141 = vst.msk [vmem:[#allocation2 + $0x69] sm:$0x1] %vm1756_vm15, %v11121_v46  ;;  %v22340_v19 = vld [vmem:[#allocation2 + $0x61] sm:$0xff]  ;;  %v22364_v38 = vld [vmem:[#allocation2 + $0x50] sm:$0xff] }
0x12bc   : > { %11101 = vst.msk [vmem:[#allocation2 + $0x80] sm:$0xff] %vm1714_vm13, %v11058_v37  ;;  %v22381_v35 = vpack.c.bf16 %v22364_v38, %v22373_v41  ;;  %v22420_v56 = vld [vmem:[#allocation2 + $0x52] sm:$0xff]  ;;  %v18921_v46 = vld [vmem:[%s23121_s1 + $0xa68] sm:$0xff]  }
0x12bd   : > { %17636 = vmatpush3.bf16.msra.mxu1 %v18912_v12  ;;  %v10980_v51 = vpop.permute.xlu0 %10979  ;;  %v11060_v52 = vpop.permute.xlu1 %11059  ;;  %v11112_v13 = vld [vmem:[#allocation2 + $0x71] sm:$0x1]  ;;  %v22428_v12 = vld [vmem:[#allocation2 + $0x42] sm:$0xff] }
0x12be   : > { %17645 = vmatprep.subr.bf16.mxu1 %v18913_v11  ;;  %v22344_v10 = vld [vmem:[#allocation2 + $0x71] sm:$0xff]  ;;  %11022 = vst.msk [vmem:[#allocation2 + $0x88] sm:$0x3] %vm1634_vm12, %v10980_v51  ;;  %v22435_v8 = vpack.c.bf16 %v22420_v56, %v22428_v12  ;;  %v11559_v51 = vpack.c.bf16 %v22361_v21, %v22271_v59  ;;  %v11560_v59 = vpack.c.bf16 %v22373_v41, %v22366_v3 }
0x12bf   : > { %v11122_v27 = vld [vmem:[#allocation2 + $0x78] sm:$0x1]  ;;  %v22349_v25 = vpack.c.bf16 %v22344_v10, %v22340_v19  ;;  %11132 = vst.msk [vmem:[#allocation2 + $0x70] sm:$0x1] %vm1756_vm15, %v11112_v13  ;;  %v11697_v21 = vpack.c.bf16 %v22286_v43, %v22284_v29  ;;  %v11698_v29 = vpack.c.bf16 %v22314_v1, %v22282_v22  ;;  %v18929_v43 = vld [vmem:[%s23121_s1 + $0xaa8] sm:$0xff]   ;;  %v18930_v3 = vld [vmem:[%s23121_s1 + $0xab0] sm:$0xff]  }
0x12c0   : > { %11142 = vst.msk [vmem:[#allocation2 + $0x79] sm:$0x1] %vm1756_vm15, %v11122_v27  ;;  %v18923_v13 = vld [vmem:[%s23121_s1 + $0xa78] sm:$0xff]   ;;  %v18924_v27 = vld [vmem:[%s23121_s1 + $0xa80] sm:$0xff]  }
0x12c1   : > { %11102 = vst.msk [vmem:[#allocation2 + $0x88] sm:$0x3] %vm1716_vm14, %v11060_v52  ;;  %17624 = vmatmul.mubr.msk.bf16.gmra.mrb[28].mxu1 %vm170_vm0, %v22349_v25  ;;  %v10982_v49 = vpop.permute.xlu0 %10981  ;;  %v11062_v23 = vpop.permute.xlu1 %11061  ;;  %v18922_v52 = vld [vmem:[%s23121_s1 + $0xa70] sm:$0xff]   ;;  %v18931_v1 = vld [vmem:[%s23121_s1 + $0xab8] sm:$0xff]  }
0x12c2   : > { %17637 = vmatprep.mubr.msk.bf16.mxu1 %vm170_vm0, %v11161_v34  ;;  %11023 = vst.msk [vmem:[#allocation2 + $0x90] sm:$0xff] %vm1632_vm11, %v10982_v49  ;;  %v11159_v33 = vld [vmem:[#allocation2 + $0x60] sm:$0xff]  ;;  %v18925_v49 = vld [vmem:[%s23121_s1 + $0xa88] sm:$0xff]  }
0x12c3   : > { %v11113_v47 = vld [vmem:[#allocation2 + $0x81] sm:$0x1]  ;;  %11103 = vst.msk [vmem:[#allocation2 + $0x90] sm:$0xff] %vm1714_vm13, %v11062_v23  ;;  %v22446_v37 = vld [vmem:[#allocation2 + $0x62] sm:$0xff]  ;;  %v11561_v34 = vpack.c.bf16 %v11159_v33, %v22364_v38  ;;  %v18927_v38 = vld [vmem:[%s23121_s1 + $0xa98] sm:$0xff]  }
0x12c4   : > { %11133 = vst.msk [vmem:[#allocation2 + $0x80] sm:$0x1] %vm1756_vm15, %v11113_v47  ;;  %v18926_v47 = vld [vmem:[%s23121_s1 + $0xa90] sm:$0xff]  }
0x12c5   : > { %v10984_v54 = vpop.permute.xlu0 %10983  ;;  %v11064_v55 = vpop.permute.xlu1 %11063 }
0x12c6   : > { %11024 = vst.msk [vmem:[#allocation2 + $0x98] sm:$0x3] %vm1634_vm12, %v10984_v54  ;;  %v22394_v7 = vld [vmem:[#allocation2 + $0x70] sm:$0xff]  ;;  %v18928_v54 = vld [vmem:[%s23121_s1 + $0xaa0] sm:$0xff]  }
0x12c7   : > { %11104 = vst.msk [vmem:[#allocation2 + $0x98] sm:$0x3] %vm1716_vm14, %v11064_v55  ;;  %v22402_v31 = vpack.c.bf16 %v22394_v7, %v11159_v33  ;;  %v22444_v44 = vld [vmem:[#allocation2 + $0x72] sm:$0xff]  ;;  %v11699_v55 = vpack.c.bf16 %v22340_v19, %v22316_v28  ;;  %v11835_v28 = vpack.c.bf16 %v22418_v24, %v22404_v9  ;;  %v18932_v19 = vld [vmem:[%s23121_s1 + $0xac0] sm:$0xff]  }
0x12c8   : > { %v11123_v14 = vld [vmem:[#allocation2 + $0x88] sm:$0x1]  ;;  %v22450_v63 = vpack.c.bf16 %v22444_v44, %v22446_v37  ;;  %v18936_v33 = vld [vmem:[%s23121_s1 + $0xae0] sm:$0xff]   ;;  %v18939_v9 = vld [vmem:[%s23121_s1 + $0xaf8] sm:$0xff]  }
0x12c9   : > { %11143 = vst.msk [vmem:[#allocation2 + $0x89] sm:$0x1] %vm1756_vm15, %v11123_v14  ;;  %17638 = vmatmul.mubr.msk.bf16.vlgmr.msra.gmra.mrb[24].mxu1 %vm170_vm0, %v22371_v6  ;;  %v22504_v41 = vld [vmem:[#allocation2 + $0x81] sm:$0xff]  ;;  %v18934_v14 = vld [vmem:[%s23121_s1 + $0xad0] sm:$0xff]  }
0x12ca   : > { %17646 = vmatpush3.bf16.msra.mxu1 %v18913_v11  ;;  %17641 = vmatprep.mubr.msk.bf16.mxu1 %vm170_vm0, %v22381_v35  ;;  %v11114_v61 = vld [vmem:[#allocation2 + $0x91] sm:$0x1]  ;;  %v18920_v11 = vld [vmem:[%s23121_s1 + $0xa60] sm:$0xff]   ;;  %v11700_v22 = vpack.c.bf16 %v22504_v41, %v22344_v10  ;;  %v18933_v10 = vld [vmem:[%s23121_s1 + $0xac8] sm:$0xff]  }
0x12cb   : > { %17647 = vmatprep.subr.bf16.mxu1 %v18914_v48  ;;  %v22391_v62 = vld [vmem:[#allocation2 + $0x80] sm:$0xff]  ;;  %11134 = vst.msk [vmem:[#allocation2 + $0x90] sm:$0x1] %vm1756_vm15, %v11114_v61  ;;  %v11837_v61 = vpack.c.bf16 %v22446_v37, %v22420_v56  ;;  %v18946_v56 = vld [vmem:[%s23121_s1 + $0xb30] sm:$0xff]  }
0x12cc   : > { %11151 = vst.msk [vmem:[#allocation2 + $0x90] sm:$0xff] %vm170_vm0, %v22391_v62  ;;  %v11562_v23 = vpack.c.bf16 %v22391_v62, %v22394_v7 }
0x12ce   : > { %17648 = vmatpush3.bf16.msra.mxu1 %v18914_v48  ;;  %v11124_v17 = vld [vmem:[#allocation2 + $0x98] sm:$0x1]  ;;  %v11836_v48 = vpack.c.bf16 %v22428_v12, %v22422_v39 }
0x12cf   : > { %17649 = vmatprep.subr.bf16.mxu1 %v18915_v4  ;;  %11144 = vst.msk [vmem:[#allocation2 + $0x99] sm:$0x1] %vm1756_vm15, %v11124_v17  ;;  %v18938_v17 = vld [vmem:[%s23121_s1 + $0xaf0] sm:$0xff]  }
0x12d0   : > { %v11148_v18 = vld [vmem:[#allocation2 + $0x88] sm:$0x3] }
0x12d1   : > { %17642 = vmatmul.mubr.msk.bf16.gmra.mrb[28].mxu1 %vm170_vm0, %v22402_v31  ;;  %11152 = vst.msk [vmem:[#allocation2 + $0x98] sm:$0x3] %vm172_vm1, %v11148_v18  ;;  %v11834_v7 = vld [vmem:[#allocation2 + $0x82] sm:$0xff] }
0x12d2   : > { %17650 = vmatpush3.bf16.msra.mxu1 %v18915_v4  ;;  %17655 = vmatprep.mubr.msk.bf16.mxu1 %vm170_vm0, %v11421_v45  ;;  %v18935_v4 = vld [vmem:[%s23121_s1 + $0xad8] sm:$0xff]   ;;  %v11838_v2 = vpack.c.bf16 %v11834_v7, %v22444_v44 }
0x12d3   : > { %17651 = vmatprep.subr.bf16.mxu1 %v18916_v36  ;;  %v22556_v18 = vld [vmem:[#allocation2 + $0x90] sm:$0xff] }
0x12d4   : > { %v11976_v45 = vpack.c.bf16 %v22556_v18, %v22391_v62  ;;  %v18943_v62 = vld [vmem:[%s23121_s1 + $0xb18] sm:$0xff]  }
0x12d6   : > { %17652 = vmatpush3.bf16.msra.mxu1 %v18916_v36  ;;  %v18937_v36 = vld [vmem:[%s23121_s1 + $0xae8] sm:$0xff]  }
0x12d7   : > { %17653 = vmatprep.subr.bf16.mxu1 %v18917_v16 }
0x12da   : > { %17654 = vmatpush3.bf16.msra.mxu1 %v18917_v16  ;;  %v18944_v16 = vld [vmem:[%s23121_s1 + $0xb20] sm:$0xff]  }
0x12db   : > { %17663 = vmatprep.subr.bf16.mxu1 %v18918_v30 }
0x12dd   : > { %17656 = vmatmul.mubr.msk.bf16.vlgmr.msra.gmra.mrb[24].mxu1 %vm170_vm0, %v22426_v0 }
0x12de   : > { %17659 = vmatprep.mubr.msk.bf16.mxu1 %vm170_vm0, %v22435_v8  ;;  %17664 = vmatpush3.bf16.msra.mxu1 %v18918_v30  ;;  %v12110_v30 = vld [vmem:[#allocation2 + $0x91] sm:$0xff] }
0x12df   : > { %17665 = vmatprep.subr.bf16.mxu1 %v18919_v60  ;;  %v12114_v24 = vpack.c.bf16 %v12110_v30, %v22504_v41  ;;  %v18952_v30 = vld [vmem:[%s23121_s1 + $0xb88] sm:$0xff]  }
0x12e2   : > { %17666 = vmatpush3.bf16.msra.mxu1 %v18919_v60 }
0x12e3   : > { %17667 = vmatprep.subr.bf16.mxu1 %v18920_v11 }
0x12e5   : > { %17660 = vmatmul.mubr.msk.bf16.gmra.mrb[28].mxu1 %vm170_vm0, %v22450_v63 }
0x12e6   : > { %17668 = vmatpush3.bf16.msra.mxu1 %v18920_v11  ;;  %17673 = vmatprep.mubr.msk.bf16.mxu1 %vm170_vm0, %v11559_v51 }
0x12e7   : > { %17669 = vmatprep.subr.bf16.mxu1 %v18921_v46 }
0x12ea   : > { %17670 = vmatpush3.bf16.msra.mxu1 %v18921_v46 }
0x12eb   : > { %17671 = vmatprep.subr.bf16.mxu1 %v18922_v52 }
0x12ee   : > { %17672 = vmatpush3.bf16.msra.mxu1 %v18922_v52 }
0x12ef   : > { %17681 = vmatprep.subr.bf16.mxu1 %v18923_v13 }
0x12f1   : > { %17674 = vmatmul.mubr.msk.bf16.vlgmr.msra.gmra.mrb[24].mxu1 %vm170_vm0, %v11560_v59 }
0x12f2   : > { %17677 = vmatprep.mubr.msk.bf16.mxu1 %vm170_vm0, %v11561_v34  ;;  %17682 = vmatpush3.bf16.msra.mxu1 %v18923_v13 }
0x12f3   : > { %17683 = vmatprep.subr.bf16.mxu1 %v18924_v27 }
0x12f6   : > { %17684 = vmatpush3.bf16.msra.mxu1 %v18924_v27 }
0x12f7   : > { %17685 = vmatprep.subr.bf16.mxu1 %v18925_v49 }
0x12f9   : > { %17678 = vmatmul.mubr.msk.bf16.gmra.mrb[28].mxu1 %vm170_vm0, %v11562_v23 }
0x12fa   : > { %17686 = vmatpush3.bf16.msra.mxu1 %v18925_v49  ;;  %17691 = vmatprep.mubr.msk.bf16.mxu1 %vm170_vm0, %v11697_v21 }
0x12fb   : > { %17687 = vmatprep.subr.bf16.mxu1 %v18926_v47 }
0x12fe   : > { %17688 = vmatpush3.bf16.msra.mxu1 %v18926_v47 }
0x12ff   : > { %17689 = vmatprep.subr.bf16.mxu1 %v18927_v38 }
0x1302   : > { %17690 = vmatpush3.bf16.msra.mxu1 %v18927_v38 }
0x1303   : > { %17699 = vmatprep.subr.bf16.mxu1 %v18928_v54 }
0x1305   : > { %17692 = vmatmul.mubr.msk.bf16.vlgmr.msra.gmra.mrb[24].mxu1 %vm170_vm0, %v11698_v29 }
0x1306   : > { %17695 = vmatprep.mubr.msk.bf16.mxu1 %vm170_vm0, %v11699_v55  ;;  %17700 = vmatpush3.bf16.msra.mxu1 %v18928_v54 }
0x1307   : > { %17701 = vmatprep.subr.bf16.mxu1 %v18929_v43 }
0x130a   : > { %17702 = vmatpush3.bf16.msra.mxu1 %v18929_v43  ;;  %v12444_v43 = vld [vmem:[#allocation2 + $0x8] sm:$0x3] }
0x130b   : > { %17703 = vmatprep.subr.bf16.mxu1 %v18930_v3 }
0x130d   : > { %17696 = vmatmul.mubr.msk.bf16.gmra.mrb[28].mxu1 %vm170_vm0, %v11700_v22 }
0x130e   : > { %17704 = vmatpush3.bf16.msra.mxu1 %v18930_v3  ;;  %17709 = vmatprep.mubr.msk.bf16.mxu1 %vm170_vm0, %v11835_v28 }
0x130f   : > { %17705 = vmatprep.subr.bf16.mxu1 %v18931_v1 }
0x1312   : > { %17706 = vmatpush3.bf16.msra.mxu1 %v18931_v1 }
0x1313   : > { %17707 = vmatprep.subr.bf16.mxu1 %v18932_v19 }
0x1316   : > { %17708 = vmatpush3.bf16.msra.mxu1 %v18932_v19 }
0x1317   : > { %17717 = vmatprep.subr.bf16.mxu1 %v18933_v10 }
0x1319   : > { %17710 = vmatmul.mubr.msk.bf16.vlgmr.msra.gmra.mrb[24].mxu1 %vm170_vm0, %v11836_v48 }
0x131a   : > { %17713 = vmatprep.mubr.msk.bf16.mxu1 %vm170_vm0, %v11837_v61  ;;  %17718 = vmatpush3.bf16.msra.mxu1 %v18933_v10 }
0x131b   : > { %17719 = vmatprep.subr.bf16.mxu1 %v18934_v14 }
0x131e   : > { %17720 = vmatpush3.bf16.msra.mxu1 %v18934_v14 }
0x131f   : > { %17721 = vmatprep.subr.bf16.mxu1 %v18935_v4 }
0x1321   : > { %17714 = vmatmul.mubr.msk.bf16.gmra.mrb[28].mxu1 %vm170_vm0, %v11838_v2  ;;  %v18948_v2 = vld [vmem:[%s23121_s1 + $0xb68] sm:$0xff]  }
0x1322   : > { %17722 = vmatpush3.bf16.msra.mxu1 %v18935_v4  ;;  %17727 = vmatprep.mubr.msk.bf16.mxu1 %vm170_vm0, %v22371_v6  ;;  %v18940_v6 = vld [vmem:[%s23121_s1 + $0xb00] sm:$0xff]  }
0x1323   : > { %17723 = vmatprep.subr.bf16.mxu1 %v18936_v33 }
0x1326   : > { %17724 = vmatpush3.bf16.msra.mxu1 %v18936_v33 }
0x1327   : > { %17725 = vmatprep.subr.bf16.mxu1 %v18937_v36 }
0x132a   : > { %17726 = vmatpush3.bf16.msra.mxu1 %v18937_v36 }
0x132b   : > { %17735 = vmatprep.subr.bf16.mxu1 %v18938_v17 }
0x132d   : > { %17728 = vmatmul.mubr.msk.bf16.vlgmr.msra.gmra.mrb[24].mxu1 %vm170_vm0, %v22381_v35  ;;  %v18941_v35 = vld [vmem:[%s23121_s1 + $0xb08] sm:$0xff]  }
0x132e   : > { %17731 = vmatprep.mubr.msk.bf16.mxu1 %vm170_vm0, %v22402_v31  ;;  %17736 = vmatpush3.bf16.msra.mxu1 %v18938_v17  ;;  %v18942_v31 = vld [vmem:[%s23121_s1 + $0xb10] sm:$0xff]  }
0x132f   : > { %17737 = vmatprep.subr.bf16.mxu1 %v18939_v9 }
0x1332   : > { %17738 = vmatpush3.bf16.msra.mxu1 %v18939_v9  ;;  %v18949_v9 = vld [vmem:[%s23121_s1 + $0xb70] sm:$0xff]  }
0x1333   : > { %17739 = vmatprep.subr.bf16.mxu1 %v18940_v6 }
0x1335   : > { %17732 = vmatmul.mubr.msk.bf16.gmra.mrb[28].mxu1 %vm170_vm0, %v11976_v45  ;;  %v18950_v45 = vld [vmem:[%s23121_s1 + $0xb78] sm:$0xff]  }
0x1336   : > { %17740 = vmatpush3.bf16.msra.mxu1 %v18940_v6  ;;  %17745 = vmatprep.mubr.msk.bf16.mxu1 %vm170_vm0, %v22293_v15  ;;  %v18945_v15 = vld [vmem:[%s23121_s1 + $0xb28] sm:$0xff]  }
0x1337   : > { %17741 = vmatprep.subr.bf16.mxu1 %v18941_v35 }
0x133a   : > { %17742 = vmatpush3.bf16.msra.mxu1 %v18941_v35 }
0x133b   : > { %17743 = vmatprep.subr.bf16.mxu1 %v18942_v31 }
0x133e   : > { %17744 = vmatpush3.bf16.msra.mxu1 %v18942_v31 }
0x133f   : > { %17753 = vmatprep.subr.bf16.mxu1 %v18943_v62 }
0x1341   : > { %17746 = vmatmul.mubr.msk.bf16.vlgmr.msra.gmra.mrb[24].mxu1 %vm170_vm0, %v22322_v42  ;;  %v18947_v42 = vld [vmem:[%s23121_s1 + $0xb38] sm:$0xff]  }
0x1342   : > { %17749 = vmatprep.mubr.msk.bf16.mxu1 %vm170_vm0, %v22349_v25  ;;  %17754 = vmatpush3.bf16.msra.mxu1 %v18943_v62  ;;  %v12248_v25 = vld [vmem:[#allocation2 + $0x92] sm:$0xff] }
0x1343   : > { %17755 = vmatprep.subr.bf16.mxu1 %v18944_v16  ;;  %v12252_v39 = vpack.c.bf16 %v12248_v25, %v11834_v7 }
0x1346   : > { %17756 = vmatpush3.bf16.msra.mxu1 %v18944_v16 }
0x1347   : > { %17757 = vmatprep.subr.bf16.mxu1 %v18945_v15 }
0x1349   : > { %17750 = vmatmul.mubr.msk.bf16.gmra.mrb[28].mxu1 %vm170_vm0, %v12114_v24 }
0x134a   : > { %17758 = vmatpush3.bf16.msra.mxu1 %v18945_v15  ;;  %17763 = vmatprep.mubr.msk.bf16.mxu1 %vm170_vm0, %v22426_v0  ;;  %v18951_v15 = vld [vmem:[%s23121_s1 + $0xb80] sm:$0xff]  }
0x134b   : > { %17759 = vmatprep.subr.bf16.mxu1 %v18946_v56 }
0x134e   : > { %17760 = vmatpush3.bf16.msra.mxu1 %v18946_v56 }
0x134f   : > { %17761 = vmatprep.subr.bf16.mxu1 %v18947_v42 }
0x1352   : > { %17762 = vmatpush3.bf16.msra.mxu1 %v18947_v42 }
0x1353   : > { %17771 = vmatprep.subr.bf16.mxu1 %v18948_v2 }
0x1355   : > { %17764 = vmatmul.mubr.msk.bf16.vlgmr.msra.gmra.mrb[24].mxu1 %vm170_vm0, %v22435_v8 }
0x1356   : > { %17767 = vmatprep.mubr.msk.bf16.mxu1 %vm170_vm0, %v22450_v63  ;;  %17772 = vmatpush3.bf16.msra.mxu1 %v18948_v2 }
0x1357   : > { %17773 = vmatprep.subr.bf16.mxu1 %v18949_v9 }
0x135a   : > { %17774 = vmatpush3.bf16.msra.mxu1 %v18949_v9 }
0x135b   : > { %17775 = vmatprep.subr.bf16.mxu1 %v18950_v45 }
0x135d   : > { %17768 = vmatmul.mubr.msk.bf16.gmra.mrb[28].mxu1 %vm170_vm0, %v12252_v39 }
0x135e   : > { %17776 = vmatpush3.bf16.msra.mxu1 %v18950_v45 }
0x135f   : > { %17777 = vmatprep.subr.bf16.mxu1 %v18951_v15 }
0x1362   : > { %17778 = vmatpush3.bf16.msra.mxu1 %v18951_v15  ;;  %v18955_v15 = vld [vmem:[%s23121_s1 + $0xb50] sm:$0xff]  }
0x1363   : > { %17779 = vmatprep.subr.bf16.mxu1 %v18952_v30 }
0x1366   : > { %17780 = vmatpush3.bf16.msra.mxu1 %v18952_v30 }
0x1428   : > { %v17765_v12 = vpop.f32.mrb[24].mxu1 }
0x1429   : > { %v12340_v0 = vpop.f32.mrb[25].mxu1  ;;  %v12389_v37 = vmul.f32 0.01, %v17765_v12  ;;  %vm12381_vm7 = vcmp.ge.f32.partialorder %v17765_v12, 0.0 }
0x142a   : > { %vm12379_vm5 = vcmp.ge.f32.partialorder %v12340_v0, 0.0  ;;  %v12387_v60 = vmul.f32 0.01, %v12340_v0  ;;  %v17766_v11 = vpop.f32.mrb[26].mxu1 }
0x142b   : > { %v12343_v44 = vpop.f32.mrb[27].mxu1  ;;  %v12390_v8 = vmul.f32 0.01, %v17766_v11  ;;  %vm12382_vm8 = vcmp.ge.f32.partialorder %v17766_v11, 0.0  ;;  %v12397_v13 = vsel %vm12381_vm7, %v17765_v12, %v12389_v37 }
0x142c   : > { %vm12380_vm6 = vcmp.ge.f32.partialorder %v12343_v44, 0.0  ;;  %v12388_v46 = vmul.f32 0.01, %v12343_v44  ;;  %v12395_v51 = vsel %vm12379_vm5, %v12340_v0, %v12387_v60  ;;  %v22661_v0 = vld [vmem:[%s23121_s1 + $0xb40] sm:$0xff]  }
0x142d   : > { %12411 = vrot.lane.b32.xlu0 %v12395_v51, %s19063_s8  ;;  %v12398_v49 = vsel %vm12382_vm8, %v17766_v11, %v12390_v8  ;;  %17789 = vmatprep.subr.bf16.mxu1 %v22661_v0 }
0x142e   : > { %v12396_v52 = vsel %vm12380_vm6, %v12343_v44, %v12388_v46  ;;  %v12462_v46 = vld [vmem:[#allocation2 + $0x98] sm:$0x3] }
0x142f   : > { %12413 = vrot.lane.b32.xlu1 %v12396_v52, %s19063_s8 }
0x1430   : > { %v17769_v63 = vpop.f32.mrb[28].mxu1 }
0x1431   : > { %12415 = vrot.lane.b32.xlu0 %v12397_v13, %s19063_s8  ;;  %v12356_v59 = vpop.f32.mrb[29].mxu1  ;;  %v12393_v47 = vmul.f32 0.01, %v17769_v63  ;;  %vm12385_vm4 = vcmp.ge.f32.partialorder %v17769_v63, 0.0 }
0x1432   : > { %vm12383_vm9 = vcmp.ge.f32.partialorder %v12356_v59, 0.0  ;;  %v12391_v27 = vmul.f32 0.01, %v12356_v59  ;;  %v17770_v34 = vpop.f32.mrb[30].mxu1 }
0x1433   : > { %12417 = vrot.lane.b32.xlu1 %v12398_v49, %s19063_s8  ;;  %v12359_v23 = vpop.f32.mrb[31].mxu1  ;;  %v12401_v29 = vsel %vm12385_vm4, %v17769_v63, %v12393_v47  ;;  %v12394_v55 = vmul.f32 0.01, %v17770_v34  ;;  %vm12386_vm5 = vcmp.ge.f32.partialorder %v17770_v34, 0.0 }
0x1434   : > { %vm12384_vm10 = vcmp.ge.f32.partialorder %v12359_v23, 0.0  ;;  %v12392_v21 = vmul.f32 0.01, %v12359_v23  ;;  %v12399_v38 = vsel %vm12383_vm9, %v12356_v59, %v12391_v27 }
0x1435   : > { %12419 = vrot.lane.b32.xlu0 %v12399_v38, %s19063_s8  ;;  %v12402_v3 = vsel %vm12386_vm5, %v17770_v34, %v12394_v55 }
0x1436   : > { %v12400_v54 = vsel %vm12384_vm10, %v12359_v23, %v12392_v21 }
0x1437   : > { %12421 = vrot.lane.b32.xlu1 %v12400_v54, %s19063_s8 }
0x1439   : > { %12423 = vrot.lane.b32.xlu0 %v12401_v29, %s19063_s8 }
0x143b   : > { %12483 = vrot.lane.b32.xlu1 %v22342_v26, %s19064_s7 }
0x143d   : > { %12485 = vrot.lane.b32.xlu0 %v12444_v43, %s19064_s7 }
0x143f   : > { %12563 = vrot.lane.b32.xlu1 %v22342_v26, %s19063_s8 }
0x1441   : > { %12565 = vrot.lane.b32.xlu0 %v12444_v43, %s19063_s8 }
0x1443   : > { %12425 = vrot.lane.b32.xlu1 %v12402_v3, %s19063_s8 }
0x149f   : > { %v12412_v41 = vpop.permute.xlu0 %12411 }
0x14a0   : > { %12435 = vst.msk [vmem:[#allocation2 + $0x11] sm:$0xff] %vm233_vm2, %v12412_v41 }
0x14a1   : > { %v12414_v22 = vpop.permute.xlu1 %12413 }
0x14a2   : > { %12436 = vst.msk [vmem:[#allocation2 + $0x21] sm:$0xff] %vm233_vm2, %v12414_v22 }
0x14a3   : > { %v12416_v1 = vpop.permute.xlu0 %12415 }
0x14a4   : > { %12437 = vst.msk [vmem:[#allocation2 + $0x31] sm:$0xff] %vm233_vm2, %v12416_v1 }
0x14a5   : > { %v12418_v28 = vpop.permute.xlu1 %12417 }
0x14a6   : > { %12438 = vst.msk [vmem:[#allocation2 + $0x41] sm:$0xff] %vm233_vm2, %v12418_v28 }
0x14a7   : > { %v12420_v19 = vpop.permute.xlu0 %12419  ;;  %v12446_v36 = vld [vmem:[#allocation2 + $0x18] sm:$0x3]  ;;  %v12445_v17 = vld [vmem:[#allocation2 + $0x10] sm:$0xff] }
0x14a8   : > { %12439 = vst.msk [vmem:[#allocation2 + $0x51] sm:$0xff] %vm233_vm2, %v12420_v19 }
0x14a9   : > { %v12422_v26 = vpop.permute.xlu1 %12421  ;;  %v12447_v24 = vld [vmem:[#allocation2 + $0x20] sm:$0xff]  ;;  %v12448_v56 = vld [vmem:[#allocation2 + $0x28] sm:$0x3] }
0x14aa   : > { %12440 = vst.msk [vmem:[#allocation2 + $0x61] sm:$0xff] %vm233_vm2, %v12422_v26 }
0x14ab   : > { %v12424_v10 = vpop.permute.xlu0 %12423  ;;  %v12449_v48 = vld [vmem:[#allocation2 + $0x30] sm:$0xff]  ;;  %v12450_v14 = vld [vmem:[#allocation2 + $0x38] sm:$0x3] }
0x14ac   : > { %12441 = vst.msk [vmem:[#allocation2 + $0x71] sm:$0xff] %vm233_vm2, %v12424_v10  ;;  %12495 = vrot.lane.b32.xlu0 %v12449_v48, %s19064_s7  ;;  %12497 = vrot.lane.b32.xlu1 %v12450_v14, %s19064_s7 }
0x14ad   : > { %v12484_v61 = vpop.permute.xlu1 %12483  ;;  %v12451_v31 = vld [vmem:[#allocation2 + $0x40] sm:$0xff]  ;;  %v12452_v16 = vld [vmem:[#allocation2 + $0x48] sm:$0x3] }
0x14ae   : > { %12543 = vst.msk [vmem:[#allocation2] sm:$0xff] %vm1632_vm11, %v12484_v61 }
0x14af   : > { %v12486_v4 = vpop.permute.xlu0 %12485  ;;  %v12453_v39 = vld [vmem:[#allocation2 + $0x50] sm:$0xff]  ;;  %v12454_v12 = vld [vmem:[#allocation2 + $0x58] sm:$0x3] }
0x14b0   : > { %12544 = vst.msk [vmem:[#allocation2 + $0x8] sm:$0x3] %vm1634_vm12, %v12486_v4  ;;  %12575 = vrot.lane.b32.xlu0 %v12449_v48, %s19063_s8  ;;  %12577 = vrot.lane.b32.xlu1 %v12450_v14, %s19063_s8 }
0x14b1   : > { %v12564_v7 = vpop.permute.xlu1 %12563  ;;  %v12456_v60 = vld [vmem:[#allocation2 + $0x68] sm:$0x3]  ;;  %v12455_v11 = vld [vmem:[#allocation2 + $0x60] sm:$0xff] }
0x14b2   : > { %12623 = vst.msk [vmem:[#allocation2] sm:$0xff] %vm1714_vm13, %v12564_v7 }
0x14b3   : > { %v12566_v33 = vpop.permute.xlu0 %12565  ;;  %v12457_v42 = vld [vmem:[#allocation2 + $0x70] sm:$0xff]  ;;  %v12458_v25 = vld [vmem:[#allocation2 + $0x78] sm:$0x3] }
0x14b4   : > { %12624 = vst.msk [vmem:[#allocation2 + $0x8] sm:$0x3] %vm1716_vm14, %v12566_v33  ;;  %12489 = vrot.lane.b32.xlu0 %v12446_v36, %s19064_s7  ;;  %12487 = vrot.lane.b32.xlu1 %v12445_v17, %s19064_s7 }
0x14b5   : > { %v12426_v6 = vpop.permute.xlu1 %12425 }
0x14b6   : > { %12442 = vst.msk [vmem:[#allocation2 + $0x81] sm:$0xff] %vm233_vm2, %v12426_v6 }
0x14b8   : > { %12569 = vrot.lane.b32.xlu0 %v12446_v36, %s19063_s8  ;;  %12567 = vrot.lane.b32.xlu1 %v12445_v17, %s19063_s8 }
0x14b9   : > { %v12643_v35 = vld [vmem:[#allocation2 + $0x1] sm:$0x1] }
0x14ba   : > { %12663 = vst.msk [vmem:[#allocation2] sm:$0x1] %vm1756_vm15, %v12643_v35  ;;  %v18954_v35 = vld [vmem:[%s23121_s1 + $0xb48] sm:$0xff]  }
0x14bb   : > { %v12653_v62 = vld [vmem:[#allocation2 + $0x8] sm:$0x1] }
0x14bc   : > { %12673 = vst.msk [vmem:[#allocation2 + $0x9] sm:$0x1] %vm1756_vm15, %v12653_v62  ;;  %12499 = vrot.lane.b32.xlu0 %v12451_v31, %s19064_s7  ;;  %12501 = vrot.lane.b32.xlu1 %v12452_v16, %s19064_s7 }
0x14bd   : > { %v12459_v44 = vld [vmem:[#allocation2 + $0x80] sm:$0xff]  ;;  %v12460_v37 = vld [vmem:[#allocation2 + $0x88] sm:$0x3] }
0x14c0   : > { %12579 = vrot.lane.b32.xlu0 %v12451_v31, %s19063_s8  ;;  %12581 = vrot.lane.b32.xlu1 %v12452_v16, %s19063_s8 }
0x14c4   : > { %12491 = vrot.lane.b32.xlu0 %v12447_v24, %s19064_s7  ;;  %12493 = vrot.lane.b32.xlu1 %v12448_v56, %s19064_s7 }
0x14c8   : > { %12571 = vrot.lane.b32.xlu0 %v12447_v24, %s19063_s8  ;;  %12573 = vrot.lane.b32.xlu1 %v12448_v56, %s19063_s8  ;;  %v18956_v56 = vld [vmem:[%s23121_s1 + $0xb58] sm:$0xff]  }
0x14cc   : > { %12511 = vrot.lane.b32.xlu0 %v12457_v42, %s19064_s7  ;;  %12513 = vrot.lane.b32.xlu1 %v12458_v25, %s19064_s7 }
0x14d0   : > { %12503 = vrot.lane.b32.xlu0 %v12453_v39, %s19064_s7  ;;  %12505 = vrot.lane.b32.xlu1 %v12454_v12, %s19064_s7 }
0x14d4   : > { %12583 = vrot.lane.b32.xlu0 %v12453_v39, %s19063_s8  ;;  %12585 = vrot.lane.b32.xlu1 %v12454_v12, %s19063_s8 }
0x14d8   : > { %12509 = vrot.lane.b32.xlu1 %v12456_v60, %s19064_s7  ;;  %12507 = vrot.lane.b32.xlu0 %v12455_v11, %s19064_s7 }
0x14dc   : > { %12589 = vrot.lane.b32.xlu1 %v12456_v60, %s19063_s8  ;;  %12587 = vrot.lane.b32.xlu0 %v12455_v11, %s19063_s8  ;;  %v18957_v11 = vld [vmem:[%s23121_s1 + $0xb60] sm:$0xff]  }
0x14e0   : > { %12593 = vrot.lane.b32.xlu1 %v12458_v25, %s19063_s8  ;;  %12591 = vrot.lane.b32.xlu0 %v12457_v42, %s19063_s8 }
0x14e4   : > { %12595 = vrot.lane.b32.xlu1 %v12459_v44, %s19063_s8  ;;  %12515 = vrot.lane.b32.xlu0 %v12459_v44, %s19064_s7 }
0x14e8   : > { %12597 = vrot.lane.b32.xlu1 %v12460_v37, %s19063_s8  ;;  %12517 = vrot.lane.b32.xlu0 %v12460_v37, %s19064_s7 }
0x14ec   : > { %12599 = vrot.lane.b32.xlu1 %v22556_v18, %s19063_s8  ;;  %12519 = vrot.lane.b32.xlu0 %v22556_v18, %s19064_s7 }
0x14f0   : > { %12601 = vrot.lane.b32.xlu1 %v12462_v46, %s19063_s8  ;;  %12521 = vrot.lane.b32.xlu0 %v12462_v46, %s19064_s7  ;;  %v18958_v46 = vld [vmem:[%s23121_s1 + $0xb90] sm:$0xff]  }
0x151e   : > { %v12496_v51 = vpop.permute.xlu0 %12495  ;;  %v12498_v8 = vpop.permute.xlu1 %12497 }
0x151f   : > { %12549 = vst.msk [vmem:[#allocation2 + $0x30] sm:$0xff] %vm1632_vm11, %v12496_v51 }
0x1520   : > { %12550 = vst.msk [vmem:[#allocation2 + $0x38] sm:$0x3] %vm1634_vm12, %v12498_v8 }
0x1522   : > { %v12576_v52 = vpop.permute.xlu0 %12575  ;;  %v12578_v63 = vpop.permute.xlu1 %12577 }
0x1523   : > { %12629 = vst.msk [vmem:[#allocation2 + $0x30] sm:$0xff] %vm1714_vm13, %v12576_v52 }
0x1524   : > { %12630 = vst.msk [vmem:[#allocation2 + $0x38] sm:$0x3] %vm1716_vm14, %v12578_v63 }
0x1526   : > { %v12490_v13 = vpop.permute.xlu0 %12489  ;;  %v12488_v59 = vpop.permute.xlu1 %12487 }
0x1527   : > { %12546 = vst.msk [vmem:[#allocation2 + $0x18] sm:$0x3] %vm1634_vm12, %v12490_v13 }
0x1528   : > { %12545 = vst.msk [vmem:[#allocation2 + $0x10] sm:$0xff] %vm1632_vm11, %v12488_v59 }
0x152a   : > { %v12570_v18 = vpop.permute.xlu0 %12569  ;;  %v12568_v27 = vpop.permute.xlu1 %12567  ;;  %v12646_v34 = vld [vmem:[#allocation2 + $0x31] sm:$0x1] }
0x152b   : > { %v12656_v49 = vld [vmem:[#allocation2 + $0x38] sm:$0x1]  ;;  %12626 = vst.msk [vmem:[#allocation2 + $0x18] sm:$0x3] %vm1716_vm14, %v12570_v18 }
0x152c   : > { %12625 = vst.msk [vmem:[#allocation2 + $0x10] sm:$0xff] %vm1714_vm13, %v12568_v27  ;;  %v22702_v3 = vld [vmem:[#allocation2 + $0x31] sm:$0xff] }
0x152d   : > { %12666 = vst.msk [vmem:[#allocation2 + $0x30] sm:$0x1] %vm1756_vm15, %v12646_v34  ;;  %12676 = vst.msk [vmem:[#allocation2 + $0x39] sm:$0x1] %vm1756_vm15, %v12656_v49 }
0x152e   : > { %v12500_v23 = vpop.permute.xlu0 %12499  ;;  %v12502_v47 = vpop.permute.xlu1 %12501 }
0x152f   : > { %12551 = vst.msk [vmem:[#allocation2 + $0x40] sm:$0xff] %vm1632_vm11, %v12500_v23 }
0x1530   : > { %12552 = vst.msk [vmem:[#allocation2 + $0x48] sm:$0x3] %vm1634_vm12, %v12502_v47 }
0x1532   : > { %v12654_v21 = vld [vmem:[#allocation2 + $0x18] sm:$0x1]  ;;  %v12580_v38 = vpop.permute.xlu0 %12579  ;;  %v12582_v54 = vpop.permute.xlu1 %12581 }
0x1533   : > { %v12644_v29 = vld [vmem:[#allocation2 + $0x11] sm:$0x1]  ;;  %12674 = vst.msk [vmem:[#allocation2 + $0x19] sm:$0x1] %vm1756_vm15, %v12654_v21 }
0x1534   : > { %12631 = vst.msk [vmem:[#allocation2 + $0x40] sm:$0xff] %vm1714_vm13, %v12580_v38  ;;  %v22719_v33 = vld [vmem:[#allocation2 + $0x11] sm:$0xff] }
0x1535   : > { %12632 = vst.msk [vmem:[#allocation2 + $0x48] sm:$0x3] %vm1716_vm14, %v12582_v54 }
0x1536   : > { %12664 = vst.msk [vmem:[#allocation2 + $0x10] sm:$0x1] %vm1756_vm15, %v12644_v29  ;;  %v12492_v43 = vpop.permute.xlu0 %12491  ;;  %v12494_v55 = vpop.permute.xlu1 %12493 }
0x1537   : > { %12547 = vst.msk [vmem:[#allocation2 + $0x20] sm:$0xff] %vm1632_vm11, %v12492_v43 }
0x1538   : > { %12548 = vst.msk [vmem:[#allocation2 + $0x28] sm:$0x3] %vm1634_vm12, %v12494_v55 }
0x153a   : > { %v12572_v41 = vpop.permute.xlu0 %12571  ;;  %v12574_v22 = vpop.permute.xlu1 %12573  ;;  %v12684_v28 = vld [vmem:[#allocation2 + $0x18] sm:$0x3] }
0x153b   : > { %12627 = vst.msk [vmem:[#allocation2 + $0x20] sm:$0xff] %vm1714_vm13, %v12572_v41  ;;  %v12647_v26 = vld [vmem:[#allocation2 + $0x41] sm:$0x1] }
0x153c   : > { %v22706_v19 = vld [vmem:[#allocation2 + $0x41] sm:$0xff]  ;;  %12628 = vst.msk [vmem:[#allocation2 + $0x28] sm:$0x3] %vm1716_vm14, %v12574_v22 }
0x153d   : > { %v22704_v1 = vld [vmem:[#allocation2 + $0x10] sm:$0xff]  ;;  %12688 = vst.msk [vmem:[#allocation2 + $0x8] sm:$0x3] %vm172_vm1, %v12684_v28  ;;  %v12657_v10 = vld [vmem:[#allocation2 + $0x48] sm:$0x1]  ;;  %v13236_v48 = vpack.c.bf16 %v22706_v19, %v22702_v3 }
0x153e   : > { %12687 = vst.msk [vmem:[#allocation2] sm:$0xff] %vm170_vm0, %v22704_v1  ;;  %v12512_v14 = vpop.permute.xlu0 %12511  ;;  %v12514_v61 = vpop.permute.xlu1 %12513 }
0x153f   : > { %12667 = vst.msk [vmem:[#allocation2 + $0x40] sm:$0x1] %vm1756_vm15, %v12647_v26  ;;  %12677 = vst.msk [vmem:[#allocation2 + $0x49] sm:$0x1] %vm1756_vm15, %v12657_v10  ;;  %v22800_v26 = vld [vmem:[#allocation2 + $0x30] sm:$0xff] }
0x1540   : > { %12557 = vst.msk [vmem:[#allocation2 + $0x70] sm:$0xff] %vm1632_vm11, %v12512_v14 }
0x1541   : > { %12558 = vst.msk [vmem:[#allocation2 + $0x78] sm:$0x3] %vm1634_vm12, %v12514_v61  ;;  %v18959_v61 = vld [vmem:[%s23121_s1 + $0xb98] sm:$0xff]  }
0x1542   : > { %v12504_v4 = vpop.permute.xlu0 %12503  ;;  %v12506_v7 = vpop.permute.xlu1 %12505  ;;  %v12645_v6 = vld [vmem:[#allocation2 + $0x21] sm:$0x1] }
0x1543   : > { %v22721_v36 = vld [vmem:[#allocation2 + $0x21] sm:$0xff]  ;;  %12553 = vst.msk [vmem:[#allocation2 + $0x50] sm:$0xff] %vm1632_vm11, %v12504_v4 }
0x1544   : > { %12554 = vst.msk [vmem:[#allocation2 + $0x58] sm:$0x3] %vm1634_vm12, %v12506_v7  ;;  %v22728_v9 = vpack.c.bf16 %v22702_v3, %v22721_v36  ;;  %v13235_v45 = vpack.c.bf16 %v22721_v36, %v22719_v33  ;;  %v12655_v31 = vld [vmem:[#allocation2 + $0x28] sm:$0x1]  ;;  %v18976_v3 = vld [vmem:[%s23121_s1 + $0xc20] sm:$0xff]  }
0x1545   : > { %v12714_v2 = vld [vmem:[#allocation2 + $0x1] sm:$0xff]  ;;  %12665 = vst.msk [vmem:[#allocation2 + $0x20] sm:$0x1] %vm1756_vm15, %v12645_v6  ;;  %12675 = vst.msk [vmem:[#allocation2 + $0x29] sm:$0x1] %vm1756_vm15, %v12655_v31 }
0x1546   : > { %v12722_v17 = vpack.c.bf16 %v22719_v33, %v12714_v2  ;;  %v12584_v62 = vpop.permute.xlu0 %12583  ;;  %v12586_v16 = vpop.permute.xlu1 %12585  ;;  %v12691_v18 = vld [vmem:[#allocation2] sm:$0xff]  ;;  %v18975_v33 = vld [vmem:[%s23121_s1 + $0xc18] sm:$0xff]  }
0x1547   : > { %12633 = vst.msk [vmem:[#allocation2 + $0x50] sm:$0xff] %vm1714_vm13, %v12584_v62  ;;  %v12699_v38 = vpack.c.bf16 %v22704_v1, %v12691_v18  ;;  %v22807_v14 = vld [vmem:[#allocation2 + $0x40] sm:$0xff] }
0x1548   : > { %17781 = vmatprep.mubr.msk.bf16.mxu1 %vm170_vm0, %v12722_v17  ;;  %12634 = vst.msk [vmem:[#allocation2 + $0x58] sm:$0x3] %vm1716_vm14, %v12586_v16  ;;  %v18960_v17 = vld [vmem:[%s23121_s1 + $0xba0] sm:$0xff]   ;;  %v18961_v16 = vld [vmem:[%s23121_s1 + $0xba8] sm:$0xff]  }
0x1549   : > { %17782 = vmatmul.mubr.msk.bf16.vlgmr.msra.gmra.mrb[32].mxu1 %vm170_vm0, %v22728_v9  ;;  %v12951_v31 = vld [vmem:[#allocation2 + $0x2] sm:$0xff] }
0x154a   : > { %17790 = vmatpush3.bf16.msra.mxu1 %v22661_v0  ;;  %v12508_v30 = vpop.permute.xlu0 %12507  ;;  %v12510_v24 = vpop.permute.xlu1 %12509 }
0x154b   : > { %17791 = vmatprep.subr.bf16.mxu1 %v18954_v35  ;;  %12555 = vst.msk [vmem:[#allocation2 + $0x60] sm:$0xff] %vm1632_vm11, %v12508_v30 }
0x154c   : > { %12556 = vst.msk [vmem:[#allocation2 + $0x68] sm:$0x3] %vm1634_vm12, %v12510_v24  ;;  %v22795_v55 = vld [vmem:[#allocation2 + $0x20] sm:$0xff]  ;;  %v22838_v24 = vld [vmem:[#allocation2 + $0x12] sm:$0xff] }
0x154d   : > { %v22805_v10 = vpack.c.bf16 %v22800_v26, %v22795_v55 }
0x154e   : > { %17792 = vmatpush3.bf16.msra.mxu1 %v18954_v35  ;;  %v12588_v42 = vpop.permute.xlu0 %12587  ;;  %v12590_v25 = vpop.permute.xlu1 %12589  ;;  %v12648_v12 = vld [vmem:[#allocation2 + $0x51] sm:$0x1] }
0x154f   : > { %17793 = vmatprep.subr.bf16.mxu1 %v18955_v15  ;;  %v22751_v39 = vld [vmem:[#allocation2 + $0x51] sm:$0xff]  ;;  %12635 = vst.msk [vmem:[#allocation2 + $0x60] sm:$0xff] %vm1714_vm13, %v12588_v42  ;;  %v12959_v42 = vpack.c.bf16 %v22838_v24, %v12951_v31 }
0x1550   : > { %v12658_v0 = vld [vmem:[#allocation2 + $0x58] sm:$0x1]  ;;  %12636 = vst.msk [vmem:[#allocation2 + $0x68] sm:$0x3] %vm1716_vm14, %v12590_v25  ;;  %v22757_v60 = vpack.c.bf16 %v22751_v39, %v22706_v19  ;;  %v18962_v25 = vld [vmem:[%s23121_s1 + $0xbb0] sm:$0xff]  }
0x1551   : > { %12668 = vst.msk [vmem:[#allocation2 + $0x50] sm:$0x1] %vm1756_vm15, %v12648_v12  ;;  %12678 = vst.msk [vmem:[#allocation2 + $0x59] sm:$0x1] %vm1756_vm15, %v12658_v0  ;;  %v18963_v12 = vld [vmem:[%s23121_s1 + $0xbb8] sm:$0xff]   ;;  %v22852_v0 = vld [vmem:[#allocation2 + $0x22] sm:$0xff] }
0x1552   : > { %17794 = vmatpush3.bf16.msra.mxu1 %v18955_v15  ;;  %17785 = vmatprep.mubr.msk.bf16.mxu1 %vm170_vm0, %v22757_v60  ;;  %v12592_v44 = vpop.permute.xlu0 %12591  ;;  %v12594_v37 = vpop.permute.xlu1 %12593  ;;  %v13373_v19 = vpack.c.bf16 %v22852_v0, %v22838_v24  ;;  %v18983_v31 = vld [vmem:[%s23121_s1 + $0xc58] sm:$0xff]   ;;  %v18986_v24 = vld [vmem:[%s23121_s1 + $0xc70] sm:$0xff]  }
0x1553   : > { %17795 = vmatprep.subr.bf16.mxu1 %v18956_v56  ;;  %12637 = vst.msk [vmem:[#allocation2 + $0x70] sm:$0xff] %vm1714_vm13, %v12592_v44  ;;  %v22856_v44 = vld [vmem:[#allocation2 + $0x32] sm:$0xff] }
0x1554   : > { %12638 = vst.msk [vmem:[#allocation2 + $0x78] sm:$0x3] %vm1716_vm14, %v12594_v37  ;;  %v22860_v37 = vpack.c.bf16 %v22856_v44, %v22852_v0  ;;  %v18994_v0 = vld [vmem:[%s23122_s2 + $0x28] sm:$0xff]  }
0x1556   : > { %17796 = vmatpush3.bf16.msra.mxu1 %v18956_v56  ;;  %v12516_v51 = vpop.permute.xlu0 %12515  ;;  %v12596_v8 = vpop.permute.xlu1 %12595  ;;  %v12649_v63 = vld [vmem:[#allocation2 + $0x61] sm:$0x1] }
0x1557   : > { %17797 = vmatprep.subr.bf16.mxu1 %v18957_v11  ;;  %v22771_v52 = vld [vmem:[#allocation2 + $0x61] sm:$0xff]  ;;  %12559 = vst.msk [vmem:[#allocation2 + $0x80] sm:$0xff] %vm1632_vm11, %v12516_v51 }
0x1558   : > { %12669 = vst.msk [vmem:[#allocation2 + $0x60] sm:$0x1] %vm1756_vm15, %v12649_v63  ;;  %v12659_v13 = vld [vmem:[#allocation2 + $0x68] sm:$0x1]  ;;  %v13237_v59 = vpack.c.bf16 %v22771_v52, %v22751_v39  ;;  %v22798_v41 = vld [vmem:[#allocation2 + $0x50] sm:$0xff]  ;;  %v18964_v51 = vld [vmem:[%s23121_s1 + $0xbc0] sm:$0xff]  }
0x1559   : > { %12639 = vst.msk [vmem:[#allocation2 + $0x80] sm:$0xff] %vm1714_vm13, %v12596_v8  ;;  %v22815_v7 = vpack.c.bf16 %v22798_v41, %v22807_v14  ;;  %v22876_v63 = vld [vmem:[%s23122_s2 + $0x20] sm:$0xff]   ;;  %v18978_v39 = vld [vmem:[%s23121_s1 + $0xc30] sm:$0xff]  }
0x155a   : > { %17798 = vmatpush3.bf16.msra.mxu1 %v18957_v11  ;;  %12679 = vst.msk [vmem:[#allocation2 + $0x69] sm:$0x1] %vm1756_vm15, %v12659_v13  ;;  %v12518_v27 = vpop.permute.xlu0 %12517  ;;  %v12598_v34 = vpop.permute.xlu1 %12597  ;;  %v12650_v23 = vld [vmem:[#allocation2 + $0x71] sm:$0x1]  ;;  %v22854_v11 = vld [vmem:[#allocation2 + $0x52] sm:$0xff]  ;;  %v18965_v13 = vld [vmem:[%s23121_s1 + $0xbc8] sm:$0xff]   ;;  %17933 = vmatprep.subr.bf16.mxu0 %v22876_v63 }
0x155b   : > { %17807 = vmatprep.subr.bf16.mxu1 %v18958_v46  ;;  %v22779_v49 = vld [vmem:[#allocation2 + $0x71] sm:$0xff]  ;;  %12560 = vst.msk [vmem:[#allocation2 + $0x88] sm:$0x3] %vm1634_vm12, %v12518_v27  ;;  %17934 = vmatpush3.bf16.msra.mxu0 %v22876_v63 }
0x155c   : > { %v12660_v47 = vld [vmem:[#allocation2 + $0x78] sm:$0x1]  ;;  %v22784_v21 = vpack.c.bf16 %v22779_v49, %v22771_v52  ;;  %12670 = vst.msk [vmem:[#allocation2 + $0x70] sm:$0x1] %vm1756_vm15, %v12650_v23  ;;  %v18966_v23 = vld [vmem:[%s23121_s1 + $0xbd0] sm:$0xff]   ;;  %17935 = vmatprep.subr.bf16.mxu0 %v18994_v0 }
0x155d   : > { %12680 = vst.msk [vmem:[#allocation2 + $0x79] sm:$0x1] %vm1756_vm15, %v12660_v47  ;;  %v13097_v47 = vpack.c.bf16 %v22795_v55, %v22704_v1  ;;  %v13098_v1 = vpack.c.bf16 %v22807_v14, %v22800_v26  ;;  %v18970_v55 = vld [vmem:[%s23121_s1 + $0xbf0] sm:$0xff]   ;;  %v18973_v26 = vld [vmem:[%s23121_s1 + $0xc08] sm:$0xff]  }
0x155e   : > { %12640 = vst.msk [vmem:[#allocation2 + $0x88] sm:$0x3] %vm1716_vm14, %v12598_v34  ;;  %17786 = vmatmul.mubr.msk.bf16.gmra.mrb[36].mxu1 %vm170_vm0, %v22784_v21  ;;  %v12520_v54 = vpop.permute.xlu0 %12519  ;;  %v12600_v29 = vpop.permute.xlu1 %12599  ;;  %v18974_v14 = vld [vmem:[%s23121_s1 + $0xc10] sm:$0xff]  }
0x155f   : > { %17799 = vmatprep.mubr.msk.bf16.mxu1 %vm170_vm0, %v12699_v38  ;;  %12561 = vst.msk [vmem:[#allocation2 + $0x90] sm:$0xff] %vm1632_vm11, %v12520_v54  ;;  %v12697_v62 = vld [vmem:[#allocation2 + $0x60] sm:$0xff]  ;;  %v18967_v38 = vld [vmem:[%s23121_s1 + $0xbd8] sm:$0xff]   ;;  %17936 = vmatpush3.bf16.msra.mxu0 %v18994_v0 }
0x1560   : > { %v12651_v43 = vld [vmem:[#allocation2 + $0x81] sm:$0x1]  ;;  %12641 = vst.msk [vmem:[#allocation2 + $0x90] sm:$0xff] %vm1714_vm13, %v12600_v29  ;;  %v18969_v29 = vld [vmem:[%s23121_s1 + $0xbe8] sm:$0xff]  }
0x1561   : > { %12671 = vst.msk [vmem:[#allocation2 + $0x80] sm:$0x1] %vm1756_vm15, %v12651_v43  ;;  %v22887_v27 = vld [vmem:[#allocation2 + $0x62] sm:$0xff]  ;;  %v13099_v43 = vpack.c.bf16 %v12697_v62, %v22798_v41 }
0x1562   : > { %v12522_v22 = vpop.permute.xlu0 %12521  ;;  %v12602_v28 = vpop.permute.xlu1 %12601  ;;  %v18968_v54 = vld [vmem:[%s23121_s1 + $0xbe0] sm:$0xff]  }
0x1563   : > { %12562 = vst.msk [vmem:[#allocation2 + $0x98] sm:$0x3] %vm1634_vm12, %v12522_v22  ;;  %v22828_v35 = vld [vmem:[#allocation2 + $0x70] sm:$0xff]  ;;  %v18972_v41 = vld [vmem:[%s23121_s1 + $0xc00] sm:$0xff]  }
0x1564   : > { %12642 = vst.msk [vmem:[#allocation2 + $0x98] sm:$0x3] %vm1716_vm14, %v12602_v28  ;;  %v22836_v30 = vpack.c.bf16 %v22828_v35, %v12697_v62  ;;  %v22884_v18 = vld [vmem:[#allocation2 + $0x72] sm:$0xff]  ;;  %v18984_v62 = vld [vmem:[%s23121_s1 + $0xc60] sm:$0xff]  }
0x1565   : > { %v12661_v4 = vld [vmem:[#allocation2 + $0x88] sm:$0x1]  ;;  %v22891_v34 = vpack.c.bf16 %v22884_v18, %v22887_v27  ;;  %v18971_v28 = vld [vmem:[%s23121_s1 + $0xbf8] sm:$0xff]  }
0x1566   : > { %12681 = vst.msk [vmem:[#allocation2 + $0x89] sm:$0x1] %vm1756_vm15, %v12661_v4  ;;  %17800 = vmatmul.mubr.msk.bf16.vlgmr.msra.gmra.mrb[32].mxu1 %vm170_vm0, %v22805_v10  ;;  %v22948_v36 = vld [vmem:[#allocation2 + $0x81] sm:$0xff] }
0x1567   : > { %17808 = vmatpush3.bf16.msra.mxu1 %v18958_v46  ;;  %17803 = vmatprep.mubr.msk.bf16.mxu1 %vm170_vm0, %v22815_v7  ;;  %v12652_v2 = vld [vmem:[#allocation2 + $0x91] sm:$0x1]  ;;  %v22862_v46 = vld [vmem:[#allocation2 + $0x42] sm:$0xff] }
0x1568   : > { %17809 = vmatprep.subr.bf16.mxu1 %v18959_v61  ;;  %v22825_v6 = vld [vmem:[#allocation2 + $0x80] sm:$0xff]  ;;  %12672 = vst.msk [vmem:[#allocation2 + $0x90] sm:$0x1] %vm1756_vm15, %v12652_v2  ;;  %v22869_v8 = vpack.c.bf16 %v22854_v11, %v22862_v46  ;;  %v13374_v52 = vpack.c.bf16 %v22862_v46, %v22856_v44  ;;  %v18996_v44 = vld [vmem:[%s23122_s2 + $0x38] sm:$0xff]  }
0x1569   : > { %12689 = vst.msk [vmem:[#allocation2 + $0x90] sm:$0xff] %vm170_vm0, %v22825_v6  ;;  %v13100_v22 = vpack.c.bf16 %v22825_v6, %v22828_v35  ;;  %v18982_v35 = vld [vmem:[%s23121_s1 + $0xc50] sm:$0xff]  }
0x156b   : > { %17810 = vmatpush3.bf16.msra.mxu1 %v18959_v61  ;;  %v12662_v15 = vld [vmem:[#allocation2 + $0x98] sm:$0x1]  ;;  %v18980_v61 = vld [vmem:[%s23121_s1 + $0xc40] sm:$0xff]  }
0x156c   : > { %17811 = vmatprep.subr.bf16.mxu1 %v18960_v17  ;;  %12682 = vst.msk [vmem:[#allocation2 + $0x99] sm:$0x1] %vm1756_vm15, %v12662_v15 }
0x156d   : > { %v12686_v56 = vld [vmem:[#allocation2 + $0x88] sm:$0x3] }
0x156e   : > { %17804 = vmatmul.mubr.msk.bf16.gmra.mrb[36].mxu1 %vm170_vm0, %v22836_v30  ;;  %12690 = vst.msk [vmem:[#allocation2 + $0x98] sm:$0x3] %vm172_vm1, %v12686_v56  ;;  %v13372_v4 = vld [vmem:[#allocation2 + $0x82] sm:$0xff] }
0x156f   : > { %17812 = vmatpush3.bf16.msra.mxu1 %v18960_v17  ;;  %17817 = vmatprep.mubr.msk.bf16.mxu1 %vm170_vm0, %v12959_v42  ;;  %v13376_v2 = vpack.c.bf16 %v13372_v4, %v22884_v18  ;;  %v18981_v17 = vld [vmem:[%s23121_s1 + $0xc48] sm:$0xff]  }
0x1570   : > { %17813 = vmatprep.subr.bf16.mxu1 %v18961_v16 }
0x1573   : > { %17814 = vmatpush3.bf16.msra.mxu1 %v18961_v16  ;;  %v13510_v16 = vld [vmem:[#allocation2 + $0x90] sm:$0xff] }
0x1574   : > { %17815 = vmatprep.subr.bf16.mxu1 %v18962_v25  ;;  %v13514_v15 = vpack.c.bf16 %v13510_v16, %v22825_v6  ;;  %v18988_v6 = vld [vmem:[%s23121_s1 + $0xc80] sm:$0xff]  }
0x1575   : > { %v13648_v56 = vld [vmem:[#allocation2 + $0x91] sm:$0xff] }
0x1576   : > { %v13652_v42 = vpack.c.bf16 %v13648_v56, %v22948_v36 }
0x1577   : > { %17816 = vmatpush3.bf16.msra.mxu1 %v18962_v25  ;;  %v18991_v25 = vld [vmem:[%s23121_s1 + $0xc98] sm:$0xff]  }
0x1578   : > { %17825 = vmatprep.subr.bf16.mxu1 %v18963_v12 }
0x157a   : > { %17818 = vmatmul.mubr.msk.bf16.vlgmr.msra.gmra.mrb[32].mxu1 %vm170_vm0, %v22860_v37 }
0x157b   : > { %17821 = vmatprep.mubr.msk.bf16.mxu1 %vm170_vm0, %v22869_v8  ;;  %17826 = vmatpush3.bf16.msra.mxu1 %v18963_v12 }
0x157c   : > { %17827 = vmatprep.subr.bf16.mxu1 %v18964_v51 }
0x157f   : > { %17828 = vmatpush3.bf16.msra.mxu1 %v18964_v51 }
0x1580   : > { %17829 = vmatprep.subr.bf16.mxu1 %v18965_v13 }
0x1582   : > { %17822 = vmatmul.mubr.msk.bf16.gmra.mrb[36].mxu1 %vm170_vm0, %v22891_v34 }
0x1583   : > { %17830 = vmatpush3.bf16.msra.mxu1 %v18965_v13  ;;  %17835 = vmatprep.mubr.msk.bf16.mxu1 %vm170_vm0, %v13097_v47 }
0x1584   : > { %17831 = vmatprep.subr.bf16.mxu1 %v18966_v23 }
0x1587   : > { %17832 = vmatpush3.bf16.msra.mxu1 %v18966_v23 }
0x1588   : > { %17833 = vmatprep.subr.bf16.mxu1 %v18967_v38 }
0x158b   : > { %17834 = vmatpush3.bf16.msra.mxu1 %v18967_v38 }
0x158c   : > { %17843 = vmatprep.subr.bf16.mxu1 %v18968_v54 }
0x158e   : > { %17836 = vmatmul.mubr.msk.bf16.vlgmr.msra.gmra.mrb[32].mxu1 %vm170_vm0, %v13098_v1 }
0x158f   : > { %17839 = vmatprep.mubr.msk.bf16.mxu1 %vm170_vm0, %v13099_v43  ;;  %17844 = vmatpush3.bf16.msra.mxu1 %v18968_v54 }
0x1590   : > { %17845 = vmatprep.subr.bf16.mxu1 %v18969_v29 }
0x1593   : > { %17846 = vmatpush3.bf16.msra.mxu1 %v18969_v29 }
0x1594   : > { %17847 = vmatprep.subr.bf16.mxu1 %v18970_v55 }
0x1596   : > { %17840 = vmatmul.mubr.msk.bf16.gmra.mrb[36].mxu1 %vm170_vm0, %v13100_v22 }
0x1597   : > { %17848 = vmatpush3.bf16.msra.mxu1 %v18970_v55  ;;  %17853 = vmatprep.mubr.msk.bf16.mxu1 %vm170_vm0, %v13235_v45  ;;  %v13238_v45 = vpack.c.bf16 %v22948_v36, %v22779_v49  ;;  %v13375_v49 = vpack.c.bf16 %v22887_v27, %v22854_v11  ;;  %v18995_v11 = vld [vmem:[%s23122_s2 + $0x30] sm:$0xff]  }
0x1598   : > { %17849 = vmatprep.subr.bf16.mxu1 %v18971_v28  ;;  %17937 = vmatprep.subr.bf16.mxu0 %v18995_v11 }
0x1599   : > { %17938 = vmatpush3.bf16.msra.mxu0 %v18995_v11 }
0x159a   : > { %17939 = vmatprep.subr.bf16.mxu0 %v18996_v44 }
0x159b   : > { %17850 = vmatpush3.bf16.msra.mxu1 %v18971_v28 }
0x159c   : > { %17851 = vmatprep.subr.bf16.mxu1 %v18972_v41 }
0x159d   : > { %17940 = vmatpush3.bf16.msra.mxu0 %v18996_v44 }
0x159f   : > { %17852 = vmatpush3.bf16.msra.mxu1 %v18972_v41 }
0x15a0   : > { %17861 = vmatprep.subr.bf16.mxu1 %v18973_v26 }
0x15a2   : > { %17854 = vmatmul.mubr.msk.bf16.vlgmr.msra.gmra.mrb[32].mxu1 %vm170_vm0, %v13236_v48  ;;  %v18977_v48 = vld [vmem:[%s23121_s1 + $0xc28] sm:$0xff]  }
0x15a3   : > { %17857 = vmatprep.mubr.msk.bf16.mxu1 %vm170_vm0, %v13237_v59  ;;  %17862 = vmatpush3.bf16.msra.mxu1 %v18973_v26  ;;  %v18979_v59 = vld [vmem:[%s23121_s1 + $0xc38] sm:$0xff]  }
0x15a4   : > { %17863 = vmatprep.subr.bf16.mxu1 %v18974_v14 }
0x15a7   : > { %17864 = vmatpush3.bf16.msra.mxu1 %v18974_v14 }
0x15a8   : > { %17865 = vmatprep.subr.bf16.mxu1 %v18975_v33 }
0x15aa   : > { %17858 = vmatmul.mubr.msk.bf16.gmra.mrb[36].mxu1 %vm170_vm0, %v13238_v45 }
0x15ab   : > { %17866 = vmatpush3.bf16.msra.mxu1 %v18975_v33  ;;  %17871 = vmatprep.mubr.msk.bf16.mxu1 %vm170_vm0, %v13373_v19 }
0x15ac   : > { %17867 = vmatprep.subr.bf16.mxu1 %v18976_v3 }
0x15af   : > { %17868 = vmatpush3.bf16.msra.mxu1 %v18976_v3 }
0x15b0   : > { %17869 = vmatprep.subr.bf16.mxu1 %v18977_v48 }
0x15b3   : > { %17870 = vmatpush3.bf16.msra.mxu1 %v18977_v48 }
0x15b4   : > { %17879 = vmatprep.subr.bf16.mxu1 %v18978_v39 }
0x15b6   : > { %17872 = vmatmul.mubr.msk.bf16.vlgmr.msra.gmra.mrb[32].mxu1 %vm170_vm0, %v13374_v52 }
0x15b7   : > { %17875 = vmatprep.mubr.msk.bf16.mxu1 %vm170_vm0, %v13375_v49  ;;  %17880 = vmatpush3.bf16.msra.mxu1 %v18978_v39 }
0x15b8   : > { %17881 = vmatprep.subr.bf16.mxu1 %v18979_v59 }
0x15bb   : > { %17882 = vmatpush3.bf16.msra.mxu1 %v18979_v59 }
0x15bc   : > { %17883 = vmatprep.subr.bf16.mxu1 %v18980_v61 }
0x15be   : > { %17876 = vmatmul.mubr.msk.bf16.gmra.mrb[36].mxu1 %vm170_vm0, %v13376_v2 }
0x15bf   : > { %17884 = vmatpush3.bf16.msra.mxu1 %v18980_v61  ;;  %17889 = vmatprep.mubr.msk.bf16.mxu1 %vm170_vm0, %v22805_v10  ;;  %v18985_v10 = vld [vmem:[%s23121_s1 + $0xc68] sm:$0xff]  }
0x15c0   : > { %17885 = vmatprep.subr.bf16.mxu1 %v18981_v17 }
0x15c3   : > { %17886 = vmatpush3.bf16.msra.mxu1 %v18981_v17 }
0x15c4   : > { %17887 = vmatprep.subr.bf16.mxu1 %v18982_v35 }
0x15c7   : > { %17888 = vmatpush3.bf16.msra.mxu1 %v18982_v35 }
0x15c8   : > { %17897 = vmatprep.subr.bf16.mxu1 %v18983_v31 }
0x15ca   : > { %17890 = vmatmul.mubr.msk.bf16.vlgmr.msra.gmra.mrb[32].mxu1 %vm170_vm0, %v22815_v7  ;;  %v18987_v7 = vld [vmem:[%s23121_s1 + $0xc78] sm:$0xff]  }
0x15cb   : > { %17893 = vmatprep.mubr.msk.bf16.mxu1 %vm170_vm0, %v22836_v30  ;;  %17898 = vmatpush3.bf16.msra.mxu1 %v18983_v31  ;;  %v18989_v30 = vld [vmem:[%s23121_s1 + $0xc88] sm:$0xff]  }
0x15cc   : > { %17899 = vmatprep.subr.bf16.mxu1 %v18984_v62 }
0x15cf   : > { %17900 = vmatpush3.bf16.msra.mxu1 %v18984_v62 }
0x15d0   : > { %17901 = vmatprep.subr.bf16.mxu1 %v18985_v10 }
0x15d2   : > { %17894 = vmatmul.mubr.msk.bf16.gmra.mrb[36].mxu1 %vm170_vm0, %v13514_v15 }
0x15d3   : > { %17902 = vmatpush3.bf16.msra.mxu1 %v18985_v10  ;;  %17907 = vmatprep.mubr.msk.bf16.mxu1 %vm170_vm0, %v22728_v9  ;;  %v18990_v9 = vld [vmem:[%s23121_s1 + $0xc90] sm:$0xff]  }
0x15d4   : > { %17903 = vmatprep.subr.bf16.mxu1 %v18986_v24 }
0x15d7   : > { %17904 = vmatpush3.bf16.msra.mxu1 %v18986_v24 }
0x15d8   : > { %17905 = vmatprep.subr.bf16.mxu1 %v18987_v7 }
0x15db   : > { %17906 = vmatpush3.bf16.msra.mxu1 %v18987_v7 }
0x15dc   : > { %17915 = vmatprep.subr.bf16.mxu1 %v18988_v6 }
0x15de   : > { %17908 = vmatmul.mubr.msk.bf16.vlgmr.msra.gmra.mrb[32].mxu1 %vm170_vm0, %v22757_v60  ;;  %v18992_v60 = vld [vmem:[%s23121_s1 + $0xca0] sm:$0xff]  }
0x15df   : > { %17911 = vmatprep.mubr.msk.bf16.mxu1 %vm170_vm0, %v22784_v21  ;;  %17916 = vmatpush3.bf16.msra.mxu1 %v18988_v6  ;;  %v13786_v21 = vld [vmem:[#allocation2 + $0x92] sm:$0xff] }
0x15e0   : > { %17917 = vmatprep.subr.bf16.mxu1 %v18989_v30  ;;  %v13790_v12 = vpack.c.bf16 %v13786_v21, %v13372_v4 }
0x15e3   : > { %17918 = vmatpush3.bf16.msra.mxu1 %v18989_v30 }
0x15e4   : > { %17919 = vmatprep.subr.bf16.mxu1 %v18990_v9 }
0x15e6   : > { %17912 = vmatmul.mubr.msk.bf16.gmra.mrb[36].mxu1 %vm170_vm0, %v13652_v42 }
0x15e7   : > { %17920 = vmatpush3.bf16.msra.mxu1 %v18990_v9  ;;  %17925 = vmatprep.mubr.msk.bf16.mxu1 %vm170_vm0, %v22860_v37 }
0x15e8   : > { %17921 = vmatprep.subr.bf16.mxu1 %v18991_v25 }
0x15eb   : > { %17922 = vmatpush3.bf16.msra.mxu1 %v18991_v25 }
0x15ec   : > { %17923 = vmatprep.subr.bf16.mxu1 %v18992_v60 }
0x15ef   : > { %17924 = vmatpush3.bf16.msra.mxu1 %v18992_v60 }
0x15f0   : > { %17949 = vmatprep.subr.bf16.mxu1 %v22876_v63 }
0x15f2   : > { %17926 = vmatmul.mubr.msk.bf16.vlgmr.msra.gmra.mrb[32].mxu1 %vm170_vm0, %v22869_v8 }
0x15f3   : > { %17929 = vmatprep.mubr.msk.bf16.mxu1 %vm170_vm0, %v22891_v34  ;;  %17953 = vmatpush3.bf16.msra.mxu1 %v22876_v63 }
0x15f4   : > { %17950 = vmatprep.subr.bf16.mxu1 %v18994_v0 }
0x15f7   : > { %17954 = vmatpush3.bf16.msra.mxu1 %v18994_v0 }
0x15f8   : > { %17951 = vmatprep.subr.bf16.mxu1 %v18995_v11 }
0x15fa   : > { %17930 = vmatmul.mubr.msk.bf16.gmra.mrb[36].mxu1 %vm170_vm0, %v13790_v12 }
0x15fb   : > { %17955 = vmatpush3.bf16.msra.mxu1 %v18995_v11 }
0x15fc   : > { %17952 = vmatprep.subr.bf16.mxu1 %v18996_v44 }
0x15ff   : > { %17956 = vmatpush3.bf16.msra.mxu1 %v18996_v44 }
0x16c5   : > { %v17927_v37 = vpop.f32.mrb[32].mxu1 }
0x16c6   : > { %v13919_v46 = vadd.f32 %v17927_v37, %v22150_v53  ;;  %v13878_v51 = vpop.f32.mrb[33].mxu1 }
0x16c7   : > { %v13917_v8 = vadd.f32 %v13878_v51, %v22142_v20  ;;  %v17928_v63 = vpop.f32.mrb[34].mxu1 }
0x16c8   : > { %v13935_v13 = vmul.f32 0.01, %v13919_v46  ;;  %v13920_v18 = vadd.f32 %v17928_v63, %v22154_v5  ;;  %v13881_v27 = vpop.f32.mrb[35].mxu1  ;;  %vm13927_vm0 = vcmp.ge.f32.partialorder %v13919_v46, 0.0 }
0x16c9   : > { %v13933_v34 = vmul.f32 0.01, %v13917_v8  ;;  %v13918_v23 = vadd.f32 %v13881_v27, %v22146_v32  ;;  %vm13925_vm1 = vcmp.ge.f32.partialorder %v13917_v8, 0.0 }
0x16ca   : > { %vm13928_vm2 = vcmp.ge.f32.partialorder %v13920_v18, 0.0  ;;  %v13936_v47 = vmul.f32 0.01, %v13920_v18  ;;  %v13943_v54 = vsel %vm13927_vm0, %v13919_v46, %v13935_v13 }
0x16cb   : > { %vm13926_vm11 = vcmp.ge.f32.partialorder %v13918_v23, 0.0  ;;  %v13934_v38 = vmul.f32 0.01, %v13918_v23  ;;  %v13941_v53 = vsel %vm13925_vm1, %v13917_v8, %v13933_v34 }
0x16cc   : > { %v13944_v1 = vsel %vm13928_vm2, %v13920_v18, %v13936_v47 }
0x16cd   : > { %v13950_v29 = vpack.c.bf16 %v13944_v1, %v13943_v54  ;;  %v13942_v43 = vsel %vm13926_vm11, %v13918_v23, %v13934_v38  ;;  %v17931_v20 = vpop.f32.mrb[36].mxu1 }
0x16ce   : > { %v13949_v55 = vpack.c.bf16 %v13942_v43, %v13941_v53  ;;  %v13923_v22 = vadd.f32 %v17931_v20, %v22166_v58  ;;  %v13894_v5 = vpop.f32.mrb[37].mxu1 }
0x16cf   : > { %v13921_v28 = vadd.f32 %v13894_v5, %v22158_v40  ;;  %v17932_v41 = vpop.f32.mrb[38].mxu1 }
0x16d0   : > { %v13939_v26 = vmul.f32 0.01, %v13923_v22  ;;  %v13924_v32 = vadd.f32 %v17932_v41, %v22176_v50  ;;  %v13897_v14 = vpop.f32.mrb[39].mxu1  ;;  %17941 = vmatprep.mubr.msk.bf16.mxu0 %vm10755_vm3, %v13949_v55  ;;  %vm13931_vm12 = vcmp.ge.f32.partialorder %v13923_v22, 0.0 }
0x16d1   : > { %v13937_v33 = vmul.f32 0.01, %v13921_v28  ;;  %v13922_v36 = vadd.f32 %v13897_v14, %v22162_v57  ;;  %17942 = vmatmul.mubr.msk.bf16.vlgmr.msra.gmra.mrb[40].mxu0 %vm10755_vm3, %v13950_v29  ;;  %vm13929_vm13 = vcmp.ge.f32.partialorder %v13921_v28, 0.0 }
0x16d2   : > { %vm13932_vm14 = vcmp.ge.f32.partialorder %v13924_v32, 0.0  ;;  %v13940_v58 = vmul.f32 0.01, %v13924_v32  ;;  %v13947_v40 = vsel %vm13931_vm12, %v13923_v22, %v13939_v26 }
0x16d3   : > { %vm13930_vm15 = vcmp.ge.f32.partialorder %v13922_v36, 0.0  ;;  %v13938_v45 = vmul.f32 0.01, %v13922_v36  ;;  %v13945_v19 = vsel %vm13929_vm13, %v13921_v28, %v13937_v33 }
0x16d4   : > { %v13948_v3 = vsel %vm13932_vm14, %v13924_v32, %v13940_v58 }
0x16d5   : > { %v13952_v48 = vpack.c.bf16 %v13948_v3, %v13947_v40  ;;  %v13946_v50 = vsel %vm13930_vm15, %v13922_v36, %v13938_v45 }
0x16d6   : > { %v13951_v39 = vpack.c.bf16 %v13946_v50, %v13945_v19 }
0x16d8   : > { %17945 = vmatprep.mubr.msk.bf16.mxu1 %vm10755_vm3, %v13951_v39 }
0x16d9   : > { %17946 = vmatmul.mubr.msk.bf16.vlgmr.msra.gmra.mrb[40].mxu1 %vm10755_vm3, %v13952_v48 }
0x17a4   : > { %v17943_v57 = vpop.f32.mrb[40].mxu0 }
0x17a5   : > { %14065 = vst.msk [vmem:[%s163_s30 + $0x10] sm:$0xff] %vm10755_vm3, %v17943_v57  ;;  %v14032_v52 = vpop.f32.mrb[41].mxu0 }
0x17a6   : > { %14063 = vst.msk [vmem:[%s163_s30] sm:$0xff] %vm10755_vm3, %v14032_v52  ;;  %v17944_v59 = vpop.f32.mrb[42].mxu0 }
0x17a7   : > { %14066 = vst.msk [vmem:[%s163_s30 + $0x18] sm:$0xff] %vm10755_vm3, %v17944_v59  ;;  %v14035_v49 = vpop.f32.mrb[43].mxu0 }
0x17a8   : > { %14064 = vst.msk [vmem:[%s163_s30 + $0x8] sm:$0xff] %vm10755_vm3, %v14035_v49 }
0x17ac   : > { %v17947_v61 = vpop.f32.mrb[40].mxu1 }
0x17ad   : > { %14069 = vst.msk [vmem:[%s163_s30 + $0x30] sm:$0xff] %vm10755_vm3, %v17947_v61  ;;  %v14048_v4 = vpop.f32.mrb[41].mxu1 }
0x17ae   : > { %14067 = vst.msk [vmem:[%s163_s30 + $0x20] sm:$0xff] %vm10755_vm3, %v14048_v4  ;;  %v17948_v2 = vpop.f32.mrb[42].mxu1 }
0x17af   : > { %14070 = vst.msk [vmem:[%s163_s30 + $0x38] sm:$0xff] %vm10755_vm3, %v17948_v2  ;;  %v14051_v17 = vpop.f32.mrb[43].mxu1 }
0x17b0   : > { %14068 = vst.msk [vmem:[%s163_s30 + $0x28] sm:$0xff] %vm10755_vm3, %v14051_v17 }
0x17b1   : > { %19011 = shalt.err (!%p19008_p3)
}
0x17b2   : > { %s19012_s24 = scalar_lea.hbm %s23071_s10, 1024  ;;  %s19016_s27 = scalar_lea.hbm %s23123_s3, 2048 }
0x17b3   : > { %p19013_p4 = scmp.ne.s32.totalorder %s23071_s10, %s19012_s24  ;;  %p19017_p9 = scmp.lt.u32.totalorder %s23071_s10, %s23123_s3 }
0x17b4   : > { %p19018_p10 = scmp.lt.u32.totalorder %s19016_s27, %s19012_s24  ;;  %p19020_p12 = scmp.lt.u32.totalorder %s19012_s24, %s23071_s10 }
0x17b5   : > { %p19014_p7 = pnand %p19013_p4, %p19125_p5 }
0x17b6   : > { %p19019_p11 = por %p19018_p10, %p19017_p9 }
0x17b7   : > { %p19015_p8 = pneg %p19014_p7 }
0x17b8   : > { %p19021_p13 = por %p19020_p12, %p19019_p11 }
0x17ba   : > { %p19022_p0 = pnand %p19021_p13, %p19015_p8 }
0x17bc   : > { %19025 = shalt.err (!%p19022_p0)
}
0x17bd   : > { %s19066_s29 = smov 128  }
0x17be   : > { %18541 = dma.vmem_to_hbm [thread:$0]  (%p19125_p5), %s23074_s5, 1024, %s23071_s10, %s23078_s16, %s19066_s29, %s19066_s29, %s19063_s8  }
0x17bf PF: > { %p18547_p1 = scmp.ge.s32.totalorder %s19060_s15, 2  ;;  %s14100_s30 = sand.u32 1, %s19048_s12  }
0x17c0   : > { %s14101_s4 = scalar_lea.sflag [#allocation4], %s14100_s30 }
0x17c1   : > { %p18544_p2 = pnand %p18547_p1, %p19129_p6 }
0x17c3   : > { %19043 = dma.done.wait (!%p18544_p2), %s14101_s4, 1024  }
0x17c4   : > { %19045 = vsyncadd (!%p18544_p2), %s14101_s4, 4294966272  ;;  %p13_p3 = scmp.ge.s32.totalorder %s19112_s18, 4   ;;  %s23126_s12 = smov %s19052_s13 }
0x17c5   : > { %s23127_s13 = smov %s19056_s14  ;;  %s23128_s14 = smov %s19123_s21 }
0x17c6   : > { %s23129_s15 = smov %s19112_s18  ;;  %15 = sbr.rel (!%p13_p3) target bundleno = 3 (0x3), region = 152 }
0x17cd   :  { %14106 = vsyncpa [#allocation4], 1 }
0x17ce   :  { %14108 = vsyncpa [#allocation4 + $0x1], 1 }

</bundles_post_ra>
